<compile_context>
chip_gen: v5e
topology: v5e:2x2
jax: 0.10.0
libtpu: 0.0.40
codegen_flags: <defaults>
</compile_context>

<pallas_src>
import jax
import jax.numpy as jnp
from jax import lax
from jax.experimental import pallas as pl
from jax.experimental.pallas import tpu as pltpu

# Hyper-parameters from the PyTorch module.
n_embd = 32
n_head = 6
n_layer = 6
head_size = n_embd // n_head          # 5 (unpadded; used for the attention scale)
HEAD_PAD = 8                          # per-head width padded to 8 lanes
HP = n_head * HEAD_PAD                # 48
block_size = 20
LN_EPS = 1e-5                         # torch.nn.LayerNorm default eps
ATTN_SCALE = head_size ** -0.5        # k.shape[-1] ** -0.5 with the ORIGINAL head_size
NEG_INF = -1e30                       # finite mask value (NaN-safe)


def _layernorm(x, g, b):
    mu = jnp.mean(x, axis=-1, keepdims=True)
    var = jnp.mean((x - mu) ** 2, axis=-1, keepdims=True)
    return (x - mu) * lax.rsqrt(var + LN_EPS) * g + b


# ---------------------------------------------------------------------------
# Single fused kernel: pos-embed + recurrence + n_layer blocks + ln_f + lm_head.
# ---------------------------------------------------------------------------
def gpt_fused_kernel(tok_ref, locs_ref, mask_ref, misc_ref,
                     wkqv_ref, wf1_ref, wpf2_ref, vecs_ref, out_ref):
    B, T, C = tok_ref.shape
    BT = B * T
    f32 = jnp.float32

    # ---- unpack the misc slab (front-end + final weights) ----
    misc = misc_ref[...]                         # (80, C)
    wr_prev = misc[0:C, :]                       # (C, C)   recurrence "prev" weight
    wlm = misc[C:2 * C, :]                       # (C, C)   lm_head weight
    w_cur = misc[2 * C:2 * C + 8, :]             # (8, C)   folded pos-MLP @ Wr_cur (rows 2..7 zero)
    b_cur = misc[2 * C + 8, :]                   # (C,)     folded bias
    lnf_g = misc[2 * C + 9, :]
    lnf_b = misc[2 * C + 10, :]
    blm = misc[2 * C + 11, :]

    # ---- position embedding: folded affine map, then sigmoid recurrence over T ----
    locs2 = locs_ref[...].reshape(BT, 8)         # locations zero-padded to 8 lanes
    cur_proj = (jnp.dot(locs2, w_cur, preferred_element_type=f32)
                + b_cur).reshape(B, T, C)
    prev = jax.nn.sigmoid(cur_proj[:, 0, :])     # "prev" row is zeros at i == 0
    rows = [prev]
    for i in range(1, T):                        # T small & static -> unrolled
        prev = jax.nn.sigmoid(
            jnp.dot(prev, wr_prev, preferred_element_type=f32) + cur_proj[:, i, :])
        rows.append(prev)
    pos_emb = jnp.stack(rows, axis=1)            # (B, T, C) kept in vregs (no scratch)

    # ---- block-diagonal + causal additive mask (built in the wrapper, resident) ----
    mask = mask_ref[...][None, :, :]             # (1, n_head*T, n_head*T)

    # ---- transformer blocks (tuple roles swap every layer) ----
    a = tok_ref[...]      # tuple[0] ("pos_emb" inside Block.forward)
    b = pos_emb           # tuple[1] (residual stream updated by the block)
    for l in range(n_layer):
        wkqv_l = wkqv_ref[l]                     # (C, 2*HP)  [wkq | wv], head-padded
        wf1_l = wf1_ref[l]                       # (C, 4C)
        wpf2_l = wpf2_ref[l]                     # (HP + 4C, C)
        wproj_l = wpf2_l[0:HP, :]                # (HP, C)
        wf2_l = wpf2_l[HP:, :]                   # (4C, C)
        v_l = vecs_ref[l]                        # (3, 4C) packed small vectors
        ln1g, ln1b = v_l[0, 0:C], v_l[0, C:2 * C]
        ln2g, ln2b = v_l[0, 2 * C:3 * C], v_l[0, 3 * C:4 * C]
        bproj, bf2 = v_l[1, 0:C], v_l[1, C:2 * C]
        bf1 = v_l[2, :]

        # One LayerNorm over the row-stacked (a; b), one fused q/k|v projection.
        ab = jnp.concatenate([a.reshape(BT, C), b.reshape(BT, C)], axis=0)   # (2BT, C)
        ln_ab = _layernorm(ab, ln1g, ln1b)
        qkv = jnp.dot(ln_ab, wkqv_l, preferred_element_type=f32)            # (2BT, 2HP)
        qk = qkv[BT:, 0:HP].reshape(B, T, HP)    # from ln1(b): queries == keys
        vv = qkv[0:BT, HP:].reshape(B, T, HP)    # from ln1(a): values

        # Head-stacked rows: (B, n_head*T, HEAD_PAD); heads kept independent by the mask.
        q_st = jnp.concatenate(
            [qk[:, :, h * HEAD_PAD:(h + 1) * HEAD_PAD] for h in range(n_head)], axis=1)
        v_st = jnp.concatenate(
            [vv[:, :, h * HEAD_PAD:(h + 1) * HEAD_PAD] for h in range(n_head)], axis=1)

        s = jnp.einsum('bqd,bkd->bqk', q_st, q_st,
                       preferred_element_type=f32) * ATTN_SCALE + mask
        m = jnp.max(s, axis=-1, keepdims=True)
        e = jnp.exp(s - m)
        w = e / jnp.sum(e, axis=-1, keepdims=True)          # exact divide (parity)
        o = jnp.einsum('bqk,bkd->bqd', w, v_st,
                       preferred_element_type=f32)           # (B, n_head*T, HEAD_PAD)

        # Output projection: per-head accumulate (8-row-aligned slices, no lane concat).
        sa = None
        for h in range(n_head):
            o_h = o[:, h * T:(h + 1) * T, :].reshape(BT, HEAD_PAD)
            ph = jnp.dot(o_h, wproj_l[h * HEAD_PAD:(h + 1) * HEAD_PAD, :],
                         preferred_element_type=f32)
            sa = ph if sa is None else sa + ph
        sa = sa + bproj
        b1 = b + sa.reshape(B, T, C)

        ln2b1 = _layernorm(b1.reshape(BT, C), ln2g, ln2b)
        h1 = jnp.maximum(jnp.dot(ln2b1, wf1_l, preferred_element_type=f32) + bf1, 0.0)
        h2 = jnp.dot(h1, wf2_l, preferred_element_type=f32) + bf2
        b_new = b1 + h2.reshape(B, T, C)

        a, b = b_new, a                          # Block returns (x_new, pos_var)

    # ---- final LayerNorm + lm_head on tuple[0] ----
    xf = _layernorm(a.reshape(BT, C), lnf_g, lnf_b)
    out_ref[...] = jnp.dot(xf, wlm, preferred_element_type=f32) + blm


# ---------------------------------------------------------------------------
# Wrapper: single gridless pallas_call, everything resident in VMEM (<< 1 MiB).
# ---------------------------------------------------------------------------
@jax.jit
def gpt_forward(idx, locs, prep):
    B, T, C = idx.shape
    # Pad the 2-D locations to 8 lanes (matching the zero-padded folded weight rows).
    locs_p = jnp.pad(locs.astype(jnp.float32),
                     ((0, 0), (0, 0), (0, 8 - locs.shape[-1])))
    # Block-diagonal (per-head) + causal additive mask for the head-stacked layout.
    HT = n_head * T
    r = jnp.arange(HT)
    same_head = (r[:, None] // T) == (r[None, :] // T)
    causal = (r[None, :] % T) <= (r[:, None] % T)
    mask = jnp.where(same_head & causal, 0.0, NEG_INF).astype(jnp.float32)

    args = (idx.astype(jnp.float32), locs_p, mask, prep['misc'],
            prep['wkqv'], prep['wf1'], prep['wpf2'], prep['vecs'])
    flat = pl.pallas_call(
        gpt_fused_kernel,
        out_shape=jax.ShapeDtypeStruct((B * T, C), jnp.float32),
        in_specs=[pl.BlockSpec(memory_space=pltpu.MemorySpace.VMEM)] * len(args),
        out_specs=pl.BlockSpec(memory_space=pltpu.MemorySpace.VMEM),
        cost_estimate=pl.CostEstimate(flops=4_200_000, transcendentals=40_000,
                                      bytes_accessed=380_000),
    )(*args)
    logits = flat.reshape(B, T, C)
    loss = None                                  # targets=None path
    return logits, loss


# ---------------------------------------------------------------------------
# Parameter preparation (host-side): fold the linear pos-MLP chain and Wr_cur,
# zero-pad heads 5 -> 8, and pack everything into a handful of dense slabs.
# ---------------------------------------------------------------------------
def prepare_params(p):
    f32 = jnp.float32
    # Fold 2->8->32->128->32 linear chain into one (2, n_embd) affine map.
    wpos = p['pw1'] @ p['pw2'] @ p['pw3'] @ p['pw4']
    bpos = ((p['pb1'] @ p['pw2'] + p['pb2']) @ p['pw3'] + p['pb3']) @ p['pw4'] + p['pb4']
    # cat([prev, cur], -1) @ Wr == prev @ Wr[:32] + cur @ Wr[32:]; fold the cur half.
    wr_prev = p['wr'][:n_embd, :]
    wr_cur = p['wr'][n_embd:, :]
    w_cur = wpos @ wr_cur                        # (2, n_embd)
    b_cur = bpos @ wr_cur + p['br']              # (n_embd,)

    def pad_cols(w):   # (C, n_head*5) -> (C, n_head*8), zero-padded per head
        parts = [jnp.pad(w[:, h * head_size:(h + 1) * head_size],
                         ((0, 0), (0, HEAD_PAD - head_size))) for h in range(n_head)]
        return jnp.concatenate(parts, axis=1)

    def pad_rows(w):   # (n_head*5, C) -> (n_head*8, C), zero-padded per head
        parts = [jnp.pad(w[h * head_size:(h + 1) * head_size, :],
                         ((0, HEAD_PAD - head_size), (0, 0))) for h in range(n_head)]
        return jnp.concatenate(parts, axis=0)

    # Misc slab: wr_prev | wlm | w_cur(padded to 8 rows) | b_cur | lnf_g | lnf_b | blm.
    misc = jnp.zeros((80, n_embd), f32)
    misc = misc.at[0:n_embd].set(wr_prev)
    misc = misc.at[n_embd:2 * n_embd].set(p['wlm'])
    misc = misc.at[2 * n_embd:2 * n_embd + 2].set(w_cur)
    misc = misc.at[2 * n_embd + 8].set(b_cur)
    misc = misc.at[2 * n_embd + 9].set(p['lnf_g'])
    misc = misc.at[2 * n_embd + 10].set(p['lnf_b'])
    misc = misc.at[2 * n_embd + 11].set(p['blm'])

    blocks = p['blocks']
    wkqv = jnp.stack([jnp.concatenate([pad_cols(blk['wkq']), pad_cols(blk['wv'])],
                                      axis=1) for blk in blocks])     # (L, C, 2*HP)
    wf1 = jnp.stack([blk['wf1'] for blk in blocks])                   # (L, C, 4C)
    wpf2 = jnp.stack([jnp.concatenate([pad_rows(blk['wproj']), blk['wf2']],
                                      axis=0) for blk in blocks])     # (L, HP+4C, C)
    vec_rows = []
    for blk in blocks:
        r0 = jnp.concatenate([blk['ln1_g'], blk['ln1_b'], blk['ln2_g'], blk['ln2_b']])
        r1 = jnp.concatenate([blk['bproj'], blk['bf2'],
                              jnp.zeros((2 * n_embd,), f32)])
        r2 = blk['bf1']
        vec_rows.append(jnp.stack([r0, r1, r2]))
    vecs = jnp.stack(vec_rows)                                        # (L, 3, 4C)

    return dict(misc=misc, wkqv=wkqv, wf1=wf1, wpf2=wpf2, vecs=vecs)


# ---------------------------------------------------------------------------
# Deterministic synthetic parameter init (matches PyTorch shapes / _init_weights).
# ---------------------------------------------------------------------------
def init_params(key):
    keys = iter(jax.random.split(key, 128))

    def lin_w(in_dim, out_dim):
        return jax.random.normal(next(keys), (in_dim, out_dim), jnp.float32) * 0.02

    def zeros(n):
        return jnp.zeros((n,), jnp.float32)

    def ones(n):
        return jnp.ones((n,), jnp.float32)

    p = {}
    p['pw1'], p['pb1'] = lin_w(2, 8), zeros(8)
    p['pw2'], p['pb2'] = lin_w(8, 32), zeros(32)
    p['pw3'], p['pb3'] = lin_w(32, 128), zeros(128)
    p['pw4'], p['pb4'] = lin_w(128, n_embd), zeros(n_embd)
    p['wr'], p['br'] = lin_w(2 * n_embd, n_embd), zeros(n_embd)

    blocks = []
    for _ in range(n_layer):
        blk = {
            'ln1_g': ones(n_embd), 'ln1_b': zeros(n_embd),
            'ln2_g': ones(n_embd), 'ln2_b': zeros(n_embd),
            # per-head (n_embd, head_size) projections concatenated along the out dim
            'wkq': jnp.concatenate([lin_w(n_embd, head_size) for _ in range(n_head)], axis=1),
            'wv': jnp.concatenate([lin_w(n_embd, head_size) for _ in range(n_head)], axis=1),
        }
        blk['wproj'], blk['bproj'] = lin_w(n_head * head_size, n_embd), zeros(n_embd)
        blk['wf1'], blk['bf1'] = lin_w(n_embd, 4 * n_embd), zeros(4 * n_embd)
        blk['wf2'], blk['bf2'] = lin_w(4 * n_embd, n_embd), zeros(n_embd)
        blocks.append(blk)
    p['blocks'] = blocks

    p['lnf_g'], p['lnf_b'] = ones(n_embd), zeros(n_embd)
    p['wlm'], p['blm'] = lin_w(n_embd, n_embd), zeros(n_embd)
    return p


if __name__ == "__main__":
    key = jax.random.PRNGKey(0)
    kp, ki, kl = jax.random.split(key, 3)
    params = init_params(kp)
    prep = prepare_params(params)

    B, T = 2, 8                         # T <= block_size (20)
    idx = jax.random.normal(ki, (B, T, n_embd), jnp.float32)   # token embeddings
    locs = jax.random.normal(kl, (B, T, 2), jnp.float32)       # 2-D locations

    logits, loss = gpt_forward(idx, locs, prep)
    jax.block_until_ready(logits)
    assert logits.shape == (B, T, n_embd) and logits.dtype == jnp.float32
    assert bool(jnp.all(jnp.isfinite(logits)))
    assert loss is None
    print("KERNEL_OK")
</pallas_src>

<mosaic_0001>
module attributes {stable_mosaic.version = 11 : i64} {
  func.func @gpt_fused_kernel(%arg0: memref<2x8x32xf32, #tpu.memory_space<vmem>>, %arg1: memref<2x8x8xf32, #tpu.memory_space<vmem>>, %arg2: memref<48x48xf32, #tpu.memory_space<vmem>>, %arg3: memref<80x32xf32, #tpu.memory_space<vmem>>, %arg4: memref<6x32x96xf32, #tpu.memory_space<vmem>>, %arg5: memref<6x32x128xf32, #tpu.memory_space<vmem>>, %arg6: memref<6x176x32xf32, #tpu.memory_space<vmem>>, %arg7: memref<6x3x128xf32, #tpu.memory_space<vmem>>, %arg8: memref<16x32xf32, #tpu.memory_space<vmem>>) attributes {dimension_semantics = [], scalar_prefetch = 0 : i64, scratch_operands = 0 : i64, tpu.core_type = #tpu.core_type<tc>} {
    %c0 = arith.constant 0 : index
    %c0_0 = arith.constant 0 : index
    %0 = vector.load %arg3[%c0, %c0_0] : memref<80x32xf32, #tpu.memory_space<vmem>>, vector<80x32xf32>
    %1 = vector.extract_strided_slice %0 {offsets = [0, 0], sizes = [32, 32], strides = [1, 1]} : vector<80x32xf32> to vector<32x32xf32>
    %2 = vector.extract_strided_slice %0 {offsets = [32, 0], sizes = [32, 32], strides = [1, 1]} : vector<80x32xf32> to vector<32x32xf32>
    %3 = vector.extract_strided_slice %0 {offsets = [64, 0], sizes = [8, 32], strides = [1, 1]} : vector<80x32xf32> to vector<8x32xf32>
    %4 = vector.extract_strided_slice %0 {offsets = [72, 0], sizes = [1, 32], strides = [1, 1]} : vector<80x32xf32> to vector<1x32xf32>
    %5 = vector.shape_cast %4 : vector<1x32xf32> to vector<32xf32>
    %6 = vector.extract_strided_slice %0 {offsets = [73, 0], sizes = [1, 32], strides = [1, 1]} : vector<80x32xf32> to vector<1x32xf32>
    %7 = vector.shape_cast %6 : vector<1x32xf32> to vector<32xf32>
    %8 = vector.extract_strided_slice %0 {offsets = [74, 0], sizes = [1, 32], strides = [1, 1]} : vector<80x32xf32> to vector<1x32xf32>
    %9 = vector.shape_cast %8 : vector<1x32xf32> to vector<32xf32>
    %10 = vector.extract_strided_slice %0 {offsets = [75, 0], sizes = [1, 32], strides = [1, 1]} : vector<80x32xf32> to vector<1x32xf32>
    %11 = vector.shape_cast %10 : vector<1x32xf32> to vector<32xf32>
    %c0_1 = arith.constant 0 : index
    %c0_2 = arith.constant 0 : index
    %c0_3 = arith.constant 0 : index
    %12 = vector.load %arg1[%c0_1, %c0_2, %c0_3] : memref<2x8x8xf32, #tpu.memory_space<vmem>>, vector<2x8x8xf32>
    %13 = vector.shape_cast %12 : vector<2x8x8xf32> to vector<16x8xf32>
    %cst = arith.constant dense<0.000000e+00> : vector<16x32xf32>
    %14 = tpu.matmul %13, %3, %cst {dimension_numbers = #tpu.dot_dimension_numbers<[1], [0], [0], [1], [0, 0, 1, 1], [], []>} : vector<16x8xf32>, vector<8x32xf32>, vector<16x32xf32> -> vector<16x32xf32>
    %15 = vector.shape_cast %5 : vector<32xf32> to vector<1x32xf32>
    %16 = vector.broadcast %15 : vector<1x32xf32> to vector<16x32xf32>
    %17 = arith.addf %14, %16 : vector<16x32xf32>
    %18 = vector.shape_cast %17 : vector<16x32xf32> to vector<2x8x32xf32>
    %19 = vector.extract_strided_slice %18 {offsets = [0, 0, 0], sizes = [2, 1, 32], strides = [1, 1, 1]} : vector<2x8x32xf32> to vector<2x1x32xf32>
    %20 = vector.shape_cast %19 : vector<2x1x32xf32> to vector<2x32xf32>
    %21 = arith.negf %20 : vector<2x32xf32>
    %22 = math.exp %21 : vector<2x32xf32>
    %cst_4 = arith.constant 1.000000e+00 : f32
    %23 = vector.broadcast %cst_4 : f32 to vector<2x32xf32>
    %24 = arith.addf %23, %22 : vector<2x32xf32>
    %25 = arith.divf %23, %24 : vector<2x32xf32>
    %cst_5 = arith.constant dense<0.000000e+00> : vector<2x32xf32>
    %26 = tpu.matmul %25, %1, %cst_5 {dimension_numbers = #tpu.dot_dimension_numbers<[1], [0], [0], [1], [0, 0, 1, 1], [], []>} : vector<2x32xf32>, vector<32x32xf32>, vector<2x32xf32> -> vector<2x32xf32>
    %27 = vector.extract_strided_slice %18 {offsets = [0, 1, 0], sizes = [2, 1, 32], strides = [1, 1, 1]} : vector<2x8x32xf32> to vector<2x1x32xf32>
    %28 = vector.shape_cast %27 : vector<2x1x32xf32> to vector<2x32xf32>
    %29 = arith.addf %26, %28 : vector<2x32xf32>
    %30 = arith.negf %29 : vector<2x32xf32>
    %31 = math.exp %30 : vector<2x32xf32>
    %cst_6 = arith.constant 1.000000e+00 : f32
    %32 = vector.broadcast %cst_6 : f32 to vector<2x32xf32>
    %33 = arith.addf %32, %31 : vector<2x32xf32>
    %34 = arith.divf %32, %33 : vector<2x32xf32>
    %cst_7 = arith.constant dense<0.000000e+00> : vector<2x32xf32>
    %35 = tpu.matmul %34, %1, %cst_7 {dimension_numbers = #tpu.dot_dimension_numbers<[1], [0], [0], [1], [0, 0, 1, 1], [], []>} : vector<2x32xf32>, vector<32x32xf32>, vector<2x32xf32> -> vector<2x32xf32>
    %36 = vector.extract_strided_slice %18 {offsets = [0, 2, 0], sizes = [2, 1, 32], strides = [1, 1, 1]} : vector<2x8x32xf32> to vector<2x1x32xf32>
    %37 = vector.shape_cast %36 : vector<2x1x32xf32> to vector<2x32xf32>
    %38 = arith.addf %35, %37 : vector<2x32xf32>
    %39 = arith.negf %38 : vector<2x32xf32>
    %40 = math.exp %39 : vector<2x32xf32>
    %cst_8 = arith.constant 1.000000e+00 : f32
    %41 = vector.broadcast %cst_8 : f32 to vector<2x32xf32>
    %42 = arith.addf %41, %40 : vector<2x32xf32>
    %43 = arith.divf %41, %42 : vector<2x32xf32>
    %cst_9 = arith.constant dense<0.000000e+00> : vector<2x32xf32>
    %44 = tpu.matmul %43, %1, %cst_9 {dimension_numbers = #tpu.dot_dimension_numbers<[1], [0], [0], [1], [0, 0, 1, 1], [], []>} : vector<2x32xf32>, vector<32x32xf32>, vector<2x32xf32> -> vector<2x32xf32>
    %45 = vector.extract_strided_slice %18 {offsets = [0, 3, 0], sizes = [2, 1, 32], strides = [1, 1, 1]} : vector<2x8x32xf32> to vector<2x1x32xf32>
    %46 = vector.shape_cast %45 : vector<2x1x32xf32> to vector<2x32xf32>
    %47 = arith.addf %44, %46 : vector<2x32xf32>
    %48 = arith.negf %47 : vector<2x32xf32>
    %49 = math.exp %48 : vector<2x32xf32>
    %cst_10 = arith.constant 1.000000e+00 : f32
    %50 = vector.broadcast %cst_10 : f32 to vector<2x32xf32>
    %51 = arith.addf %50, %49 : vector<2x32xf32>
    %52 = arith.divf %50, %51 : vector<2x32xf32>
    %cst_11 = arith.constant dense<0.000000e+00> : vector<2x32xf32>
    %53 = tpu.matmul %52, %1, %cst_11 {dimension_numbers = #tpu.dot_dimension_numbers<[1], [0], [0], [1], [0, 0, 1, 1], [], []>} : vector<2x32xf32>, vector<32x32xf32>, vector<2x32xf32> -> vector<2x32xf32>
    %54 = vector.extract_strided_slice %18 {offsets = [0, 4, 0], sizes = [2, 1, 32], strides = [1, 1, 1]} : vector<2x8x32xf32> to vector<2x1x32xf32>
    %55 = vector.shape_cast %54 : vector<2x1x32xf32> to vector<2x32xf32>
    %56 = arith.addf %53, %55 : vector<2x32xf32>
    %57 = arith.negf %56 : vector<2x32xf32>
    %58 = math.exp %57 : vector<2x32xf32>
    %cst_12 = arith.constant 1.000000e+00 : f32
    %59 = vector.broadcast %cst_12 : f32 to vector<2x32xf32>
    %60 = arith.addf %59, %58 : vector<2x32xf32>
    %61 = arith.divf %59, %60 : vector<2x32xf32>
    %cst_13 = arith.constant dense<0.000000e+00> : vector<2x32xf32>
    %62 = tpu.matmul %61, %1, %cst_13 {dimension_numbers = #tpu.dot_dimension_numbers<[1], [0], [0], [1], [0, 0, 1, 1], [], []>} : vector<2x32xf32>, vector<32x32xf32>, vector<2x32xf32> -> vector<2x32xf32>
    %63 = vector.extract_strided_slice %18 {offsets = [0, 5, 0], sizes = [2, 1, 32], strides = [1, 1, 1]} : vector<2x8x32xf32> to vector<2x1x32xf32>
    %64 = vector.shape_cast %63 : vector<2x1x32xf32> to vector<2x32xf32>
    %65 = arith.addf %62, %64 : vector<2x32xf32>
    %66 = arith.negf %65 : vector<2x32xf32>
    %67 = math.exp %66 : vector<2x32xf32>
    %cst_14 = arith.constant 1.000000e+00 : f32
    %68 = vector.broadcast %cst_14 : f32 to vector<2x32xf32>
    %69 = arith.addf %68, %67 : vector<2x32xf32>
    %70 = arith.divf %68, %69 : vector<2x32xf32>
    %cst_15 = arith.constant dense<0.000000e+00> : vector<2x32xf32>
    %71 = tpu.matmul %70, %1, %cst_15 {dimension_numbers = #tpu.dot_dimension_numbers<[1], [0], [0], [1], [0, 0, 1, 1], [], []>} : vector<2x32xf32>, vector<32x32xf32>, vector<2x32xf32> -> vector<2x32xf32>
    %72 = vector.extract_strided_slice %18 {offsets = [0, 6, 0], sizes = [2, 1, 32], strides = [1, 1, 1]} : vector<2x8x32xf32> to vector<2x1x32xf32>
    %73 = vector.shape_cast %72 : vector<2x1x32xf32> to vector<2x32xf32>
    %74 = arith.addf %71, %73 : vector<2x32xf32>
    %75 = arith.negf %74 : vector<2x32xf32>
    %76 = math.exp %75 : vector<2x32xf32>
    %cst_16 = arith.constant 1.000000e+00 : f32
    %77 = vector.broadcast %cst_16 : f32 to vector<2x32xf32>
    %78 = arith.addf %77, %76 : vector<2x32xf32>
    %79 = arith.divf %77, %78 : vector<2x32xf32>
    %cst_17 = arith.constant dense<0.000000e+00> : vector<2x32xf32>
    %80 = tpu.matmul %79, %1, %cst_17 {dimension_numbers = #tpu.dot_dimension_numbers<[1], [0], [0], [1], [0, 0, 1, 1], [], []>} : vector<2x32xf32>, vector<32x32xf32>, vector<2x32xf32> -> vector<2x32xf32>
    %81 = vector.extract_strided_slice %18 {offsets = [0, 7, 0], sizes = [2, 1, 32], strides = [1, 1, 1]} : vector<2x8x32xf32> to vector<2x1x32xf32>
    %82 = vector.shape_cast %81 : vector<2x1x32xf32> to vector<2x32xf32>
    %83 = arith.addf %80, %82 : vector<2x32xf32>
    %84 = arith.negf %83 : vector<2x32xf32>
    %85 = math.exp %84 : vector<2x32xf32>
    %cst_18 = arith.constant 1.000000e+00 : f32
    %86 = vector.broadcast %cst_18 : f32 to vector<2x32xf32>
    %87 = arith.addf %86, %85 : vector<2x32xf32>
    %88 = arith.divf %86, %87 : vector<2x32xf32>
    %89 = vector.shape_cast %25 : vector<2x32xf32> to vector<2x1x32xf32>
    %90 = vector.shape_cast %34 : vector<2x32xf32> to vector<2x1x32xf32>
    %91 = vector.shape_cast %43 : vector<2x32xf32> to vector<2x1x32xf32>
    %92 = vector.shape_cast %52 : vector<2x32xf32> to vector<2x1x32xf32>
    %93 = vector.shape_cast %61 : vector<2x32xf32> to vector<2x1x32xf32>
    %94 = vector.shape_cast %70 : vector<2x32xf32> to vector<2x1x32xf32>
    %95 = vector.shape_cast %79 : vector<2x32xf32> to vector<2x1x32xf32>
    %96 = vector.shape_cast %88 : vector<2x32xf32> to vector<2x1x32xf32>
    %97 = tpu.concatenate %89, %90, %91, %92, %93, %94, %95, %96 in 1 : vector<2x1x32xf32>, vector<2x1x32xf32>, vector<2x1x32xf32>, vector<2x1x32xf32>, vector<2x1x32xf32>, vector<2x1x32xf32>, vector<2x1x32xf32>, vector<2x1x32xf32> -> vector<2x8x32xf32>
    %c0_19 = arith.constant 0 : index
    %c0_20 = arith.constant 0 : index
    %98 = vector.load %arg2[%c0_19, %c0_20] : memref<48x48xf32, #tpu.memory_space<vmem>>, vector<48x48xf32>
    %99 = vector.shape_cast %98 : vector<48x48xf32> to vector<1x48x48xf32>
    %c0_21 = arith.constant 0 : index
    %c0_22 = arith.constant 0 : index
    %c0_23 = arith.constant 0 : index
    %100 = vector.load %arg0[%c0_21, %c0_22, %c0_23] : memref<2x8x32xf32, #tpu.memory_space<vmem>>, vector<2x8x32xf32>
    %c0_24 = arith.constant 0 : index
    %c0_25 = arith.constant 0 : index
    %c0_26 = arith.constant 0 : index
    %101 = vector.load %arg4[%c0_24, %c0_25, %c0_26] : memref<6x32x96xf32, #tpu.memory_space<vmem>>, vector<1x32x96xf32>
    %102 = vector.shape_cast %101 : vector<1x32x96xf32> to vector<32x96xf32>
    %c0_27 = arith.constant 0 : index
    %c0_28 = arith.constant 0 : index
    %c0_29 = arith.constant 0 : index
    %103 = vector.load %arg5[%c0_27, %c0_28, %c0_29] : memref<6x32x128xf32, #tpu.memory_space<vmem>>, vector<1x32x128xf32>
    %104 = vector.shape_cast %103 : vector<1x32x128xf32> to vector<32x128xf32>
    %c0_30 = arith.constant 0 : index
    %c0_31 = arith.constant 0 : index
    %c0_32 = arith.constant 0 : index
    %105 = vector.load %arg6[%c0_30, %c0_31, %c0_32] : memref<6x176x32xf32, #tpu.memory_space<vmem>>, vector<1x176x32xf32>
    %106 = vector.shape_cast %105 : vector<1x176x32xf32> to vector<176x32xf32>
    %107 = vector.extract_strided_slice %106 {offsets = [0, 0], sizes = [48, 32], strides = [1, 1]} : vector<176x32xf32> to vector<48x32xf32>
    %108 = vector.extract_strided_slice %106 {offsets = [48, 0], sizes = [128, 32], strides = [1, 1]} : vector<176x32xf32> to vector<128x32xf32>
    %c0_33 = arith.constant 0 : index
    %c0_34 = arith.constant 0 : index
    %c0_35 = arith.constant 0 : index
    %109 = vector.load %arg7[%c0_33, %c0_34, %c0_35] : memref<6x3x128xf32, #tpu.memory_space<vmem>>, vector<1x3x128xf32>
    %110 = vector.shape_cast %109 : vector<1x3x128xf32> to vector<3x128xf32>
    %111 = vector.extract_strided_slice %110 {offsets = [0, 0], sizes = [1, 32], strides = [1, 1]} : vector<3x128xf32> to vector<1x32xf32>
    %112 = vector.shape_cast %111 : vector<1x32xf32> to vector<32xf32>
    %113 = vector.extract_strided_slice %110 {offsets = [0, 32], sizes = [1, 32], strides = [1, 1]} : vector<3x128xf32> to vector<1x32xf32>
    %114 = vector.shape_cast %113 : vector<1x32xf32> to vector<32xf32>
    %115 = vector.extract_strided_slice %110 {offsets = [0, 64], sizes = [1, 32], strides = [1, 1]} : vector<3x128xf32> to vector<1x32xf32>
    %116 = vector.shape_cast %115 : vector<1x32xf32> to vector<32xf32>
    %117 = vector.extract_strided_slice %110 {offsets = [0, 96], sizes = [1, 32], strides = [1, 1]} : vector<3x128xf32> to vector<1x32xf32>
    %118 = vector.shape_cast %117 : vector<1x32xf32> to vector<32xf32>
    %119 = vector.extract_strided_slice %110 {offsets = [1, 0], sizes = [1, 32], strides = [1, 1]} : vector<3x128xf32> to vector<1x32xf32>
    %120 = vector.shape_cast %119 : vector<1x32xf32> to vector<32xf32>
    %121 = vector.extract_strided_slice %110 {offsets = [1, 32], sizes = [1, 32], strides = [1, 1]} : vector<3x128xf32> to vector<1x32xf32>
    %122 = vector.shape_cast %121 : vector<1x32xf32> to vector<32xf32>
    %123 = vector.extract_strided_slice %110 {offsets = [2, 0], sizes = [1, 128], strides = [1, 1]} : vector<3x128xf32> to vector<1x128xf32>
    %124 = vector.shape_cast %123 : vector<1x128xf32> to vector<128xf32>
    %125 = vector.shape_cast %100 : vector<2x8x32xf32> to vector<16x32xf32>
    %126 = vector.shape_cast %97 : vector<2x8x32xf32> to vector<16x32xf32>
    %127 = tpu.concatenate %125, %126 in 0 : vector<16x32xf32>, vector<16x32xf32> -> vector<32x32xf32>
    %cst_36 = arith.constant dense<0.000000e+00> : vector<32xf32>
    %128 = vector.multi_reduction <add>, %127, %cst_36 [1] : vector<32x32xf32> to vector<32xf32>
    %129 = vector.shape_cast %128 : vector<32xf32> to vector<32x1xf32>
    %cst_37 = arith.constant 3.200000e+01 : f32
    %130 = vector.broadcast %cst_37 : f32 to vector<32x1xf32>
    %131 = arith.divf %129, %130 : vector<32x1xf32>
    %132 = vector.broadcast %131 : vector<32x1xf32> to vector<32x32xf32>
    %133 = arith.subf %127, %132 : vector<32x32xf32>
    %134 = arith.mulf %133, %133 : vector<32x32xf32>
    %cst_38 = arith.constant dense<0.000000e+00> : vector<32xf32>
    %135 = vector.multi_reduction <add>, %134, %cst_38 [1] : vector<32x32xf32> to vector<32xf32>
    %136 = vector.shape_cast %135 : vector<32xf32> to vector<32x1xf32>
    %cst_39 = arith.constant 3.200000e+01 : f32
    %137 = vector.broadcast %cst_39 : f32 to vector<32x1xf32>
    %138 = arith.divf %136, %137 : vector<32x1xf32>
    %139 = vector.broadcast %131 : vector<32x1xf32> to vector<32x32xf32>
    %140 = arith.subf %127, %139 : vector<32x32xf32>
    %cst_40 = arith.constant 9.99999974E-6 : f32
    %141 = vector.broadcast %cst_40 : f32 to vector<32x1xf32>
    %142 = arith.addf %138, %141 : vector<32x1xf32>
    %143 = math.rsqrt %142 : vector<32x1xf32>
    %144 = vector.broadcast %143 : vector<32x1xf32> to vector<32x32xf32>
    %145 = arith.mulf %140, %144 : vector<32x32xf32>
    %146 = vector.shape_cast %112 : vector<32xf32> to vector<1x32xf32>
    %147 = vector.broadcast %146 : vector<1x32xf32> to vector<32x32xf32>
    %148 = arith.mulf %145, %147 : vector<32x32xf32>
    %149 = vector.shape_cast %114 : vector<32xf32> to vector<1x32xf32>
    %150 = vector.broadcast %149 : vector<1x32xf32> to vector<32x32xf32>
    %151 = arith.addf %148, %150 : vector<32x32xf32>
    %cst_41 = arith.constant dense<0.000000e+00> : vector<32x96xf32>
    %152 = tpu.matmul %151, %102, %cst_41 {dimension_numbers = #tpu.dot_dimension_numbers<[1], [0], [0], [1], [0, 0, 1, 1], [], []>} : vector<32x32xf32>, vector<32x96xf32>, vector<32x96xf32> -> vector<32x96xf32>
    %153 = vector.extract_strided_slice %152 {offsets = [16, 0], sizes = [16, 48], strides = [1, 1]} : vector<32x96xf32> to vector<16x48xf32>
    %154 = vector.shape_cast %153 : vector<16x48xf32> to vector<2x8x48xf32>
    %155 = vector.extract_strided_slice %152 {offsets = [0, 48], sizes = [16, 48], strides = [1, 1]} : vector<32x96xf32> to vector<16x48xf32>
    %156 = vector.shape_cast %155 : vector<16x48xf32> to vector<2x8x48xf32>
    %157 = vector.extract_strided_slice %154 {offsets = [0, 0, 0], sizes = [2, 8, 8], strides = [1, 1, 1]} : vector<2x8x48xf32> to vector<2x8x8xf32>
    %158 = vector.extract_strided_slice %154 {offsets = [0, 0, 8], sizes = [2, 8, 8], strides = [1, 1, 1]} : vector<2x8x48xf32> to vector<2x8x8xf32>
    %159 = vector.extract_strided_slice %154 {offsets = [0, 0, 16], sizes = [2, 8, 8], strides = [1, 1, 1]} : vector<2x8x48xf32> to vector<2x8x8xf32>
    %160 = vector.extract_strided_slice %154 {offsets = [0, 0, 24], sizes = [2, 8, 8], strides = [1, 1, 1]} : vector<2x8x48xf32> to vector<2x8x8xf32>
    %161 = vector.extract_strided_slice %154 {offsets = [0, 0, 32], sizes = [2, 8, 8], strides = [1, 1, 1]} : vector<2x8x48xf32> to vector<2x8x8xf32>
    %162 = vector.extract_strided_slice %154 {offsets = [0, 0, 40], sizes = [2, 8, 8], strides = [1, 1, 1]} : vector<2x8x48xf32> to vector<2x8x8xf32>
    %163 = tpu.concatenate %157, %158, %159, %160, %161, %162 in 1 : vector<2x8x8xf32>, vector<2x8x8xf32>, vector<2x8x8xf32>, vector<2x8x8xf32>, vector<2x8x8xf32>, vector<2x8x8xf32> -> vector<2x48x8xf32>
    %164 = vector.extract_strided_slice %156 {offsets = [0, 0, 0], sizes = [2, 8, 8], strides = [1, 1, 1]} : vector<2x8x48xf32> to vector<2x8x8xf32>
    %165 = vector.extract_strided_slice %156 {offsets = [0, 0, 8], sizes = [2, 8, 8], strides = [1, 1, 1]} : vector<2x8x48xf32> to vector<2x8x8xf32>
    %166 = vector.extract_strided_slice %156 {offsets = [0, 0, 16], sizes = [2, 8, 8], strides = [1, 1, 1]} : vector<2x8x48xf32> to vector<2x8x8xf32>
    %167 = vector.extract_strided_slice %156 {offsets = [0, 0, 24], sizes = [2, 8, 8], strides = [1, 1, 1]} : vector<2x8x48xf32> to vector<2x8x8xf32>
    %168 = vector.extract_strided_slice %156 {offsets = [0, 0, 32], sizes = [2, 8, 8], strides = [1, 1, 1]} : vector<2x8x48xf32> to vector<2x8x8xf32>
    %169 = vector.extract_strided_slice %156 {offsets = [0, 0, 40], sizes = [2, 8, 8], strides = [1, 1, 1]} : vector<2x8x48xf32> to vector<2x8x8xf32>
    %170 = tpu.concatenate %164, %165, %166, %167, %168, %169 in 1 : vector<2x8x8xf32>, vector<2x8x8xf32>, vector<2x8x8xf32>, vector<2x8x8xf32>, vector<2x8x8xf32>, vector<2x8x8xf32> -> vector<2x48x8xf32>
    "tpu.trace_start"() <{level = 10 : i32, message = "bqd,bkd->bqk"}> : () -> ()
    %cst_42 = arith.constant dense<0.000000e+00> : vector<2x48x48xf32>
    %171 = tpu.matmul %163, %163, %cst_42 {dimension_numbers = #tpu.dot_dimension_numbers<[2], [2], [1], [1], [0, 0, 0, 1, 1, 1], [0], [0]>} : vector<2x48x8xf32>, vector<2x48x8xf32>, vector<2x48x48xf32> -> vector<2x48x48xf32>
    "tpu.trace_stop"() : () -> ()
    %cst_43 = arith.constant 0.44721359 : f32
    %172 = vector.broadcast %cst_43 : f32 to vector<2x48x48xf32>
    %173 = arith.mulf %171, %172 : vector<2x48x48xf32>
    %174 = vector.broadcast %99 : vector<1x48x48xf32> to vector<2x48x48xf32>
    %175 = arith.addf %173, %174 : vector<2x48x48xf32>
    %cst_44 = arith.constant dense<0xFF800000> : vector<2x48xf32>
    %176 = vector.multi_reduction <maximumf>, %175, %cst_44 [2] : vector<2x48x48xf32> to vector<2x48xf32>
    %177 = vector.shape_cast %176 : vector<2x48xf32> to vector<2x48x1xf32>
    %178 = vector.broadcast %177 : vector<2x48x1xf32> to vector<2x48x48xf32>
    %179 = arith.subf %175, %178 : vector<2x48x48xf32>
    %180 = math.exp %179 : vector<2x48x48xf32>
    %cst_45 = arith.constant dense<0.000000e+00> : vector<2x48xf32>
    %181 = vector.multi_reduction <add>, %180, %cst_45 [2] : vector<2x48x48xf32> to vector<2x48xf32>
    %182 = vector.shape_cast %181 : vector<2x48xf32> to vector<2x48x1xf32>
    %183 = vector.broadcast %182 : vector<2x48x1xf32> to vector<2x48x48xf32>
    %184 = arith.divf %180, %183 : vector<2x48x48xf32>
    "tpu.trace_start"() <{level = 10 : i32, message = "bqk,bkd->bqd"}> : () -> ()
    %cst_46 = arith.constant dense<0.000000e+00> : vector<2x48x8xf32>
    %185 = tpu.matmul %184, %170, %cst_46 {dimension_numbers = #tpu.dot_dimension_numbers<[2], [1], [1], [2], [0, 0, 0, 1, 1, 2], [0], [0]>} : vector<2x48x48xf32>, vector<2x48x8xf32>, vector<2x48x8xf32> -> vector<2x48x8xf32>
    "tpu.trace_stop"() : () -> ()
    %186 = vector.extract_strided_slice %185 {offsets = [0, 0, 0], sizes = [2, 8, 8], strides = [1, 1, 1]} : vector<2x48x8xf32> to vector<2x8x8xf32>
    %187 = vector.shape_cast %186 : vector<2x8x8xf32> to vector<16x8xf32>
    %188 = vector.extract_strided_slice %107 {offsets = [0, 0], sizes = [8, 32], strides = [1, 1]} : vector<48x32xf32> to vector<8x32xf32>
    %cst_47 = arith.constant dense<0.000000e+00> : vector<16x32xf32>
    %189 = tpu.matmul %187, %188, %cst_47 {dimension_numbers = #tpu.dot_dimension_numbers<[1], [0], [0], [1], [0, 0, 1, 1], [], []>} : vector<16x8xf32>, vector<8x32xf32>, vector<16x32xf32> -> vector<16x32xf32>
    %190 = vector.extract_strided_slice %185 {offsets = [0, 8, 0], sizes = [2, 8, 8], strides = [1, 1, 1]} : vector<2x48x8xf32> to vector<2x8x8xf32>
    %191 = vector.shape_cast %190 : vector<2x8x8xf32> to vector<16x8xf32>
    %192 = vector.extract_strided_slice %107 {offsets = [8, 0], sizes = [8, 32], strides = [1, 1]} : vector<48x32xf32> to vector<8x32xf32>
    %cst_48 = arith.constant dense<0.000000e+00> : vector<16x32xf32>
    %193 = tpu.matmul %191, %192, %cst_48 {dimension_numbers = #tpu.dot_dimension_numbers<[1], [0], [0], [1], [0, 0, 1, 1], [], []>} : vector<16x8xf32>, vector<8x32xf32>, vector<16x32xf32> -> vector<16x32xf32>
    %194 = arith.addf %189, %193 : vector<16x32xf32>
    %195 = vector.extract_strided_slice %185 {offsets = [0, 16, 0], sizes = [2, 8, 8], strides = [1, 1, 1]} : vector<2x48x8xf32> to vector<2x8x8xf32>
    %196 = vector.shape_cast %195 : vector<2x8x8xf32> to vector<16x8xf32>
    %197 = vector.extract_strided_slice %107 {offsets = [16, 0], sizes = [8, 32], strides = [1, 1]} : vector<48x32xf32> to vector<8x32xf32>
    %cst_49 = arith.constant dense<0.000000e+00> : vector<16x32xf32>
    %198 = tpu.matmul %196, %197, %cst_49 {dimension_numbers = #tpu.dot_dimension_numbers<[1], [0], [0], [1], [0, 0, 1, 1], [], []>} : vector<16x8xf32>, vector<8x32xf32>, vector<16x32xf32> -> vector<16x32xf32>
    %199 = arith.addf %194, %198 : vector<16x32xf32>
    %200 = vector.extract_strided_slice %185 {offsets = [0, 24, 0], sizes = [2, 8, 8], strides = [1, 1, 1]} : vector<2x48x8xf32> to vector<2x8x8xf32>
    %201 = vector.shape_cast %200 : vector<2x8x8xf32> to vector<16x8xf32>
    %202 = vector.extract_strided_slice %107 {offsets = [24, 0], sizes = [8, 32], strides = [1, 1]} : vector<48x32xf32> to vector<8x32xf32>
    %cst_50 = arith.constant dense<0.000000e+00> : vector<16x32xf32>
    %203 = tpu.matmul %201, %202, %cst_50 {dimension_numbers = #tpu.dot_dimension_numbers<[1], [0], [0], [1], [0, 0, 1, 1], [], []>} : vector<16x8xf32>, vector<8x32xf32>, vector<16x32xf32> -> vector<16x32xf32>
    %204 = arith.addf %199, %203 : vector<16x32xf32>
    %205 = vector.extract_strided_slice %185 {offsets = [0, 32, 0], sizes = [2, 8, 8], strides = [1, 1, 1]} : vector<2x48x8xf32> to vector<2x8x8xf32>
    %206 = vector.shape_cast %205 : vector<2x8x8xf32> to vector<16x8xf32>
    %207 = vector.extract_strided_slice %107 {offsets = [32, 0], sizes = [8, 32], strides = [1, 1]} : vector<48x32xf32> to vector<8x32xf32>
    %cst_51 = arith.constant dense<0.000000e+00> : vector<16x32xf32>
    %208 = tpu.matmul %206, %207, %cst_51 {dimension_numbers = #tpu.dot_dimension_numbers<[1], [0], [0], [1], [0, 0, 1, 1], [], []>} : vector<16x8xf32>, vector<8x32xf32>, vector<16x32xf32> -> vector<16x32xf32>
    %209 = arith.addf %204, %208 : vector<16x32xf32>
    %210 = vector.extract_strided_slice %185 {offsets = [0, 40, 0], sizes = [2, 8, 8], strides = [1, 1, 1]} : vector<2x48x8xf32> to vector<2x8x8xf32>
    %211 = vector.shape_cast %210 : vector<2x8x8xf32> to vector<16x8xf32>
    %212 = vector.extract_strided_slice %107 {offsets = [40, 0], sizes = [8, 32], strides = [1, 1]} : vector<48x32xf32> to vector<8x32xf32>
    %cst_52 = arith.constant dense<0.000000e+00> : vector<16x32xf32>
    %213 = tpu.matmul %211, %212, %cst_52 {dimension_numbers = #tpu.dot_dimension_numbers<[1], [0], [0], [1], [0, 0, 1, 1], [], []>} : vector<16x8xf32>, vector<8x32xf32>, vector<16x32xf32> -> vector<16x32xf32>
    %214 = arith.addf %209, %213 : vector<16x32xf32>
    %215 = vector.shape_cast %120 : vector<32xf32> to vector<1x32xf32>
    %216 = vector.broadcast %215 : vector<1x32xf32> to vector<16x32xf32>
    %217 = arith.addf %214, %216 : vector<16x32xf32>
    %218 = vector.shape_cast %217 : vector<16x32xf32> to vector<2x8x32xf32>
    %219 = arith.addf %97, %218 : vector<2x8x32xf32>
    %220 = vector.shape_cast %219 : vector<2x8x32xf32> to vector<16x32xf32>
    %cst_53 = arith.constant dense<0.000000e+00> : vector<16xf32>
    %221 = vector.multi_reduction <add>, %220, %cst_53 [1] : vector<16x32xf32> to vector<16xf32>
    %222 = vector.shape_cast %221 : vector<16xf32> to vector<16x1xf32>
    %cst_54 = arith.constant 3.200000e+01 : f32
    %223 = vector.broadcast %cst_54 : f32 to vector<16x1xf32>
    %224 = arith.divf %222, %223 : vector<16x1xf32>
    %225 = vector.broadcast %224 : vector<16x1xf32> to vector<16x32xf32>
    %226 = arith.subf %220, %225 : vector<16x32xf32>
    %227 = arith.mulf %226, %226 : vector<16x32xf32>
    %cst_55 = arith.constant dense<0.000000e+00> : vector<16xf32>
    %228 = vector.multi_reduction <add>, %227, %cst_55 [1] : vector<16x32xf32> to vector<16xf32>
    %229 = vector.shape_cast %228 : vector<16xf32> to vector<16x1xf32>
    %cst_56 = arith.constant 3.200000e+01 : f32
    %230 = vector.broadcast %cst_56 : f32 to vector<16x1xf32>
    %231 = arith.divf %229, %230 : vector<16x1xf32>
    %232 = vector.broadcast %224 : vector<16x1xf32> to vector<16x32xf32>
    %233 = arith.subf %220, %232 : vector<16x32xf32>
    %cst_57 = arith.constant 9.99999974E-6 : f32
    %234 = vector.broadcast %cst_57 : f32 to vector<16x1xf32>
    %235 = arith.addf %231, %234 : vector<16x1xf32>
    %236 = math.rsqrt %235 : vector<16x1xf32>
    %237 = vector.broadcast %236 : vector<16x1xf32> to vector<16x32xf32>
    %238 = arith.mulf %233, %237 : vector<16x32xf32>
    %239 = vector.shape_cast %116 : vector<32xf32> to vector<1x32xf32>
    %240 = vector.broadcast %239 : vector<1x32xf32> to vector<16x32xf32>
    %241 = arith.mulf %238, %240 : vector<16x32xf32>
    %242 = vector.shape_cast %118 : vector<32xf32> to vector<1x32xf32>
    %243 = vector.broadcast %242 : vector<1x32xf32> to vector<16x32xf32>
    %244 = arith.addf %241, %243 : vector<16x32xf32>
    %cst_58 = arith.constant dense<0.000000e+00> : vector<16x128xf32>
    %245 = tpu.matmul %244, %104, %cst_58 {dimension_numbers = #tpu.dot_dimension_numbers<[1], [0], [0], [1], [0, 0, 1, 1], [], []>} : vector<16x32xf32>, vector<32x128xf32>, vector<16x128xf32> -> vector<16x128xf32>
    %246 = vector.shape_cast %124 : vector<128xf32> to vector<1x128xf32>
    %247 = vector.broadcast %246 : vector<1x128xf32> to vector<16x128xf32>
    %248 = arith.addf %245, %247 : vector<16x128xf32>
    %cst_59 = arith.constant 0.000000e+00 : f32
    %249 = vector.broadcast %cst_59 : f32 to vector<16x128xf32>
    %250 = arith.maximumf %248, %249 : vector<16x128xf32>
    %cst_60 = arith.constant dense<0.000000e+00> : vector<16x32xf32>
    %251 = tpu.matmul %250, %108, %cst_60 {dimension_numbers = #tpu.dot_dimension_numbers<[1], [0], [0], [1], [0, 0, 1, 1], [], []>} : vector<16x128xf32>, vector<128x32xf32>, vector<16x32xf32> -> vector<16x32xf32>
    %252 = vector.shape_cast %122 : vector<32xf32> to vector<1x32xf32>
    %253 = vector.broadcast %252 : vector<1x32xf32> to vector<16x32xf32>
    %254 = arith.addf %251, %253 : vector<16x32xf32>
    %255 = vector.shape_cast %254 : vector<16x32xf32> to vector<2x8x32xf32>
    %256 = arith.addf %219, %255 : vector<2x8x32xf32>
    %c1 = arith.constant 1 : index
    %c0_61 = arith.constant 0 : index
    %c0_62 = arith.constant 0 : index
    %257 = vector.load %arg4[%c1, %c0_61, %c0_62] : memref<6x32x96xf32, #tpu.memory_space<vmem>>, vector<1x32x96xf32>
    %258 = vector.shape_cast %257 : vector<1x32x96xf32> to vector<32x96xf32>
    %c1_63 = arith.constant 1 : index
    %c0_64 = arith.constant 0 : index
    %c0_65 = arith.constant 0 : index
    %259 = vector.load %arg5[%c1_63, %c0_64, %c0_65] : memref<6x32x128xf32, #tpu.memory_space<vmem>>, vector<1x32x128xf32>
    %260 = vector.shape_cast %259 : vector<1x32x128xf32> to vector<32x128xf32>
    %c1_66 = arith.constant 1 : index
    %c0_67 = arith.constant 0 : index
    %c0_68 = arith.constant 0 : index
    %261 = vector.load %arg6[%c1_66, %c0_67, %c0_68] : memref<6x176x32xf32, #tpu.memory_space<vmem>>, vector<1x176x32xf32>
    %262 = vector.shape_cast %261 : vector<1x176x32xf32> to vector<176x32xf32>
    %263 = vector.extract_strided_slice %262 {offsets = [0, 0], sizes = [48, 32], strides = [1, 1]} : vector<176x32xf32> to vector<48x32xf32>
    %264 = vector.extract_strided_slice %262 {offsets = [48, 0], sizes = [128, 32], strides = [1, 1]} : vector<176x32xf32> to vector<128x32xf32>
    %c1_69 = arith.constant 1 : index
    %c0_70 = arith.constant 0 : index
    %c0_71 = arith.constant 0 : index
    %265 = vector.load %arg7[%c1_69, %c0_70, %c0_71] : memref<6x3x128xf32, #tpu.memory_space<vmem>>, vector<1x3x128xf32>
    %266 = vector.shape_cast %265 : vector<1x3x128xf32> to vector<3x128xf32>
    %267 = vector.extract_strided_slice %266 {offsets = [0, 0], sizes = [1, 32], strides = [1, 1]} : vector<3x128xf32> to vector<1x32xf32>
    %268 = vector.shape_cast %267 : vector<1x32xf32> to vector<32xf32>
    %269 = vector.extract_strided_slice %266 {offsets = [0, 32], sizes = [1, 32], strides = [1, 1]} : vector<3x128xf32> to vector<1x32xf32>
    %270 = vector.shape_cast %269 : vector<1x32xf32> to vector<32xf32>
    %271 = vector.extract_strided_slice %266 {offsets = [0, 64], sizes = [1, 32], strides = [1, 1]} : vector<3x128xf32> to vector<1x32xf32>
    %272 = vector.shape_cast %271 : vector<1x32xf32> to vector<32xf32>
    %273 = vector.extract_strided_slice %266 {offsets = [0, 96], sizes = [1, 32], strides = [1, 1]} : vector<3x128xf32> to vector<1x32xf32>
    %274 = vector.shape_cast %273 : vector<1x32xf32> to vector<32xf32>
    %275 = vector.extract_strided_slice %266 {offsets = [1, 0], sizes = [1, 32], strides = [1, 1]} : vector<3x128xf32> to vector<1x32xf32>
    %276 = vector.shape_cast %275 : vector<1x32xf32> to vector<32xf32>
    %277 = vector.extract_strided_slice %266 {offsets = [1, 32], sizes = [1, 32], strides = [1, 1]} : vector<3x128xf32> to vector<1x32xf32>
    %278 = vector.shape_cast %277 : vector<1x32xf32> to vector<32xf32>
    %279 = vector.extract_strided_slice %266 {offsets = [2, 0], sizes = [1, 128], strides = [1, 1]} : vector<3x128xf32> to vector<1x128xf32>
    %280 = vector.shape_cast %279 : vector<1x128xf32> to vector<128xf32>
    %281 = vector.shape_cast %256 : vector<2x8x32xf32> to vector<16x32xf32>
    %282 = vector.shape_cast %100 : vector<2x8x32xf32> to vector<16x32xf32>
    %283 = tpu.concatenate %281, %282 in 0 : vector<16x32xf32>, vector<16x32xf32> -> vector<32x32xf32>
    %cst_72 = arith.constant dense<0.000000e+00> : vector<32xf32>
    %284 = vector.multi_reduction <add>, %283, %cst_72 [1] : vector<32x32xf32> to vector<32xf32>
    %285 = vector.shape_cast %284 : vector<32xf32> to vector<32x1xf32>
    %cst_73 = arith.constant 3.200000e+01 : f32
    %286 = vector.broadcast %cst_73 : f32 to vector<32x1xf32>
    %287 = arith.divf %285, %286 : vector<32x1xf32>
    %288 = vector.broadcast %287 : vector<32x1xf32> to vector<32x32xf32>
    %289 = arith.subf %283, %288 : vector<32x32xf32>
    %290 = arith.mulf %289, %289 : vector<32x32xf32>
    %cst_74 = arith.constant dense<0.000000e+00> : vector<32xf32>
    %291 = vector.multi_reduction <add>, %290, %cst_74 [1] : vector<32x32xf32> to vector<32xf32>
    %292 = vector.shape_cast %291 : vector<32xf32> to vector<32x1xf32>
    %cst_75 = arith.constant 3.200000e+01 : f32
    %293 = vector.broadcast %cst_75 : f32 to vector<32x1xf32>
    %294 = arith.divf %292, %293 : vector<32x1xf32>
    %295 = vector.broadcast %287 : vector<32x1xf32> to vector<32x32xf32>
    %296 = arith.subf %283, %295 : vector<32x32xf32>
    %cst_76 = arith.constant 9.99999974E-6 : f32
    %297 = vector.broadcast %cst_76 : f32 to vector<32x1xf32>
    %298 = arith.addf %294, %297 : vector<32x1xf32>
    %299 = math.rsqrt %298 : vector<32x1xf32>
    %300 = vector.broadcast %299 : vector<32x1xf32> to vector<32x32xf32>
    %301 = arith.mulf %296, %300 : vector<32x32xf32>
    %302 = vector.shape_cast %268 : vector<32xf32> to vector<1x32xf32>
    %303 = vector.broadcast %302 : vector<1x32xf32> to vector<32x32xf32>
    %304 = arith.mulf %301, %303 : vector<32x32xf32>
    %305 = vector.shape_cast %270 : vector<32xf32> to vector<1x32xf32>
    %306 = vector.broadcast %305 : vector<1x32xf32> to vector<32x32xf32>
    %307 = arith.addf %304, %306 : vector<32x32xf32>
    %cst_77 = arith.constant dense<0.000000e+00> : vector<32x96xf32>
    %308 = tpu.matmul %307, %258, %cst_77 {dimension_numbers = #tpu.dot_dimension_numbers<[1], [0], [0], [1], [0, 0, 1, 1], [], []>} : vector<32x32xf32>, vector<32x96xf32>, vector<32x96xf32> -> vector<32x96xf32>
    %309 = vector.extract_strided_slice %308 {offsets = [16, 0], sizes = [16, 48], strides = [1, 1]} : vector<32x96xf32> to vector<16x48xf32>
    %310 = vector.shape_cast %309 : vector<16x48xf32> to vector<2x8x48xf32>
    %311 = vector.extract_strided_slice %308 {offsets = [0, 48], sizes = [16, 48], strides = [1, 1]} : vector<32x96xf32> to vector<16x48xf32>
    %312 = vector.shape_cast %311 : vector<16x48xf32> to vector<2x8x48xf32>
    %313 = vector.extract_strided_slice %310 {offsets = [0, 0, 0], sizes = [2, 8, 8], strides = [1, 1, 1]} : vector<2x8x48xf32> to vector<2x8x8xf32>
    %314 = vector.extract_strided_slice %310 {offsets = [0, 0, 8], sizes = [2, 8, 8], strides = [1, 1, 1]} : vector<2x8x48xf32> to vector<2x8x8xf32>
    %315 = vector.extract_strided_slice %310 {offsets = [0, 0, 16], sizes = [2, 8, 8], strides = [1, 1, 1]} : vector<2x8x48xf32> to vector<2x8x8xf32>
    %316 = vector.extract_strided_slice %310 {offsets = [0, 0, 24], sizes = [2, 8, 8], strides = [1, 1, 1]} : vector<2x8x48xf32> to vector<2x8x8xf32>
    %317 = vector.extract_strided_slice %310 {offsets = [0, 0, 32], sizes = [2, 8, 8], strides = [1, 1, 1]} : vector<2x8x48xf32> to vector<2x8x8xf32>
    %318 = vector.extract_strided_slice %310 {offsets = [0, 0, 40], sizes = [2, 8, 8], strides = [1, 1, 1]} : vector<2x8x48xf32> to vector<2x8x8xf32>
    %319 = tpu.concatenate %313, %314, %315, %316, %317, %318 in 1 : vector<2x8x8xf32>, vector<2x8x8xf32>, vector<2x8x8xf32>, vector<2x8x8xf32>, vector<2x8x8xf32>, vector<2x8x8xf32> -> vector<2x48x8xf32>
    %320 = vector.extract_strided_slice %312 {offsets = [0, 0, 0], sizes = [2, 8, 8], strides = [1, 1, 1]} : vector<2x8x48xf32> to vector<2x8x8xf32>
    %321 = vector.extract_strided_slice %312 {offsets = [0, 0, 8], sizes = [2, 8, 8], strides = [1, 1, 1]} : vector<2x8x48xf32> to vector<2x8x8xf32>
    %322 = vector.extract_strided_slice %312 {offsets = [0, 0, 16], sizes = [2, 8, 8], strides = [1, 1, 1]} : vector<2x8x48xf32> to vector<2x8x8xf32>
    %323 = vector.extract_strided_slice %312 {offsets = [0, 0, 24], sizes = [2, 8, 8], strides = [1, 1, 1]} : vector<2x8x48xf32> to vector<2x8x8xf32>
    %324 = vector.extract_strided_slice %312 {offsets = [0, 0, 32], sizes = [2, 8, 8], strides = [1, 1, 1]} : vector<2x8x48xf32> to vector<2x8x8xf32>
    %325 = vector.extract_strided_slice %312 {offsets = [0, 0, 40], sizes = [2, 8, 8], strides = [1, 1, 1]} : vector<2x8x48xf32> to vector<2x8x8xf32>
    %326 = tpu.concatenate %320, %321, %322, %323, %324, %325 in 1 : vector<2x8x8xf32>, vector<2x8x8xf32>, vector<2x8x8xf32>, vector<2x8x8xf32>, vector<2x8x8xf32>, vector<2x8x8xf32> -> vector<2x48x8xf32>
    "tpu.trace_start"() <{level = 10 : i32, message = "bqd,bkd->bqk"}> : () -> ()
    %cst_78 = arith.constant dense<0.000000e+00> : vector<2x48x48xf32>
    %327 = tpu.matmul %319, %319, %cst_78 {dimension_numbers = #tpu.dot_dimension_numbers<[2], [2], [1], [1], [0, 0, 0, 1, 1, 1], [0], [0]>} : vector<2x48x8xf32>, vector<2x48x8xf32>, vector<2x48x48xf32> -> vector<2x48x48xf32>
    "tpu.trace_stop"() : () -> ()
    %cst_79 = arith.constant 0.44721359 : f32
    %328 = vector.broadcast %cst_79 : f32 to vector<2x48x48xf32>
    %329 = arith.mulf %327, %328 : vector<2x48x48xf32>
    %330 = vector.broadcast %99 : vector<1x48x48xf32> to vector<2x48x48xf32>
    %331 = arith.addf %329, %330 : vector<2x48x48xf32>
    %cst_80 = arith.constant dense<0xFF800000> : vector<2x48xf32>
    %332 = vector.multi_reduction <maximumf>, %331, %cst_80 [2] : vector<2x48x48xf32> to vector<2x48xf32>
    %333 = vector.shape_cast %332 : vector<2x48xf32> to vector<2x48x1xf32>
    %334 = vector.broadcast %333 : vector<2x48x1xf32> to vector<2x48x48xf32>
    %335 = arith.subf %331, %334 : vector<2x48x48xf32>
    %336 = math.exp %335 : vector<2x48x48xf32>
    %cst_81 = arith.constant dense<0.000000e+00> : vector<2x48xf32>
    %337 = vector.multi_reduction <add>, %336, %cst_81 [2] : vector<2x48x48xf32> to vector<2x48xf32>
    %338 = vector.shape_cast %337 : vector<2x48xf32> to vector<2x48x1xf32>
    %339 = vector.broadcast %338 : vector<2x48x1xf32> to vector<2x48x48xf32>
    %340 = arith.divf %336, %339 : vector<2x48x48xf32>
    "tpu.trace_start"() <{level = 10 : i32, message = "bqk,bkd->bqd"}> : () -> ()
    %cst_82 = arith.constant dense<0.000000e+00> : vector<2x48x8xf32>
    %341 = tpu.matmul %340, %326, %cst_82 {dimension_numbers = #tpu.dot_dimension_numbers<[2], [1], [1], [2], [0, 0, 0, 1, 1, 2], [0], [0]>} : vector<2x48x48xf32>, vector<2x48x8xf32>, vector<2x48x8xf32> -> vector<2x48x8xf32>
    "tpu.trace_stop"() : () -> ()
    %342 = vector.extract_strided_slice %341 {offsets = [0, 0, 0], sizes = [2, 8, 8], strides = [1, 1, 1]} : vector<2x48x8xf32> to vector<2x8x8xf32>
    %343 = vector.shape_cast %342 : vector<2x8x8xf32> to vector<16x8xf32>
    %344 = vector.extract_strided_slice %263 {offsets = [0, 0], sizes = [8, 32], strides = [1, 1]} : vector<48x32xf32> to vector<8x32xf32>
    %cst_83 = arith.constant dense<0.000000e+00> : vector<16x32xf32>
    %345 = tpu.matmul %343, %344, %cst_83 {dimension_numbers = #tpu.dot_dimension_numbers<[1], [0], [0], [1], [0, 0, 1, 1], [], []>} : vector<16x8xf32>, vector<8x32xf32>, vector<16x32xf32> -> vector<16x32xf32>
    %346 = vector.extract_strided_slice %341 {offsets = [0, 8, 0], sizes = [2, 8, 8], strides = [1, 1, 1]} : vector<2x48x8xf32> to vector<2x8x8xf32>
    %347 = vector.shape_cast %346 : vector<2x8x8xf32> to vector<16x8xf32>
    %348 = vector.extract_strided_slice %263 {offsets = [8, 0], sizes = [8, 32], strides = [1, 1]} : vector<48x32xf32> to vector<8x32xf32>
    %cst_84 = arith.constant dense<0.000000e+00> : vector<16x32xf32>
    %349 = tpu.matmul %347, %348, %cst_84 {dimension_numbers = #tpu.dot_dimension_numbers<[1], [0], [0], [1], [0, 0, 1, 1], [], []>} : vector<16x8xf32>, vector<8x32xf32>, vector<16x32xf32> -> vector<16x32xf32>
    %350 = arith.addf %345, %349 : vector<16x32xf32>
    %351 = vector.extract_strided_slice %341 {offsets = [0, 16, 0], sizes = [2, 8, 8], strides = [1, 1, 1]} : vector<2x48x8xf32> to vector<2x8x8xf32>
    %352 = vector.shape_cast %351 : vector<2x8x8xf32> to vector<16x8xf32>
    %353 = vector.extract_strided_slice %263 {offsets = [16, 0], sizes = [8, 32], strides = [1, 1]} : vector<48x32xf32> to vector<8x32xf32>
    %cst_85 = arith.constant dense<0.000000e+00> : vector<16x32xf32>
    %354 = tpu.matmul %352, %353, %cst_85 {dimension_numbers = #tpu.dot_dimension_numbers<[1], [0], [0], [1], [0, 0, 1, 1], [], []>} : vector<16x8xf32>, vector<8x32xf32>, vector<16x32xf32> -> vector<16x32xf32>
    %355 = arith.addf %350, %354 : vector<16x32xf32>
    %356 = vector.extract_strided_slice %341 {offsets = [0, 24, 0], sizes = [2, 8, 8], strides = [1, 1, 1]} : vector<2x48x8xf32> to vector<2x8x8xf32>
    %357 = vector.shape_cast %356 : vector<2x8x8xf32> to vector<16x8xf32>
    %358 = vector.extract_strided_slice %263 {offsets = [24, 0], sizes = [8, 32], strides = [1, 1]} : vector<48x32xf32> to vector<8x32xf32>
    %cst_86 = arith.constant dense<0.000000e+00> : vector<16x32xf32>
    %359 = tpu.matmul %357, %358, %cst_86 {dimension_numbers = #tpu.dot_dimension_numbers<[1], [0], [0], [1], [0, 0, 1, 1], [], []>} : vector<16x8xf32>, vector<8x32xf32>, vector<16x32xf32> -> vector<16x32xf32>
    %360 = arith.addf %355, %359 : vector<16x32xf32>
    %361 = vector.extract_strided_slice %341 {offsets = [0, 32, 0], sizes = [2, 8, 8], strides = [1, 1, 1]} : vector<2x48x8xf32> to vector<2x8x8xf32>
    %362 = vector.shape_cast %361 : vector<2x8x8xf32> to vector<16x8xf32>
    %363 = vector.extract_strided_slice %263 {offsets = [32, 0], sizes = [8, 32], strides = [1, 1]} : vector<48x32xf32> to vector<8x32xf32>
    %cst_87 = arith.constant dense<0.000000e+00> : vector<16x32xf32>
    %364 = tpu.matmul %362, %363, %cst_87 {dimension_numbers = #tpu.dot_dimension_numbers<[1], [0], [0], [1], [0, 0, 1, 1], [], []>} : vector<16x8xf32>, vector<8x32xf32>, vector<16x32xf32> -> vector<16x32xf32>
    %365 = arith.addf %360, %364 : vector<16x32xf32>
    %366 = vector.extract_strided_slice %341 {offsets = [0, 40, 0], sizes = [2, 8, 8], strides = [1, 1, 1]} : vector<2x48x8xf32> to vector<2x8x8xf32>
    %367 = vector.shape_cast %366 : vector<2x8x8xf32> to vector<16x8xf32>
    %368 = vector.extract_strided_slice %263 {offsets = [40, 0], sizes = [8, 32], strides = [1, 1]} : vector<48x32xf32> to vector<8x32xf32>
    %cst_88 = arith.constant dense<0.000000e+00> : vector<16x32xf32>
    %369 = tpu.matmul %367, %368, %cst_88 {dimension_numbers = #tpu.dot_dimension_numbers<[1], [0], [0], [1], [0, 0, 1, 1], [], []>} : vector<16x8xf32>, vector<8x32xf32>, vector<16x32xf32> -> vector<16x32xf32>
    %370 = arith.addf %365, %369 : vector<16x32xf32>
    %371 = vector.shape_cast %276 : vector<32xf32> to vector<1x32xf32>
    %372 = vector.broadcast %371 : vector<1x32xf32> to vector<16x32xf32>
    %373 = arith.addf %370, %372 : vector<16x32xf32>
    %374 = vector.shape_cast %373 : vector<16x32xf32> to vector<2x8x32xf32>
    %375 = arith.addf %100, %374 : vector<2x8x32xf32>
    %376 = vector.shape_cast %375 : vector<2x8x32xf32> to vector<16x32xf32>
    %cst_89 = arith.constant dense<0.000000e+00> : vector<16xf32>
    %377 = vector.multi_reduction <add>, %376, %cst_89 [1] : vector<16x32xf32> to vector<16xf32>
    %378 = vector.shape_cast %377 : vector<16xf32> to vector<16x1xf32>
    %cst_90 = arith.constant 3.200000e+01 : f32
    %379 = vector.broadcast %cst_90 : f32 to vector<16x1xf32>
    %380 = arith.divf %378, %379 : vector<16x1xf32>
    %381 = vector.broadcast %380 : vector<16x1xf32> to vector<16x32xf32>
    %382 = arith.subf %376, %381 : vector<16x32xf32>
    %383 = arith.mulf %382, %382 : vector<16x32xf32>
    %cst_91 = arith.constant dense<0.000000e+00> : vector<16xf32>
    %384 = vector.multi_reduction <add>, %383, %cst_91 [1] : vector<16x32xf32> to vector<16xf32>
    %385 = vector.shape_cast %384 : vector<16xf32> to vector<16x1xf32>
    %cst_92 = arith.constant 3.200000e+01 : f32
    %386 = vector.broadcast %cst_92 : f32 to vector<16x1xf32>
    %387 = arith.divf %385, %386 : vector<16x1xf32>
    %388 = vector.broadcast %380 : vector<16x1xf32> to vector<16x32xf32>
    %389 = arith.subf %376, %388 : vector<16x32xf32>
    %cst_93 = arith.constant 9.99999974E-6 : f32
    %390 = vector.broadcast %cst_93 : f32 to vector<16x1xf32>
    %391 = arith.addf %387, %390 : vector<16x1xf32>
    %392 = math.rsqrt %391 : vector<16x1xf32>
    %393 = vector.broadcast %392 : vector<16x1xf32> to vector<16x32xf32>
    %394 = arith.mulf %389, %393 : vector<16x32xf32>
    %395 = vector.shape_cast %272 : vector<32xf32> to vector<1x32xf32>
    %396 = vector.broadcast %395 : vector<1x32xf32> to vector<16x32xf32>
    %397 = arith.mulf %394, %396 : vector<16x32xf32>
    %398 = vector.shape_cast %274 : vector<32xf32> to vector<1x32xf32>
    %399 = vector.broadcast %398 : vector<1x32xf32> to vector<16x32xf32>
    %400 = arith.addf %397, %399 : vector<16x32xf32>
    %cst_94 = arith.constant dense<0.000000e+00> : vector<16x128xf32>
    %401 = tpu.matmul %400, %260, %cst_94 {dimension_numbers = #tpu.dot_dimension_numbers<[1], [0], [0], [1], [0, 0, 1, 1], [], []>} : vector<16x32xf32>, vector<32x128xf32>, vector<16x128xf32> -> vector<16x128xf32>
    %402 = vector.shape_cast %280 : vector<128xf32> to vector<1x128xf32>
    %403 = vector.broadcast %402 : vector<1x128xf32> to vector<16x128xf32>
    %404 = arith.addf %401, %403 : vector<16x128xf32>
    %cst_95 = arith.constant 0.000000e+00 : f32
    %405 = vector.broadcast %cst_95 : f32 to vector<16x128xf32>
    %406 = arith.maximumf %404, %405 : vector<16x128xf32>
    %cst_96 = arith.constant dense<0.000000e+00> : vector<16x32xf32>
    %407 = tpu.matmul %406, %264, %cst_96 {dimension_numbers = #tpu.dot_dimension_numbers<[1], [0], [0], [1], [0, 0, 1, 1], [], []>} : vector<16x128xf32>, vector<128x32xf32>, vector<16x32xf32> -> vector<16x32xf32>
    %408 = vector.shape_cast %278 : vector<32xf32> to vector<1x32xf32>
    %409 = vector.broadcast %408 : vector<1x32xf32> to vector<16x32xf32>
    %410 = arith.addf %407, %409 : vector<16x32xf32>
    %411 = vector.shape_cast %410 : vector<16x32xf32> to vector<2x8x32xf32>
    %412 = arith.addf %375, %411 : vector<2x8x32xf32>
    %c2 = arith.constant 2 : index
    %c0_97 = arith.constant 0 : index
    %c0_98 = arith.constant 0 : index
    %413 = vector.load %arg4[%c2, %c0_97, %c0_98] : memref<6x32x96xf32, #tpu.memory_space<vmem>>, vector<1x32x96xf32>
    %414 = vector.shape_cast %413 : vector<1x32x96xf32> to vector<32x96xf32>
    %c2_99 = arith.constant 2 : index
    %c0_100 = arith.constant 0 : index
    %c0_101 = arith.constant 0 : index
    %415 = vector.load %arg5[%c2_99, %c0_100, %c0_101] : memref<6x32x128xf32, #tpu.memory_space<vmem>>, vector<1x32x128xf32>
    %416 = vector.shape_cast %415 : vector<1x32x128xf32> to vector<32x128xf32>
    %c2_102 = arith.constant 2 : index
    %c0_103 = arith.constant 0 : index
    %c0_104 = arith.constant 0 : index
    %417 = vector.load %arg6[%c2_102, %c0_103, %c0_104] : memref<6x176x32xf32, #tpu.memory_space<vmem>>, vector<1x176x32xf32>
    %418 = vector.shape_cast %417 : vector<1x176x32xf32> to vector<176x32xf32>
    %419 = vector.extract_strided_slice %418 {offsets = [0, 0], sizes = [48, 32], strides = [1, 1]} : vector<176x32xf32> to vector<48x32xf32>
    %420 = vector.extract_strided_slice %418 {offsets = [48, 0], sizes = [128, 32], strides = [1, 1]} : vector<176x32xf32> to vector<128x32xf32>
    %c2_105 = arith.constant 2 : index
    %c0_106 = arith.constant 0 : index
    %c0_107 = arith.constant 0 : index
    %421 = vector.load %arg7[%c2_105, %c0_106, %c0_107] : memref<6x3x128xf32, #tpu.memory_space<vmem>>, vector<1x3x128xf32>
    %422 = vector.shape_cast %421 : vector<1x3x128xf32> to vector<3x128xf32>
    %423 = vector.extract_strided_slice %422 {offsets = [0, 0], sizes = [1, 32], strides = [1, 1]} : vector<3x128xf32> to vector<1x32xf32>
    %424 = vector.shape_cast %423 : vector<1x32xf32> to vector<32xf32>
    %425 = vector.extract_strided_slice %422 {offsets = [0, 32], sizes = [1, 32], strides = [1, 1]} : vector<3x128xf32> to vector<1x32xf32>
    %426 = vector.shape_cast %425 : vector<1x32xf32> to vector<32xf32>
    %427 = vector.extract_strided_slice %422 {offsets = [0, 64], sizes = [1, 32], strides = [1, 1]} : vector<3x128xf32> to vector<1x32xf32>
    %428 = vector.shape_cast %427 : vector<1x32xf32> to vector<32xf32>
    %429 = vector.extract_strided_slice %422 {offsets = [0, 96], sizes = [1, 32], strides = [1, 1]} : vector<3x128xf32> to vector<1x32xf32>
    %430 = vector.shape_cast %429 : vector<1x32xf32> to vector<32xf32>
    %431 = vector.extract_strided_slice %422 {offsets = [1, 0], sizes = [1, 32], strides = [1, 1]} : vector<3x128xf32> to vector<1x32xf32>
    %432 = vector.shape_cast %431 : vector<1x32xf32> to vector<32xf32>
    %433 = vector.extract_strided_slice %422 {offsets = [1, 32], sizes = [1, 32], strides = [1, 1]} : vector<3x128xf32> to vector<1x32xf32>
    %434 = vector.shape_cast %433 : vector<1x32xf32> to vector<32xf32>
    %435 = vector.extract_strided_slice %422 {offsets = [2, 0], sizes = [1, 128], strides = [1, 1]} : vector<3x128xf32> to vector<1x128xf32>
    %436 = vector.shape_cast %435 : vector<1x128xf32> to vector<128xf32>
    %437 = vector.shape_cast %412 : vector<2x8x32xf32> to vector<16x32xf32>
    %438 = vector.shape_cast %256 : vector<2x8x32xf32> to vector<16x32xf32>
    %439 = tpu.concatenate %437, %438 in 0 : vector<16x32xf32>, vector<16x32xf32> -> vector<32x32xf32>
    %cst_108 = arith.constant dense<0.000000e+00> : vector<32xf32>
    %440 = vector.multi_reduction <add>, %439, %cst_108 [1] : vector<32x32xf32> to vector<32xf32>
    %441 = vector.shape_cast %440 : vector<32xf32> to vector<32x1xf32>
    %cst_109 = arith.constant 3.200000e+01 : f32
    %442 = vector.broadcast %cst_109 : f32 to vector<32x1xf32>
    %443 = arith.divf %441, %442 : vector<32x1xf32>
    %444 = vector.broadcast %443 : vector<32x1xf32> to vector<32x32xf32>
    %445 = arith.subf %439, %444 : vector<32x32xf32>
    %446 = arith.mulf %445, %445 : vector<32x32xf32>
    %cst_110 = arith.constant dense<0.000000e+00> : vector<32xf32>
    %447 = vector.multi_reduction <add>, %446, %cst_110 [1] : vector<32x32xf32> to vector<32xf32>
    %448 = vector.shape_cast %447 : vector<32xf32> to vector<32x1xf32>
    %cst_111 = arith.constant 3.200000e+01 : f32
    %449 = vector.broadcast %cst_111 : f32 to vector<32x1xf32>
    %450 = arith.divf %448, %449 : vector<32x1xf32>
    %451 = vector.broadcast %443 : vector<32x1xf32> to vector<32x32xf32>
    %452 = arith.subf %439, %451 : vector<32x32xf32>
    %cst_112 = arith.constant 9.99999974E-6 : f32
    %453 = vector.broadcast %cst_112 : f32 to vector<32x1xf32>
    %454 = arith.addf %450, %453 : vector<32x1xf32>
    %455 = math.rsqrt %454 : vector<32x1xf32>
    %456 = vector.broadcast %455 : vector<32x1xf32> to vector<32x32xf32>
    %457 = arith.mulf %452, %456 : vector<32x32xf32>
    %458 = vector.shape_cast %424 : vector<32xf32> to vector<1x32xf32>
    %459 = vector.broadcast %458 : vector<1x32xf32> to vector<32x32xf32>
    %460 = arith.mulf %457, %459 : vector<32x32xf32>
    %461 = vector.shape_cast %426 : vector<32xf32> to vector<1x32xf32>
    %462 = vector.broadcast %461 : vector<1x32xf32> to vector<32x32xf32>
    %463 = arith.addf %460, %462 : vector<32x32xf32>
    %cst_113 = arith.constant dense<0.000000e+00> : vector<32x96xf32>
    %464 = tpu.matmul %463, %414, %cst_113 {dimension_numbers = #tpu.dot_dimension_numbers<[1], [0], [0], [1], [0, 0, 1, 1], [], []>} : vector<32x32xf32>, vector<32x96xf32>, vector<32x96xf32> -> vector<32x96xf32>
    %465 = vector.extract_strided_slice %464 {offsets = [16, 0], sizes = [16, 48], strides = [1, 1]} : vector<32x96xf32> to vector<16x48xf32>
    %466 = vector.shape_cast %465 : vector<16x48xf32> to vector<2x8x48xf32>
    %467 = vector.extract_strided_slice %464 {offsets = [0, 48], sizes = [16, 48], strides = [1, 1]} : vector<32x96xf32> to vector<16x48xf32>
    %468 = vector.shape_cast %467 : vector<16x48xf32> to vector<2x8x48xf32>
    %469 = vector.extract_strided_slice %466 {offsets = [0, 0, 0], sizes = [2, 8, 8], strides = [1, 1, 1]} : vector<2x8x48xf32> to vector<2x8x8xf32>
    %470 = vector.extract_strided_slice %466 {offsets = [0, 0, 8], sizes = [2, 8, 8], strides = [1, 1, 1]} : vector<2x8x48xf32> to vector<2x8x8xf32>
    %471 = vector.extract_strided_slice %466 {offsets = [0, 0, 16], sizes = [2, 8, 8], strides = [1, 1, 1]} : vector<2x8x48xf32> to vector<2x8x8xf32>
    %472 = vector.extract_strided_slice %466 {offsets = [0, 0, 24], sizes = [2, 8, 8], strides = [1, 1, 1]} : vector<2x8x48xf32> to vector<2x8x8xf32>
    %473 = vector.extract_strided_slice %466 {offsets = [0, 0, 32], sizes = [2, 8, 8], strides = [1, 1, 1]} : vector<2x8x48xf32> to vector<2x8x8xf32>
    %474 = vector.extract_strided_slice %466 {offsets = [0, 0, 40], sizes = [2, 8, 8], strides = [1, 1, 1]} : vector<2x8x48xf32> to vector<2x8x8xf32>
    %475 = tpu.concatenate %469, %470, %471, %472, %473, %474 in 1 : vector<2x8x8xf32>, vector<2x8x8xf32>, vector<2x8x8xf32>, vector<2x8x8xf32>, vector<2x8x8xf32>, vector<2x8x8xf32> -> vector<2x48x8xf32>
    %476 = vector.extract_strided_slice %468 {offsets = [0, 0, 0], sizes = [2, 8, 8], strides = [1, 1, 1]} : vector<2x8x48xf32> to vector<2x8x8xf32>
    %477 = vector.extract_strided_slice %468 {offsets = [0, 0, 8], sizes = [2, 8, 8], strides = [1, 1, 1]} : vector<2x8x48xf32> to vector<2x8x8xf32>
    %478 = vector.extract_strided_slice %468 {offsets = [0, 0, 16], sizes = [2, 8, 8], strides = [1, 1, 1]} : vector<2x8x48xf32> to vector<2x8x8xf32>
    %479 = vector.extract_strided_slice %468 {offsets = [0, 0, 24], sizes = [2, 8, 8], strides = [1, 1, 1]} : vector<2x8x48xf32> to vector<2x8x8xf32>
    %480 = vector.extract_strided_slice %468 {offsets = [0, 0, 32], sizes = [2, 8, 8], strides = [1, 1, 1]} : vector<2x8x48xf32> to vector<2x8x8xf32>
    %481 = vector.extract_strided_slice %468 {offsets = [0, 0, 40], sizes = [2, 8, 8], strides = [1, 1, 1]} : vector<2x8x48xf32> to vector<2x8x8xf32>
    %482 = tpu.concatenate %476, %477, %478, %479, %480, %481 in 1 : vector<2x8x8xf32>, vector<2x8x8xf32>, vector<2x8x8xf32>, vector<2x8x8xf32>, vector<2x8x8xf32>, vector<2x8x8xf32> -> vector<2x48x8xf32>
    "tpu.trace_start"() <{level = 10 : i32, message = "bqd,bkd->bqk"}> : () -> ()
    %cst_114 = arith.constant dense<0.000000e+00> : vector<2x48x48xf32>
    %483 = tpu.matmul %475, %475, %cst_114 {dimension_numbers = #tpu.dot_dimension_numbers<[2], [2], [1], [1], [0, 0, 0, 1, 1, 1], [0], [0]>} : vector<2x48x8xf32>, vector<2x48x8xf32>, vector<2x48x48xf32> -> vector<2x48x48xf32>
    "tpu.trace_stop"() : () -> ()
    %cst_115 = arith.constant 0.44721359 : f32
    %484 = vector.broadcast %cst_115 : f32 to vector<2x48x48xf32>
    %485 = arith.mulf %483, %484 : vector<2x48x48xf32>
    %486 = vector.broadcast %99 : vector<1x48x48xf32> to vector<2x48x48xf32>
    %487 = arith.addf %485, %486 : vector<2x48x48xf32>
    %cst_116 = arith.constant dense<0xFF800000> : vector<2x48xf32>
    %488 = vector.multi_reduction <maximumf>, %487, %cst_116 [2] : vector<2x48x48xf32> to vector<2x48xf32>
    %489 = vector.shape_cast %488 : vector<2x48xf32> to vector<2x48x1xf32>
    %490 = vector.broadcast %489 : vector<2x48x1xf32> to vector<2x48x48xf32>
    %491 = arith.subf %487, %490 : vector<2x48x48xf32>
    %492 = math.exp %491 : vector<2x48x48xf32>
    %cst_117 = arith.constant dense<0.000000e+00> : vector<2x48xf32>
    %493 = vector.multi_reduction <add>, %492, %cst_117 [2] : vector<2x48x48xf32> to vector<2x48xf32>
    %494 = vector.shape_cast %493 : vector<2x48xf32> to vector<2x48x1xf32>
    %495 = vector.broadcast %494 : vector<2x48x1xf32> to vector<2x48x48xf32>
    %496 = arith.divf %492, %495 : vector<2x48x48xf32>
    "tpu.trace_start"() <{level = 10 : i32, message = "bqk,bkd->bqd"}> : () -> ()
    %cst_118 = arith.constant dense<0.000000e+00> : vector<2x48x8xf32>
    %497 = tpu.matmul %496, %482, %cst_118 {dimension_numbers = #tpu.dot_dimension_numbers<[2], [1], [1], [2], [0, 0, 0, 1, 1, 2], [0], [0]>} : vector<2x48x48xf32>, vector<2x48x8xf32>, vector<2x48x8xf32> -> vector<2x48x8xf32>
    "tpu.trace_stop"() : () -> ()
    %498 = vector.extract_strided_slice %497 {offsets = [0, 0, 0], sizes = [2, 8, 8], strides = [1, 1, 1]} : vector<2x48x8xf32> to vector<2x8x8xf32>
    %499 = vector.shape_cast %498 : vector<2x8x8xf32> to vector<16x8xf32>
    %500 = vector.extract_strided_slice %419 {offsets = [0, 0], sizes = [8, 32], strides = [1, 1]} : vector<48x32xf32> to vector<8x32xf32>
    %cst_119 = arith.constant dense<0.000000e+00> : vector<16x32xf32>
    %501 = tpu.matmul %499, %500, %cst_119 {dimension_numbers = #tpu.dot_dimension_numbers<[1], [0], [0], [1], [0, 0, 1, 1], [], []>} : vector<16x8xf32>, vector<8x32xf32>, vector<16x32xf32> -> vector<16x32xf32>
    %502 = vector.extract_strided_slice %497 {offsets = [0, 8, 0], sizes = [2, 8, 8], strides = [1, 1, 1]} : vector<2x48x8xf32> to vector<2x8x8xf32>
    %503 = vector.shape_cast %502 : vector<2x8x8xf32> to vector<16x8xf32>
    %504 = vector.extract_strided_slice %419 {offsets = [8, 0], sizes = [8, 32], strides = [1, 1]} : vector<48x32xf32> to vector<8x32xf32>
    %cst_120 = arith.constant dense<0.000000e+00> : vector<16x32xf32>
    %505 = tpu.matmul %503, %504, %cst_120 {dimension_numbers = #tpu.dot_dimension_numbers<[1], [0], [0], [1], [0, 0, 1, 1], [], []>} : vector<16x8xf32>, vector<8x32xf32>, vector<16x32xf32> -> vector<16x32xf32>
    %506 = arith.addf %501, %505 : vector<16x32xf32>
    %507 = vector.extract_strided_slice %497 {offsets = [0, 16, 0], sizes = [2, 8, 8], strides = [1, 1, 1]} : vector<2x48x8xf32> to vector<2x8x8xf32>
    %508 = vector.shape_cast %507 : vector<2x8x8xf32> to vector<16x8xf32>
    %509 = vector.extract_strided_slice %419 {offsets = [16, 0], sizes = [8, 32], strides = [1, 1]} : vector<48x32xf32> to vector<8x32xf32>
    %cst_121 = arith.constant dense<0.000000e+00> : vector<16x32xf32>
    %510 = tpu.matmul %508, %509, %cst_121 {dimension_numbers = #tpu.dot_dimension_numbers<[1], [0], [0], [1], [0, 0, 1, 1], [], []>} : vector<16x8xf32>, vector<8x32xf32>, vector<16x32xf32> -> vector<16x32xf32>
    %511 = arith.addf %506, %510 : vector<16x32xf32>
    %512 = vector.extract_strided_slice %497 {offsets = [0, 24, 0], sizes = [2, 8, 8], strides = [1, 1, 1]} : vector<2x48x8xf32> to vector<2x8x8xf32>
    %513 = vector.shape_cast %512 : vector<2x8x8xf32> to vector<16x8xf32>
    %514 = vector.extract_strided_slice %419 {offsets = [24, 0], sizes = [8, 32], strides = [1, 1]} : vector<48x32xf32> to vector<8x32xf32>
    %cst_122 = arith.constant dense<0.000000e+00> : vector<16x32xf32>
    %515 = tpu.matmul %513, %514, %cst_122 {dimension_numbers = #tpu.dot_dimension_numbers<[1], [0], [0], [1], [0, 0, 1, 1], [], []>} : vector<16x8xf32>, vector<8x32xf32>, vector<16x32xf32> -> vector<16x32xf32>
    %516 = arith.addf %511, %515 : vector<16x32xf32>
    %517 = vector.extract_strided_slice %497 {offsets = [0, 32, 0], sizes = [2, 8, 8], strides = [1, 1, 1]} : vector<2x48x8xf32> to vector<2x8x8xf32>
    %518 = vector.shape_cast %517 : vector<2x8x8xf32> to vector<16x8xf32>
    %519 = vector.extract_strided_slice %419 {offsets = [32, 0], sizes = [8, 32], strides = [1, 1]} : vector<48x32xf32> to vector<8x32xf32>
    %cst_123 = arith.constant dense<0.000000e+00> : vector<16x32xf32>
    %520 = tpu.matmul %518, %519, %cst_123 {dimension_numbers = #tpu.dot_dimension_numbers<[1], [0], [0], [1], [0, 0, 1, 1], [], []>} : vector<16x8xf32>, vector<8x32xf32>, vector<16x32xf32> -> vector<16x32xf32>
    %521 = arith.addf %516, %520 : vector<16x32xf32>
    %522 = vector.extract_strided_slice %497 {offsets = [0, 40, 0], sizes = [2, 8, 8], strides = [1, 1, 1]} : vector<2x48x8xf32> to vector<2x8x8xf32>
    %523 = vector.shape_cast %522 : vector<2x8x8xf32> to vector<16x8xf32>
    %524 = vector.extract_strided_slice %419 {offsets = [40, 0], sizes = [8, 32], strides = [1, 1]} : vector<48x32xf32> to vector<8x32xf32>
    %cst_124 = arith.constant dense<0.000000e+00> : vector<16x32xf32>
    %525 = tpu.matmul %523, %524, %cst_124 {dimension_numbers = #tpu.dot_dimension_numbers<[1], [0], [0], [1], [0, 0, 1, 1], [], []>} : vector<16x8xf32>, vector<8x32xf32>, vector<16x32xf32> -> vector<16x32xf32>
    %526 = arith.addf %521, %525 : vector<16x32xf32>
    %527 = vector.shape_cast %432 : vector<32xf32> to vector<1x32xf32>
    %528 = vector.broadcast %527 : vector<1x32xf32> to vector<16x32xf32>
    %529 = arith.addf %526, %528 : vector<16x32xf32>
    %530 = vector.shape_cast %529 : vector<16x32xf32> to vector<2x8x32xf32>
    %531 = arith.addf %256, %530 : vector<2x8x32xf32>
    %532 = vector.shape_cast %531 : vector<2x8x32xf32> to vector<16x32xf32>
    %cst_125 = arith.constant dense<0.000000e+00> : vector<16xf32>
    %533 = vector.multi_reduction <add>, %532, %cst_125 [1] : vector<16x32xf32> to vector<16xf32>
    %534 = vector.shape_cast %533 : vector<16xf32> to vector<16x1xf32>
    %cst_126 = arith.constant 3.200000e+01 : f32
    %535 = vector.broadcast %cst_126 : f32 to vector<16x1xf32>
    %536 = arith.divf %534, %535 : vector<16x1xf32>
    %537 = vector.broadcast %536 : vector<16x1xf32> to vector<16x32xf32>
    %538 = arith.subf %532, %537 : vector<16x32xf32>
    %539 = arith.mulf %538, %538 : vector<16x32xf32>
    %cst_127 = arith.constant dense<0.000000e+00> : vector<16xf32>
    %540 = vector.multi_reduction <add>, %539, %cst_127 [1] : vector<16x32xf32> to vector<16xf32>
    %541 = vector.shape_cast %540 : vector<16xf32> to vector<16x1xf32>
    %cst_128 = arith.constant 3.200000e+01 : f32
    %542 = vector.broadcast %cst_128 : f32 to vector<16x1xf32>
    %543 = arith.divf %541, %542 : vector<16x1xf32>
    %544 = vector.broadcast %536 : vector<16x1xf32> to vector<16x32xf32>
    %545 = arith.subf %532, %544 : vector<16x32xf32>
    %cst_129 = arith.constant 9.99999974E-6 : f32
    %546 = vector.broadcast %cst_129 : f32 to vector<16x1xf32>
    %547 = arith.addf %543, %546 : vector<16x1xf32>
    %548 = math.rsqrt %547 : vector<16x1xf32>
    %549 = vector.broadcast %548 : vector<16x1xf32> to vector<16x32xf32>
    %550 = arith.mulf %545, %549 : vector<16x32xf32>
    %551 = vector.shape_cast %428 : vector<32xf32> to vector<1x32xf32>
    %552 = vector.broadcast %551 : vector<1x32xf32> to vector<16x32xf32>
    %553 = arith.mulf %550, %552 : vector<16x32xf32>
    %554 = vector.shape_cast %430 : vector<32xf32> to vector<1x32xf32>
    %555 = vector.broadcast %554 : vector<1x32xf32> to vector<16x32xf32>
    %556 = arith.addf %553, %555 : vector<16x32xf32>
    %cst_130 = arith.constant dense<0.000000e+00> : vector<16x128xf32>
    %557 = tpu.matmul %556, %416, %cst_130 {dimension_numbers = #tpu.dot_dimension_numbers<[1], [0], [0], [1], [0, 0, 1, 1], [], []>} : vector<16x32xf32>, vector<32x128xf32>, vector<16x128xf32> -> vector<16x128xf32>
    %558 = vector.shape_cast %436 : vector<128xf32> to vector<1x128xf32>
    %559 = vector.broadcast %558 : vector<1x128xf32> to vector<16x128xf32>
    %560 = arith.addf %557, %559 : vector<16x128xf32>
    %cst_131 = arith.constant 0.000000e+00 : f32
    %561 = vector.broadcast %cst_131 : f32 to vector<16x128xf32>
    %562 = arith.maximumf %560, %561 : vector<16x128xf32>
    %cst_132 = arith.constant dense<0.000000e+00> : vector<16x32xf32>
    %563 = tpu.matmul %562, %420, %cst_132 {dimension_numbers = #tpu.dot_dimension_numbers<[1], [0], [0], [1], [0, 0, 1, 1], [], []>} : vector<16x128xf32>, vector<128x32xf32>, vector<16x32xf32> -> vector<16x32xf32>
    %564 = vector.shape_cast %434 : vector<32xf32> to vector<1x32xf32>
    %565 = vector.broadcast %564 : vector<1x32xf32> to vector<16x32xf32>
    %566 = arith.addf %563, %565 : vector<16x32xf32>
    %567 = vector.shape_cast %566 : vector<16x32xf32> to vector<2x8x32xf32>
    %568 = arith.addf %531, %567 : vector<2x8x32xf32>
    %c3 = arith.constant 3 : index
    %c0_133 = arith.constant 0 : index
    %c0_134 = arith.constant 0 : index
    %569 = vector.load %arg4[%c3, %c0_133, %c0_134] : memref<6x32x96xf32, #tpu.memory_space<vmem>>, vector<1x32x96xf32>
    %570 = vector.shape_cast %569 : vector<1x32x96xf32> to vector<32x96xf32>
    %c3_135 = arith.constant 3 : index
    %c0_136 = arith.constant 0 : index
    %c0_137 = arith.constant 0 : index
    %571 = vector.load %arg5[%c3_135, %c0_136, %c0_137] : memref<6x32x128xf32, #tpu.memory_space<vmem>>, vector<1x32x128xf32>
    %572 = vector.shape_cast %571 : vector<1x32x128xf32> to vector<32x128xf32>
    %c3_138 = arith.constant 3 : index
    %c0_139 = arith.constant 0 : index
    %c0_140 = arith.constant 0 : index
    %573 = vector.load %arg6[%c3_138, %c0_139, %c0_140] : memref<6x176x32xf32, #tpu.memory_space<vmem>>, vector<1x176x32xf32>
    %574 = vector.shape_cast %573 : vector<1x176x32xf32> to vector<176x32xf32>
    %575 = vector.extract_strided_slice %574 {offsets = [0, 0], sizes = [48, 32], strides = [1, 1]} : vector<176x32xf32> to vector<48x32xf32>
    %576 = vector.extract_strided_slice %574 {offsets = [48, 0], sizes = [128, 32], strides = [1, 1]} : vector<176x32xf32> to vector<128x32xf32>
    %c3_141 = arith.constant 3 : index
    %c0_142 = arith.constant 0 : index
    %c0_143 = arith.constant 0 : index
    %577 = vector.load %arg7[%c3_141, %c0_142, %c0_143] : memref<6x3x128xf32, #tpu.memory_space<vmem>>, vector<1x3x128xf32>
    %578 = vector.shape_cast %577 : vector<1x3x128xf32> to vector<3x128xf32>
    %579 = vector.extract_strided_slice %578 {offsets = [0, 0], sizes = [1, 32], strides = [1, 1]} : vector<3x128xf32> to vector<1x32xf32>
    %580 = vector.shape_cast %579 : vector<1x32xf32> to vector<32xf32>
    %581 = vector.extract_strided_slice %578 {offsets = [0, 32], sizes = [1, 32], strides = [1, 1]} : vector<3x128xf32> to vector<1x32xf32>
    %582 = vector.shape_cast %581 : vector<1x32xf32> to vector<32xf32>
    %583 = vector.extract_strided_slice %578 {offsets = [0, 64], sizes = [1, 32], strides = [1, 1]} : vector<3x128xf32> to vector<1x32xf32>
    %584 = vector.shape_cast %583 : vector<1x32xf32> to vector<32xf32>
    %585 = vector.extract_strided_slice %578 {offsets = [0, 96], sizes = [1, 32], strides = [1, 1]} : vector<3x128xf32> to vector<1x32xf32>
    %586 = vector.shape_cast %585 : vector<1x32xf32> to vector<32xf32>
    %587 = vector.extract_strided_slice %578 {offsets = [1, 0], sizes = [1, 32], strides = [1, 1]} : vector<3x128xf32> to vector<1x32xf32>
    %588 = vector.shape_cast %587 : vector<1x32xf32> to vector<32xf32>
    %589 = vector.extract_strided_slice %578 {offsets = [1, 32], sizes = [1, 32], strides = [1, 1]} : vector<3x128xf32> to vector<1x32xf32>
    %590 = vector.shape_cast %589 : vector<1x32xf32> to vector<32xf32>
    %591 = vector.extract_strided_slice %578 {offsets = [2, 0], sizes = [1, 128], strides = [1, 1]} : vector<3x128xf32> to vector<1x128xf32>
    %592 = vector.shape_cast %591 : vector<1x128xf32> to vector<128xf32>
    %593 = vector.shape_cast %568 : vector<2x8x32xf32> to vector<16x32xf32>
    %594 = vector.shape_cast %412 : vector<2x8x32xf32> to vector<16x32xf32>
    %595 = tpu.concatenate %593, %594 in 0 : vector<16x32xf32>, vector<16x32xf32> -> vector<32x32xf32>
    %cst_144 = arith.constant dense<0.000000e+00> : vector<32xf32>
    %596 = vector.multi_reduction <add>, %595, %cst_144 [1] : vector<32x32xf32> to vector<32xf32>
    %597 = vector.shape_cast %596 : vector<32xf32> to vector<32x1xf32>
    %cst_145 = arith.constant 3.200000e+01 : f32
    %598 = vector.broadcast %cst_145 : f32 to vector<32x1xf32>
    %599 = arith.divf %597, %598 : vector<32x1xf32>
    %600 = vector.broadcast %599 : vector<32x1xf32> to vector<32x32xf32>
    %601 = arith.subf %595, %600 : vector<32x32xf32>
    %602 = arith.mulf %601, %601 : vector<32x32xf32>
    %cst_146 = arith.constant dense<0.000000e+00> : vector<32xf32>
    %603 = vector.multi_reduction <add>, %602, %cst_146 [1] : vector<32x32xf32> to vector<32xf32>
    %604 = vector.shape_cast %603 : vector<32xf32> to vector<32x1xf32>
    %cst_147 = arith.constant 3.200000e+01 : f32
    %605 = vector.broadcast %cst_147 : f32 to vector<32x1xf32>
    %606 = arith.divf %604, %605 : vector<32x1xf32>
    %607 = vector.broadcast %599 : vector<32x1xf32> to vector<32x32xf32>
    %608 = arith.subf %595, %607 : vector<32x32xf32>
    %cst_148 = arith.constant 9.99999974E-6 : f32
    %609 = vector.broadcast %cst_148 : f32 to vector<32x1xf32>
    %610 = arith.addf %606, %609 : vector<32x1xf32>
    %611 = math.rsqrt %610 : vector<32x1xf32>
    %612 = vector.broadcast %611 : vector<32x1xf32> to vector<32x32xf32>
    %613 = arith.mulf %608, %612 : vector<32x32xf32>
    %614 = vector.shape_cast %580 : vector<32xf32> to vector<1x32xf32>
    %615 = vector.broadcast %614 : vector<1x32xf32> to vector<32x32xf32>
    %616 = arith.mulf %613, %615 : vector<32x32xf32>
    %617 = vector.shape_cast %582 : vector<32xf32> to vector<1x32xf32>
    %618 = vector.broadcast %617 : vector<1x32xf32> to vector<32x32xf32>
    %619 = arith.addf %616, %618 : vector<32x32xf32>
    %cst_149 = arith.constant dense<0.000000e+00> : vector<32x96xf32>
    %620 = tpu.matmul %619, %570, %cst_149 {dimension_numbers = #tpu.dot_dimension_numbers<[1], [0], [0], [1], [0, 0, 1, 1], [], []>} : vector<32x32xf32>, vector<32x96xf32>, vector<32x96xf32> -> vector<32x96xf32>
    %621 = vector.extract_strided_slice %620 {offsets = [16, 0], sizes = [16, 48], strides = [1, 1]} : vector<32x96xf32> to vector<16x48xf32>
    %622 = vector.shape_cast %621 : vector<16x48xf32> to vector<2x8x48xf32>
    %623 = vector.extract_strided_slice %620 {offsets = [0, 48], sizes = [16, 48], strides = [1, 1]} : vector<32x96xf32> to vector<16x48xf32>
    %624 = vector.shape_cast %623 : vector<16x48xf32> to vector<2x8x48xf32>
    %625 = vector.extract_strided_slice %622 {offsets = [0, 0, 0], sizes = [2, 8, 8], strides = [1, 1, 1]} : vector<2x8x48xf32> to vector<2x8x8xf32>
    %626 = vector.extract_strided_slice %622 {offsets = [0, 0, 8], sizes = [2, 8, 8], strides = [1, 1, 1]} : vector<2x8x48xf32> to vector<2x8x8xf32>
    %627 = vector.extract_strided_slice %622 {offsets = [0, 0, 16], sizes = [2, 8, 8], strides = [1, 1, 1]} : vector<2x8x48xf32> to vector<2x8x8xf32>
    %628 = vector.extract_strided_slice %622 {offsets = [0, 0, 24], sizes = [2, 8, 8], strides = [1, 1, 1]} : vector<2x8x48xf32> to vector<2x8x8xf32>
    %629 = vector.extract_strided_slice %622 {offsets = [0, 0, 32], sizes = [2, 8, 8], strides = [1, 1, 1]} : vector<2x8x48xf32> to vector<2x8x8xf32>
    %630 = vector.extract_strided_slice %622 {offsets = [0, 0, 40], sizes = [2, 8, 8], strides = [1, 1, 1]} : vector<2x8x48xf32> to vector<2x8x8xf32>
    %631 = tpu.concatenate %625, %626, %627, %628, %629, %630 in 1 : vector<2x8x8xf32>, vector<2x8x8xf32>, vector<2x8x8xf32>, vector<2x8x8xf32>, vector<2x8x8xf32>, vector<2x8x8xf32> -> vector<2x48x8xf32>
    %632 = vector.extract_strided_slice %624 {offsets = [0, 0, 0], sizes = [2, 8, 8], strides = [1, 1, 1]} : vector<2x8x48xf32> to vector<2x8x8xf32>
    %633 = vector.extract_strided_slice %624 {offsets = [0, 0, 8], sizes = [2, 8, 8], strides = [1, 1, 1]} : vector<2x8x48xf32> to vector<2x8x8xf32>
    %634 = vector.extract_strided_slice %624 {offsets = [0, 0, 16], sizes = [2, 8, 8], strides = [1, 1, 1]} : vector<2x8x48xf32> to vector<2x8x8xf32>
    %635 = vector.extract_strided_slice %624 {offsets = [0, 0, 24], sizes = [2, 8, 8], strides = [1, 1, 1]} : vector<2x8x48xf32> to vector<2x8x8xf32>
    %636 = vector.extract_strided_slice %624 {offsets = [0, 0, 32], sizes = [2, 8, 8], strides = [1, 1, 1]} : vector<2x8x48xf32> to vector<2x8x8xf32>
    %637 = vector.extract_strided_slice %624 {offsets = [0, 0, 40], sizes = [2, 8, 8], strides = [1, 1, 1]} : vector<2x8x48xf32> to vector<2x8x8xf32>
    %638 = tpu.concatenate %632, %633, %634, %635, %636, %637 in 1 : vector<2x8x8xf32>, vector<2x8x8xf32>, vector<2x8x8xf32>, vector<2x8x8xf32>, vector<2x8x8xf32>, vector<2x8x8xf32> -> vector<2x48x8xf32>
    "tpu.trace_start"() <{level = 10 : i32, message = "bqd,bkd->bqk"}> : () -> ()
    %cst_150 = arith.constant dense<0.000000e+00> : vector<2x48x48xf32>
    %639 = tpu.matmul %631, %631, %cst_150 {dimension_numbers = #tpu.dot_dimension_numbers<[2], [2], [1], [1], [0, 0, 0, 1, 1, 1], [0], [0]>} : vector<2x48x8xf32>, vector<2x48x8xf32>, vector<2x48x48xf32> -> vector<2x48x48xf32>
    "tpu.trace_stop"() : () -> ()
    %cst_151 = arith.constant 0.44721359 : f32
    %640 = vector.broadcast %cst_151 : f32 to vector<2x48x48xf32>
    %641 = arith.mulf %639, %640 : vector<2x48x48xf32>
    %642 = vector.broadcast %99 : vector<1x48x48xf32> to vector<2x48x48xf32>
    %643 = arith.addf %641, %642 : vector<2x48x48xf32>
    %cst_152 = arith.constant dense<0xFF800000> : vector<2x48xf32>
    %644 = vector.multi_reduction <maximumf>, %643, %cst_152 [2] : vector<2x48x48xf32> to vector<2x48xf32>
    %645 = vector.shape_cast %644 : vector<2x48xf32> to vector<2x48x1xf32>
    %646 = vector.broadcast %645 : vector<2x48x1xf32> to vector<2x48x48xf32>
    %647 = arith.subf %643, %646 : vector<2x48x48xf32>
    %648 = math.exp %647 : vector<2x48x48xf32>
    %cst_153 = arith.constant dense<0.000000e+00> : vector<2x48xf32>
    %649 = vector.multi_reduction <add>, %648, %cst_153 [2] : vector<2x48x48xf32> to vector<2x48xf32>
    %650 = vector.shape_cast %649 : vector<2x48xf32> to vector<2x48x1xf32>
    %651 = vector.broadcast %650 : vector<2x48x1xf32> to vector<2x48x48xf32>
    %652 = arith.divf %648, %651 : vector<2x48x48xf32>
    "tpu.trace_start"() <{level = 10 : i32, message = "bqk,bkd->bqd"}> : () -> ()
    %cst_154 = arith.constant dense<0.000000e+00> : vector<2x48x8xf32>
    %653 = tpu.matmul %652, %638, %cst_154 {dimension_numbers = #tpu.dot_dimension_numbers<[2], [1], [1], [2], [0, 0, 0, 1, 1, 2], [0], [0]>} : vector<2x48x48xf32>, vector<2x48x8xf32>, vector<2x48x8xf32> -> vector<2x48x8xf32>
    "tpu.trace_stop"() : () -> ()
    %654 = vector.extract_strided_slice %653 {offsets = [0, 0, 0], sizes = [2, 8, 8], strides = [1, 1, 1]} : vector<2x48x8xf32> to vector<2x8x8xf32>
    %655 = vector.shape_cast %654 : vector<2x8x8xf32> to vector<16x8xf32>
    %656 = vector.extract_strided_slice %575 {offsets = [0, 0], sizes = [8, 32], strides = [1, 1]} : vector<48x32xf32> to vector<8x32xf32>
    %cst_155 = arith.constant dense<0.000000e+00> : vector<16x32xf32>
    %657 = tpu.matmul %655, %656, %cst_155 {dimension_numbers = #tpu.dot_dimension_numbers<[1], [0], [0], [1], [0, 0, 1, 1], [], []>} : vector<16x8xf32>, vector<8x32xf32>, vector<16x32xf32> -> vector<16x32xf32>
    %658 = vector.extract_strided_slice %653 {offsets = [0, 8, 0], sizes = [2, 8, 8], strides = [1, 1, 1]} : vector<2x48x8xf32> to vector<2x8x8xf32>
    %659 = vector.shape_cast %658 : vector<2x8x8xf32> to vector<16x8xf32>
    %660 = vector.extract_strided_slice %575 {offsets = [8, 0], sizes = [8, 32], strides = [1, 1]} : vector<48x32xf32> to vector<8x32xf32>
    %cst_156 = arith.constant dense<0.000000e+00> : vector<16x32xf32>
    %661 = tpu.matmul %659, %660, %cst_156 {dimension_numbers = #tpu.dot_dimension_numbers<[1], [0], [0], [1], [0, 0, 1, 1], [], []>} : vector<16x8xf32>, vector<8x32xf32>, vector<16x32xf32> -> vector<16x32xf32>
    %662 = arith.addf %657, %661 : vector<16x32xf32>
    %663 = vector.extract_strided_slice %653 {offsets = [0, 16, 0], sizes = [2, 8, 8], strides = [1, 1, 1]} : vector<2x48x8xf32> to vector<2x8x8xf32>
    %664 = vector.shape_cast %663 : vector<2x8x8xf32> to vector<16x8xf32>
    %665 = vector.extract_strided_slice %575 {offsets = [16, 0], sizes = [8, 32], strides = [1, 1]} : vector<48x32xf32> to vector<8x32xf32>
    %cst_157 = arith.constant dense<0.000000e+00> : vector<16x32xf32>
    %666 = tpu.matmul %664, %665, %cst_157 {dimension_numbers = #tpu.dot_dimension_numbers<[1], [0], [0], [1], [0, 0, 1, 1], [], []>} : vector<16x8xf32>, vector<8x32xf32>, vector<16x32xf32> -> vector<16x32xf32>
    %667 = arith.addf %662, %666 : vector<16x32xf32>
    %668 = vector.extract_strided_slice %653 {offsets = [0, 24, 0], sizes = [2, 8, 8], strides = [1, 1, 1]} : vector<2x48x8xf32> to vector<2x8x8xf32>
    %669 = vector.shape_cast %668 : vector<2x8x8xf32> to vector<16x8xf32>
    %670 = vector.extract_strided_slice %575 {offsets = [24, 0], sizes = [8, 32], strides = [1, 1]} : vector<48x32xf32> to vector<8x32xf32>
    %cst_158 = arith.constant dense<0.000000e+00> : vector<16x32xf32>
    %671 = tpu.matmul %669, %670, %cst_158 {dimension_numbers = #tpu.dot_dimension_numbers<[1], [0], [0], [1], [0, 0, 1, 1], [], []>} : vector<16x8xf32>, vector<8x32xf32>, vector<16x32xf32> -> vector<16x32xf32>
    %672 = arith.addf %667, %671 : vector<16x32xf32>
    %673 = vector.extract_strided_slice %653 {offsets = [0, 32, 0], sizes = [2, 8, 8], strides = [1, 1, 1]} : vector<2x48x8xf32> to vector<2x8x8xf32>
    %674 = vector.shape_cast %673 : vector<2x8x8xf32> to vector<16x8xf32>
    %675 = vector.extract_strided_slice %575 {offsets = [32, 0], sizes = [8, 32], strides = [1, 1]} : vector<48x32xf32> to vector<8x32xf32>
    %cst_159 = arith.constant dense<0.000000e+00> : vector<16x32xf32>
    %676 = tpu.matmul %674, %675, %cst_159 {dimension_numbers = #tpu.dot_dimension_numbers<[1], [0], [0], [1], [0, 0, 1, 1], [], []>} : vector<16x8xf32>, vector<8x32xf32>, vector<16x32xf32> -> vector<16x32xf32>
    %677 = arith.addf %672, %676 : vector<16x32xf32>
    %678 = vector.extract_strided_slice %653 {offsets = [0, 40, 0], sizes = [2, 8, 8], strides = [1, 1, 1]} : vector<2x48x8xf32> to vector<2x8x8xf32>
    %679 = vector.shape_cast %678 : vector<2x8x8xf32> to vector<16x8xf32>
    %680 = vector.extract_strided_slice %575 {offsets = [40, 0], sizes = [8, 32], strides = [1, 1]} : vector<48x32xf32> to vector<8x32xf32>
    %cst_160 = arith.constant dense<0.000000e+00> : vector<16x32xf32>
    %681 = tpu.matmul %679, %680, %cst_160 {dimension_numbers = #tpu.dot_dimension_numbers<[1], [0], [0], [1], [0, 0, 1, 1], [], []>} : vector<16x8xf32>, vector<8x32xf32>, vector<16x32xf32> -> vector<16x32xf32>
    %682 = arith.addf %677, %681 : vector<16x32xf32>
    %683 = vector.shape_cast %588 : vector<32xf32> to vector<1x32xf32>
    %684 = vector.broadcast %683 : vector<1x32xf32> to vector<16x32xf32>
    %685 = arith.addf %682, %684 : vector<16x32xf32>
    %686 = vector.shape_cast %685 : vector<16x32xf32> to vector<2x8x32xf32>
    %687 = arith.addf %412, %686 : vector<2x8x32xf32>
    %688 = vector.shape_cast %687 : vector<2x8x32xf32> to vector<16x32xf32>
    %cst_161 = arith.constant dense<0.000000e+00> : vector<16xf32>
    %689 = vector.multi_reduction <add>, %688, %cst_161 [1] : vector<16x32xf32> to vector<16xf32>
    %690 = vector.shape_cast %689 : vector<16xf32> to vector<16x1xf32>
    %cst_162 = arith.constant 3.200000e+01 : f32
    %691 = vector.broadcast %cst_162 : f32 to vector<16x1xf32>
    %692 = arith.divf %690, %691 : vector<16x1xf32>
    %693 = vector.broadcast %692 : vector<16x1xf32> to vector<16x32xf32>
    %694 = arith.subf %688, %693 : vector<16x32xf32>
    %695 = arith.mulf %694, %694 : vector<16x32xf32>
    %cst_163 = arith.constant dense<0.000000e+00> : vector<16xf32>
    %696 = vector.multi_reduction <add>, %695, %cst_163 [1] : vector<16x32xf32> to vector<16xf32>
    %697 = vector.shape_cast %696 : vector<16xf32> to vector<16x1xf32>
    %cst_164 = arith.constant 3.200000e+01 : f32
    %698 = vector.broadcast %cst_164 : f32 to vector<16x1xf32>
    %699 = arith.divf %697, %698 : vector<16x1xf32>
    %700 = vector.broadcast %692 : vector<16x1xf32> to vector<16x32xf32>
    %701 = arith.subf %688, %700 : vector<16x32xf32>
    %cst_165 = arith.constant 9.99999974E-6 : f32
    %702 = vector.broadcast %cst_165 : f32 to vector<16x1xf32>
    %703 = arith.addf %699, %702 : vector<16x1xf32>
    %704 = math.rsqrt %703 : vector<16x1xf32>
    %705 = vector.broadcast %704 : vector<16x1xf32> to vector<16x32xf32>
    %706 = arith.mulf %701, %705 : vector<16x32xf32>
    %707 = vector.shape_cast %584 : vector<32xf32> to vector<1x32xf32>
    %708 = vector.broadcast %707 : vector<1x32xf32> to vector<16x32xf32>
    %709 = arith.mulf %706, %708 : vector<16x32xf32>
    %710 = vector.shape_cast %586 : vector<32xf32> to vector<1x32xf32>
    %711 = vector.broadcast %710 : vector<1x32xf32> to vector<16x32xf32>
    %712 = arith.addf %709, %711 : vector<16x32xf32>
    %cst_166 = arith.constant dense<0.000000e+00> : vector<16x128xf32>
    %713 = tpu.matmul %712, %572, %cst_166 {dimension_numbers = #tpu.dot_dimension_numbers<[1], [0], [0], [1], [0, 0, 1, 1], [], []>} : vector<16x32xf32>, vector<32x128xf32>, vector<16x128xf32> -> vector<16x128xf32>
    %714 = vector.shape_cast %592 : vector<128xf32> to vector<1x128xf32>
    %715 = vector.broadcast %714 : vector<1x128xf32> to vector<16x128xf32>
    %716 = arith.addf %713, %715 : vector<16x128xf32>
    %cst_167 = arith.constant 0.000000e+00 : f32
    %717 = vector.broadcast %cst_167 : f32 to vector<16x128xf32>
    %718 = arith.maximumf %716, %717 : vector<16x128xf32>
    %cst_168 = arith.constant dense<0.000000e+00> : vector<16x32xf32>
    %719 = tpu.matmul %718, %576, %cst_168 {dimension_numbers = #tpu.dot_dimension_numbers<[1], [0], [0], [1], [0, 0, 1, 1], [], []>} : vector<16x128xf32>, vector<128x32xf32>, vector<16x32xf32> -> vector<16x32xf32>
    %720 = vector.shape_cast %590 : vector<32xf32> to vector<1x32xf32>
    %721 = vector.broadcast %720 : vector<1x32xf32> to vector<16x32xf32>
    %722 = arith.addf %719, %721 : vector<16x32xf32>
    %723 = vector.shape_cast %722 : vector<16x32xf32> to vector<2x8x32xf32>
    %724 = arith.addf %687, %723 : vector<2x8x32xf32>
    %c4 = arith.constant 4 : index
    %c0_169 = arith.constant 0 : index
    %c0_170 = arith.constant 0 : index
    %725 = vector.load %arg4[%c4, %c0_169, %c0_170] : memref<6x32x96xf32, #tpu.memory_space<vmem>>, vector<1x32x96xf32>
    %726 = vector.shape_cast %725 : vector<1x32x96xf32> to vector<32x96xf32>
    %c4_171 = arith.constant 4 : index
    %c0_172 = arith.constant 0 : index
    %c0_173 = arith.constant 0 : index
    %727 = vector.load %arg5[%c4_171, %c0_172, %c0_173] : memref<6x32x128xf32, #tpu.memory_space<vmem>>, vector<1x32x128xf32>
    %728 = vector.shape_cast %727 : vector<1x32x128xf32> to vector<32x128xf32>
    %c4_174 = arith.constant 4 : index
    %c0_175 = arith.constant 0 : index
    %c0_176 = arith.constant 0 : index
    %729 = vector.load %arg6[%c4_174, %c0_175, %c0_176] : memref<6x176x32xf32, #tpu.memory_space<vmem>>, vector<1x176x32xf32>
    %730 = vector.shape_cast %729 : vector<1x176x32xf32> to vector<176x32xf32>
    %731 = vector.extract_strided_slice %730 {offsets = [0, 0], sizes = [48, 32], strides = [1, 1]} : vector<176x32xf32> to vector<48x32xf32>
    %732 = vector.extract_strided_slice %730 {offsets = [48, 0], sizes = [128, 32], strides = [1, 1]} : vector<176x32xf32> to vector<128x32xf32>
    %c4_177 = arith.constant 4 : index
    %c0_178 = arith.constant 0 : index
    %c0_179 = arith.constant 0 : index
    %733 = vector.load %arg7[%c4_177, %c0_178, %c0_179] : memref<6x3x128xf32, #tpu.memory_space<vmem>>, vector<1x3x128xf32>
    %734 = vector.shape_cast %733 : vector<1x3x128xf32> to vector<3x128xf32>
    %735 = vector.extract_strided_slice %734 {offsets = [0, 0], sizes = [1, 32], strides = [1, 1]} : vector<3x128xf32> to vector<1x32xf32>
    %736 = vector.shape_cast %735 : vector<1x32xf32> to vector<32xf32>
    %737 = vector.extract_strided_slice %734 {offsets = [0, 32], sizes = [1, 32], strides = [1, 1]} : vector<3x128xf32> to vector<1x32xf32>
    %738 = vector.shape_cast %737 : vector<1x32xf32> to vector<32xf32>
    %739 = vector.extract_strided_slice %734 {offsets = [0, 64], sizes = [1, 32], strides = [1, 1]} : vector<3x128xf32> to vector<1x32xf32>
    %740 = vector.shape_cast %739 : vector<1x32xf32> to vector<32xf32>
    %741 = vector.extract_strided_slice %734 {offsets = [0, 96], sizes = [1, 32], strides = [1, 1]} : vector<3x128xf32> to vector<1x32xf32>
    %742 = vector.shape_cast %741 : vector<1x32xf32> to vector<32xf32>
    %743 = vector.extract_strided_slice %734 {offsets = [1, 0], sizes = [1, 32], strides = [1, 1]} : vector<3x128xf32> to vector<1x32xf32>
    %744 = vector.shape_cast %743 : vector<1x32xf32> to vector<32xf32>
    %745 = vector.extract_strided_slice %734 {offsets = [1, 32], sizes = [1, 32], strides = [1, 1]} : vector<3x128xf32> to vector<1x32xf32>
    %746 = vector.shape_cast %745 : vector<1x32xf32> to vector<32xf32>
    %747 = vector.extract_strided_slice %734 {offsets = [2, 0], sizes = [1, 128], strides = [1, 1]} : vector<3x128xf32> to vector<1x128xf32>
    %748 = vector.shape_cast %747 : vector<1x128xf32> to vector<128xf32>
    %749 = vector.shape_cast %724 : vector<2x8x32xf32> to vector<16x32xf32>
    %750 = vector.shape_cast %568 : vector<2x8x32xf32> to vector<16x32xf32>
    %751 = tpu.concatenate %749, %750 in 0 : vector<16x32xf32>, vector<16x32xf32> -> vector<32x32xf32>
    %cst_180 = arith.constant dense<0.000000e+00> : vector<32xf32>
    %752 = vector.multi_reduction <add>, %751, %cst_180 [1] : vector<32x32xf32> to vector<32xf32>
    %753 = vector.shape_cast %752 : vector<32xf32> to vector<32x1xf32>
    %cst_181 = arith.constant 3.200000e+01 : f32
    %754 = vector.broadcast %cst_181 : f32 to vector<32x1xf32>
    %755 = arith.divf %753, %754 : vector<32x1xf32>
    %756 = vector.broadcast %755 : vector<32x1xf32> to vector<32x32xf32>
    %757 = arith.subf %751, %756 : vector<32x32xf32>
    %758 = arith.mulf %757, %757 : vector<32x32xf32>
    %cst_182 = arith.constant dense<0.000000e+00> : vector<32xf32>
    %759 = vector.multi_reduction <add>, %758, %cst_182 [1] : vector<32x32xf32> to vector<32xf32>
    %760 = vector.shape_cast %759 : vector<32xf32> to vector<32x1xf32>
    %cst_183 = arith.constant 3.200000e+01 : f32
    %761 = vector.broadcast %cst_183 : f32 to vector<32x1xf32>
    %762 = arith.divf %760, %761 : vector<32x1xf32>
    %763 = vector.broadcast %755 : vector<32x1xf32> to vector<32x32xf32>
    %764 = arith.subf %751, %763 : vector<32x32xf32>
    %cst_184 = arith.constant 9.99999974E-6 : f32
    %765 = vector.broadcast %cst_184 : f32 to vector<32x1xf32>
    %766 = arith.addf %762, %765 : vector<32x1xf32>
    %767 = math.rsqrt %766 : vector<32x1xf32>
    %768 = vector.broadcast %767 : vector<32x1xf32> to vector<32x32xf32>
    %769 = arith.mulf %764, %768 : vector<32x32xf32>
    %770 = vector.shape_cast %736 : vector<32xf32> to vector<1x32xf32>
    %771 = vector.broadcast %770 : vector<1x32xf32> to vector<32x32xf32>
    %772 = arith.mulf %769, %771 : vector<32x32xf32>
    %773 = vector.shape_cast %738 : vector<32xf32> to vector<1x32xf32>
    %774 = vector.broadcast %773 : vector<1x32xf32> to vector<32x32xf32>
    %775 = arith.addf %772, %774 : vector<32x32xf32>
    %cst_185 = arith.constant dense<0.000000e+00> : vector<32x96xf32>
    %776 = tpu.matmul %775, %726, %cst_185 {dimension_numbers = #tpu.dot_dimension_numbers<[1], [0], [0], [1], [0, 0, 1, 1], [], []>} : vector<32x32xf32>, vector<32x96xf32>, vector<32x96xf32> -> vector<32x96xf32>
    %777 = vector.extract_strided_slice %776 {offsets = [16, 0], sizes = [16, 48], strides = [1, 1]} : vector<32x96xf32> to vector<16x48xf32>
    %778 = vector.shape_cast %777 : vector<16x48xf32> to vector<2x8x48xf32>
    %779 = vector.extract_strided_slice %776 {offsets = [0, 48], sizes = [16, 48], strides = [1, 1]} : vector<32x96xf32> to vector<16x48xf32>
    %780 = vector.shape_cast %779 : vector<16x48xf32> to vector<2x8x48xf32>
    %781 = vector.extract_strided_slice %778 {offsets = [0, 0, 0], sizes = [2, 8, 8], strides = [1, 1, 1]} : vector<2x8x48xf32> to vector<2x8x8xf32>
    %782 = vector.extract_strided_slice %778 {offsets = [0, 0, 8], sizes = [2, 8, 8], strides = [1, 1, 1]} : vector<2x8x48xf32> to vector<2x8x8xf32>
    %783 = vector.extract_strided_slice %778 {offsets = [0, 0, 16], sizes = [2, 8, 8], strides = [1, 1, 1]} : vector<2x8x48xf32> to vector<2x8x8xf32>
    %784 = vector.extract_strided_slice %778 {offsets = [0, 0, 24], sizes = [2, 8, 8], strides = [1, 1, 1]} : vector<2x8x48xf32> to vector<2x8x8xf32>
    %785 = vector.extract_strided_slice %778 {offsets = [0, 0, 32], sizes = [2, 8, 8], strides = [1, 1, 1]} : vector<2x8x48xf32> to vector<2x8x8xf32>
    %786 = vector.extract_strided_slice %778 {offsets = [0, 0, 40], sizes = [2, 8, 8], strides = [1, 1, 1]} : vector<2x8x48xf32> to vector<2x8x8xf32>
    %787 = tpu.concatenate %781, %782, %783, %784, %785, %786 in 1 : vector<2x8x8xf32>, vector<2x8x8xf32>, vector<2x8x8xf32>, vector<2x8x8xf32>, vector<2x8x8xf32>, vector<2x8x8xf32> -> vector<2x48x8xf32>
    %788 = vector.extract_strided_slice %780 {offsets = [0, 0, 0], sizes = [2, 8, 8], strides = [1, 1, 1]} : vector<2x8x48xf32> to vector<2x8x8xf32>
    %789 = vector.extract_strided_slice %780 {offsets = [0, 0, 8], sizes = [2, 8, 8], strides = [1, 1, 1]} : vector<2x8x48xf32> to vector<2x8x8xf32>
    %790 = vector.extract_strided_slice %780 {offsets = [0, 0, 16], sizes = [2, 8, 8], strides = [1, 1, 1]} : vector<2x8x48xf32> to vector<2x8x8xf32>
    %791 = vector.extract_strided_slice %780 {offsets = [0, 0, 24], sizes = [2, 8, 8], strides = [1, 1, 1]} : vector<2x8x48xf32> to vector<2x8x8xf32>
    %792 = vector.extract_strided_slice %780 {offsets = [0, 0, 32], sizes = [2, 8, 8], strides = [1, 1, 1]} : vector<2x8x48xf32> to vector<2x8x8xf32>
    %793 = vector.extract_strided_slice %780 {offsets = [0, 0, 40], sizes = [2, 8, 8], strides = [1, 1, 1]} : vector<2x8x48xf32> to vector<2x8x8xf32>
    %794 = tpu.concatenate %788, %789, %790, %791, %792, %793 in 1 : vector<2x8x8xf32>, vector<2x8x8xf32>, vector<2x8x8xf32>, vector<2x8x8xf32>, vector<2x8x8xf32>, vector<2x8x8xf32> -> vector<2x48x8xf32>
    "tpu.trace_start"() <{level = 10 : i32, message = "bqd,bkd->bqk"}> : () -> ()
    %cst_186 = arith.constant dense<0.000000e+00> : vector<2x48x48xf32>
    %795 = tpu.matmul %787, %787, %cst_186 {dimension_numbers = #tpu.dot_dimension_numbers<[2], [2], [1], [1], [0, 0, 0, 1, 1, 1], [0], [0]>} : vector<2x48x8xf32>, vector<2x48x8xf32>, vector<2x48x48xf32> -> vector<2x48x48xf32>
    "tpu.trace_stop"() : () -> ()
    %cst_187 = arith.constant 0.44721359 : f32
    %796 = vector.broadcast %cst_187 : f32 to vector<2x48x48xf32>
    %797 = arith.mulf %795, %796 : vector<2x48x48xf32>
    %798 = vector.broadcast %99 : vector<1x48x48xf32> to vector<2x48x48xf32>
    %799 = arith.addf %797, %798 : vector<2x48x48xf32>
    %cst_188 = arith.constant dense<0xFF800000> : vector<2x48xf32>
    %800 = vector.multi_reduction <maximumf>, %799, %cst_188 [2] : vector<2x48x48xf32> to vector<2x48xf32>
    %801 = vector.shape_cast %800 : vector<2x48xf32> to vector<2x48x1xf32>
    %802 = vector.broadcast %801 : vector<2x48x1xf32> to vector<2x48x48xf32>
    %803 = arith.subf %799, %802 : vector<2x48x48xf32>
    %804 = math.exp %803 : vector<2x48x48xf32>
    %cst_189 = arith.constant dense<0.000000e+00> : vector<2x48xf32>
    %805 = vector.multi_reduction <add>, %804, %cst_189 [2] : vector<2x48x48xf32> to vector<2x48xf32>
    %806 = vector.shape_cast %805 : vector<2x48xf32> to vector<2x48x1xf32>
    %807 = vector.broadcast %806 : vector<2x48x1xf32> to vector<2x48x48xf32>
    %808 = arith.divf %804, %807 : vector<2x48x48xf32>
    "tpu.trace_start"() <{level = 10 : i32, message = "bqk,bkd->bqd"}> : () -> ()
    %cst_190 = arith.constant dense<0.000000e+00> : vector<2x48x8xf32>
    %809 = tpu.matmul %808, %794, %cst_190 {dimension_numbers = #tpu.dot_dimension_numbers<[2], [1], [1], [2], [0, 0, 0, 1, 1, 2], [0], [0]>} : vector<2x48x48xf32>, vector<2x48x8xf32>, vector<2x48x8xf32> -> vector<2x48x8xf32>
    "tpu.trace_stop"() : () -> ()
    %810 = vector.extract_strided_slice %809 {offsets = [0, 0, 0], sizes = [2, 8, 8], strides = [1, 1, 1]} : vector<2x48x8xf32> to vector<2x8x8xf32>
    %811 = vector.shape_cast %810 : vector<2x8x8xf32> to vector<16x8xf32>
    %812 = vector.extract_strided_slice %731 {offsets = [0, 0], sizes = [8, 32], strides = [1, 1]} : vector<48x32xf32> to vector<8x32xf32>
    %cst_191 = arith.constant dense<0.000000e+00> : vector<16x32xf32>
    %813 = tpu.matmul %811, %812, %cst_191 {dimension_numbers = #tpu.dot_dimension_numbers<[1], [0], [0], [1], [0, 0, 1, 1], [], []>} : vector<16x8xf32>, vector<8x32xf32>, vector<16x32xf32> -> vector<16x32xf32>
    %814 = vector.extract_strided_slice %809 {offsets = [0, 8, 0], sizes = [2, 8, 8], strides = [1, 1, 1]} : vector<2x48x8xf32> to vector<2x8x8xf32>
    %815 = vector.shape_cast %814 : vector<2x8x8xf32> to vector<16x8xf32>
    %816 = vector.extract_strided_slice %731 {offsets = [8, 0], sizes = [8, 32], strides = [1, 1]} : vector<48x32xf32> to vector<8x32xf32>
    %cst_192 = arith.constant dense<0.000000e+00> : vector<16x32xf32>
    %817 = tpu.matmul %815, %816, %cst_192 {dimension_numbers = #tpu.dot_dimension_numbers<[1], [0], [0], [1], [0, 0, 1, 1], [], []>} : vector<16x8xf32>, vector<8x32xf32>, vector<16x32xf32> -> vector<16x32xf32>
    %818 = arith.addf %813, %817 : vector<16x32xf32>
    %819 = vector.extract_strided_slice %809 {offsets = [0, 16, 0], sizes = [2, 8, 8], strides = [1, 1, 1]} : vector<2x48x8xf32> to vector<2x8x8xf32>
    %820 = vector.shape_cast %819 : vector<2x8x8xf32> to vector<16x8xf32>
    %821 = vector.extract_strided_slice %731 {offsets = [16, 0], sizes = [8, 32], strides = [1, 1]} : vector<48x32xf32> to vector<8x32xf32>
    %cst_193 = arith.constant dense<0.000000e+00> : vector<16x32xf32>
    %822 = tpu.matmul %820, %821, %cst_193 {dimension_numbers = #tpu.dot_dimension_numbers<[1], [0], [0], [1], [0, 0, 1, 1], [], []>} : vector<16x8xf32>, vector<8x32xf32>, vector<16x32xf32> -> vector<16x32xf32>
    %823 = arith.addf %818, %822 : vector<16x32xf32>
    %824 = vector.extract_strided_slice %809 {offsets = [0, 24, 0], sizes = [2, 8, 8], strides = [1, 1, 1]} : vector<2x48x8xf32> to vector<2x8x8xf32>
    %825 = vector.shape_cast %824 : vector<2x8x8xf32> to vector<16x8xf32>
    %826 = vector.extract_strided_slice %731 {offsets = [24, 0], sizes = [8, 32], strides = [1, 1]} : vector<48x32xf32> to vector<8x32xf32>
    %cst_194 = arith.constant dense<0.000000e+00> : vector<16x32xf32>
    %827 = tpu.matmul %825, %826, %cst_194 {dimension_numbers = #tpu.dot_dimension_numbers<[1], [0], [0], [1], [0, 0, 1, 1], [], []>} : vector<16x8xf32>, vector<8x32xf32>, vector<16x32xf32> -> vector<16x32xf32>
    %828 = arith.addf %823, %827 : vector<16x32xf32>
    %829 = vector.extract_strided_slice %809 {offsets = [0, 32, 0], sizes = [2, 8, 8], strides = [1, 1, 1]} : vector<2x48x8xf32> to vector<2x8x8xf32>
    %830 = vector.shape_cast %829 : vector<2x8x8xf32> to vector<16x8xf32>
    %831 = vector.extract_strided_slice %731 {offsets = [32, 0], sizes = [8, 32], strides = [1, 1]} : vector<48x32xf32> to vector<8x32xf32>
    %cst_195 = arith.constant dense<0.000000e+00> : vector<16x32xf32>
    %832 = tpu.matmul %830, %831, %cst_195 {dimension_numbers = #tpu.dot_dimension_numbers<[1], [0], [0], [1], [0, 0, 1, 1], [], []>} : vector<16x8xf32>, vector<8x32xf32>, vector<16x32xf32> -> vector<16x32xf32>
    %833 = arith.addf %828, %832 : vector<16x32xf32>
    %834 = vector.extract_strided_slice %809 {offsets = [0, 40, 0], sizes = [2, 8, 8], strides = [1, 1, 1]} : vector<2x48x8xf32> to vector<2x8x8xf32>
    %835 = vector.shape_cast %834 : vector<2x8x8xf32> to vector<16x8xf32>
    %836 = vector.extract_strided_slice %731 {offsets = [40, 0], sizes = [8, 32], strides = [1, 1]} : vector<48x32xf32> to vector<8x32xf32>
    %cst_196 = arith.constant dense<0.000000e+00> : vector<16x32xf32>
    %837 = tpu.matmul %835, %836, %cst_196 {dimension_numbers = #tpu.dot_dimension_numbers<[1], [0], [0], [1], [0, 0, 1, 1], [], []>} : vector<16x8xf32>, vector<8x32xf32>, vector<16x32xf32> -> vector<16x32xf32>
    %838 = arith.addf %833, %837 : vector<16x32xf32>
    %839 = vector.shape_cast %744 : vector<32xf32> to vector<1x32xf32>
    %840 = vector.broadcast %839 : vector<1x32xf32> to vector<16x32xf32>
    %841 = arith.addf %838, %840 : vector<16x32xf32>
    %842 = vector.shape_cast %841 : vector<16x32xf32> to vector<2x8x32xf32>
    %843 = arith.addf %568, %842 : vector<2x8x32xf32>
    %844 = vector.shape_cast %843 : vector<2x8x32xf32> to vector<16x32xf32>
    %cst_197 = arith.constant dense<0.000000e+00> : vector<16xf32>
    %845 = vector.multi_reduction <add>, %844, %cst_197 [1] : vector<16x32xf32> to vector<16xf32>
    %846 = vector.shape_cast %845 : vector<16xf32> to vector<16x1xf32>
    %cst_198 = arith.constant 3.200000e+01 : f32
    %847 = vector.broadcast %cst_198 : f32 to vector<16x1xf32>
    %848 = arith.divf %846, %847 : vector<16x1xf32>
    %849 = vector.broadcast %848 : vector<16x1xf32> to vector<16x32xf32>
    %850 = arith.subf %844, %849 : vector<16x32xf32>
    %851 = arith.mulf %850, %850 : vector<16x32xf32>
    %cst_199 = arith.constant dense<0.000000e+00> : vector<16xf32>
    %852 = vector.multi_reduction <add>, %851, %cst_199 [1] : vector<16x32xf32> to vector<16xf32>
    %853 = vector.shape_cast %852 : vector<16xf32> to vector<16x1xf32>
    %cst_200 = arith.constant 3.200000e+01 : f32
    %854 = vector.broadcast %cst_200 : f32 to vector<16x1xf32>
    %855 = arith.divf %853, %854 : vector<16x1xf32>
    %856 = vector.broadcast %848 : vector<16x1xf32> to vector<16x32xf32>
    %857 = arith.subf %844, %856 : vector<16x32xf32>
    %cst_201 = arith.constant 9.99999974E-6 : f32
    %858 = vector.broadcast %cst_201 : f32 to vector<16x1xf32>
    %859 = arith.addf %855, %858 : vector<16x1xf32>
    %860 = math.rsqrt %859 : vector<16x1xf32>
    %861 = vector.broadcast %860 : vector<16x1xf32> to vector<16x32xf32>
    %862 = arith.mulf %857, %861 : vector<16x32xf32>
    %863 = vector.shape_cast %740 : vector<32xf32> to vector<1x32xf32>
    %864 = vector.broadcast %863 : vector<1x32xf32> to vector<16x32xf32>
    %865 = arith.mulf %862, %864 : vector<16x32xf32>
    %866 = vector.shape_cast %742 : vector<32xf32> to vector<1x32xf32>
    %867 = vector.broadcast %866 : vector<1x32xf32> to vector<16x32xf32>
    %868 = arith.addf %865, %867 : vector<16x32xf32>
    %cst_202 = arith.constant dense<0.000000e+00> : vector<16x128xf32>
    %869 = tpu.matmul %868, %728, %cst_202 {dimension_numbers = #tpu.dot_dimension_numbers<[1], [0], [0], [1], [0, 0, 1, 1], [], []>} : vector<16x32xf32>, vector<32x128xf32>, vector<16x128xf32> -> vector<16x128xf32>
    %870 = vector.shape_cast %748 : vector<128xf32> to vector<1x128xf32>
    %871 = vector.broadcast %870 : vector<1x128xf32> to vector<16x128xf32>
    %872 = arith.addf %869, %871 : vector<16x128xf32>
    %cst_203 = arith.constant 0.000000e+00 : f32
    %873 = vector.broadcast %cst_203 : f32 to vector<16x128xf32>
    %874 = arith.maximumf %872, %873 : vector<16x128xf32>
    %cst_204 = arith.constant dense<0.000000e+00> : vector<16x32xf32>
    %875 = tpu.matmul %874, %732, %cst_204 {dimension_numbers = #tpu.dot_dimension_numbers<[1], [0], [0], [1], [0, 0, 1, 1], [], []>} : vector<16x128xf32>, vector<128x32xf32>, vector<16x32xf32> -> vector<16x32xf32>
    %876 = vector.shape_cast %746 : vector<32xf32> to vector<1x32xf32>
    %877 = vector.broadcast %876 : vector<1x32xf32> to vector<16x32xf32>
    %878 = arith.addf %875, %877 : vector<16x32xf32>
    %879 = vector.shape_cast %878 : vector<16x32xf32> to vector<2x8x32xf32>
    %880 = arith.addf %843, %879 : vector<2x8x32xf32>
    %c5 = arith.constant 5 : index
    %c0_205 = arith.constant 0 : index
    %c0_206 = arith.constant 0 : index
    %881 = vector.load %arg4[%c5, %c0_205, %c0_206] : memref<6x32x96xf32, #tpu.memory_space<vmem>>, vector<1x32x96xf32>
    %882 = vector.shape_cast %881 : vector<1x32x96xf32> to vector<32x96xf32>
    %c5_207 = arith.constant 5 : index
    %c0_208 = arith.constant 0 : index
    %c0_209 = arith.constant 0 : index
    %883 = vector.load %arg5[%c5_207, %c0_208, %c0_209] : memref<6x32x128xf32, #tpu.memory_space<vmem>>, vector<1x32x128xf32>
    %884 = vector.shape_cast %883 : vector<1x32x128xf32> to vector<32x128xf32>
    %c5_210 = arith.constant 5 : index
    %c0_211 = arith.constant 0 : index
    %c0_212 = arith.constant 0 : index
    %885 = vector.load %arg6[%c5_210, %c0_211, %c0_212] : memref<6x176x32xf32, #tpu.memory_space<vmem>>, vector<1x176x32xf32>
    %886 = vector.shape_cast %885 : vector<1x176x32xf32> to vector<176x32xf32>
    %887 = vector.extract_strided_slice %886 {offsets = [0, 0], sizes = [48, 32], strides = [1, 1]} : vector<176x32xf32> to vector<48x32xf32>
    %888 = vector.extract_strided_slice %886 {offsets = [48, 0], sizes = [128, 32], strides = [1, 1]} : vector<176x32xf32> to vector<128x32xf32>
    %c5_213 = arith.constant 5 : index
    %c0_214 = arith.constant 0 : index
    %c0_215 = arith.constant 0 : index
    %889 = vector.load %arg7[%c5_213, %c0_214, %c0_215] : memref<6x3x128xf32, #tpu.memory_space<vmem>>, vector<1x3x128xf32>
    %890 = vector.shape_cast %889 : vector<1x3x128xf32> to vector<3x128xf32>
    %891 = vector.extract_strided_slice %890 {offsets = [0, 0], sizes = [1, 32], strides = [1, 1]} : vector<3x128xf32> to vector<1x32xf32>
    %892 = vector.shape_cast %891 : vector<1x32xf32> to vector<32xf32>
    %893 = vector.extract_strided_slice %890 {offsets = [0, 32], sizes = [1, 32], strides = [1, 1]} : vector<3x128xf32> to vector<1x32xf32>
    %894 = vector.shape_cast %893 : vector<1x32xf32> to vector<32xf32>
    %895 = vector.extract_strided_slice %890 {offsets = [0, 64], sizes = [1, 32], strides = [1, 1]} : vector<3x128xf32> to vector<1x32xf32>
    %896 = vector.shape_cast %895 : vector<1x32xf32> to vector<32xf32>
    %897 = vector.extract_strided_slice %890 {offsets = [0, 96], sizes = [1, 32], strides = [1, 1]} : vector<3x128xf32> to vector<1x32xf32>
    %898 = vector.shape_cast %897 : vector<1x32xf32> to vector<32xf32>
    %899 = vector.extract_strided_slice %890 {offsets = [1, 0], sizes = [1, 32], strides = [1, 1]} : vector<3x128xf32> to vector<1x32xf32>
    %900 = vector.shape_cast %899 : vector<1x32xf32> to vector<32xf32>
    %901 = vector.extract_strided_slice %890 {offsets = [1, 32], sizes = [1, 32], strides = [1, 1]} : vector<3x128xf32> to vector<1x32xf32>
    %902 = vector.shape_cast %901 : vector<1x32xf32> to vector<32xf32>
    %903 = vector.extract_strided_slice %890 {offsets = [2, 0], sizes = [1, 128], strides = [1, 1]} : vector<3x128xf32> to vector<1x128xf32>
    %904 = vector.shape_cast %903 : vector<1x128xf32> to vector<128xf32>
    %905 = vector.shape_cast %880 : vector<2x8x32xf32> to vector<16x32xf32>
    %906 = vector.shape_cast %724 : vector<2x8x32xf32> to vector<16x32xf32>
    %907 = tpu.concatenate %905, %906 in 0 : vector<16x32xf32>, vector<16x32xf32> -> vector<32x32xf32>
    %cst_216 = arith.constant dense<0.000000e+00> : vector<32xf32>
    %908 = vector.multi_reduction <add>, %907, %cst_216 [1] : vector<32x32xf32> to vector<32xf32>
    %909 = vector.shape_cast %908 : vector<32xf32> to vector<32x1xf32>
    %cst_217 = arith.constant 3.200000e+01 : f32
    %910 = vector.broadcast %cst_217 : f32 to vector<32x1xf32>
    %911 = arith.divf %909, %910 : vector<32x1xf32>
    %912 = vector.broadcast %911 : vector<32x1xf32> to vector<32x32xf32>
    %913 = arith.subf %907, %912 : vector<32x32xf32>
    %914 = arith.mulf %913, %913 : vector<32x32xf32>
    %cst_218 = arith.constant dense<0.000000e+00> : vector<32xf32>
    %915 = vector.multi_reduction <add>, %914, %cst_218 [1] : vector<32x32xf32> to vector<32xf32>
    %916 = vector.shape_cast %915 : vector<32xf32> to vector<32x1xf32>
    %cst_219 = arith.constant 3.200000e+01 : f32
    %917 = vector.broadcast %cst_219 : f32 to vector<32x1xf32>
    %918 = arith.divf %916, %917 : vector<32x1xf32>
    %919 = vector.broadcast %911 : vector<32x1xf32> to vector<32x32xf32>
    %920 = arith.subf %907, %919 : vector<32x32xf32>
    %cst_220 = arith.constant 9.99999974E-6 : f32
    %921 = vector.broadcast %cst_220 : f32 to vector<32x1xf32>
    %922 = arith.addf %918, %921 : vector<32x1xf32>
    %923 = math.rsqrt %922 : vector<32x1xf32>
    %924 = vector.broadcast %923 : vector<32x1xf32> to vector<32x32xf32>
    %925 = arith.mulf %920, %924 : vector<32x32xf32>
    %926 = vector.shape_cast %892 : vector<32xf32> to vector<1x32xf32>
    %927 = vector.broadcast %926 : vector<1x32xf32> to vector<32x32xf32>
    %928 = arith.mulf %925, %927 : vector<32x32xf32>
    %929 = vector.shape_cast %894 : vector<32xf32> to vector<1x32xf32>
    %930 = vector.broadcast %929 : vector<1x32xf32> to vector<32x32xf32>
    %931 = arith.addf %928, %930 : vector<32x32xf32>
    %cst_221 = arith.constant dense<0.000000e+00> : vector<32x96xf32>
    %932 = tpu.matmul %931, %882, %cst_221 {dimension_numbers = #tpu.dot_dimension_numbers<[1], [0], [0], [1], [0, 0, 1, 1], [], []>} : vector<32x32xf32>, vector<32x96xf32>, vector<32x96xf32> -> vector<32x96xf32>
    %933 = vector.extract_strided_slice %932 {offsets = [16, 0], sizes = [16, 48], strides = [1, 1]} : vector<32x96xf32> to vector<16x48xf32>
    %934 = vector.shape_cast %933 : vector<16x48xf32> to vector<2x8x48xf32>
    %935 = vector.extract_strided_slice %932 {offsets = [0, 48], sizes = [16, 48], strides = [1, 1]} : vector<32x96xf32> to vector<16x48xf32>
    %936 = vector.shape_cast %935 : vector<16x48xf32> to vector<2x8x48xf32>
    %937 = vector.extract_strided_slice %934 {offsets = [0, 0, 0], sizes = [2, 8, 8], strides = [1, 1, 1]} : vector<2x8x48xf32> to vector<2x8x8xf32>
    %938 = vector.extract_strided_slice %934 {offsets = [0, 0, 8], sizes = [2, 8, 8], strides = [1, 1, 1]} : vector<2x8x48xf32> to vector<2x8x8xf32>
    %939 = vector.extract_strided_slice %934 {offsets = [0, 0, 16], sizes = [2, 8, 8], strides = [1, 1, 1]} : vector<2x8x48xf32> to vector<2x8x8xf32>
    %940 = vector.extract_strided_slice %934 {offsets = [0, 0, 24], sizes = [2, 8, 8], strides = [1, 1, 1]} : vector<2x8x48xf32> to vector<2x8x8xf32>
    %941 = vector.extract_strided_slice %934 {offsets = [0, 0, 32], sizes = [2, 8, 8], strides = [1, 1, 1]} : vector<2x8x48xf32> to vector<2x8x8xf32>
    %942 = vector.extract_strided_slice %934 {offsets = [0, 0, 40], sizes = [2, 8, 8], strides = [1, 1, 1]} : vector<2x8x48xf32> to vector<2x8x8xf32>
    %943 = tpu.concatenate %937, %938, %939, %940, %941, %942 in 1 : vector<2x8x8xf32>, vector<2x8x8xf32>, vector<2x8x8xf32>, vector<2x8x8xf32>, vector<2x8x8xf32>, vector<2x8x8xf32> -> vector<2x48x8xf32>
    %944 = vector.extract_strided_slice %936 {offsets = [0, 0, 0], sizes = [2, 8, 8], strides = [1, 1, 1]} : vector<2x8x48xf32> to vector<2x8x8xf32>
    %945 = vector.extract_strided_slice %936 {offsets = [0, 0, 8], sizes = [2, 8, 8], strides = [1, 1, 1]} : vector<2x8x48xf32> to vector<2x8x8xf32>
    %946 = vector.extract_strided_slice %936 {offsets = [0, 0, 16], sizes = [2, 8, 8], strides = [1, 1, 1]} : vector<2x8x48xf32> to vector<2x8x8xf32>
    %947 = vector.extract_strided_slice %936 {offsets = [0, 0, 24], sizes = [2, 8, 8], strides = [1, 1, 1]} : vector<2x8x48xf32> to vector<2x8x8xf32>
    %948 = vector.extract_strided_slice %936 {offsets = [0, 0, 32], sizes = [2, 8, 8], strides = [1, 1, 1]} : vector<2x8x48xf32> to vector<2x8x8xf32>
    %949 = vector.extract_strided_slice %936 {offsets = [0, 0, 40], sizes = [2, 8, 8], strides = [1, 1, 1]} : vector<2x8x48xf32> to vector<2x8x8xf32>
    %950 = tpu.concatenate %944, %945, %946, %947, %948, %949 in 1 : vector<2x8x8xf32>, vector<2x8x8xf32>, vector<2x8x8xf32>, vector<2x8x8xf32>, vector<2x8x8xf32>, vector<2x8x8xf32> -> vector<2x48x8xf32>
    "tpu.trace_start"() <{level = 10 : i32, message = "bqd,bkd->bqk"}> : () -> ()
    %cst_222 = arith.constant dense<0.000000e+00> : vector<2x48x48xf32>
    %951 = tpu.matmul %943, %943, %cst_222 {dimension_numbers = #tpu.dot_dimension_numbers<[2], [2], [1], [1], [0, 0, 0, 1, 1, 1], [0], [0]>} : vector<2x48x8xf32>, vector<2x48x8xf32>, vector<2x48x48xf32> -> vector<2x48x48xf32>
    "tpu.trace_stop"() : () -> ()
    %cst_223 = arith.constant 0.44721359 : f32
    %952 = vector.broadcast %cst_223 : f32 to vector<2x48x48xf32>
    %953 = arith.mulf %951, %952 : vector<2x48x48xf32>
    %954 = vector.broadcast %99 : vector<1x48x48xf32> to vector<2x48x48xf32>
    %955 = arith.addf %953, %954 : vector<2x48x48xf32>
    %cst_224 = arith.constant dense<0xFF800000> : vector<2x48xf32>
    %956 = vector.multi_reduction <maximumf>, %955, %cst_224 [2] : vector<2x48x48xf32> to vector<2x48xf32>
    %957 = vector.shape_cast %956 : vector<2x48xf32> to vector<2x48x1xf32>
    %958 = vector.broadcast %957 : vector<2x48x1xf32> to vector<2x48x48xf32>
    %959 = arith.subf %955, %958 : vector<2x48x48xf32>
    %960 = math.exp %959 : vector<2x48x48xf32>
    %cst_225 = arith.constant dense<0.000000e+00> : vector<2x48xf32>
    %961 = vector.multi_reduction <add>, %960, %cst_225 [2] : vector<2x48x48xf32> to vector<2x48xf32>
    %962 = vector.shape_cast %961 : vector<2x48xf32> to vector<2x48x1xf32>
    %963 = vector.broadcast %962 : vector<2x48x1xf32> to vector<2x48x48xf32>
    %964 = arith.divf %960, %963 : vector<2x48x48xf32>
    "tpu.trace_start"() <{level = 10 : i32, message = "bqk,bkd->bqd"}> : () -> ()
    %cst_226 = arith.constant dense<0.000000e+00> : vector<2x48x8xf32>
    %965 = tpu.matmul %964, %950, %cst_226 {dimension_numbers = #tpu.dot_dimension_numbers<[2], [1], [1], [2], [0, 0, 0, 1, 1, 2], [0], [0]>} : vector<2x48x48xf32>, vector<2x48x8xf32>, vector<2x48x8xf32> -> vector<2x48x8xf32>
    "tpu.trace_stop"() : () -> ()
    %966 = vector.extract_strided_slice %965 {offsets = [0, 0, 0], sizes = [2, 8, 8], strides = [1, 1, 1]} : vector<2x48x8xf32> to vector<2x8x8xf32>
    %967 = vector.shape_cast %966 : vector<2x8x8xf32> to vector<16x8xf32>
    %968 = vector.extract_strided_slice %887 {offsets = [0, 0], sizes = [8, 32], strides = [1, 1]} : vector<48x32xf32> to vector<8x32xf32>
    %cst_227 = arith.constant dense<0.000000e+00> : vector<16x32xf32>
    %969 = tpu.matmul %967, %968, %cst_227 {dimension_numbers = #tpu.dot_dimension_numbers<[1], [0], [0], [1], [0, 0, 1, 1], [], []>} : vector<16x8xf32>, vector<8x32xf32>, vector<16x32xf32> -> vector<16x32xf32>
    %970 = vector.extract_strided_slice %965 {offsets = [0, 8, 0], sizes = [2, 8, 8], strides = [1, 1, 1]} : vector<2x48x8xf32> to vector<2x8x8xf32>
    %971 = vector.shape_cast %970 : vector<2x8x8xf32> to vector<16x8xf32>
    %972 = vector.extract_strided_slice %887 {offsets = [8, 0], sizes = [8, 32], strides = [1, 1]} : vector<48x32xf32> to vector<8x32xf32>
    %cst_228 = arith.constant dense<0.000000e+00> : vector<16x32xf32>
    %973 = tpu.matmul %971, %972, %cst_228 {dimension_numbers = #tpu.dot_dimension_numbers<[1], [0], [0], [1], [0, 0, 1, 1], [], []>} : vector<16x8xf32>, vector<8x32xf32>, vector<16x32xf32> -> vector<16x32xf32>
    %974 = arith.addf %969, %973 : vector<16x32xf32>
    %975 = vector.extract_strided_slice %965 {offsets = [0, 16, 0], sizes = [2, 8, 8], strides = [1, 1, 1]} : vector<2x48x8xf32> to vector<2x8x8xf32>
    %976 = vector.shape_cast %975 : vector<2x8x8xf32> to vector<16x8xf32>
    %977 = vector.extract_strided_slice %887 {offsets = [16, 0], sizes = [8, 32], strides = [1, 1]} : vector<48x32xf32> to vector<8x32xf32>
    %cst_229 = arith.constant dense<0.000000e+00> : vector<16x32xf32>
    %978 = tpu.matmul %976, %977, %cst_229 {dimension_numbers = #tpu.dot_dimension_numbers<[1], [0], [0], [1], [0, 0, 1, 1], [], []>} : vector<16x8xf32>, vector<8x32xf32>, vector<16x32xf32> -> vector<16x32xf32>
    %979 = arith.addf %974, %978 : vector<16x32xf32>
    %980 = vector.extract_strided_slice %965 {offsets = [0, 24, 0], sizes = [2, 8, 8], strides = [1, 1, 1]} : vector<2x48x8xf32> to vector<2x8x8xf32>
    %981 = vector.shape_cast %980 : vector<2x8x8xf32> to vector<16x8xf32>
    %982 = vector.extract_strided_slice %887 {offsets = [24, 0], sizes = [8, 32], strides = [1, 1]} : vector<48x32xf32> to vector<8x32xf32>
    %cst_230 = arith.constant dense<0.000000e+00> : vector<16x32xf32>
    %983 = tpu.matmul %981, %982, %cst_230 {dimension_numbers = #tpu.dot_dimension_numbers<[1], [0], [0], [1], [0, 0, 1, 1], [], []>} : vector<16x8xf32>, vector<8x32xf32>, vector<16x32xf32> -> vector<16x32xf32>
    %984 = arith.addf %979, %983 : vector<16x32xf32>
    %985 = vector.extract_strided_slice %965 {offsets = [0, 32, 0], sizes = [2, 8, 8], strides = [1, 1, 1]} : vector<2x48x8xf32> to vector<2x8x8xf32>
    %986 = vector.shape_cast %985 : vector<2x8x8xf32> to vector<16x8xf32>
    %987 = vector.extract_strided_slice %887 {offsets = [32, 0], sizes = [8, 32], strides = [1, 1]} : vector<48x32xf32> to vector<8x32xf32>
    %cst_231 = arith.constant dense<0.000000e+00> : vector<16x32xf32>
    %988 = tpu.matmul %986, %987, %cst_231 {dimension_numbers = #tpu.dot_dimension_numbers<[1], [0], [0], [1], [0, 0, 1, 1], [], []>} : vector<16x8xf32>, vector<8x32xf32>, vector<16x32xf32> -> vector<16x32xf32>
    %989 = arith.addf %984, %988 : vector<16x32xf32>
    %990 = vector.extract_strided_slice %965 {offsets = [0, 40, 0], sizes = [2, 8, 8], strides = [1, 1, 1]} : vector<2x48x8xf32> to vector<2x8x8xf32>
    %991 = vector.shape_cast %990 : vector<2x8x8xf32> to vector<16x8xf32>
    %992 = vector.extract_strided_slice %887 {offsets = [40, 0], sizes = [8, 32], strides = [1, 1]} : vector<48x32xf32> to vector<8x32xf32>
    %cst_232 = arith.constant dense<0.000000e+00> : vector<16x32xf32>
    %993 = tpu.matmul %991, %992, %cst_232 {dimension_numbers = #tpu.dot_dimension_numbers<[1], [0], [0], [1], [0, 0, 1, 1], [], []>} : vector<16x8xf32>, vector<8x32xf32>, vector<16x32xf32> -> vector<16x32xf32>
    %994 = arith.addf %989, %993 : vector<16x32xf32>
    %995 = vector.shape_cast %900 : vector<32xf32> to vector<1x32xf32>
    %996 = vector.broadcast %995 : vector<1x32xf32> to vector<16x32xf32>
    %997 = arith.addf %994, %996 : vector<16x32xf32>
    %998 = vector.shape_cast %997 : vector<16x32xf32> to vector<2x8x32xf32>
    %999 = arith.addf %724, %998 : vector<2x8x32xf32>
    %1000 = vector.shape_cast %999 : vector<2x8x32xf32> to vector<16x32xf32>
    %cst_233 = arith.constant dense<0.000000e+00> : vector<16xf32>
    %1001 = vector.multi_reduction <add>, %1000, %cst_233 [1] : vector<16x32xf32> to vector<16xf32>
    %1002 = vector.shape_cast %1001 : vector<16xf32> to vector<16x1xf32>
    %cst_234 = arith.constant 3.200000e+01 : f32
    %1003 = vector.broadcast %cst_234 : f32 to vector<16x1xf32>
    %1004 = arith.divf %1002, %1003 : vector<16x1xf32>
    %1005 = vector.broadcast %1004 : vector<16x1xf32> to vector<16x32xf32>
    %1006 = arith.subf %1000, %1005 : vector<16x32xf32>
    %1007 = arith.mulf %1006, %1006 : vector<16x32xf32>
    %cst_235 = arith.constant dense<0.000000e+00> : vector<16xf32>
    %1008 = vector.multi_reduction <add>, %1007, %cst_235 [1] : vector<16x32xf32> to vector<16xf32>
    %1009 = vector.shape_cast %1008 : vector<16xf32> to vector<16x1xf32>
    %cst_236 = arith.constant 3.200000e+01 : f32
    %1010 = vector.broadcast %cst_236 : f32 to vector<16x1xf32>
    %1011 = arith.divf %1009, %1010 : vector<16x1xf32>
    %1012 = vector.broadcast %1004 : vector<16x1xf32> to vector<16x32xf32>
    %1013 = arith.subf %1000, %1012 : vector<16x32xf32>
    %cst_237 = arith.constant 9.99999974E-6 : f32
    %1014 = vector.broadcast %cst_237 : f32 to vector<16x1xf32>
    %1015 = arith.addf %1011, %1014 : vector<16x1xf32>
    %1016 = math.rsqrt %1015 : vector<16x1xf32>
    %1017 = vector.broadcast %1016 : vector<16x1xf32> to vector<16x32xf32>
    %1018 = arith.mulf %1013, %1017 : vector<16x32xf32>
    %1019 = vector.shape_cast %896 : vector<32xf32> to vector<1x32xf32>
    %1020 = vector.broadcast %1019 : vector<1x32xf32> to vector<16x32xf32>
    %1021 = arith.mulf %1018, %1020 : vector<16x32xf32>
    %1022 = vector.shape_cast %898 : vector<32xf32> to vector<1x32xf32>
    %1023 = vector.broadcast %1022 : vector<1x32xf32> to vector<16x32xf32>
    %1024 = arith.addf %1021, %1023 : vector<16x32xf32>
    %cst_238 = arith.constant dense<0.000000e+00> : vector<16x128xf32>
    %1025 = tpu.matmul %1024, %884, %cst_238 {dimension_numbers = #tpu.dot_dimension_numbers<[1], [0], [0], [1], [0, 0, 1, 1], [], []>} : vector<16x32xf32>, vector<32x128xf32>, vector<16x128xf32> -> vector<16x128xf32>
    %1026 = vector.shape_cast %904 : vector<128xf32> to vector<1x128xf32>
    %1027 = vector.broadcast %1026 : vector<1x128xf32> to vector<16x128xf32>
    %1028 = arith.addf %1025, %1027 : vector<16x128xf32>
    %cst_239 = arith.constant 0.000000e+00 : f32
    %1029 = vector.broadcast %cst_239 : f32 to vector<16x128xf32>
    %1030 = arith.maximumf %1028, %1029 : vector<16x128xf32>
    %cst_240 = arith.constant dense<0.000000e+00> : vector<16x32xf32>
    %1031 = tpu.matmul %1030, %888, %cst_240 {dimension_numbers = #tpu.dot_dimension_numbers<[1], [0], [0], [1], [0, 0, 1, 1], [], []>} : vector<16x128xf32>, vector<128x32xf32>, vector<16x32xf32> -> vector<16x32xf32>
    %1032 = vector.shape_cast %902 : vector<32xf32> to vector<1x32xf32>
    %1033 = vector.broadcast %1032 : vector<1x32xf32> to vector<16x32xf32>
    %1034 = arith.addf %1031, %1033 : vector<16x32xf32>
    %1035 = vector.shape_cast %1034 : vector<16x32xf32> to vector<2x8x32xf32>
    %1036 = arith.addf %999, %1035 : vector<2x8x32xf32>
    %1037 = vector.shape_cast %1036 : vector<2x8x32xf32> to vector<16x32xf32>
    %cst_241 = arith.constant dense<0.000000e+00> : vector<16xf32>
    %1038 = vector.multi_reduction <add>, %1037, %cst_241 [1] : vector<16x32xf32> to vector<16xf32>
    %1039 = vector.shape_cast %1038 : vector<16xf32> to vector<16x1xf32>
    %cst_242 = arith.constant 3.200000e+01 : f32
    %1040 = vector.broadcast %cst_242 : f32 to vector<16x1xf32>
    %1041 = arith.divf %1039, %1040 : vector<16x1xf32>
    %1042 = vector.broadcast %1041 : vector<16x1xf32> to vector<16x32xf32>
    %1043 = arith.subf %1037, %1042 : vector<16x32xf32>
    %1044 = arith.mulf %1043, %1043 : vector<16x32xf32>
    %cst_243 = arith.constant dense<0.000000e+00> : vector<16xf32>
    %1045 = vector.multi_reduction <add>, %1044, %cst_243 [1] : vector<16x32xf32> to vector<16xf32>
    %1046 = vector.shape_cast %1045 : vector<16xf32> to vector<16x1xf32>
    %cst_244 = arith.constant 3.200000e+01 : f32
    %1047 = vector.broadcast %cst_244 : f32 to vector<16x1xf32>
    %1048 = arith.divf %1046, %1047 : vector<16x1xf32>
    %1049 = vector.broadcast %1041 : vector<16x1xf32> to vector<16x32xf32>
    %1050 = arith.subf %1037, %1049 : vector<16x32xf32>
    %cst_245 = arith.constant 9.99999974E-6 : f32
    %1051 = vector.broadcast %cst_245 : f32 to vector<16x1xf32>
    %1052 = arith.addf %1048, %1051 : vector<16x1xf32>
    %1053 = math.rsqrt %1052 : vector<16x1xf32>
    %1054 = vector.broadcast %1053 : vector<16x1xf32> to vector<16x32xf32>
    %1055 = arith.mulf %1050, %1054 : vector<16x32xf32>
    %1056 = vector.shape_cast %7 : vector<32xf32> to vector<1x32xf32>
    %1057 = vector.broadcast %1056 : vector<1x32xf32> to vector<16x32xf32>
    %1058 = arith.mulf %1055, %1057 : vector<16x32xf32>
    %1059 = vector.shape_cast %9 : vector<32xf32> to vector<1x32xf32>
    %1060 = vector.broadcast %1059 : vector<1x32xf32> to vector<16x32xf32>
    %1061 = arith.addf %1058, %1060 : vector<16x32xf32>
    %cst_246 = arith.constant dense<0.000000e+00> : vector<16x32xf32>
    %1062 = tpu.matmul %1061, %2, %cst_246 {dimension_numbers = #tpu.dot_dimension_numbers<[1], [0], [0], [1], [0, 0, 1, 1], [], []>} : vector<16x32xf32>, vector<32x32xf32>, vector<16x32xf32> -> vector<16x32xf32>
    %1063 = vector.shape_cast %11 : vector<32xf32> to vector<1x32xf32>
    %1064 = vector.broadcast %1063 : vector<1x32xf32> to vector<16x32xf32>
    %1065 = arith.addf %1062, %1064 : vector<16x32xf32>
    %c0_247 = arith.constant 0 : index
    %c0_248 = arith.constant 0 : index
    %1066 = vector.load %arg8[%c0_247, %c0_248] : memref<16x32xf32, #tpu.memory_space<vmem>>, vector<16x32xf32>
    tpu.vector_store %arg8[%c0_247, %c0_248], %1065 {strides = array<i32>} : memref<16x32xf32, #tpu.memory_space<vmem>>, vector<16x32xf32>,
    return
  }
}

</mosaic_0001>

<bundles_post_ra>
// kernel: gpt_forward.1
= control target key start
LH: loop header
LB: loop body
LE: loop exit
PB: predicated region body
PF: predicated region fallthrough
CT: control target
= control target key end

     0   :  { %vm43_vm0 = vcmask 64512   ;;  %s11070_s0 = inlined_call_operand.vmem [shape: f32[2,8,32], index: 0, kind: input, shape index: {}]   ;;  %s11071_s1 = inlined_call_operand.vmem [shape: f32[2,8,8], index: 1, kind: input, shape index: {}]   ;;  %s11072_s2 = inlined_call_operand.vmem [shape: f32[48,48], index: 2, kind: input, shape index: {}]   ;;  %s11073_s3 = inlined_call_operand.vmem [shape: f32[80,32], index: 3, kind: input, shape index: {}]   ;;  %s11074_s4 = inlined_call_operand.vmem [shape: f32[6,32,96], index: 4, kind: input, shape index: {}]   ;;  %s11075_s5 = inlined_call_operand.vmem [shape: f32[6,32,128], index: 5, kind: input, shape index: {}]   ;;  %s11076_s6 = inlined_call_operand.vmem [shape: f32[6,176,32], index: 6, kind: input, shape index: {}]   ;;  %s11077_s7 = inlined_call_operand.vmem [shape: f32[6,3,128], index: 7, kind: input, shape index: {}]   ;;  %s11078_s8 = inlined_call_operand.hbm [shape: f32[16,32], index: 8, kind: output, shape index: {}]  }
   0x1   :  { %v38_v0 = vld [vmem:[%s11073_s3 + $0x40] sm:$0xff]  ;;  %v41_v2 = vld [vmem:[%s11071_s1 + $0x8] sm:$0xff] }
   0x2   :  { %v40_v1 = vld [vmem:[%s11071_s1] sm:$0xff]  ;;  %65 = vmatpush.msra.mxu0 %v38_v0  ;;  %7313 = vmatpush.msra.mxu1 %v38_v0 }
   0x3   :  { %13 = vsyncpa [#allocation3], 0  ;;  %6814 = vmatmul.msk.f32.vlgmr.msra.gmra.mxu0 %vm43_vm0, %v40_v1  ;;  %6815 = vmatmul.msk.f32.vlgmr.msra.gmra.mxu1 %vm43_vm0, %v41_v2  ;;  %v8174_v3 = vld [vmem:[%s11073_s3 + $0x18] sm:$0xff]  ;;  %v8179_v4 = vld [vmem:[%s11073_s3 + $0x10] sm:$0xff]  ;;  %vm114_vm1 = vcmask 1041409   ;;  %vm121_vm10 = vcmask 261120  }
   0x4   :  { %136 = vmatpush.msrb.mxu1 %v8174_v3  ;;  %228 = vmatpush.msra.mxu3 %v8174_v3  ;;  %v8186_v5 = vld [vmem:[%s11073_s3 + $0x8] sm:$0xff]  ;;  %v8194_v6 = vld [vmem:[%s11073_s3] sm:$0xff]  ;;  %s8104_s26 = smov 96   ;;  %s8105_s13 = smov 104  }
   0x5   :  { %320 = vmatpush.msrb.mxu0 %v8174_v3  ;;  %v39_v7 = vld [vmem:[%s11073_s3 + $0x48] sm:$0xff]  ;;  %s8106_s14 = smov 88   ;;  %s8107_s1 = smov 112  }
   0x6   :  { %137 = vmatpush.msrb.mxu1 %v8179_v4  ;;  %229 = vmatpush.msra.mxu3 %v8179_v4  ;;  %v42_v8 = vperm.slane %v39_v7, 0  ;;  %s8108_s15 = smov 120   ;;  %s8109_s16 = smov 80  }
   0x7   :  { %321 = vmatpush.msrb.mxu0 %v8179_v4  ;;  %s8110_s27 = smov 64   ;;  %s8111_s28 = smov 32  }
   0x8   :  { %138 = vmatpush.msrb.mxu1 %v8186_v5  ;;  %230 = vmatpush.msra.mxu3 %v8186_v5  ;;  %s6802_s20 = sshll.u32 %s11078_s8, 4  ;;  %s6803_s20 = int_to_ptr.hbm [resolvable:$true] %s6802_s20 }
   0x9   :  { %322 = vmatpush.msrb.mxu0 %v8186_v5 }
   0xa   :  { %139 = vmatpush.msrb.mxu1 %v8194_v6  ;;  %231 = vmatpush.msra.mxu3 %v8194_v6 }
   0xb   :  { %323 = vmatpush.msrb.mxu0 %v8194_v6 }
   0xc   :  { %182 = vmatpush.msra.mxu1 %v8174_v3  ;;  %366 = vmatpush.msrb.mxu3 %v8174_v3 }
   0xd   :  { %412 = vmatpush.msra.mxu0 %v8174_v3 }
   0xe   :  { %183 = vmatpush.msra.mxu1 %v8179_v4  ;;  %367 = vmatpush.msrb.mxu3 %v8179_v4 }
   0xf   :  { %413 = vmatpush.msra.mxu0 %v8179_v4 }
  0x10   :  { %184 = vmatpush.msra.mxu1 %v8186_v5  ;;  %368 = vmatpush.msrb.mxu3 %v8186_v5 }
  0x11   :  { %414 = vmatpush.msra.mxu0 %v8186_v5 }
  0x12   :  { %185 = vmatpush.msra.mxu1 %v8194_v6  ;;  %369 = vmatpush.msrb.mxu3 %v8194_v6 }
  0x13   :  { %415 = vmatpush.msra.mxu0 %v8194_v6 }
  0x80   :  { %v67_v9 = vpop.f32.mrf.mxu0  ;;  %v70_v10 = vpop.f32.mrf.mxu1 }
  0x81   :  { %v68_v11 = vadd.f32 %v67_v9, %v42_v8  ;;  %v71_v12 = vadd.f32 %v70_v10, %v42_v8 }
  0x83   :  { %v6816_v13 = vmul.f32 -1.442695, %v68_v11  ;;  %v6817_v14 = vmul.f32 -1.442695, %v71_v12  ;;  %v118_v15 = vrot.slane %v68_v11, 1  ;;  %v163_v16 = vrot.slane %v68_v11, 2 }
  0x84   :  { %v164_v17 = vrot.slane %v71_v12, 1  ;;  %v209_v18 = vrot.slane %v68_v11, 3  ;;  %v210_v19 = vrot.slane %v71_v12, 2  ;;  %v255_v20 = vrot.slane %v68_v11, 4 }
  0x85   :  { %7656 = vpow2.f32 %v6816_v13  ;;  %v119_v21 = vsel %vm114_vm1, %v71_v12, %v118_v15  ;;  %v256_v22 = vrot.slane %v71_v12, 3  ;;  %v301_v23 = vrot.slane %v68_v11, 5 }
  0x86   :  { %7658 = vpow2.f32 %v6817_v14  ;;  %v8220_v24 = vsel %vm114_vm1, %v164_v17, %v163_v16  ;;  %v8223_v25 = vsel %vm114_vm1, %v210_v19, %v209_v18  ;;  %v302_v26 = vrot.slane %v71_v12, 4 }
  0x87   :  { %v8226_v27 = vsel %vm114_vm1, %v256_v22, %v255_v20  ;;  %v347_v28 = vrot.slane %v68_v11, 6  ;;  %v348_v29 = vrot.slane %v71_v12, 5  ;;  %v393_v30 = vrot.slane %v68_v11, 7 }
  0x88   :  { %v8229_v31 = vsel %vm114_vm1, %v302_v26, %v301_v23  ;;  %v394_v32 = vrot.slane %v71_v12, 6 }
  0x89   :  { %v8232_v33 = vsel %vm114_vm1, %v348_v29, %v347_v28 }
  0x8a   :  { %v8235_v34 = vsel %vm114_vm1, %v394_v32, %v393_v30 }
  0x8b   :  { %v7657_v35 = vpop.eup %7656 }
  0x8c   :  { %v7659_v36 = vpop.eup %7658  ;;  %v79_v37 = vadd.f32 1.0, %v7657_v35 }
  0x8d   :  { %v80_v38 = vadd.f32 1.0, %v7659_v36 }
  0x8e   :  { %7660 = vrcp.f32 %v79_v37  ;;  %vm86_vm4 = vweird.f32 %v79_v37  ;;  %v92_v50 = vand.u32 2147483648, %v79_v37  ;;  %v90_v51 = vand.u32 2147483647, %v79_v37 }
  0x8f   :  { %7662 = vrcp.f32 %v80_v38  ;;  %v107_v46 = vand.u32 2147483648, %v80_v38  ;;  %v105_v48 = vand.u32 2147483647, %v80_v38  ;;  %vm101_vm6 = vweird.f32 %v80_v38 }
  0x90   :  { %v93_v56 = vor.u32 1.1754944e-38, %v92_v50  ;;  %vm91_vm9 = vcmp.eq.f32.partialorder %v90_v51, 8.507059e+37 }
  0x91   :  { %v108_v53 = vor.u32 1.1754944e-38, %v107_v46  ;;  %vm106_vm8 = vcmp.eq.f32.partialorder %v105_v48, 8.507059e+37 }
  0x94   :  { %v7661_v39 = vpop.eup %7660 }
  0x95   :  { %v7663_v40 = vpop.eup %7662  ;;  %v82_v41 = vmul.f32 %v7661_v39, %v79_v37  ;;  %vm87_vm2 = vweird.f32 %v7661_v39 }
  0x96   :  { %v97_v42 = vmul.f32 %v7663_v40, %v80_v38  ;;  %vm102_vm3 = vweird.f32 %v7663_v40  ;;  %vm88_vm5 = vmor %vm86_vm4, %vm87_vm2  ;;  %vm475_vm4 = vcmask 1040384  }
  0x97   :  { %v83_v43 = vsub.f32 1.0, %v82_v41  ;;  %vm103_vm7 = vmor %vm101_vm6, %vm102_vm3 }
  0x98   :  { %v98_v44 = vsub.f32 1.0, %v97_v42 }
  0x99   :  { %v84_v45 = vmul.f32 %v7661_v39, %v83_v43 }
  0x9a   :  { %v99_v47 = vmul.f32 %v7663_v40, %v98_v44 }
  0x9b   :  { %v85_v49 = vadd.f32 %v7661_v39, %v84_v45 }
  0x9c   :  { %v100_v52 = vadd.f32 %v7663_v40, %v99_v47 }
  0x9d   :  { %v89_v54 = vsel %vm88_vm5, %v7661_v39, %v85_v49  ;;  %vm478_vm5 = vcmask 1041408  }
  0x9e   :  { %v104_v55 = vsel %vm103_vm7, %v7663_v40, %v100_v52  ;;  %v94_v59 = vsel %vm91_vm9, %v93_v56, %v89_v54 }
  0x9f   :  { %v8237_v57 = vsel %vm106_vm8, %v108_v53, %v104_v55 }
  0xa0   :  { %v113_v58 = vrot.slane %v8237_v57, 7 }
  0xa2   :  { %v115_v60 = vsel %vm114_vm1, %v113_v58, %v94_v59 }
  0xa3   :  { %6818 = vmatmul.msk.f32.vlgmr.msrb.gmra.mxu1 %vm121_vm10, %v115_v60 }
  0xa4   :  { %274 = vmatpush.msrb.mxu1 %v8174_v3 }
  0xa6   :  { %275 = vmatpush.msrb.mxu1 %v8179_v4 }
  0xa8   :  { %276 = vmatpush.msrb.mxu1 %v8186_v5 }
  0xaa   :  { %277 = vmatpush.msrb.mxu1 %v8194_v6 }
 0x120   :  { %v141_v61 = vpop.f32.mrf.mxu1 }
 0x121   :  { %v142_v62 = vadd.f32 %v141_v61, %v119_v21 }
 0x123   :  { %v6819_v63 = vmul.f32 -1.442695, %v142_v62 }
 0x125   :  { %7664 = vpow2.f32 %v6819_v63 }
 0x12b   :  { %v7665_v0 = vpop.eup %7664 }
 0x12c   :  { %v147_v1 = vadd.f32 1.0, %v7665_v0 }
 0x12e   :  { %7666 = vrcp.f32 %v147_v1  ;;  %v159_v9 = vand.u32 2147483648, %v147_v1  ;;  %v157_v3 = vand.u32 2147483647, %v147_v1  ;;  %vm153_vm12 = vweird.f32 %v147_v1 }
 0x130   :  { %v160_v4 = vor.u32 1.1754944e-38, %v159_v9  ;;  %vm158_vm14 = vcmp.eq.f32.partialorder %v157_v3, 8.507059e+37 }
 0x134   :  { %v7667_v2 = vpop.eup %7666 }
 0x135   :  { %v149_v7 = vmul.f32 %v7667_v2, %v147_v1  ;;  %vm154_vm11 = vweird.f32 %v7667_v2 }
 0x136   :  { %vm155_vm13 = vmor %vm153_vm12, %vm154_vm11  ;;  %vm481_vm11 = vcmask 1042432  }
 0x137   :  { %v150_v8 = vsub.f32 1.0, %v149_v7 }
 0x139   :  { %v151_v10 = vmul.f32 %v7667_v2, %v150_v8 }
 0x13b   :  { %v152_v11 = vadd.f32 %v7667_v2, %v151_v10 }
 0x13d   :  { %v156_v5 = vsel %vm155_vm13, %v7667_v2, %v152_v11 }
 0x13e   :  { %v161_v6 = vsel %vm158_vm14, %v160_v4, %v156_v5 }
 0x13f   :  { %6820 = vmatmul.msk.f32.vlgmr.msra.gmra.mxu1 %vm121_vm10, %v161_v6  ;;  %v439_v23 = vrot.slane %v161_v6, 1  ;;  %v447_v28 = vperm.slane %v161_v6, 0 }
 0x141   :  { %v476_v37 = vsel %vm475_vm4, %v94_v59, %v447_v28 }
 0x1bc   :  { %v187_v12 = vpop.f32.mrf.mxu1 }
 0x1bd   :  { %v188_v13 = vadd.f32 %v187_v12, %v8220_v24  ;;  %v448_v24 = vperm.slane %v439_v23, 0 }
 0x1bf   :  { %v6821_v14 = vmul.f32 -1.442695, %v188_v13  ;;  %v477_v40 = vsel %vm475_vm4, %v8237_v57, %v448_v24 }
 0x1c1   :  { %7668 = vpow2.f32 %v6821_v14 }
 0x1c7   :  { %v7669_v15 = vpop.eup %7668 }
 0x1c8   :  { %v193_v16 = vadd.f32 1.0, %v7669_v15 }
 0x1ca   :  { %7670 = vrcp.f32 %v193_v16  ;;  %v205_v20 = vand.u32 2147483648, %v193_v16  ;;  %v203_v22 = vand.u32 2147483647, %v193_v16  ;;  %vm199_vm1 = vweird.f32 %v193_v16 }
 0x1cc   :  { %v206_v29 = vor.u32 1.1754944e-38, %v205_v20  ;;  %vm204_vm3 = vcmp.eq.f32.partialorder %v203_v22, 8.507059e+37 }
 0x1d0   :  { %v7671_v17 = vpop.eup %7670 }
 0x1d1   :  { %v195_v18 = vmul.f32 %v7671_v17, %v193_v16  ;;  %vm200_vm15 = vweird.f32 %v7671_v17 }
 0x1d2   :  { %vm201_vm2 = vmor %vm199_vm1, %vm200_vm15  ;;  %vm484_vm1 = vcmask 1043456  }
 0x1d3   :  { %v196_v19 = vsub.f32 1.0, %v195_v18 }
 0x1d5   :  { %v197_v21 = vmul.f32 %v7671_v17, %v196_v19 }
 0x1d7   :  { %v198_v26 = vadd.f32 %v7671_v17, %v197_v21 }
 0x1d9   :  { %v202_v30 = vsel %vm201_vm2, %v7671_v17, %v198_v26 }
 0x1da   :  { %v207_v32 = vsel %vm204_vm3, %v206_v29, %v202_v30 }
 0x1db   :  { %6822 = vmatmul.msk.f32.vlgmr.msra.gmra.mxu3 %vm121_vm10, %v207_v32  ;;  %v440_v35 = vrot.slane %v207_v32, 1  ;;  %v451_v36 = vperm.slane %v207_v32, 0 }
 0x1dd   :  { %v452_v38 = vperm.slane %v440_v35, 0  ;;  %v479_v39 = vsel %vm478_vm5, %v476_v37, %v451_v36 }
 0x1df   :  { %v480_v41 = vsel %vm478_vm5, %v477_v40, %v452_v38  ;;  %v502_v40 = vld [vmem:[%s11070_s0] sm:$0xff] }
 0x25e   :  { %v233_v42 = vpop.f32.mrf.mxu3 }
 0x25f   :  { %v234_v43 = vadd.f32 %v233_v42, %v8223_v25 }
 0x261   :  { %v6823_v44 = vmul.f32 -1.442695, %v234_v43 }
 0x263   :  { %7672 = vpow2.f32 %v6823_v44  ;;  %v503_v44 = vld [vmem:[%s11070_s0 + $0x8] sm:$0xff] }
 0x269   :  { %v7673_v45 = vpop.eup %7672 }
 0x26a   :  { %v239_v46 = vadd.f32 1.0, %v7673_v45  ;;  %v538_v45 = vsel %vm121_vm10, %v503_v44, 0.0 }
 0x26c   :  { %7674 = vrcp.f32 %v239_v46  ;;  %v251_v50 = vand.u32 2147483648, %v239_v46  ;;  %v249_v52 = vand.u32 2147483647, %v239_v46  ;;  %vm245_vm7 = vweird.f32 %v239_v46 }
 0x26e   :  { %v252_v54 = vor.u32 1.1754944e-38, %v251_v50  ;;  %vm250_vm9 = vcmp.eq.f32.partialorder %v249_v52, 8.507059e+37 }
 0x272   :  { %v7675_v47 = vpop.eup %7674 }
 0x273   :  { %v241_v48 = vmul.f32 %v7675_v47, %v239_v46  ;;  %vm246_vm6 = vweird.f32 %v7675_v47 }
 0x274   :  { %vm247_vm8 = vmor %vm245_vm7, %vm246_vm6  ;;  %vm487_vm6 = vcmask 1044480  }
 0x275   :  { %v242_v49 = vsub.f32 1.0, %v241_v48 }
 0x277   :  { %v243_v51 = vmul.f32 %v7675_v47, %v242_v49 }
 0x279   :  { %v244_v53 = vadd.f32 %v7675_v47, %v243_v51 }
 0x27b   :  { %v248_v55 = vsel %vm247_vm8, %v7675_v47, %v244_v53 }
 0x27c   :  { %v253_v56 = vsel %vm250_vm9, %v252_v54, %v248_v55 }
 0x27d   :  { %6824 = vmatmul.msk.f32.vlgmr.msrb.gmra.mxu1 %vm121_vm10, %v253_v56  ;;  %v441_v25 = vrot.slane %v253_v56, 1  ;;  %v455_v57 = vperm.slane %v253_v56, 0 }
 0x27f   :  { %v456_v58 = vperm.slane %v441_v25, 0  ;;  %v482_v59 = vsel %vm481_vm11, %v479_v39, %v455_v57 }
 0x281   :  { %v483_v60 = vsel %vm481_vm11, %v480_v41, %v456_v58  ;;  %v535_v41 = vsel %vm121_vm10, %v502_v40, 0.0 }
 0x282   :  { %536 = vadd.xlane.f32.xlu0 %v535_v41 }
 0x28a   :  { %539 = vadd.xlane.f32.xlu0 %v538_v45  ;;  %v506_v45 = vld [vmem:[%s11074_s4 + $0x10] sm:$0xff] }
 0x2fa   :  { %v279_v61 = vpop.f32.mrf.mxu1 }
 0x2fb   :  { %v280_v62 = vadd.f32 %v279_v61, %v8226_v27 }
 0x2fd   :  { %v6825_v63 = vmul.f32 -1.442695, %v280_v62  ;;  %v8103_v62 = vmov 32.0  }
 0x2ff   :  { %7676 = vpow2.f32 %v6825_v63 }
 0x305   :  { %v7677_v0 = vpop.eup %7676 }
 0x306   :  { %v285_v1 = vadd.f32 1.0, %v7677_v0 }
 0x308   :  { %7678 = vrcp.f32 %v285_v1  ;;  %v297_v9 = vand.u32 2147483648, %v285_v1  ;;  %v295_v3 = vand.u32 2147483647, %v285_v1  ;;  %vm291_vm13 = vweird.f32 %v285_v1 }
 0x30a   :  { %v298_v4 = vor.u32 1.1754944e-38, %v297_v9  ;;  %vm296_vm15 = vcmp.eq.f32.partialorder %v295_v3, 8.507059e+37  ;;  %v537_v9 = vpop.xlane.xlu0 %536 }
 0x30e   :  { %v7679_v2 = vpop.eup %7678 }
 0x30f   :  { %v287_v7 = vmul.f32 %v7679_v2, %v285_v1  ;;  %vm292_vm12 = vweird.f32 %v7679_v2 }
 0x310   :  { %vm293_vm14 = vmor %vm291_vm13, %vm292_vm12  ;;  %vm490_vm12 = vcmask 1045504  }
 0x311   :  { %v288_v8 = vsub.f32 1.0, %v287_v7 }
 0x313   :  { %v289_v10 = vmul.f32 %v7679_v2, %v288_v8 }
 0x315   :  { %v290_v11 = vadd.f32 %v7679_v2, %v289_v10 }
 0x317   :  { %v294_v5 = vsel %vm293_vm14, %v7679_v2, %v290_v11 }
 0x318   :  { %v299_v6 = vsel %vm296_vm15, %v298_v4, %v294_v5  ;;  %v540_v5 = vpop.xlane.xlu0 %539 }
 0x319   :  { %6826 = vmatmul.msk.f32.vlgmr.msrb.gmra.mxu0 %vm121_vm10, %v299_v6  ;;  %v442_v27 = vrot.slane %v299_v6, 1  ;;  %v459_v12 = vperm.slane %v299_v6, 0 }
 0x31b   :  { %v460_v13 = vperm.slane %v442_v27, 0  ;;  %v485_v14 = vsel %vm484_vm1, %v482_v59, %v459_v12 }
 0x31d   :  { %v486_v15 = vsel %vm484_vm1, %v483_v60, %v460_v13 }
 0x396   :  { %v325_v16 = vpop.f32.mrf.mxu0 }
 0x397   :  { %v326_v17 = vadd.f32 %v325_v16, %v8229_v31 }
 0x399   :  { %v6827_v18 = vmul.f32 -1.442695, %v326_v17 }
 0x39b   :  { %7680 = vpow2.f32 %v6827_v18  ;;  %v534_v18 = vld [vmem:[%s11077_s7] sm:$0x7] }
 0x3a1   :  { %v7681_v19 = vpop.eup %7680 }
 0x3a2   :  { %v331_v20 = vadd.f32 1.0, %v7681_v19 }
 0x3a4   :  { %7682 = vrcp.f32 %v331_v20  ;;  %v343_v26 = vand.u32 2147483648, %v331_v20  ;;  %v341_v29 = vand.u32 2147483647, %v331_v20  ;;  %vm337_vm3 = vweird.f32 %v331_v20 }
 0x3a6   :  { %v344_v24 = vor.u32 1.1754944e-38, %v343_v26  ;;  %vm342_vm5 = vcmp.eq.f32.partialorder %v341_v29, 8.507059e+37 }
 0x3aa   :  { %v7683_v21 = vpop.eup %7682 }
 0x3ab   :  { %v333_v22 = vmul.f32 %v7683_v21, %v331_v20  ;;  %vm338_vm2 = vweird.f32 %v7683_v21  ;;  %v8284_v20 = vperm.slane %v534_v18, 0 }
 0x3ac   :  { %vm339_vm4 = vmor %vm337_vm3, %vm338_vm2  ;;  %vm493_vm3 = vcmask 1046528  }
 0x3ad   :  { %v334_v23 = vsub.f32 1.0, %v333_v22 }
 0x3af   :  { %v335_v28 = vmul.f32 %v7683_v21, %v334_v23 }
 0x3b1   :  { %v336_v30 = vadd.f32 %v7683_v21, %v335_v28 }
 0x3b3   :  { %v340_v32 = vsel %vm339_vm4, %v7683_v21, %v336_v30 }
 0x3b4   :  { %v345_v35 = vsel %vm342_vm5, %v344_v24, %v340_v32 }
 0x3b5   :  { %6828 = vmatmul.msk.f32.vlgmr.msrb.gmra.mxu3 %vm121_vm10, %v345_v35  ;;  %v443_v31 = vrot.slane %v345_v35, 1  ;;  %v463_v36 = vperm.slane %v345_v35, 0 }
 0x3b7   :  { %v464_v37 = vperm.slane %v443_v31, 0  ;;  %v488_v38 = vsel %vm487_vm6, %v485_v14, %v463_v36 }
 0x3b9   :  { %v489_v39 = vsel %vm487_vm6, %v486_v15, %v464_v37 }
 0x438   :  { %v371_v42 = vpop.f32.mrf.mxu3 }
 0x439   :  { %v372_v43 = vadd.f32 %v371_v42, %v8232_v33 }
 0x43b   :  { %v6829_v46 = vmul.f32 -1.442695, %v372_v43 }
 0x43d   :  { %7684 = vpow2.f32 %v6829_v46 }
 0x443   :  { %v7685_v47 = vpop.eup %7684 }
 0x444   :  { %v377_v48 = vadd.f32 1.0, %v7685_v47 }
 0x446   :  { %7686 = vrcp.f32 %v377_v48  ;;  %v389_v52 = vand.u32 2147483648, %v377_v48  ;;  %v387_v54 = vand.u32 2147483647, %v377_v48  ;;  %vm383_vm8 = vweird.f32 %v377_v48 }
 0x447   :  { %7688 = vrcp.f32 %v8103_v62 }
 0x448   :  { %v390_v55 = vor.u32 1.1754944e-38, %v389_v52  ;;  %vm388_vm11 = vcmp.eq.f32.partialorder %v387_v54, 8.507059e+37 }
 0x44c   :  { %v7687_v49 = vpop.eup %7686 }
 0x44d   :  { %v379_v50 = vmul.f32 %v7687_v49, %v377_v48  ;;  %vm384_vm7 = vweird.f32 %v7687_v49  ;;  %v7689_v63 = vpop.eup %7688  ;;  %v505_v48 = vld [vmem:[%s11074_s4 + $0x8] sm:$0xff] }
 0x44e   :  { %vm385_vm9 = vmor %vm383_vm8, %vm384_vm7  ;;  %v548_v0 = vmul.f32 32.0, %v7689_v63  ;;  %vm552_vm13 = vweird.f32 %v7689_v63 }
 0x44f   :  { %v380_v51 = vsub.f32 1.0, %v379_v50  ;;  %v504_v50 = vld [vmem:[%s11074_s4] sm:$0xff] }
 0x450   :  { %v549_v1 = vsub.f32 1.0, %v548_v0 }
 0x451   :  { %v381_v53 = vmul.f32 %v7687_v49, %v380_v51 }
 0x452   :  { %v550_v2 = vmul.f32 %v7689_v63, %v549_v1 }
 0x453   :  { %v382_v33 = vadd.f32 %v7687_v49, %v381_v53 }
 0x454   :  { %v551_v7 = vadd.f32 %v7689_v63, %v550_v2 }
 0x455   :  { %v386_v56 = vsel %vm385_vm9, %v7687_v49, %v382_v33 }
 0x456   :  { %v391_v25 = vsel %vm388_vm11, %v390_v55, %v386_v56  ;;  %v8266_v8 = vsel %vm552_vm13, %v7689_v63, %v551_v7 }
 0x457   :  { %6830 = vmatmul.msk.f32.vlgmr.msra.gmra.mxu0 %vm121_vm10, %v391_v25  ;;  %v444_v57 = vrot.slane %v391_v25, 1  ;;  %v467_v58 = vperm.slane %v391_v25, 0  ;;  %v554_v10 = vmul.f32 %v8266_v8, %v537_v9  ;;  %v555_v6 = vmul.f32 %v8266_v8, %v540_v5 }
 0x459   :  { %v468_v59 = vperm.slane %v444_v57, 0  ;;  %v491_v60 = vsel %vm490_vm12, %v488_v38, %v467_v58  ;;  %v8269_v3 = vsub.f32 %v502_v40, %v554_v10  ;;  %v8275_v27 = vsub.f32 %v503_v44, %v555_v6  ;;  %v507_v44 = vld [vmem:[%s11074_s4 + $0x18] sm:$0xff] }
 0x45a   :  { %667 = vmatpush.msra.mxu1 %v507_v44 }
 0x45b   :  { %v492_v61 = vsel %vm490_vm12, %v489_v39, %v468_v59  ;;  %v562_v11 = vmul.f32 %v8269_v3, %v8269_v3  ;;  %v563_v12 = vmul.f32 %v8275_v27, %v8275_v27 }
 0x45c   :  { %668 = vmatpush.msra.mxu1 %v506_v45 }
 0x45d   :  { %v566_v4 = vsel %vm121_vm10, %v562_v11, 0.0  ;;  %v569_v13 = vsel %vm121_vm10, %v563_v12, 0.0 }
 0x45e   :  { %567 = vadd.xlane.f32.xlu2 %v566_v4  ;;  %669 = vmatpush.msra.mxu1 %v505_v48 }
 0x460   :  { %670 = vmatpush.msra.mxu1 %v504_v50 }
 0x466   :  { %570 = vadd.xlane.f32.xlu2 %v569_v13 }
 0x47e   :  { %636 = vrot.lane.b32.xlu2 %v8284_v20, %s8104_s26 }
 0x4d1   :  { %v568_v41 = vpop.xlane.xlu2 %567 }
 0x4d2   :  { %v578_v42 = vmul.f32 %v568_v41, %v8266_v8 }
 0x4d4   :  { %v417_v14 = vpop.f32.mrf.mxu0  ;;  %v582_v43 = vadd.f32 1e-05, %v578_v42 }
 0x4d5   :  { %v418_v15 = vadd.f32 %v417_v14, %v8235_v34 }
 0x4d6   :  { %vm592_vm4 = vweird.f32 %v582_v43 }
 0x4d7   :  { %v6831_v16 = vmul.f32 -1.442695, %v418_v15 }
 0x4d9   :  { %7690 = vpow2.f32 %v6831_v16  ;;  %v571_v53 = vpop.xlane.xlu2 %570 }
 0x4da   :  { %v579_v54 = vmul.f32 %v571_v53, %v8266_v8 }
 0x4dc   :  { %v583_v55 = vadd.f32 1e-05, %v579_v54 }
 0x4de   :  { %vm602_vm7 = vweird.f32 %v583_v55 }
 0x4df   :  { %v7691_v17 = vpop.eup %7690 }
 0x4e0   :  { %v423_v19 = vadd.f32 1.0, %v7691_v17 }
 0x4e1   :  { %v637_v62 = vpop.permute.xlu2 %636 }
 0x4e2   :  { %7692 = vrcp.f32 %v423_v19  ;;  %v435_v26 = vand.u32 2147483648, %v423_v19  ;;  %v433_v28 = vand.u32 2147483647, %v423_v19  ;;  %vm429_vm15 = vweird.f32 %v423_v19 }
 0x4e3   :  { %7694 = vrsqrt.f32 %v582_v43 }
 0x4e4   :  { %v436_v30 = vor.u32 1.1754944e-38, %v435_v26  ;;  %vm434_vm2 = vcmp.eq.f32.partialorder %v433_v28, 8.507059e+37  ;;  %7696 = vrsqrt.f32 %v583_v55 }
 0x4e8   :  { %v7693_v21 = vpop.eup %7692 }
 0x4e9   :  { %v425_v22 = vmul.f32 %v7693_v21, %v423_v19  ;;  %vm430_vm14 = vweird.f32 %v7693_v21  ;;  %v7695_v46 = vpop.eup %7694 }
 0x4ea   :  { %vm431_vm1 = vmor %vm429_vm15, %vm430_vm14  ;;  %v587_v47 = vmul.f32 %v7695_v46, %v582_v43  ;;  %vm593_vm5 = vweird.f32 %v7695_v46  ;;  %v7697_v57 = vpop.eup %7696 }
 0x4eb   :  { %v426_v23 = vsub.f32 1.0, %v425_v22  ;;  %vm594_vm6 = vmor %vm592_vm4, %vm593_vm5  ;;  %v597_v58 = vmul.f32 %v7697_v57, %v583_v55  ;;  %vm603_vm8 = vweird.f32 %v7697_v57 }
 0x4ec   :  { %v588_v49 = vmul.f32 %v7695_v46, %v587_v47  ;;  %vm604_vm9 = vmor %vm602_vm7, %vm603_vm8 }
 0x4ed   :  { %v427_v34 = vmul.f32 %v7693_v21, %v426_v23 }
 0x4ee   :  { %v589_v51 = vmul.f32 0.5, %v588_v49 }
 0x4ef   :  { %v428_v29 = vadd.f32 %v7693_v21, %v427_v34 }
 0x4f0   :  { %v590_v52 = vsub.f32 1.5, %v589_v51 }
 0x4f1   :  { %v432_v24 = vsel %vm431_vm1, %v7693_v21, %v428_v29 }
 0x4f2   :  { %v437_v32 = vsel %vm434_vm2, %v436_v30, %v432_v24  ;;  %v591_v33 = vmul.f32 %v7695_v46, %v590_v52  ;;  %vm846_vm2 = vcmask 392192  }
 0x4f3   :  { %v471_v35 = vperm.slane %v437_v32, 0  ;;  %v446_v31 = vrot.slane %v437_v32, 1 }
 0x4f4   :  { %v595_v56 = vsel %vm594_vm6, %v7695_v46, %v591_v33 }
 0x4f5   :  { %v8288_v36 = vsel %vm493_vm3, %v491_v60, %v471_v35  ;;  %v472_v37 = vperm.slane %v446_v31, 0  ;;  %v8311_v25 = vmul.f32 %v595_v56, %v8269_v3  ;;  %v598_v60 = vmul.f32 %v7697_v57, %v597_v58 }
 0x4f6   :  { %v541_v38 = vsel %vm121_vm10, %v8288_v36, 0.0 }
 0x4f7   :  { %542 = vadd.xlane.f32.xlu1 %v541_v38  ;;  %v8292_v39 = vsel %vm493_vm3, %v492_v61, %v472_v37  ;;  %v631_v59 = vmul.f32 %v8284_v20, %v8311_v25  ;;  %v599_v61 = vmul.f32 0.5, %v598_v60 }
 0x4f8   :  { %v544_v40 = vsel %vm121_vm10, %v8292_v39, 0.0 }
 0x4f9   :  { %v639_v63 = vadd.f32 %v637_v62, %v631_v59  ;;  %v600_v0 = vsub.f32 1.5, %v599_v61 }
 0x4fb   :  { %6832 = vmatmul.msk.f32.vlgmr.msra.gmra.mxu1 %vm121_vm10, %v639_v63  ;;  %v601_v1 = vmul.f32 %v7697_v57, %v600_v0 }
 0x4fd   :  { %v605_v2 = vsel %vm604_vm9, %v7697_v57, %v601_v1 }
 0x4fe   :  { %v8317_v7 = vmul.f32 %v605_v2, %v8275_v27 }
 0x4ff   :  { %545 = vadd.xlane.f32.xlu1 %v544_v40 }
 0x500   :  { %v632_v9 = vmul.f32 %v8284_v20, %v8317_v7 }
 0x502   :  { %v640_v10 = vadd.f32 %v637_v62, %v632_v9 }
 0x504   :  { %6833 = vmatmul.msk.f32.gmra.mxu1 %vm121_vm10, %v640_v10 }
 0x56a   :  { %v543_v3 = vpop.xlane.xlu1 %542 }
 0x56b   :  { %v556_v11 = vmul.f32 %v8266_v8, %v543_v3 }
 0x56d   :  { %v560_v4 = vsub.f32 %v8288_v36, %v556_v11 }
 0x56f   :  { %v564_v5 = vmul.f32 %v560_v4, %v560_v4 }
 0x571   :  { %v572_v6 = vsel %vm121_vm10, %v564_v5, 0.0 }
 0x572   :  { %573 = vadd.xlane.f32.xlu0 %v572_v6  ;;  %v546_v12 = vpop.xlane.xlu1 %545 }
 0x573   :  { %v557_v13 = vmul.f32 %v8266_v8, %v546_v12 }
 0x575   :  { %v561_v27 = vsub.f32 %v8292_v39, %v557_v13 }
 0x577   :  { %v565_v14 = vmul.f32 %v561_v27, %v561_v27 }
 0x578   :  { %v8334_v48 = vpop.f32.mrf.mxu1 }
 0x579   :  { %v575_v15 = vsel %vm121_vm10, %v565_v14, 0.0 }
 0x57a   :  { %576 = vadd.xlane.f32.xlu1 %v575_v15 }
 0x581   :  { %v8336_v49 = vpop.f32.mrf.mxu1 }
 0x582   :  { %v7331_v52 = vpack.i.bf16 %v8336_v49, %v8334_v48 }
 0x5e5   :  { %v574_v16 = vpop.xlane.xlu0 %573 }
 0x5e6   :  { %v580_v17 = vmul.f32 %v574_v16, %v8266_v8 }
 0x5e8   :  { %v584_v18 = vadd.f32 1e-05, %v580_v17 }
 0x5ea   :  { %7698 = vrsqrt.f32 %v584_v18  ;;  %vm612_vm12 = vweird.f32 %v584_v18 }
 0x5ed   :  { %v577_v19 = vpop.xlane.xlu1 %576 }
 0x5ee   :  { %v581_v21 = vmul.f32 %v577_v19, %v8266_v8 }
 0x5f0   :  { %v7699_v22 = vpop.eup %7698  ;;  %v585_v23 = vadd.f32 1e-05, %v581_v21  ;;  %v496_v21 = vld [vmem:[%s11072_s2] sm:$0xff] }
 0x5f1   :  { %v607_v26 = vmul.f32 %v7699_v22, %v584_v18  ;;  %vm613_vm11 = vweird.f32 %v7699_v22 }
 0x5f2   :  { %7700 = vrsqrt.f32 %v585_v23  ;;  %vm614_vm13 = vmor %vm612_vm12, %vm613_vm11  ;;  %vm622_vm15 = vweird.f32 %v585_v23 }
 0x5f3   :  { %v608_v34 = vmul.f32 %v7699_v22, %v607_v26 }
 0x5f5   :  { %v609_v28 = vmul.f32 0.5, %v608_v34 }
 0x5f7   :  { %v610_v29 = vsub.f32 1.5, %v609_v28 }
 0x5f8   :  { %v7701_v30 = vpop.eup %7700 }
 0x5f9   :  { %v611_v24 = vmul.f32 %v7699_v22, %v610_v29  ;;  %v617_v32 = vmul.f32 %v7701_v30, %v585_v23  ;;  %vm623_vm14 = vweird.f32 %v7701_v30 }
 0x5fa   :  { %vm624_vm1 = vmor %vm622_vm15, %vm623_vm14 }
 0x5fb   :  { %v618_v35 = vmul.f32 %v7701_v30, %v617_v32  ;;  %v615_v31 = vsel %vm614_vm13, %v7699_v22, %v611_v24  ;;  %v497_v32 = vld [vmem:[%s11072_s2 + $0x8] sm:$0xff] }
 0x5fc   :  { %v628_v37 = vmul.f32 %v615_v31, %v560_v4 }
 0x5fd   :  { %v619_v38 = vmul.f32 0.5, %v618_v35 }
 0x5fe   :  { %v633_v40 = vmul.f32 %v8284_v20, %v628_v37 }
 0x5ff   :  { %v620_v41 = vsub.f32 1.5, %v619_v38 }
 0x600   :  { %v641_v42 = vadd.f32 %v637_v62, %v633_v40 }
 0x601   :  { %v621_v43 = vmul.f32 %v7701_v30, %v620_v41 }
 0x602   :  { %6834 = vmatmul.msk.f32.gmra.mxu1 %vm121_vm10, %v641_v42 }
 0x603   :  { %v625_v44 = vsel %vm624_vm1, %v7701_v30, %v621_v43 }
 0x604   :  { %v629_v45 = vmul.f32 %v625_v44, %v561_v27  ;;  %v498_v44 = vld [vmem:[%s11072_s2 + $0x10] sm:$0xff] }
 0x606   :  { %v634_v46 = vmul.f32 %v8284_v20, %v629_v45 }
 0x608   :  { %v642_v47 = vadd.f32 %v637_v62, %v634_v46 }
 0x60a   :  { %6835 = vmatmul.msk.f32.gmra.mxu1 %vm121_vm10, %v642_v47 }
 0x67f   :  { %v678_v50 = vpop.f32.mrf.mxu1 }
 0x680   :  { %694 = vrot.lane.b32.xlu2 %v678_v50, %s8105_s13  ;;  %702 = vrot.lane.b32.xlu0 %v678_v50, %s8106_s14 }
 0x681   :  { %698 = vrot.lane.b32.xlu1 %v678_v50, %s8104_s26 }
 0x687   :  { %v681_v51 = vpop.f32.mrf.mxu1 }
 0x688   :  { %690 = vrot.lane.b32.xlu2 %v678_v50, %s8107_s1  ;;  %704 = vrot.lane.b32.xlu0 %v681_v51, %s8106_s14 }
 0x689   :  { %700 = vrot.lane.b32.xlu1 %v681_v51, %s8104_s26 }
 0x690   :  { %696 = vrot.lane.b32.xlu2 %v681_v51, %s8105_s13  ;;  %686 = vrot.lane.b32.xlu0 %v678_v50, %s8108_s15 }
 0x691   :  { %692 = vrot.lane.b32.xlu1 %v681_v51, %s8107_s1 }
 0x698   :  { %7332 = vrot.lane.b32.xlu2 %v7331_v52, %s8104_s26  ;;  %688 = vrot.lane.b32.xlu0 %v681_v51, %s8108_s15 }
 0x699   :  { %7342 = vrot.lane.b32.xlu1 %v7331_v52, %s8107_s1 }
 0x6a0   :  { %7347 = vrot.lane.b32.xlu2 %v7331_v52, %s8108_s15  ;;  %7327 = vrot.lane.b32.xlu0 %v7331_v52, %s8106_s14 }
 0x6a8   :  { %7337 = vrot.lane.b32.xlu0 %v7331_v52, %s8105_s13 }
 0x6da   :  { %v695_v53 = vpop.permute.xlu2 %694 }
 0x6e2   :  { %v691_v54 = vpop.permute.xlu2 %690 }
 0x6ea   :  { %v697_v57 = vpop.permute.xlu2 %696 }
 0x6f2   :  { %v703_v33 = vpop.permute.xlu0 %702  ;;  %v8363_v60 = vpop.permute.xlu2 %7332 }
 0x6f3   :  { %v699_v55 = vpop.permute.xlu1 %698  ;;  %6836 = vmatpush.xpose.msk.msra.mxu2 %vm43_vm0, %v703_v33  ;;  %v7334_v1 = vunpack.i.l.bf16 %v8363_v60 }
 0x6f7   :  { %6837 = vmatpush.xpose.msk.msra.mxu2 %vm43_vm0, %v699_v55 }
 0x6fa   :  { %v705_v56 = vpop.permute.xlu0 %704  ;;  %v8370_v63 = vpop.permute.xlu2 %7347 }
 0x6fb   :  { %6838 = vmatpush.xpose.msk.msra.mxu2 %vm43_vm0, %v695_v53  ;;  %6848 = vmatpush.xpose.msk.msra.mxu3 %vm43_vm0, %v705_v56  ;;  %v701_v58 = vpop.permute.xlu1 %700  ;;  %v7349_v2 = vunpack.i.l.bf16 %v8370_v63 }
 0x6ff   :  { %6839 = vmatpush.xpose.msk.msra.mxu2 %vm43_vm0, %v691_v54  ;;  %6849 = vmatpush.xpose.msk.msra.mxu3 %vm43_vm0, %v701_v58 }
 0x702   :  { %v687_v59 = vpop.permute.xlu0 %686 }
 0x703   :  { %6840 = vmatpush.xpose.msk.msra.mxu2 %vm43_vm0, %v687_v59  ;;  %6850 = vmatpush.xpose.msk.msra.mxu3 %vm43_vm0, %v697_v57  ;;  %v693_v61 = vpop.permute.xlu1 %692 }
 0x707   :  { %6841 = vmatpush.xpose.msk.msra.mxu2 %vm43_vm0, %v678_v50  ;;  %6851 = vmatpush.xpose.msk.msra.mxu3 %vm43_vm0, %v693_v61 }
 0x70a   :  { %v689_v62 = vpop.permute.xlu0 %688  ;;  %6842 = vmatmul.msk.f32.vlgmr.msra.gmra.mxu2 %vm43_vm0, %v678_v50 }
 0x70b   :  { %6852 = vmatpush.xpose.msk.msra.mxu3 %vm43_vm0, %v689_v62  ;;  %v8378_v4 = vpop.permute.xlu1 %7342 }
 0x70c   :  { %v7344_v6 = vunpack.i.l.bf16 %v8378_v4 }
 0x70f   :  { %6853 = vmatpush.xpose.msk.msra.mxu3 %vm43_vm0, %v681_v51 }
 0x712   :  { %v7328_v0 = vpop.permute.xlu0 %7327  ;;  %6843 = vmatmul.msk.f32.gmra.mxu2 %vm43_vm0, %v687_v59  ;;  %6854 = vmatmul.msk.f32.vlgmr.msra.gmra.mxu3 %vm43_vm0, %v681_v51 }
 0x713   :  { %v7330_v9 = vunpack.i.h.bf16 %v7328_v0  ;;  %v7329_v10 = vunpack.i.l.bf16 %v7328_v0 }
 0x715   :  { %v7361_v3 = vpack.i.bf16 %v7330_v9, %v7349_v2  ;;  %v7351_v11 = vpack.i.bf16 %v7334_v1, %v7329_v10 }
 0x717   :  { %7362 = vrot.lane.b32.xlu0 %v7361_v3, %s8109_s16  ;;  %7352 = vrot.lane.b32.xlu1 %v7351_v11, %s8109_s16 }
 0x71a   :  { %v8380_v5 = vpop.permute.xlu0 %7337  ;;  %6844 = vmatmul.msk.f32.gmra.mxu2 %vm43_vm0, %v691_v54  ;;  %6855 = vmatmul.msk.f32.gmra.mxu3 %vm43_vm0, %v689_v62  ;;  %v500_v62 = vld [vmem:[%s11072_s2 + $0x20] sm:$0xff] }
 0x71b   :  { %v7339_v12 = vunpack.i.l.bf16 %v8380_v5 }
 0x71d   :  { %v7356_v13 = vpack.i.bf16 %v7344_v6, %v7339_v12 }
 0x71f   :  { %7357 = vrot.lane.b32.xlu2 %v7356_v13, %s8109_s16 }
 0x722   :  { %6845 = vmatmul.msk.f32.gmra.mxu2 %vm43_vm0, %v695_v53  ;;  %6856 = vmatmul.msk.f32.gmra.mxu3 %vm43_vm0, %v693_v61 }
 0x72a   :  { %6846 = vmatmul.msk.f32.gmra.mxu2 %vm43_vm0, %v699_v55  ;;  %6857 = vmatmul.msk.f32.gmra.mxu3 %vm43_vm0, %v697_v57 }
 0x732   :  { %6847 = vmatmul.msk.f32.gmra.mxu2 %vm43_vm0, %v703_v33  ;;  %6858 = vmatmul.msk.f32.gmra.mxu3 %vm43_vm0, %v701_v58  ;;  %v499_v33 = vld [vmem:[%s11072_s2 + $0x18] sm:$0xff] }
 0x73a   :  { %6859 = vmatmul.msk.f32.gmra.mxu3 %vm43_vm0, %v705_v56 }
 0x779   :  { %v7358_v17 = vpop.permute.xlu2 %7357 }
 0x77a   :  { %v7359_v22 = vunpack.i.l.bf16 %v7358_v17  ;;  %v7360_v26 = vunpack.i.h.bf16 %v7358_v17 }
 0x789   :  { %v7363_v27 = vpop.permute.xlu0 %7362  ;;  %v7353_v14 = vpop.permute.xlu1 %7352 }
 0x78a   :  { %v7365_v15 = vunpack.i.h.bf16 %v7363_v27  ;;  %v7354_v16 = vunpack.i.l.bf16 %v7353_v14  ;;  %v7355_v18 = vunpack.i.h.bf16 %v7353_v14  ;;  %v7364_v28 = vunpack.i.l.bf16 %v7363_v27  ;;  %v501_v27 = vld [vmem:[%s11072_s2 + $0x28] sm:$0xff] }
 0x78c   :  { %1181 = vmatpush.msrb.mxu0 %v7354_v16  ;;  %1252 = vmatpush.msrb.mxu1 %v7365_v15 }
 0x78d   :  { %v757_v19 = vpop.f32.mrf.mxu2 }
 0x78e   :  { %v822_v23 = vmul.f32 0.4472136, %v757_v19  ;;  %1182 = vmatpush.msrb.mxu0 %v7355_v18 }
 0x790   :  { %1183 = vmatpush.msrb.mxu0 %v7359_v22  ;;  %v8397_v34 = vadd.f32 %v822_v23, %v496_v21 }
 0x792   :  { %1184 = vmatpush.msrb.mxu0 %v7360_v26  ;;  %v847_v29 = vsel %vm846_vm2, %v8397_v34, -inf }
 0x793   :  { %848 = vmax.xlane.f32.xlu2 %v847_v29 }
 0x794   :  { %1185 = vmatpush.msrb.mxu0 %v7364_v28  ;;  %v7335_v28 = vunpack.i.h.bf16 %v8363_v60 }
 0x795   :  { %v760_v30 = vpop.f32.mrf.mxu2  ;;  %v804_v24 = vpop.f32.mrf.mxu3 }
 0x796   :  { %v823_v35 = vmul.f32 0.4472136, %v760_v30  ;;  %v828_v31 = vmul.f32 0.4472136, %v804_v24  ;;  %v7366_v29 = vpack.i.bf16 %v7335_v28, %v8334_v48 }
 0x798   :  { %v8404_v37 = vadd.f32 %v823_v35, %v497_v32  ;;  %v8406_v38 = vadd.f32 %v828_v31, %v496_v21 }
 0x79a   :  { %v850_v40 = vsel %vm846_vm2, %v8404_v37, -inf  ;;  %v865_v41 = vsel %vm846_vm2, %v8406_v38, -inf }
 0x79b   :  { %851 = vmax.xlane.f32.xlu1 %v850_v40  ;;  %866 = vmax.xlane.f32.xlu0 %v865_v41 }
 0x79d   :  { %v763_v42 = vpop.f32.mrf.mxu2  ;;  %v807_v43 = vpop.f32.mrf.mxu3 }
 0x79e   :  { %v824_v45 = vmul.f32 0.4472136, %v763_v42  ;;  %v829_v46 = vmul.f32 0.4472136, %v807_v43 }
 0x7a0   :  { %v8415_v47 = vadd.f32 %v829_v46, %v497_v32  ;;  %v8417_v50 = vadd.f32 %v824_v45, %v498_v44 }
 0x7a2   :  { %v868_v51 = vsel %vm846_vm2, %v8415_v47, -inf  ;;  %v853_v52 = vsel %vm846_vm2, %v8417_v50, -inf }
 0x7a3   :  { %869 = vmax.xlane.f32.xlu1 %v868_v51  ;;  %854 = vmax.xlane.f32.xlu2 %v853_v52 }
 0x7a5   :  { %v766_v53 = vpop.f32.mrf.mxu2  ;;  %v810_v54 = vpop.f32.mrf.mxu3 }
 0x7a6   :  { %v825_v55 = vmul.f32 0.4472136, %v766_v53  ;;  %v830_v57 = vmul.f32 0.4472136, %v810_v54 }
 0x7a8   :  { %v8426_v56 = vadd.f32 %v825_v55, %v499_v33  ;;  %v8433_v2 = vadd.f32 %v830_v57, %v498_v44 }
 0x7aa   :  { %v856_v58 = vsel %vm846_vm2, %v8426_v56, -inf  ;;  %v871_v11 = vsel %vm846_vm2, %v8433_v2, -inf }
 0x7ab   :  { %857 = vmax.xlane.f32.xlu1 %v856_v58 }
 0x7ad   :  { %v769_v59 = vpop.f32.mrf.mxu2  ;;  %v813_v61 = vpop.f32.mrf.mxu3 }
 0x7ae   :  { %v826_v0 = vmul.f32 0.4472136, %v769_v59  ;;  %v831_v1 = vmul.f32 0.4472136, %v813_v61 }
 0x7b0   :  { %v8435_v9 = vadd.f32 %v826_v0, %v500_v62  ;;  %v8437_v10 = vadd.f32 %v831_v1, %v499_v33 }
 0x7b2   :  { %v859_v3 = vsel %vm846_vm2, %v8435_v9, -inf  ;;  %v874_v6 = vsel %vm846_vm2, %v8437_v10, -inf }
 0x7b3   :  { %860 = vmax.xlane.f32.xlu0 %v859_v3  ;;  %872 = vmax.xlane.f32.xlu1 %v871_v11  ;;  %v7340_v11 = vunpack.i.h.bf16 %v8380_v5  ;;  %v7350_v5 = vunpack.i.h.bf16 %v8370_v63 }
 0x7b4   :  { %875 = vmax.xlane.f32.xlu2 %v874_v6 }
 0x7b5   :  { %v772_v12 = vpop.f32.mrf.mxu2  ;;  %v816_v13 = vpop.f32.mrf.mxu3 }
 0x7b6   :  { %v827_v14 = vmul.f32 0.4472136, %v772_v12  ;;  %v832_v15 = vmul.f32 0.4472136, %v816_v13  ;;  %v7345_v13 = vunpack.i.h.bf16 %v8378_v4 }
 0x7b8   :  { %v8448_v16 = vadd.f32 %v827_v14, %v501_v27  ;;  %v8450_v17 = vadd.f32 %v832_v15, %v500_v62 }
 0x7ba   :  { %v862_v18 = vsel %vm846_vm2, %v8448_v16, -inf  ;;  %v877_v19 = vsel %vm846_vm2, %v8450_v17, -inf }
 0x7bb   :  { %863 = vmax.xlane.f32.xlu1 %v862_v18  ;;  %878 = vmax.xlane.f32.xlu0 %v877_v19 }
 0x7bd   :  { %v819_v21 = vpop.f32.mrf.mxu3 }
 0x7be   :  { %v833_v22 = vmul.f32 0.4472136, %v819_v21  ;;  %v7376_v21 = vpack.i.bf16 %v8336_v49, %v7350_v5 }
 0x7c0   :  { %v8456_v23 = vadd.f32 %v833_v22, %v501_v27  ;;  %v7371_v27 = vpack.i.bf16 %v7345_v13, %v7340_v11 }
 0x7c2   :  { %v880_v26 = vsel %vm846_vm2, %v8456_v23, -inf }
 0x7c3   :  { %881 = vmax.xlane.f32.xlu2 %v880_v26 }
 0x7d4   :  { %7367 = vrot.lane.b32.xlu1 %v7366_v29, %s8109_s16 }
 0x806   :  { %v849_v30 = vpop.xlane.xlu2 %848 }
 0x807   :  { %v883_v24 = vsub.f32 %v8397_v34, %v849_v30 }
 0x809   :  { %v895_v32 = vmul.f32 1.442695, %v883_v24 }
 0x80b   :  { %7702 = vpow2.f32 %v895_v32 }
 0x80e   :  { %v867_v35 = vpop.xlane.xlu0 %866  ;;  %v852_v31 = vpop.xlane.xlu1 %851 }
 0x80f   :  { %v889_v40 = vsub.f32 %v8406_v38, %v867_v35  ;;  %v884_v41 = vsub.f32 %v8404_v37, %v852_v31 }
 0x811   :  { %v8466_v42 = vpop.eup %7702  ;;  %v907_v43 = vmul.f32 1.442695, %v889_v40  ;;  %v897_v44 = vmul.f32 1.442695, %v884_v41 }
 0x812   :  { %v919_v48 = vsel %vm846_vm2, %v8466_v42, 0.0 }
 0x813   :  { %7704 = vpow2.f32 %v907_v43  ;;  %920 = vadd.xlane.f32.xlu0 %v919_v48 }
 0x814   :  { %7706 = vpow2.f32 %v897_v44 }
 0x816   :  { %v870_v60 = vpop.xlane.xlu1 %869  ;;  %v855_v34 = vpop.xlane.xlu2 %854 }
 0x817   :  { %v885_v45 = vsub.f32 %v8417_v50, %v855_v34  ;;  %v890_v37 = vsub.f32 %v8415_v47, %v870_v60 }
 0x819   :  { %v8471_v46 = vpop.eup %7704  ;;  %v899_v51 = vmul.f32 1.442695, %v885_v45  ;;  %v909_v54 = vmul.f32 1.442695, %v890_v37 }
 0x81a   :  { %v8473_v38 = vpop.eup %7706  ;;  %v937_v52 = vsel %vm846_vm2, %v8471_v46, 0.0 }
 0x81b   :  { %v922_v53 = vsel %vm846_vm2, %v8473_v38, 0.0  ;;  %938 = vadd.xlane.f32.xlu0 %v937_v52  ;;  %7708 = vpow2.f32 %v899_v51 }
 0x81c   :  { %923 = vadd.xlane.f32.xlu2 %v922_v53  ;;  %7710 = vpow2.f32 %v909_v54 }
 0x81e   :  { %v858_v33 = vpop.xlane.xlu1 %857 }
 0x81f   :  { %v886_v50 = vsub.f32 %v8426_v56, %v858_v33 }
 0x821   :  { %v901_v55 = vmul.f32 1.442695, %v886_v50  ;;  %v8481_v57 = vpop.eup %7708 }
 0x822   :  { %v925_v47 = vsel %vm846_vm2, %v8481_v57, 0.0  ;;  %v8485_v61 = vpop.eup %7710 }
 0x823   :  { %7712 = vpow2.f32 %v901_v55  ;;  %926 = vadd.xlane.f32.xlu0 %v925_v47  ;;  %v940_v3 = vsel %vm846_vm2, %v8485_v61, 0.0 }
 0x826   :  { %v861_v58 = vpop.xlane.xlu0 %860  ;;  %v873_v15 = vpop.xlane.xlu1 %872 }
 0x827   :  { %v876_v59 = vpop.xlane.xlu2 %875  ;;  %v891_v29 = vsub.f32 %v8433_v2, %v873_v15  ;;  %v887_v32 = vsub.f32 %v8435_v9, %v861_v58 }
 0x828   :  { %v892_v62 = vsub.f32 %v8437_v10, %v876_v59 }
 0x829   :  { %v8488_v0 = vpop.eup %7712  ;;  %v911_v30 = vmul.f32 1.442695, %v891_v29  ;;  %v903_v40 = vmul.f32 1.442695, %v887_v32 }
 0x82a   :  { %v913_v1 = vmul.f32 1.442695, %v892_v62  ;;  %v928_v56 = vsel %vm846_vm2, %v8488_v0, 0.0 }
 0x82b   :  { %929 = vadd.xlane.f32.xlu1 %v928_v56  ;;  %941 = vadd.xlane.f32.xlu0 %v940_v3 }
 0x82c   :  { %7714 = vpow2.f32 %v913_v1 }
 0x82e   :  { %v879_v6 = vpop.xlane.xlu0 %878  ;;  %v864_v4 = vpop.xlane.xlu1 %863 }
 0x82f   :  { %v893_v12 = vsub.f32 %v8450_v17, %v879_v6  ;;  %v888_v63 = vsub.f32 %v8448_v16, %v864_v4 }
 0x831   :  { %v915_v10 = vmul.f32 1.442695, %v893_v12  ;;  %v905_v24 = vmul.f32 1.442695, %v888_v63 }
 0x832   :  { %v8497_v14 = vpop.eup %7714 }
 0x833   :  { %7716 = vpow2.f32 %v915_v10  ;;  %v946_v18 = vsel %vm846_vm2, %v8497_v14, 0.0 }
 0x834   :  { %7372 = vrot.lane.b32.xlu2 %v7371_v27, %s8109_s16  ;;  %947 = vadd.xlane.f32.xlu1 %v946_v18  ;;  %7718 = vpow2.f32 %v911_v30 }
 0x835   :  { %7720 = vpow2.f32 %v905_v24 }
 0x836   :  { %v882_v35 = vpop.xlane.xlu2 %881  ;;  %7722 = vpow2.f32 %v903_v40 }
 0x837   :  { %v894_v49 = vsub.f32 %v8456_v23, %v882_v35 }
 0x839   :  { %v8502_v19 = vpop.eup %7716  ;;  %v917_v43 = vmul.f32 1.442695, %v894_v49 }
 0x83a   :  { %v949_v17 = vsel %vm846_vm2, %v8502_v19, 0.0  ;;  %v8512_v31 = vpop.eup %7718 }
 0x83b   :  { %v943_v41 = vsel %vm846_vm2, %v8512_v31, 0.0  ;;  %v8517_v2 = vpop.eup %7720  ;;  %7724 = vpow2.f32 %v917_v43 }
 0x83c   :  { %950 = vadd.xlane.f32.xlu1 %v949_v17  ;;  %v934_v16 = vsel %vm846_vm2, %v8517_v2, 0.0  ;;  %v8521_v9 = vpop.eup %7722 }
 0x83d   :  { %v931_v23 = vsel %vm846_vm2, %v8521_v9, 0.0 }
 0x83f   :  { %7377 = vrot.lane.b32.xlu0 %v7376_v21, %s8109_s16 }
 0x841   :  { %v8523_v44 = vpop.eup %7724 }
 0x842   :  { %v952_v48 = vsel %vm846_vm2, %v8523_v44, 0.0 }
 0x846   :  { %v7368_v22 = vpop.permute.xlu1 %7367 }
 0x847   :  { %v7370_v26 = vunpack.i.h.bf16 %v7368_v22  ;;  %v7369_v28 = vunpack.i.l.bf16 %v7368_v22 }
 0x849   :  { %1186 = vmatpush.msrb.mxu0 %v7369_v28  ;;  %1253 = vmatpush.msrb.mxu1 %v7370_v26 }
 0x85d   :  { %944 = vadd.xlane.f32.xlu2 %v943_v41 }
 0x865   :  { %935 = vadd.xlane.f32.xlu2 %v934_v16 }
 0x869   :  { %932 = vadd.xlane.f32.xlu0 %v931_v23 }
 0x86d   :  { %953 = vadd.xlane.f32.xlu2 %v952_v48 }
 0x886   :  { %v921_v60 = vpop.xlane.xlu0 %920 }
 0x887   :  { %7726 = vrcp.f32 %v921_v60  ;;  %v966_v53 = vand.u32 2147483648, %v921_v60  ;;  %v964_v33 = vand.u32 2147483647, %v921_v60  ;;  %vm960_vm4 = vweird.f32 %v921_v60 }
 0x889   :  { %v967_v55 = vor.u32 1.1754944e-38, %v966_v53  ;;  %vm965_vm6 = vcmp.eq.f32.partialorder %v964_v33, 8.507059e+37 }
 0x88d   :  { %v7727_v34 = vpop.eup %7726 }
 0x88e   :  { %v956_v45 = vmul.f32 %v7727_v34, %v921_v60  ;;  %v8529_v51 = vpop.xlane.xlu0 %938  ;;  %vm961_vm3 = vweird.f32 %v7727_v34 }
 0x88f   :  { %v924_v37 = vpop.xlane.xlu2 %923  ;;  %vm962_vm5 = vmor %vm960_vm4, %vm961_vm3 }
 0x890   :  { %v957_v52 = vsub.f32 1.0, %v956_v45  ;;  %7728 = vrcp.f32 %v924_v37  ;;  %v981_v13 = vand.u32 2147483648, %v924_v37  ;;  %v979_v27 = vand.u32 2147483647, %v924_v37 }
 0x891   :  { %7730 = vrcp.f32 %v8529_v51  ;;  %vm975_vm8 = vweird.f32 %v924_v37 }
 0x892   :  { %v958_v54 = vmul.f32 %v7727_v34, %v957_v52  ;;  %v982_v4 = vor.u32 1.1754944e-38, %v981_v13  ;;  %vm980_vm11 = vcmp.eq.f32.partialorder %v979_v27, 8.507059e+37 }
 0x894   :  { %v959_v50 = vadd.f32 %v7727_v34, %v958_v54 }
 0x896   :  { %v7729_v47 = vpop.eup %7728  ;;  %v963_v58 = vsel %vm962_vm5, %v7727_v34, %v959_v50  ;;  %v927_v62 = vpop.xlane.xlu0 %926 }
 0x897   :  { %v971_v59 = vmul.f32 %v7729_v47, %v924_v37  ;;  %v7373_v1 = vpop.permute.xlu2 %7372  ;;  %v968_v56 = vsel %vm965_vm6, %v967_v55, %v963_v58  ;;  %7732 = vrcp.f32 %v927_v62  ;;  %vm976_vm7 = vweird.f32 %v7729_v47  ;;  %v8534_v15 = vpop.eup %7730 }
 0x898   :  { %v7374_v3 = vunpack.i.l.bf16 %v7373_v1  ;;  %v969_v6 = vmul.f32 %v8466_v42, %v968_v56  ;;  %v7375_v12 = vunpack.i.h.bf16 %v7373_v1  ;;  %vm977_vm9 = vmor %vm975_vm8, %vm976_vm7  ;;  %v1046_v26 = vmul.f32 %v8534_v15, %v8529_v51 }
 0x899   :  { %v972_v11 = vsub.f32 1.0, %v971_v59  ;;  %v996_v63 = vand.u32 2147483648, %v927_v62  ;;  %v994_v32 = vand.u32 2147483647, %v927_v62  ;;  %vm990_vm13 = vweird.f32 %v927_v62 }
 0x89a   :  { %1254 = vmatpush.msrb.mxu1 %v7374_v3  ;;  %6860 = vmatmul.msk.f32.vlgmr.msrb.gmra.mxu0 %vm846_vm2, %v969_v6  ;;  %v1047_v35 = vsub.f32 1.0, %v1046_v26  ;;  %vm1051_vm3 = vweird.f32 %v8534_v15  ;;  %v1056_v55 = vand.u32 2147483648, %v8529_v51  ;;  %vm1050_vm6 = vweird.f32 %v8529_v51 }
 0x89b   :  { %v973_v10 = vmul.f32 %v7729_v47, %v972_v11  ;;  %v997_v16 = vor.u32 1.1754944e-38, %v996_v63  ;;  %vm995_vm15 = vcmp.eq.f32.partialorder %v994_v32, 8.507059e+37  ;;  %vm1052_vm8 = vmor %vm1050_vm6, %vm1051_vm3 }
 0x89c   :  { %1255 = vmatpush.msrb.mxu1 %v7375_v12  ;;  %v1048_v48 = vmul.f32 %v8534_v15, %v1047_v35  ;;  %v1057_v3 = vor.u32 1.1754944e-38, %v1056_v55 }
 0x89d   :  { %v974_v18 = vadd.f32 %v7729_v47, %v973_v10  ;;  %v7733_v5 = vpop.eup %7732 }
 0x89e   :  { %v930_v17 = vpop.xlane.xlu1 %929  ;;  %v986_v21 = vmul.f32 %v7733_v5, %v927_v62  ;;  %v8536_v42 = vpop.xlane.xlu0 %941  ;;  %vm991_vm12 = vweird.f32 %v7733_v5  ;;  %v1049_v54 = vadd.f32 %v8534_v15, %v1048_v48 }
 0x89f   :  { %7734 = vrcp.f32 %v930_v17  ;;  %v978_v22 = vsel %vm977_vm9, %v7729_v47, %v974_v18  ;;  %vm992_vm14 = vmor %vm990_vm13, %vm991_vm12  ;;  %v1011_v37 = vand.u32 2147483648, %v930_v17  ;;  %v1009_v53 = vand.u32 2147483647, %v930_v17 }
 0x8a0   :  { %7736 = vrcp.f32 %v8536_v42  ;;  %v983_v28 = vsel %vm980_vm11, %v982_v4, %v978_v22  ;;  %v987_v29 = vsub.f32 1.0, %v986_v21  ;;  %vm1005_vm4 = vweird.f32 %v930_v17 }
 0x8a1   :  { %v984_v30 = vmul.f32 %v8473_v38, %v983_v28  ;;  %v1012_v47 = vor.u32 1.1754944e-38, %v1011_v37  ;;  %vm1010_vm7 = vcmp.eq.f32.partialorder %v1009_v53, 8.507059e+37  ;;  %v1053_v62 = vsel %vm1052_vm8, %v8534_v15, %v1049_v54 }
 0x8a2   :  { %v988_v24 = vmul.f32 %v7733_v5, %v987_v29  ;;  %vm1065_vm12 = vweird.f32 %v8536_v42 }
 0x8a3   :  { %6861 = vmatmul.msk.f32.gmra.mxu0 %vm846_vm2, %v984_v30 }
 0x8a4   :  { %v989_v40 = vadd.f32 %v7733_v5, %v988_v24 }
 0x8a5   :  { %v7735_v49 = vpop.eup %7734 }
 0x8a6   :  { %v7737_v41 = vpop.eup %7736  ;;  %v1001_v43 = vmul.f32 %v7735_v49, %v930_v17  ;;  %v993_v23 = vsel %vm992_vm14, %v7733_v5, %v989_v40  ;;  %vm1006_vm1 = vweird.f32 %v7735_v49 }
 0x8a7   :  { %v1061_v38 = vmul.f32 %v7737_v41, %v8536_v42  ;;  %v998_v34 = vsel %vm995_vm15, %v997_v16, %v993_v23  ;;  %vm1007_vm5 = vmor %vm1005_vm4, %vm1006_vm1  ;;  %vm1066_vm11 = vweird.f32 %v7737_v41  ;;  %v948_v4 = vpop.xlane.xlu1 %947 }
 0x8a8   :  { %v1002_v60 = vsub.f32 1.0, %v1001_v43  ;;  %v999_v45 = vmul.f32 %v8481_v57, %v998_v34  ;;  %v1054_v57 = vand.u32 2147483647, %v8529_v51  ;;  %v1071_v51 = vand.u32 2147483648, %v8536_v42  ;;  %vm1067_vm13 = vmor %vm1065_vm12, %vm1066_vm11 }
 0x8a9   :  { %v1062_v33 = vsub.f32 1.0, %v1061_v38  ;;  %7738 = vrcp.f32 %v948_v4  ;;  %vm1095_vm6 = vweird.f32 %v948_v4  ;;  %v1099_v54 = vand.u32 2147483647, %v948_v4 }
 0x8aa   :  { %v1003_v52 = vmul.f32 %v7735_v49, %v1002_v60  ;;  %vm1055_vm9 = vcmp.eq.f32.partialorder %v1054_v57, 8.507059e+37  ;;  %v1072_v18 = vor.u32 1.1754944e-38, %v1071_v51 }
 0x8ab   :  { %6862 = vmatmul.msk.f32.gmra.mxu0 %vm846_vm2, %v999_v45  ;;  %v1063_v56 = vmul.f32 %v7737_v41, %v1062_v33  ;;  %v1058_v12 = vsel %vm1055_vm9, %v1057_v3, %v1053_v62  ;;  %vm1100_vm8 = vcmp.eq.f32.partialorder %v1099_v54, 8.507059e+37 }
 0x8ac   :  { %v1004_v50 = vadd.f32 %v7735_v49, %v1003_v52  ;;  %v1059_v27 = vmul.f32 %v8471_v46, %v1058_v12  ;;  %v1101_v52 = vand.u32 2147483648, %v948_v4 }
 0x8ad   :  { %v1064_v13 = vadd.f32 %v7737_v41, %v1063_v56 }
 0x8ae   :  { %v1008_v58 = vsel %vm1007_vm5, %v7735_v49, %v1004_v50 }
 0x8af   :  { %v1013_v59 = vsel %vm1010_vm7, %v1012_v47, %v1008_v58  ;;  %v1068_v15 = vsel %vm1067_vm13, %v7737_v41, %v1064_v13  ;;  %v7739_v21 = vpop.eup %7738  ;;  %v8562_v46 = vpop.xlane.xlu1 %950  ;;  %v1102_v58 = vor.u32 1.1754944e-38, %v1101_v52 }
 0x8b0   :  { %v1014_v1 = vmul.f32 %v8488_v0, %v1013_v59  ;;  %v1069_v0 = vand.u32 2147483647, %v8536_v42  ;;  %v1091_v42 = vmul.f32 %v7739_v21, %v948_v4  ;;  %vm1096_vm4 = vweird.f32 %v7739_v21 }
 0x8b1   :  { %v7378_v11 = vpop.permute.xlu0 %7377  ;;  %vm1097_vm7 = vmor %vm1095_vm6, %vm1096_vm4  ;;  %v1116_v56 = vand.u32 2147483648, %v8562_v46  ;;  %vm1110_vm12 = vweird.f32 %v8562_v46 }
 0x8b2   :  { %v7379_v6 = vunpack.i.l.bf16 %v7378_v11  ;;  %v7380_v10 = vunpack.i.h.bf16 %v7378_v11  ;;  %vm1070_vm14 = vcmp.eq.f32.partialorder %v1069_v0, 8.507059e+37  ;;  %v1092_v28 = vsub.f32 1.0, %v1091_v42 }
 0x8b3   :  { %6863 = vmatmul.msk.f32.gmra.mxu0 %vm846_vm2, %v1014_v1  ;;  %v1073_v5 = vsel %vm1070_vm14, %v1072_v18, %v1068_v15 }
 0x8b4   :  { %1256 = vmatpush.msrb.mxu1 %v7379_v6  ;;  %v1074_v17 = vmul.f32 %v8485_v61, %v1073_v5  ;;  %v1093_v32 = vmul.f32 %v7739_v21, %v1092_v28 }
 0x8b6   :  { %1257 = vmatpush.msrb.mxu1 %v7380_v10  ;;  %v1094_v34 = vadd.f32 %v7739_v21, %v1093_v32 }
 0x8b7   :  { %6866 = vmatmul.msk.f32.vlgmr.msrb.gmra.mxu1 %vm846_vm2, %v1059_v27  ;;  %v1114_v27 = vand.u32 2147483647, %v8562_v46 }
 0x8b8   :  { %v1098_v50 = vsel %vm1097_vm7, %v7739_v21, %v1094_v34 }
 0x8b9   :  { %v1103_v1 = vsel %vm1100_vm8, %v1102_v58, %v1098_v50  ;;  %vm1115_vm4 = vcmp.eq.f32.partialorder %v1114_v27, 8.507059e+37 }
 0x8ba   :  { %v1104_v51 = vmul.f32 %v8497_v14, %v1103_v1 }
 0x8bf   :  { %6867 = vmatmul.msk.f32.gmra.mxu1 %vm846_vm2, %v1074_v17  ;;  %v1117_v17 = vor.u32 1.1754944e-38, %v1116_v56 }
 0x8d0   :  { %v945_v22 = vpop.xlane.xlu2 %944 }
 0x8d1   :  { %7740 = vrcp.f32 %v945_v22  ;;  %v1086_v24 = vand.u32 2147483648, %v945_v22  ;;  %v1084_v40 = vand.u32 2147483647, %v945_v22  ;;  %vm1080_vm1 = vweird.f32 %v945_v22 }
 0x8d2   :  { %7742 = vrcp.f32 %v8562_v46 }
 0x8d3   :  { %v1087_v23 = vor.u32 1.1754944e-38, %v1086_v24  ;;  %vm1085_vm5 = vcmp.eq.f32.partialorder %v1084_v40, 8.507059e+37 }
 0x8d7   :  { %v7741_v26 = vpop.eup %7740 }
 0x8d8   :  { %v1076_v29 = vmul.f32 %v7741_v26, %v945_v22  ;;  %v8565_v30 = vpop.xlane.xlu2 %935  ;;  %v8567_v63 = vpop.eup %7742  ;;  %vm1081_vm15 = vweird.f32 %v7741_v26 }
 0x8d9   :  { %7744 = vrcp.f32 %v8565_v30  ;;  %v1106_v35 = vmul.f32 %v8567_v63, %v8562_v46  ;;  %vm1082_vm3 = vmor %vm1080_vm1, %vm1081_vm15  ;;  %vm1111_vm9 = vweird.f32 %v8567_v63  ;;  %v1041_v22 = vand.u32 2147483648, %v8565_v30 }
 0x8da   :  { %v1077_v61 = vsub.f32 1.0, %v1076_v29  ;;  %vm8590_vm14 = vmor %vm1110_vm12, %vm1111_vm9  ;;  %v1039_v28 = vand.u32 2147483647, %v8565_v30 }
 0x8db   :  { %v1107_v48 = vsub.f32 1.0, %v1106_v35  ;;  %v1042_v32 = vor.u32 1.1754944e-38, %v1041_v22 }
 0x8dc   :  { %v1078_v49 = vmul.f32 %v7741_v26, %v1077_v61  ;;  %v933_v41 = vpop.xlane.xlu0 %932  ;;  %vm1040_vm9 = vcmp.eq.f32.partialorder %v1039_v28, 8.507059e+37 }
 0x8dd   :  { %7746 = vrcp.f32 %v933_v41  ;;  %v1108_v55 = vmul.f32 %v8567_v63, %v1107_v48  ;;  %v1026_v3 = vand.u32 2147483648, %v933_v41  ;;  %v1024_v12 = vand.u32 2147483647, %v933_v41  ;;  %v515_v48 = vld [vmem:[%s11076_s6 + $0x18] sm:$0xff] }
 0x8de   :  { %v1079_v43 = vadd.f32 %v7741_v26, %v1078_v49  ;;  %vm1020_vm13 = vweird.f32 %v933_v41 }
 0x8df   :  { %v8572_v16 = vpop.eup %7744  ;;  %v1109_v11 = vadd.f32 %v8567_v63, %v1108_v55  ;;  %v1027_v18 = vor.u32 1.1754944e-38, %v1026_v3  ;;  %vm1025_vm1 = vcmp.eq.f32.partialorder %v1024_v12, 8.507059e+37 }
 0x8e0   :  { %v8574_v60 = vpop.xlane.xlu2 %953  ;;  %v1083_v38 = vsel %vm1082_vm3, %v7741_v26, %v1079_v43  ;;  %v1031_v45 = vmul.f32 %v8572_v16, %v8565_v30  ;;  %vm1036_vm3 = vweird.f32 %v8572_v16 }
 0x8e1   :  { %7748 = vrcp.f32 %v8574_v60  ;;  %v1088_v37 = vsel %vm1085_vm5, %v1087_v23, %v1083_v38  ;;  %v1113_v5 = vsel %vm8590_vm14, %v8567_v63, %v1109_v11  ;;  %vm1035_vm5 = vweird.f32 %v8565_v30 }
 0x8e2   :  { %v1089_v53 = vmul.f32 %v8512_v31, %v1088_v37  ;;  %v1032_v47 = vsub.f32 1.0, %v1031_v45  ;;  %v1118_v26 = vsel %vm1115_vm4, %v1117_v17, %v1113_v5  ;;  %vm1037_vm6 = vmor %vm1035_vm5, %vm1036_vm3  ;;  %v1131_v61 = vand.u32 2147483648, %v8574_v60  ;;  %v517_v37 = vld [vmem:[%s11076_s6 + $0x28] sm:$0xff] }
 0x8e3   :  { %v7747_v33 = vpop.eup %7746  ;;  %v1119_v24 = vmul.f32 %v8502_v19, %v1118_v26  ;;  %vm1125_vm8 = vweird.f32 %v8574_v60  ;;  %v512_v19 = vld [vmem:[%s11076_s6] sm:$0xff] }
 0x8e4   :  { %6868 = vmatmul.msk.f32.gmra.mxu1 %vm846_vm2, %v1089_v53  ;;  %v1016_v57 = vmul.f32 %v7747_v33, %v933_v41  ;;  %vm1021_vm11 = vweird.f32 %v7747_v33  ;;  %v1033_v13 = vmul.f32 %v8572_v16, %v1032_v47  ;;  %v1132_v49 = vor.u32 1.1754944e-38, %v1131_v61  ;;  %1327 = vmatpush.msrb.mxu2 %v512_v19  ;;  %v510_v19 = vld [vmem:[%s11075_s5 + $0x10] sm:$0xff] }
 0x8e5   :  { %vm1022_vm15 = vmor %vm1020_vm13, %vm1021_vm11 }
 0x8e6   :  { %v1017_v62 = vsub.f32 1.0, %v1016_v57  ;;  %v1034_v21 = vadd.f32 %v8572_v16, %v1033_v13  ;;  %1449 = vmatpush.msra.mxu2 %v517_v37 }
 0x8e7   :  { %v7749_v59 = vpop.eup %7748 }
 0x8e8   :  { %v1121_v31 = vmul.f32 %v7749_v59, %v8574_v60  ;;  %v1018_v6 = vmul.f32 %v7747_v33, %v1017_v62  ;;  %vm1126_vm7 = vweird.f32 %v7749_v59  ;;  %v1038_v63 = vsel %vm1037_vm6, %v8572_v16, %v1034_v21  ;;  %v513_v16 = vld [vmem:[%s11076_s6 + $0x8] sm:$0xff] }
 0x8e9   :  { %vm1127_vm11 = vmor %vm1125_vm8, %vm1126_vm7  ;;  %v1043_v30 = vsel %vm1040_vm9, %v1042_v32, %v1038_v63  ;;  %1298 = vmatpush.msra.mxu0 %v513_v16 }
 0x8ea   :  { %v1122_v10 = vsub.f32 1.0, %v1121_v31  ;;  %v1019_v0 = vadd.f32 %v7747_v33, %v1018_v6  ;;  %v1044_v40 = vmul.f32 %v8517_v2, %v1043_v30  ;;  %v514_v2 = vld [vmem:[%s11076_s6 + $0x10] sm:$0xff] }
 0x8eb   :  { %1356 = vmatpush.msrb.mxu3 %v514_v2  ;;  %1387 = vmatpush.msrb.mxu0 %v515_v48  ;;  %v533_v48 = vld [vmem:[%s11076_s6 + $0xa8] sm:$0xff] }
 0x8ec   :  { %6869 = vmatmul.msk.f32.gmra.mxu1 %vm846_vm2, %v1104_v51  ;;  %v1123_v14 = vmul.f32 %v7749_v59, %v1122_v10  ;;  %v1023_v4 = vsel %vm1022_vm15, %v7747_v33, %v1019_v0  ;;  %v8648_v51 = vld [vmem:[%s11077_s7] sm:$0x7] }
 0x8ed   :  { %v1028_v46 = vsel %vm1025_vm1, %v1027_v18, %v1023_v4  ;;  %v1459_v27 = vperm.slane %v8648_v51, 1 }
 0x8ee   :  { %v1029_v42 = vmul.f32 %v8521_v9, %v1028_v46  ;;  %v1124_v29 = vadd.f32 %v7749_v59, %v1123_v14  ;;  %v1129_v9 = vand.u32 2147483647, %v8574_v60  ;;  %v516_v60 = vld [vmem:[%s11076_s6 + $0x20] sm:$0xff] }
 0x8ef   :  { %1418 = vmatpush.msra.mxu1 %v516_v60  ;;  %v531_v60 = vld [vmem:[%s11076_s6 + $0x98] sm:$0xff] }
 0x8f0   :  { %6864 = vmatmul.msk.f32.gmra.mxu0 %vm846_vm2, %v1029_v42  ;;  %v1128_v35 = vsel %vm1127_vm11, %v7749_v59, %v1124_v29  ;;  %vm1130_vm12 = vcmp.eq.f32.partialorder %v1129_v9, 8.507059e+37 }
 0x8f1   :  { %v1133_v41 = vsel %vm1130_vm12, %v1132_v49, %v1128_v35 }
 0x8f2   :  { %v1134_v43 = vmul.f32 %v8523_v44, %v1133_v41  ;;  %v511_v41 = vld [vmem:[%s11075_s5 + $0x18] sm:$0xff] }
 0x8f3   :  { %1537 = vmatpush.msra.mxu3 %v511_v41 }
 0x8f4   :  { %6870 = vmatmul.msk.f32.gmra.mxu1 %vm846_vm2, %v1119_v24 }
 0x8f5   :  { %1538 = vmatpush.msra.mxu3 %v510_v19 }
 0x8f8   :  { %6865 = vmatmul.msk.f32.gmra.mxu0 %vm846_vm2, %v1044_v40 }
 0x8fc   :  { %6871 = vmatmul.msk.f32.gmra.mxu1 %vm846_vm2, %v1134_v43  ;;  %v509_v43 = vld [vmem:[%s11075_s5 + $0x8] sm:$0xff] }
 0x8fd   :  { %1539 = vmatpush.msra.mxu3 %v509_v43 }
 0x917   :  { %v1188_v23 = vpop.f32.mrf.mxu0 }
 0x918   :  { %6874 = vmatmul.msk.f32.vlgmr.msrb.gmra.mxu2 %vm43_vm0, %v1188_v23 }
 0x920   :  { %v1191_v44 = vpop.f32.mrf.mxu0 }
 0x921   :  { %6872 = vmatmul.msk.f32.vlgmr.msra.gmra.mxu0 %vm43_vm0, %v1191_v44  ;;  %v532_v44 = vld [vmem:[%s11076_s6 + $0xa0] sm:$0xff] }
 0x922   :  { %1554 = vmatpush.msra.mxu0 %v533_v48 }
 0x924   :  { %1555 = vmatpush.msra.mxu0 %v532_v44 }
 0x926   :  { %1556 = vmatpush.msra.mxu0 %v531_v60 }
 0x928   :  { %v1194_v38 = vpop.f32.mrf.mxu0 }
 0x929   :  { %6876 = vmatmul.msk.f32.vlgmr.msrb.gmra.mxu3 %vm43_vm0, %v1194_v38 }
 0x930   :  { %v1197_v52 = vpop.f32.mrf.mxu0 }
 0x934   :  { %v1259_v34 = vpop.f32.mrf.mxu1 }
 0x935   :  { %6875 = vmatmul.msk.f32.gmra.mxu2 %vm43_vm0, %v1259_v34 }
 0x93c   :  { %v1262_v45 = vpop.f32.mrf.mxu1 }
 0x93d   :  { %6873 = vmatmul.msk.f32.gmra.mxu0 %vm43_vm0, %v1262_v45  ;;  %v530_v45 = vld [vmem:[%s11076_s6 + $0x90] sm:$0xff] }
 0x93e   :  { %1557 = vmatpush.msra.mxu0 %v530_v45 }
 0x945   :  { %6878 = vmatmul.msk.f32.vlgmr.msrb.gmra.mxu0 %vm43_vm0, %v1197_v52 }
 0x961   :  { %v1265_v53 = vpop.f32.mrf.mxu1 }
 0x962   :  { %6877 = vmatmul.msk.f32.gmra.mxu3 %vm43_vm0, %v1265_v53  ;;  %v529_v53 = vld [vmem:[%s11076_s6 + $0x88] sm:$0xff] }
 0x963   :  { %1558 = vmatpush.msra.mxu0 %v529_v53  ;;  %v6889_v53 = vld [vmem:[%s11074_s4 + $0x38] sm:$0xff] }
 0x964   :  { %1695 = vmatpush.msrb.mxu1 %v6889_v53 }
 0x969   :  { %v1268_v54 = vpop.f32.mrf.mxu1 }
 0x96a   :  { %6879 = vmatmul.msk.f32.gmra.mxu0 %vm43_vm0, %v1268_v54 }
 0x96d   :  { %v1200_v33 = vpop.f32.mrf.mxu0 }
 0x96e   :  { %6880 = vmatmul.msk.f32.vlgmr.msra.gmra.mxu1 %vm43_vm0, %v1200_v33  ;;  %v528_v33 = vld [vmem:[%s11076_s6 + $0x80] sm:$0xff] }
 0x96f   :  { %1559 = vmatpush.msra.mxu0 %v528_v33  ;;  %v6887_v33 = vld [vmem:[%s11074_s4 + $0x28] sm:$0xff] }
 0x971   :  { %v1271_v50 = vpop.f32.mrf.mxu1 }
 0x975   :  { %v1203_v55 = vpop.f32.mrf.mxu0 }
 0x976   :  { %6881 = vmatmul.msk.f32.gmra.mxu1 %vm43_vm0, %v1271_v50  ;;  %6882 = vmatmul.msk.f32.vlgmr.msra.gmra.mxu2 %vm43_vm0, %v1203_v55  ;;  %v527_v55 = vld [vmem:[%s11076_s6 + $0x78] sm:$0xff] }
 0x977   :  { %1560 = vmatpush.msra.mxu0 %v527_v55 }
 0x979   :  { %v1274_v47 = vpop.f32.mrf.mxu1 }
 0x97e   :  { %6883 = vmatmul.msk.f32.gmra.mxu2 %vm43_vm0, %v1274_v47 }
 0x99b   :  { %v1329_v58 = vpop.f32.mrf.mxu2 }
 0x99e   :  { %v1300_v57 = vpop.f32.mrf.mxu0 }
 0x99f   :  { %v1330_v56 = vadd.f32 %v1329_v58, %v1300_v57  ;;  %v526_v57 = vld [vmem:[%s11076_s6 + $0x70] sm:$0xff] }
 0x9a0   :  { %1561 = vmatpush.msra.mxu0 %v526_v57 }
 0x9ac   :  { %v1358_v62 = vpop.f32.mrf.mxu3 }
 0x9ad   :  { %v1364_v11 = vadd.f32 %v1358_v62, %v1330_v56  ;;  %v525_v62 = vld [vmem:[%s11076_s6 + $0x68] sm:$0xff] }
 0x9ae   :  { %1562 = vmatpush.msra.mxu0 %v525_v62 }
 0x9b8   :  { %v1332_v1 = vpop.f32.mrf.mxu2 }
 0x9ba   :  { %v1303_v59 = vpop.f32.mrf.mxu0 }
 0x9bb   :  { %v1333_v13 = vadd.f32 %v1332_v1, %v1303_v59 }
 0x9c2   :  { %v1389_v31 = vpop.f32.mrf.mxu0 }
 0x9c3   :  { %v1395_v6 = vadd.f32 %v1389_v31, %v1364_v11  ;;  %v524_v31 = vld [vmem:[%s11076_s6 + $0x60] sm:$0xff] }
 0x9c4   :  { %1563 = vmatpush.msra.mxu0 %v524_v31 }
 0x9e5   :  { %v1361_v12 = vpop.f32.mrf.mxu3 }
 0x9e6   :  { %v1365_v15 = vadd.f32 %v1361_v12, %v1333_v13  ;;  %v523_v13 = vld [vmem:[%s11076_s6 + $0x58] sm:$0xff] }
 0x9e7   :  { %v1392_v5 = vpop.f32.mrf.mxu0  ;;  %1564 = vmatpush.msra.mxu0 %v523_v13 }
 0x9e8   :  { %v1396_v4 = vadd.f32 %v1392_v5, %v1365_v15  ;;  %v522_v15 = vld [vmem:[%s11076_s6 + $0x50] sm:$0xff] }
 0x9e9   :  { %1565 = vmatpush.msra.mxu0 %v522_v15 }
 0x9eb   :  { %v1420_v3 = vpop.f32.mrf.mxu1 }
 0x9ec   :  { %v1426_v10 = vadd.f32 %v1420_v3, %v1395_v6 }
 0x9f3   :  { %v1423_v14 = vpop.f32.mrf.mxu1 }
 0x9f4   :  { %v1427_v46 = vadd.f32 %v1423_v14, %v1396_v4 }
 0x9f9   :  { %v1451_v0 = vpop.f32.mrf.mxu2 }
 0x9fa   :  { %v1457_v18 = vadd.f32 %v1451_v0, %v1426_v10 }
 0x9fc   :  { %v1460_v17 = vadd.f32 %v1459_v27, %v1457_v18 }
 0x9fe   :  { %v8652_v21 = vadd.f32 %v1460_v17, %v8288_v36  ;;  %v521_v17 = vld [vmem:[%s11076_s6 + $0x48] sm:$0xff] }
 0x9ff   :  { %1566 = vmatpush.msra.mxu0 %v521_v17 }
 0xa00   :  { %v1464_v22 = vsel %vm121_vm10, %v8652_v21, 0.0 }
 0xa01   :  { %v1454_v42 = vpop.f32.mrf.mxu2  ;;  %1465 = vadd.xlane.f32.xlu1 %v1464_v22 }
 0xa02   :  { %v1458_v26 = vadd.f32 %v1454_v42, %v1427_v46 }
 0xa04   :  { %v1461_v28 = vadd.f32 %v1459_v27, %v1458_v26  ;;  %v520_v26 = vld [vmem:[%s11076_s6 + $0x40] sm:$0xff] }
 0xa05   :  { %1567 = vmatpush.msra.mxu0 %v520_v26 }
 0xa06   :  { %v8657_v29 = vadd.f32 %v1461_v28, %v8292_v39  ;;  %v519_v28 = vld [vmem:[%s11076_s6 + $0x38] sm:$0xff] }
 0xa07   :  { %1568 = vmatpush.msra.mxu0 %v519_v28 }
 0xa08   :  { %v1467_v63 = vsel %vm121_vm10, %v8657_v29, 0.0 }
 0xa09   :  { %1468 = vadd.xlane.f32.xlu0 %v1467_v63  ;;  %v518_v63 = vld [vmem:[%s11076_s6 + $0x30] sm:$0xff] }
 0xa0a   :  { %1569 = vmatpush.msra.mxu0 %v518_v63 }
 0xa1d   :  { %1508 = vrot.lane.b32.xlu0 %v8284_v20, %s8110_s27 }
 0xa74   :  { %v1466_v36 = vpop.xlane.xlu1 %1465 }
 0xa75   :  { %v1470_v61 = vmul.f32 %v1466_v36, %v8266_v8  ;;  %v1518_v36 = vperm.slane %v8648_v51, 2 }
 0xa77   :  { %v1472_v24 = vsub.f32 %v8652_v21, %v1470_v61 }
 0xa79   :  { %v1474_v32 = vmul.f32 %v1472_v24, %v1472_v24 }
 0xa7b   :  { %v1476_v9 = vsel %vm121_vm10, %v1474_v32, 0.0 }
 0xa7c   :  { %1477 = vadd.xlane.f32.xlu2 %v1476_v9  ;;  %v1469_v30 = vpop.xlane.xlu0 %1468 }
 0xa7d   :  { %v1471_v39 = vmul.f32 %v1469_v30, %v8266_v8 }
 0xa7f   :  { %v8668_v35 = vsub.f32 %v8657_v29, %v1471_v39 }
 0xa81   :  { %v1475_v49 = vmul.f32 %v8668_v35, %v8668_v35 }
 0xa83   :  { %v1479_v40 = vsel %vm121_vm10, %v1475_v49, 0.0 }
 0xa84   :  { %1480 = vadd.xlane.f32.xlu1 %v1479_v40 }
 0xa8f   :  { %v1509_v6 = vpop.permute.xlu0 %1508 }
 0xa94   :  { %1513 = vrot.lane.b32.xlu2 %v8284_v20, %s8111_s28  ;;  %v508_v20 = vld [vmem:[%s11075_s5] sm:$0xff] }
 0xa95   :  { %1540 = vmatpush.msra.mxu3 %v508_v20 }
 0xa9d   :  { %1551 = vrot.lane.b32.xlu1 %v1459_v27, %s8104_s26 }
 0xaef   :  { %v1478_v16 = vpop.xlane.xlu2 %1477 }
 0xaf0   :  { %v1482_v2 = vmul.f32 %v1478_v16, %v8266_v8 }
 0xaf2   :  { %v1484_v23 = vadd.f32 1e-05, %v1482_v2  ;;  %v6916_v2 = vld [vmem:[%s11077_s7 + $0x4] sm:$0x7] }
 0xaf4   :  { %7750 = vrsqrt.f32 %v1484_v23  ;;  %vm1492_vm14 = vweird.f32 %v1484_v23 }
 0xaf7   :  { %v1481_v38 = vpop.xlane.xlu1 %1480  ;;  %v1514_v27 = vpop.permute.xlu2 %1513 }
 0xaf8   :  { %v1483_v34 = vmul.f32 %v1481_v38, %v8266_v8 }
 0xafa   :  { %v7751_v37 = vpop.eup %7750  ;;  %v1485_v52 = vadd.f32 1e-05, %v1483_v34 }
 0xafb   :  { %v1487_v54 = vmul.f32 %v7751_v37, %v1484_v23  ;;  %vm1493_vm13 = vweird.f32 %v7751_v37  ;;  %v8755_v23 = vperm.slane %v6916_v2, 0 }
 0xafc   :  { %7752 = vrsqrt.f32 %v1485_v52  ;;  %vm1494_vm15 = vmor %vm1492_vm14, %vm1493_vm13  ;;  %vm1502_vm3 = vweird.f32 %v1485_v52 }
 0xafd   :  { %v1488_v50 = vmul.f32 %v7751_v37, %v1487_v54  ;;  %v6888_v54 = vld [vmem:[%s11074_s4 + $0x30] sm:$0xff]  ;;  %v1661_v28 = vmul.f32 %v8755_v23, %v8311_v25 }
 0xafe   :  { %1696 = vmatpush.msrb.mxu1 %v6888_v54 }
 0xaff   :  { %v1489_v47 = vmul.f32 0.5, %v1488_v50  ;;  %v6886_v50 = vld [vmem:[%s11074_s4 + $0x20] sm:$0xff] }
 0xb00   :  { %1697 = vmatpush.msrb.mxu1 %v6887_v33 }
 0xb01   :  { %v1490_v58 = vsub.f32 1.5, %v1489_v47 }
 0xb02   :  { %v7753_v59 = vpop.eup %7752  ;;  %1698 = vmatpush.msrb.mxu1 %v6886_v50 }
 0xb03   :  { %v1497_v1 = vmul.f32 %v7753_v59, %v1485_v52  ;;  %v1491_v56 = vmul.f32 %v7751_v37, %v1490_v58  ;;  %vm1503_vm1 = vweird.f32 %v7753_v59 }
 0xb04   :  { %vm1504_vm4 = vmor %vm1502_vm3, %vm1503_vm1 }
 0xb05   :  { %v1498_v3 = vmul.f32 %v7753_v59, %v1497_v1  ;;  %v1495_v11 = vsel %vm1494_vm15, %v7751_v37, %v1491_v56 }
 0xb06   :  { %v1506_v12 = vmul.f32 %v1495_v11, %v1472_v24 }
 0xb07   :  { %v1499_v10 = vmul.f32 0.5, %v1498_v3 }
 0xb08   :  { %v1511_v0 = vmul.f32 %v1509_v6, %v1506_v12 }
 0xb09   :  { %v1500_v18 = vsub.f32 1.5, %v1499_v10 }
 0xb0a   :  { %v1516_v5 = vadd.f32 %v1514_v27, %v1511_v0 }
 0xb0b   :  { %v1501_v14 = vmul.f32 %v7753_v59, %v1500_v18 }
 0xb0c   :  { %6884 = vmatmul.msk.f32.vlgmr.msra.gmra.mxu3 %vm121_vm10, %v1516_v5 }
 0xb0d   :  { %v1505_v4 = vsel %vm1504_vm4, %v7753_v59, %v1501_v14 }
 0xb0e   :  { %v1507_v46 = vmul.f32 %v1505_v4, %v8668_v35 }
 0xb0f   :  { %v1552_v35 = vpop.permute.xlu1 %1551 }
 0xb10   :  { %v1512_v22 = vmul.f32 %v1509_v6, %v1507_v46 }
 0xb12   :  { %v1517_v42 = vadd.f32 %v1514_v27, %v1512_v22 }
 0xb14   :  { %6885 = vmatmul.msk.f32.gmra.mxu3 %vm121_vm10, %v1517_v42 }
 0xb8f   :  { %v1542_v61 = vpop.f32.mrf.mxu3 }
 0xb90   :  { %v1543_v24 = vadd.f32 %v1542_v61, %v1518_v36 }
 0xb92   :  { %v1548_v32 = vmax.f32 %v1543_v24, 0.0 }
 0xb94   :  { %1570 = vmatmul.f32.vlgmr.msra.gmra.mxu0 %v1548_v32 }
 0xb97   :  { %v1545_v9 = vpop.f32.mrf.mxu3 }
 0xb98   :  { %v1546_v30 = vadd.f32 %v1545_v9, %v1518_v36  ;;  %v1662_v36 = vmul.f32 %v8755_v23, %v8317_v7 }
 0xb9a   :  { %v1549_v39 = vmax.f32 %v1546_v30, 0.0 }
 0xb9c   :  { %1573 = vmatmul.f32.gmra.mxu0 %v1549_v39 }
 0xc11   :  { %v1571_v49 = vpop.f32.mrf.mxu0 }
 0xc12   :  { %v1572_v40 = vadd.f32 %v1571_v49, %v1552_v35 }
 0xc14   :  { %v8743_v41 = vadd.f32 %v1572_v40, %v8652_v21 }
 0xc16   :  { %v1614_v19 = vsel %vm121_vm10, %v8743_v41, 0.0 }
 0xc17   :  { %1615 = vadd.xlane.f32.xlu0 %v1614_v19 }
 0xc19   :  { %v1574_v43 = vpop.f32.mrf.mxu0 }
 0xc1a   :  { %v1575_v51 = vadd.f32 %v1574_v43, %v1552_v35 }
 0xc1c   :  { %v8748_v20 = vadd.f32 %v1575_v51, %v8657_v29 }
 0xc1e   :  { %v1617_v16 = vsel %vm121_vm10, %v8748_v20, 0.0 }
 0xc1f   :  { %1618 = vadd.xlane.f32.xlu2 %v1617_v16 }
 0xc37   :  { %1664 = vrot.lane.b32.xlu2 %v8755_v23, %s8104_s26 }
 0xc8a   :  { %v1616_v21 = vpop.xlane.xlu0 %1615 }
 0xc8b   :  { %v1620_v48 = vmul.f32 %v1616_v21, %v8266_v8 }
 0xc8d   :  { %v1622_v44 = vsub.f32 %v8743_v41, %v1620_v48 }
 0xc8f   :  { %v1624_v29 = vmul.f32 %v1622_v44, %v1622_v44 }
 0xc91   :  { %v1626_v60 = vsel %vm121_vm10, %v1624_v29, 0.0 }
 0xc92   :  { %v1619_v38 = vpop.xlane.xlu2 %1618  ;;  %1627 = vadd.xlane.f32.xlu1 %v1626_v60 }
 0xc93   :  { %v1621_v34 = vmul.f32 %v1619_v38, %v8266_v8 }
 0xc95   :  { %v1623_v45 = vsub.f32 %v8748_v20, %v1621_v34 }
 0xc97   :  { %v1625_v37 = vmul.f32 %v1623_v45, %v1623_v45 }
 0xc99   :  { %v1629_v52 = vsel %vm121_vm10, %v1625_v37, 0.0 }
 0xc9a   :  { %1630 = vadd.xlane.f32.xlu0 %v1629_v52  ;;  %v1665_v5 = vpop.permute.xlu2 %1664 }
 0xc9b   :  { %v1669_v63 = vadd.f32 %v1665_v5, %v1661_v28  ;;  %v1670_v61 = vadd.f32 %v1665_v5, %v1662_v36  ;;  %v8041_v28 = vld [vmem:[%s11072_s2 + $0x10] sm:$0xff] }
 0xd05   :  { %v1628_v55 = vpop.xlane.xlu1 %1627 }
 0xd06   :  { %v1632_v47 = vmul.f32 %v1628_v55, %v8266_v8 }
 0xd08   :  { %v1634_v57 = vadd.f32 1e-05, %v1632_v47 }
 0xd0a   :  { %7754 = vrsqrt.f32 %v1634_v57  ;;  %vm1642_vm6 = vweird.f32 %v1634_v57 }
 0xd0d   :  { %v1631_v58 = vpop.xlane.xlu0 %1630 }
 0xd0e   :  { %v1633_v59 = vmul.f32 %v1631_v58, %v8266_v8 }
 0xd10   :  { %v7755_v62 = vpop.eup %7754  ;;  %v1635_v1 = vadd.f32 1e-05, %v1633_v59 }
 0xd11   :  { %v1637_v56 = vmul.f32 %v7755_v62, %v1634_v57  ;;  %vm1643_vm5 = vweird.f32 %v7755_v62 }
 0xd12   :  { %7756 = vrsqrt.f32 %v1635_v1  ;;  %vm1644_vm7 = vmor %vm1642_vm6, %vm1643_vm5  ;;  %vm1652_vm9 = vweird.f32 %v1635_v1 }
 0xd13   :  { %v1638_v31 = vmul.f32 %v7755_v62, %v1637_v56 }
 0xd15   :  { %v1639_v3 = vmul.f32 0.5, %v1638_v31 }
 0xd17   :  { %v1640_v11 = vsub.f32 1.5, %v1639_v3 }
 0xd18   :  { %v7757_v6 = vpop.eup %7756 }
 0xd19   :  { %v1641_v12 = vmul.f32 %v7755_v62, %v1640_v11  ;;  %v1647_v13 = vmul.f32 %v7757_v6, %v1635_v1  ;;  %vm1653_vm8 = vweird.f32 %v7757_v6 }
 0xd1a   :  { %vm1654_vm11 = vmor %vm1652_vm9, %vm1653_vm8 }
 0xd1b   :  { %v1645_v10 = vsel %vm1644_vm7, %v7755_v62, %v1641_v12  ;;  %v1648_v27 = vmul.f32 %v7757_v6, %v1647_v13 }
 0xd1c   :  { %v8779_v0 = vmul.f32 %v1645_v10, %v1622_v44 }
 0xd1d   :  { %v1649_v15 = vmul.f32 0.5, %v1648_v27 }
 0xd1e   :  { %v1659_v18 = vmul.f32 %v8755_v23, %v8779_v0 }
 0xd1f   :  { %v1650_v17 = vsub.f32 1.5, %v1649_v15  ;;  %v8040_v15 = vld [vmem:[%s11072_s2 + $0x8] sm:$0xff] }
 0xd20   :  { %v1667_v14 = vadd.f32 %v1665_v5, %v1659_v18 }
 0xd21   :  { %v1651_v4 = vmul.f32 %v7757_v6, %v1650_v17 }
 0xd22   :  { %6917 = vmatmul.msk.f32.vlgmr.msrb.gmra.mxu1 %vm121_vm10, %v1667_v14 }
 0xd23   :  { %v1655_v46 = vsel %vm1654_vm11, %v7757_v6, %v1651_v4  ;;  %v8039_v6 = vld [vmem:[%s11072_s2] sm:$0xff] }
 0xd24   :  { %v8784_v22 = vmul.f32 %v1655_v46, %v1623_v45 }
 0xd26   :  { %v1660_v42 = vmul.f32 %v8755_v23, %v8784_v22 }
 0xd28   :  { %v1668_v26 = vadd.f32 %v1665_v5, %v1660_v42 }
 0xd2a   :  { %6918 = vmatmul.msk.f32.gmra.mxu1 %vm121_vm10, %v1668_v26 }
 0xd32   :  { %6919 = vmatmul.msk.f32.gmra.mxu1 %vm121_vm10, %v1669_v63 }
 0xd3a   :  { %6920 = vmatmul.msk.f32.gmra.mxu1 %vm121_vm10, %v1670_v61 }
 0xd9f   :  { %v8795_v24 = vpop.f32.mrf.mxu1 }
 0xda7   :  { %v8797_v32 = vpop.f32.mrf.mxu1 }
 0xda8   :  { %v7381_v25 = vpack.i.bf16 %v8797_v32, %v8795_v24 }
 0xdaf   :  { %v1706_v9 = vpop.f32.mrf.mxu1 }
 0xdb0   :  { %1726 = vrot.lane.b32.xlu1 %v1706_v9, %s8104_s26  ;;  %1730 = vrot.lane.b32.xlu0 %v1706_v9, %s8106_s14 }
 0xdb7   :  { %v1709_v30 = vpop.f32.mrf.mxu1 }
 0xdb8   :  { %1714 = vrot.lane.b32.xlu1 %v1706_v9, %s8108_s15  ;;  %1722 = vrot.lane.b32.xlu0 %v1706_v9, %s8105_s13 }
 0xdb9   :  { %1732 = vrot.lane.b32.xlu2 %v1709_v30, %s8106_s14 }
 0xdc0   :  { %1718 = vrot.lane.b32.xlu0 %v1706_v9, %s8107_s1  ;;  %1716 = vrot.lane.b32.xlu1 %v1709_v30, %s8108_s15 }
 0xdc1   :  { %1728 = vrot.lane.b32.xlu2 %v1709_v30, %s8104_s26 }
 0xdc8   :  { %7382 = vrot.lane.b32.xlu1 %v7381_v25, %s8106_s14  ;;  %1724 = vrot.lane.b32.xlu0 %v1709_v30, %s8105_s13 }
 0xdc9   :  { %1720 = vrot.lane.b32.xlu2 %v1709_v30, %s8107_s1 }
 0xdd0   :  { %7397 = vrot.lane.b32.xlu1 %v7381_v25, %s8107_s1  ;;  %7392 = vrot.lane.b32.xlu0 %v7381_v25, %s8105_s13 }
 0xdd1   :  { %7387 = vrot.lane.b32.xlu2 %v7381_v25, %s8104_s26 }
 0xdd9   :  { %7402 = vrot.lane.b32.xlu2 %v7381_v25, %s8108_s15 }
 0xe13   :  { %v1733_v7 = vpop.permute.xlu2 %1732 }
 0xe14   :  { %6933 = vmatpush.xpose.msk.msrb.mxu3 %vm43_vm0, %v1733_v7 }
 0xe1b   :  { %v1729_v39 = vpop.permute.xlu2 %1728 }
 0xe1c   :  { %6934 = vmatpush.xpose.msk.msrb.mxu3 %vm43_vm0, %v1729_v39 }
 0xe22   :  { %v1727_v35 = vpop.permute.xlu1 %1726  ;;  %v1731_v49 = vpop.permute.xlu0 %1730 }
 0xe23   :  { %6921 = vmatpush.xpose.msk.msrb.mxu2 %vm43_vm0, %v1731_v49  ;;  %v1721_v40 = vpop.permute.xlu2 %1720 }
 0xe27   :  { %6922 = vmatpush.xpose.msk.msrb.mxu2 %vm43_vm0, %v1727_v35 }
 0xe2a   :  { %v1715_v19 = vpop.permute.xlu1 %1714  ;;  %v1723_v43 = vpop.permute.xlu0 %1722 }
 0xe2b   :  { %6923 = vmatpush.xpose.msk.msrb.mxu2 %vm43_vm0, %v1723_v43  ;;  %v8821_v51 = vpop.permute.xlu2 %7387 }
 0xe2c   :  { %v7389_v29 = vunpack.i.l.bf16 %v8821_v51 }
 0xe32   :  { %v1719_v16 = vpop.permute.xlu0 %1718  ;;  %v1717_v2 = vpop.permute.xlu1 %1716 }
 0xe33   :  { %6924 = vmatpush.xpose.msk.msrb.mxu2 %vm43_vm0, %v1719_v16  ;;  %v8825_v21 = vpop.permute.xlu2 %7402 }
 0xe34   :  { %v7404_v60 = vunpack.i.l.bf16 %v8825_v21 }
 0xe37   :  { %6925 = vmatpush.xpose.msk.msrb.mxu2 %vm43_vm0, %v1715_v19 }
 0xe3a   :  { %v7383_v48 = vpop.permute.xlu1 %7382  ;;  %v1725_v44 = vpop.permute.xlu0 %1724 }
 0xe3b   :  { %v7385_v38 = vunpack.i.h.bf16 %v7383_v48  ;;  %v7384_v34 = vunpack.i.l.bf16 %v7383_v48  ;;  %6926 = vmatpush.xpose.msk.msrb.mxu2 %vm43_vm0, %v1706_v9  ;;  %6935 = vmatpush.xpose.msk.msrb.mxu3 %vm43_vm0, %v1725_v44  ;;  %v8043_v48 = vld [vmem:[%s11072_s2 + $0x20] sm:$0xff] }
 0xe3d   :  { %v7416_v45 = vpack.i.bf16 %v7385_v38, %v7404_v60  ;;  %v7406_v37 = vpack.i.bf16 %v7389_v29, %v7384_v34 }
 0xe3e   :  { %6927 = vmatmul.msk.f32.vlgmr.msrb.gmra.mxu2 %vm43_vm0, %v1706_v9 }
 0xe3f   :  { %6936 = vmatpush.xpose.msk.msrb.mxu3 %vm43_vm0, %v1721_v40  ;;  %7417 = vrot.lane.b32.xlu2 %v7416_v45, %s8109_s16 }
 0xe40   :  { %7407 = vrot.lane.b32.xlu1 %v7406_v37, %s8109_s16 }
 0xe42   :  { %v8835_v52 = vpop.permute.xlu1 %7397  ;;  %v8837_v53 = vpop.permute.xlu0 %7392 }
 0xe43   :  { %v7399_v54 = vunpack.i.l.bf16 %v8835_v52  ;;  %v7394_v33 = vunpack.i.l.bf16 %v8837_v53  ;;  %6937 = vmatpush.xpose.msk.msrb.mxu3 %vm43_vm0, %v1717_v2 }
 0xe45   :  { %v7411_v50 = vpack.i.bf16 %v7399_v54, %v7394_v33 }
 0xe46   :  { %6928 = vmatmul.msk.f32.gmra.mxu2 %vm43_vm0, %v1715_v19 }
 0xe47   :  { %7412 = vrot.lane.b32.xlu0 %v7411_v50, %s8109_s16  ;;  %6938 = vmatpush.xpose.msk.msrb.mxu3 %vm43_vm0, %v1709_v30 }
 0xe4a   :  { %6939 = vmatmul.msk.f32.vlgmr.msrb.gmra.mxu3 %vm43_vm0, %v1709_v30 }
 0xe4e   :  { %6929 = vmatmul.msk.f32.gmra.mxu2 %vm43_vm0, %v1719_v16 }
 0xe52   :  { %6940 = vmatmul.msk.f32.gmra.mxu3 %vm43_vm0, %v1717_v2 }
 0xe56   :  { %6930 = vmatmul.msk.f32.gmra.mxu2 %vm43_vm0, %v1723_v43 }
 0xe5a   :  { %6941 = vmatmul.msk.f32.gmra.mxu3 %vm43_vm0, %v1721_v40 }
 0xe5e   :  { %6931 = vmatmul.msk.f32.gmra.mxu2 %vm43_vm0, %v1727_v35 }
 0xe62   :  { %6942 = vmatmul.msk.f32.gmra.mxu3 %vm43_vm0, %v1725_v44 }
 0xe66   :  { %6932 = vmatmul.msk.f32.gmra.mxu2 %vm43_vm0, %v1731_v49  ;;  %v8042_v49 = vld [vmem:[%s11072_s2 + $0x18] sm:$0xff] }
 0xe6a   :  { %6943 = vmatmul.msk.f32.gmra.mxu3 %vm43_vm0, %v1729_v39 }
 0xe72   :  { %6944 = vmatmul.msk.f32.gmra.mxu3 %vm43_vm0, %v1733_v7 }
 0xe99   :  { %v7418_v55 = vpop.permute.xlu2 %7417 }
 0xe9a   :  { %v7420_v47 = vunpack.i.h.bf16 %v7418_v55  ;;  %v7419_v31 = vunpack.i.l.bf16 %v7418_v55 }
 0xe9c   :  { %2279 = vmatpush.msra.mxu1 %v7420_v47 }
 0xeb2   :  { %v7408_v57 = vpop.permute.xlu1 %7407 }
 0xeb3   :  { %v7409_v58 = vunpack.i.l.bf16 %v7408_v57  ;;  %v7410_v59 = vunpack.i.h.bf16 %v7408_v57  ;;  %v8044_v57 = vld [vmem:[%s11072_s2 + $0x28] sm:$0xff] }
 0xeb5   :  { %2208 = vmatpush.msrb.mxu0 %v7409_v58 }
 0xeb7   :  { %2209 = vmatpush.msrb.mxu0 %v7410_v59 }
 0xeb9   :  { %v7413_v62 = vpop.permute.xlu0 %7412 }
 0xeba   :  { %v7414_v1 = vunpack.i.l.bf16 %v7413_v62  ;;  %v7415_v56 = vunpack.i.h.bf16 %v7413_v62 }
 0xebc   :  { %2210 = vmatpush.msrb.mxu0 %v7414_v1 }
 0xebe   :  { %2211 = vmatpush.msrb.mxu0 %v7415_v56 }
 0xec0   :  { %2212 = vmatpush.msrb.mxu0 %v7419_v31 }
 0xec1   :  { %v1785_v3 = vpop.f32.mrf.mxu2 }
 0xec2   :  { %v1850_v11 = vmul.f32 0.4472136, %v1785_v3 }
 0xec4   :  { %v8858_v12 = vadd.f32 %v8039_v6, %v1850_v11 }
 0xec6   :  { %v1874_v13 = vsel %vm846_vm2, %v8858_v12, -inf }
 0xec7   :  { %1875 = vmax.xlane.f32.xlu0 %v1874_v13 }
 0xec9   :  { %v1788_v10 = vpop.f32.mrf.mxu2 }
 0xeca   :  { %v1851_v27 = vmul.f32 0.4472136, %v1788_v10 }
 0xecc   :  { %v8865_v18 = vadd.f32 %v8040_v15, %v1851_v27 }
 0xecd   :  { %v1832_v5 = vpop.f32.mrf.mxu3 }
 0xece   :  { %v1856_v17 = vmul.f32 0.4472136, %v1832_v5  ;;  %v1877_v14 = vsel %vm846_vm2, %v8865_v18, -inf }
 0xecf   :  { %1878 = vmax.xlane.f32.xlu2 %v1877_v14 }
 0xed0   :  { %v8869_v4 = vadd.f32 %v8039_v6, %v1856_v17 }
 0xed1   :  { %v1791_v46 = vpop.f32.mrf.mxu2 }
 0xed2   :  { %v1852_v42 = vmul.f32 0.4472136, %v1791_v46  ;;  %v1892_v26 = vsel %vm846_vm2, %v8869_v4, -inf }
 0xed3   :  { %1893 = vmax.xlane.f32.xlu1 %v1892_v26 }
 0xed4   :  { %v8876_v63 = vadd.f32 %v8041_v28, %v1852_v42 }
 0xed5   :  { %v1835_v36 = vpop.f32.mrf.mxu3 }
 0xed6   :  { %v1857_v61 = vmul.f32 0.4472136, %v1835_v36  ;;  %v1880_v9 = vsel %vm846_vm2, %v8876_v63, -inf }
 0xed7   :  { %1881 = vmax.xlane.f32.xlu2 %v1880_v9 }
 0xed8   :  { %v8880_v30 = vadd.f32 %v8040_v15, %v1857_v61 }
 0xed9   :  { %v1794_v25 = vpop.f32.mrf.mxu2 }
 0xeda   :  { %v1853_v7 = vmul.f32 0.4472136, %v1794_v25  ;;  %v1895_v39 = vsel %vm846_vm2, %v8880_v30, -inf }
 0xedb   :  { %1896 = vmax.xlane.f32.xlu0 %v1895_v39 }
 0xedc   :  { %v8887_v40 = vadd.f32 %v8042_v49, %v1853_v7 }
 0xedd   :  { %v1838_v35 = vpop.f32.mrf.mxu3 }
 0xede   :  { %v1858_v43 = vmul.f32 0.4472136, %v1838_v35  ;;  %v1883_v2 = vsel %vm846_vm2, %v8887_v40, -inf }
 0xee0   :  { %v8898_v34 = vadd.f32 %v8041_v28, %v1858_v43  ;;  %v7390_v43 = vunpack.i.h.bf16 %v8821_v51 }
 0xee1   :  { %v1797_v19 = vpop.f32.mrf.mxu2 }
 0xee2   :  { %v1854_v16 = vmul.f32 0.4472136, %v1797_v19  ;;  %v1898_v33 = vsel %vm846_vm2, %v8898_v34, -inf }
 0xee3   :  { %1884 = vmax.xlane.f32.xlu0 %v1883_v2  ;;  %v7421_v2 = vpack.i.bf16 %v7390_v43, %v8795_v24 }
 0xee4   :  { %v8894_v44 = vadd.f32 %v8043_v48, %v1854_v16 }
 0xee5   :  { %v1841_v29 = vpop.f32.mrf.mxu3 }
 0xee6   :  { %v1859_v60 = vmul.f32 0.4472136, %v1841_v29  ;;  %v1886_v38 = vsel %vm846_vm2, %v8894_v44, -inf  ;;  %v7405_v29 = vunpack.i.h.bf16 %v8825_v21 }
 0xee7   :  { %1887 = vmax.xlane.f32.xlu1 %v1886_v38 }
 0xee8   :  { %v8900_v45 = vadd.f32 %v8042_v49, %v1859_v60  ;;  %v7395_v49 = vunpack.i.h.bf16 %v8837_v53  ;;  %v7431_v51 = vpack.i.bf16 %v8797_v32, %v7405_v29 }
 0xee9   :  { %v1800_v37 = vpop.f32.mrf.mxu2 }
 0xeea   :  { %v1855_v54 = vmul.f32 0.4472136, %v1800_v37  ;;  %v1901_v50 = vsel %vm846_vm2, %v8900_v45, -inf }
 0xeeb   :  { %1899 = vmax.xlane.f32.xlu0 %v1898_v33  ;;  %1902 = vmax.xlane.f32.xlu2 %v1901_v50 }
 0xeec   :  { %v8909_v58 = vadd.f32 %v8044_v57, %v1855_v54 }
 0xeed   :  { %v1844_v55 = vpop.f32.mrf.mxu3 }
 0xeee   :  { %v1860_v47 = vmul.f32 0.4472136, %v1844_v55  ;;  %v1889_v62 = vsel %vm846_vm2, %v8909_v58, -inf }
 0xef0   :  { %v8911_v59 = vadd.f32 %v8043_v48, %v1860_v47 }
 0xef2   :  { %v1904_v1 = vsel %vm846_vm2, %v8911_v59, -inf }
 0xef3   :  { %1890 = vmax.xlane.f32.xlu0 %v1889_v62  ;;  %1905 = vmax.xlane.f32.xlu1 %v1904_v1 }
 0xef5   :  { %v1847_v56 = vpop.f32.mrf.mxu3 }
 0xef6   :  { %v1861_v31 = vmul.f32 0.4472136, %v1847_v56 }
 0xef8   :  { %v8917_v3 = vadd.f32 %v8044_v57, %v1861_v31 }
 0xefa   :  { %v1907_v11 = vsel %vm846_vm2, %v8917_v3, -inf }
 0xefb   :  { %1908 = vmax.xlane.f32.xlu2 %v1907_v11 }
 0xf3a   :  { %v1876_v6 = vpop.xlane.xlu0 %1875 }
 0xf3b   :  { %v1910_v13 = vsub.f32 %v8858_v12, %v1876_v6 }
 0xf3d   :  { %v1922_v10 = vmul.f32 1.442695, %v1910_v13 }
 0xf3f   :  { %7758 = vpow2.f32 %v1922_v10 }
 0xf42   :  { %v1879_v27 = vpop.xlane.xlu2 %1878 }
 0xf43   :  { %v1911_v15 = vsub.f32 %v8865_v18, %v1879_v27 }
 0xf45   :  { %v8923_v5 = vpop.eup %7758  ;;  %v1924_v17 = vmul.f32 1.442695, %v1911_v15 }
 0xf46   :  { %v1894_v14 = vpop.xlane.xlu1 %1893  ;;  %v1946_v46 = vsel %vm846_vm2, %v8923_v5, 0.0 }
 0xf47   :  { %7760 = vpow2.f32 %v1924_v17  ;;  %v1916_v42 = vsub.f32 %v8869_v4, %v1894_v14  ;;  %1947 = vadd.xlane.f32.xlu1 %v1946_v46 }
 0xf49   :  { %v1934_v26 = vmul.f32 1.442695, %v1916_v42 }
 0xf4a   :  { %v1882_v28 = vpop.xlane.xlu2 %1881 }
 0xf4b   :  { %7762 = vpow2.f32 %v1934_v26  ;;  %v1912_v12 = vsub.f32 %v8876_v63, %v1882_v28  ;;  %v7400_v63 = vunpack.i.h.bf16 %v8835_v52 }
 0xf4d   :  { %v8929_v36 = vpop.eup %7760  ;;  %v1926_v61 = vmul.f32 1.442695, %v1912_v12  ;;  %v7426_v16 = vpack.i.bf16 %v7400_v63, %v7395_v49 }
 0xf4e   :  { %v1897_v18 = vpop.xlane.xlu0 %1896  ;;  %v1949_v9 = vsel %vm846_vm2, %v8929_v36, 0.0 }
 0xf4f   :  { %1950 = vadd.xlane.f32.xlu0 %v1949_v9  ;;  %7764 = vpow2.f32 %v1926_v61  ;;  %v1917_v7 = vsub.f32 %v8880_v30, %v1897_v18 }
 0xf51   :  { %v8933_v25 = vpop.eup %7762  ;;  %v1936_v39 = vmul.f32 1.442695, %v1917_v7 }
 0xf52   :  { %v1964_v4 = vsel %vm846_vm2, %v8933_v25, 0.0 }
 0xf53   :  { %1965 = vadd.xlane.f32.xlu2 %v1964_v4  ;;  %7766 = vpow2.f32 %v1936_v39 }
 0xf55   :  { %v8938_v35 = vpop.eup %7764 }
 0xf56   :  { %v1952_v19 = vsel %vm846_vm2, %v8938_v35, 0.0  ;;  %v1885_v52 = vpop.xlane.xlu0 %1884 }
 0xf57   :  { %v1913_v38 = vsub.f32 %v8887_v40, %v1885_v52 }
 0xf59   :  { %v8945_v30 = vpop.eup %7766  ;;  %v1928_v33 = vmul.f32 1.442695, %v1913_v38 }
 0xf5a   :  { %v1967_v48 = vsel %vm846_vm2, %v8945_v30, 0.0  ;;  %v1888_v50 = vpop.xlane.xlu1 %1887 }
 0xf5b   :  { %1953 = vadd.xlane.f32.xlu2 %v1952_v19  ;;  %v1914_v10 = vsub.f32 %v8894_v44, %v1888_v50 }
 0xf5d   :  { %v1930_v15 = vmul.f32 1.442695, %v1914_v10 }
 0xf5e   :  { %v1900_v53 = vpop.xlane.xlu0 %1899  ;;  %v1903_v24 = vpop.xlane.xlu2 %1902 }
 0xf5f   :  { %v1918_v60 = vsub.f32 %v8898_v34, %v1900_v53  ;;  %v1919_v47 = vsub.f32 %v8900_v45, %v1903_v24 }
 0xf60   :  { %7427 = vrot.lane.b32.xlu1 %v7426_v16, %s8109_s16 }
 0xf61   :  { %v1938_v37 = vmul.f32 1.442695, %v1918_v60  ;;  %v1940_v32 = vmul.f32 1.442695, %v1919_v47 }
 0xf63   :  { %7422 = vrot.lane.b32.xlu0 %v7421_v2, %s8109_s16  ;;  %1968 = vadd.xlane.f32.xlu2 %v1967_v48  ;;  %7768 = vpow2.f32 %v1938_v37 }
 0xf64   :  { %7770 = vpow2.f32 %v1928_v33 }
 0xf66   :  { %v1891_v54 = vpop.xlane.xlu0 %1890  ;;  %v1906_v40 = vpop.xlane.xlu1 %1905 }
 0xf67   :  { %v1915_v55 = vsub.f32 %v8909_v58, %v1891_v54  ;;  %v1920_v58 = vsub.f32 %v8911_v59, %v1906_v40 }
 0xf69   :  { %v1932_v21 = vmul.f32 1.442695, %v1915_v55  ;;  %v8959_v34 = vpop.eup %7768  ;;  %v1942_v6 = vmul.f32 1.442695, %v1920_v58 }
 0xf6a   :  { %v8962_v1 = vpop.eup %7770  ;;  %v1970_v56 = vsel %vm846_vm2, %v8959_v34, 0.0 }
 0xf6b   :  { %7772 = vpow2.f32 %v1932_v21  ;;  %v1955_v45 = vsel %vm846_vm2, %v8962_v1, 0.0 }
 0xf6c   :  { %7774 = vpow2.f32 %v1940_v32 }
 0xf6e   :  { %v1909_v57 = vpop.xlane.xlu2 %1908 }
 0xf6f   :  { %v1921_v62 = vsub.f32 %v8917_v3, %v1909_v57 }
 0xf71   :  { %v1944_v31 = vmul.f32 1.442695, %v1921_v62  ;;  %v8969_v11 = vpop.eup %7772 }
 0xf72   :  { %v8971_v13 = vpop.eup %7774  ;;  %v1961_v3 = vsel %vm846_vm2, %v8969_v11, 0.0 }
 0xf73   :  { %7776 = vpow2.f32 %v1944_v31  ;;  %v1973_v59 = vsel %vm846_vm2, %v8971_v13, 0.0 }
 0xf74   :  { %7778 = vpow2.f32 %v1942_v6 }
 0xf75   :  { %7780 = vpow2.f32 %v1930_v15 }
 0xf79   :  { %v8978_v27 = vpop.eup %7776 }
 0xf7a   :  { %v8980_v17 = vpop.eup %7778  ;;  %v1979_v14 = vsel %vm846_vm2, %v8978_v27, 0.0 }
 0xf7b   :  { %7432 = vrot.lane.b32.xlu2 %v7431_v51, %s8109_s16  ;;  %v1976_v46 = vsel %vm846_vm2, %v8980_v17, 0.0  ;;  %v8986_v44 = vpop.eup %7780 }
 0xf7c   :  { %v1958_v42 = vsel %vm846_vm2, %v8986_v44, 0.0 }
 0xf8a   :  { %1971 = vadd.xlane.f32.xlu1 %v1970_v56 }
 0xf8d   :  { %1956 = vadd.xlane.f32.xlu0 %v1955_v45 }
 0xf92   :  { %1962 = vadd.xlane.f32.xlu1 %v1961_v3 }
 0xf95   :  { %1974 = vadd.xlane.f32.xlu0 %v1973_v59 }
 0xf9a   :  { %1980 = vadd.xlane.f32.xlu1 %v1979_v14 }
 0xf9d   :  { %1977 = vadd.xlane.f32.xlu0 %v1976_v46 }
 0xfa4   :  { %1959 = vadd.xlane.f32.xlu2 %v1958_v42 }
 0xfba   :  { %v1948_v26 = vpop.xlane.xlu1 %1947 }
 0xfbb   :  { %7782 = vrcp.f32 %v1948_v26  ;;  %v1993_v43 = vand.u32 2147483648, %v1948_v26  ;;  %vm1987_vm13 = vweird.f32 %v1948_v26  ;;  %v1991_v48 = vand.u32 2147483647, %v1948_v26 }
 0xfbd   :  { %v1994_v60 = vor.u32 1.1754944e-38, %v1993_v43  ;;  %vm1992_vm15 = vcmp.eq.f32.partialorder %v1991_v48, 8.507059e+37 }
 0xfc1   :  { %v7783_v28 = vpop.eup %7782 }
 0xfc2   :  { %v1983_v12 = vmul.f32 %v7783_v28, %v1948_v26  ;;  %v1951_v61 = vpop.xlane.xlu0 %1950  ;;  %vm1988_vm12 = vweird.f32 %v7783_v28 }
 0xfc3   :  { %7784 = vrcp.f32 %v1951_v61  ;;  %vm1989_vm14 = vmor %vm1987_vm13, %vm1988_vm12  ;;  %v2008_v50 = vand.u32 2147483648, %v1951_v61  ;;  %vm2002_vm3 = vweird.f32 %v1951_v61  ;;  %v2006_v40 = vand.u32 2147483647, %v1951_v61 }
 0xfc4   :  { %v1984_v18 = vsub.f32 1.0, %v1983_v12 }
 0xfc5   :  { %v2009_v6 = vor.u32 1.1754944e-38, %v2008_v50  ;;  %vm2007_vm8 = vcmp.eq.f32.partialorder %v2006_v40, 8.507059e+37 }
 0xfc6   :  { %v8990_v9 = vpop.xlane.xlu2 %1965  ;;  %v1985_v4 = vmul.f32 %v7783_v28, %v1984_v18 }
 0xfc7   :  { %7786 = vrcp.f32 %v8990_v9  ;;  %v2083_v31 = vand.u32 2147483648, %v8990_v9  ;;  %vm2077_vm6 = vweird.f32 %v8990_v9 }
 0xfc8   :  { %v1986_v49 = vadd.f32 %v7783_v28, %v1985_v4 }
 0xfc9   :  { %v7785_v7 = vpop.eup %7784  ;;  %v2084_v42 = vor.u32 1.1754944e-38, %v2083_v31 }
 0xfca   :  { %v1998_v39 = vmul.f32 %v7785_v7, %v1951_v61  ;;  %v1990_v53 = vsel %vm1989_vm14, %v7783_v28, %v1986_v49  ;;  %vm2003_vm1 = vweird.f32 %v7785_v7 }
 0xfcb   :  { %v1995_v38 = vsel %vm1992_vm15, %v1994_v60, %v1990_v53  ;;  %vm2004_vm5 = vmor %vm2002_vm3, %vm2003_vm1 }
 0xfcc   :  { %v1999_v19 = vsub.f32 1.0, %v1998_v39  ;;  %v1996_v32 = vmul.f32 %v8923_v5, %v1995_v38  ;;  %v2081_v5 = vand.u32 2147483647, %v8990_v9 }
 0xfcd   :  { %v8993_v63 = vpop.eup %7786 }
 0xfce   :  { %v2073_v16 = vmul.f32 %v8993_v63, %v8990_v9  ;;  %v8997_v2 = vpop.xlane.xlu2 %1953  ;;  %v2000_v29 = vmul.f32 %v7785_v7, %v1999_v19  ;;  %vm2078_vm4 = vweird.f32 %v8993_v63  ;;  %vm2082_vm11 = vcmp.eq.f32.partialorder %v2081_v5, 8.507059e+37 }
 0xfcf   :  { %7788 = vrcp.f32 %v8997_v2  ;;  %vm9016_vm7 = vmor %vm2077_vm6, %vm2078_vm4  ;;  %v2023_v28 = vand.u32 2147483648, %v8997_v2  ;;  %vm2017_vm12 = vweird.f32 %v8997_v2  ;;  %v2021_v4 = vand.u32 2147483647, %v8997_v2 }
 0xfd0   :  { %v2074_v52 = vsub.f32 1.0, %v2073_v16  ;;  %v2001_v33 = vadd.f32 %v7785_v7, %v2000_v29 }
 0xfd1   :  { %v2024_v19 = vor.u32 1.1754944e-38, %v2023_v28  ;;  %vm2022_vm15 = vcmp.eq.f32.partialorder %v2021_v4, 8.507059e+37 }
 0xfd2   :  { %v2075_v51 = vmul.f32 %v8993_v63, %v2074_v52  ;;  %v7428_v24 = vpop.permute.xlu1 %7427  ;;  %v2005_v45 = vsel %vm2004_vm5, %v7785_v7, %v2001_v33 }
 0xfd3   :  { %v7429_v58 = vunpack.i.l.bf16 %v7428_v24  ;;  %v7430_v3 = vunpack.i.h.bf16 %v7428_v24  ;;  %v2010_v14 = vsel %vm2007_vm8, %v2009_v6, %v2005_v45 }
 0xfd4   :  { %v2076_v62 = vadd.f32 %v8993_v63, %v2075_v51  ;;  %v2011_v9 = vmul.f32 %v8929_v36, %v2010_v14 }
 0xfd5   :  { %v9001_v37 = vpop.eup %7788  ;;  %v7423_v54 = vpop.permute.xlu0 %7422 }
 0xfd6   :  { %v2013_v55 = vmul.f32 %v9001_v37, %v8997_v2  ;;  %v7425_v47 = vunpack.i.h.bf16 %v7423_v54  ;;  %v7424_v21 = vunpack.i.l.bf16 %v7423_v54  ;;  %v1969_v57 = vpop.xlane.xlu2 %1968  ;;  %v2080_v15 = vsel %vm9016_vm7, %v8993_v63, %v2076_v62 }
 0xfd7   :  { %7790 = vrcp.f32 %v1969_v57  ;;  %vm2018_vm9 = vweird.f32 %v9001_v37  ;;  %v2085_v7 = vsel %vm2082_vm11, %v2084_v42, %v2080_v15  ;;  %v2098_v43 = vand.u32 2147483648, %v1969_v57 }
 0xfd8   :  { %v2014_v56 = vsub.f32 1.0, %v2013_v55  ;;  %2213 = vmatpush.msrb.mxu0 %v7424_v21  ;;  %2280 = vmatpush.msra.mxu1 %v7425_v47  ;;  %vm2019_vm13 = vmor %vm2017_vm12, %vm2018_vm9  ;;  %v2086_v16 = vmul.f32 %v8933_v25, %v2085_v7  ;;  %v2096_v52 = vand.u32 2147483647, %v1969_v57  ;;  %vm2092_vm1 = vweird.f32 %v1969_v57 }
 0xfd9   :  { %6945 = vmatmul.msk.f32.vlgmr.msrb.gmra.mxu0 %vm846_vm2, %v1996_v32  ;;  %v2099_v53 = vor.u32 1.1754944e-38, %v2098_v43 }
 0xfda   :  { %2281 = vmatpush.msra.mxu1 %v7429_v58  ;;  %v2015_v10 = vmul.f32 %v9001_v37, %v2014_v56  ;;  %vm2097_vm4 = vcmp.eq.f32.partialorder %v2096_v52, 8.507059e+37 }
 0xfdc   :  { %2282 = vmatpush.msra.mxu1 %v7430_v3  ;;  %v2016_v26 = vadd.f32 %v9001_v37, %v2015_v10 }
 0xfdd   :  { %v7791_v46 = vpop.eup %7790 }
 0xfde   :  { %v2088_v12 = vmul.f32 %v7791_v46, %v1969_v57  ;;  %v7433_v61 = vpop.permute.xlu2 %7432  ;;  %v2020_v49 = vsel %vm2019_vm13, %v9001_v37, %v2016_v26  ;;  %vm2093_vm14 = vweird.f32 %v7791_v46 }
 0xfdf   :  { %v7434_v18 = vunpack.i.l.bf16 %v7433_v61  ;;  %v7435_v63 = vunpack.i.h.bf16 %v7433_v61  ;;  %v2025_v36 = vsel %vm2022_vm15, %v2024_v19, %v2020_v49  ;;  %vm2094_vm3 = vmor %vm2092_vm1, %vm2093_vm14 }
 0xfe0   :  { %v2089_v39 = vsub.f32 1.0, %v2088_v12  ;;  %v2026_v60 = vmul.f32 %v8938_v35, %v2025_v36 }
 0xfe1   :  { %6946 = vmatmul.msk.f32.gmra.mxu0 %vm846_vm2, %v2011_v9  ;;  %2283 = vmatpush.msra.mxu1 %v7434_v18 }
 0xfe2   :  { %v2090_v48 = vmul.f32 %v7791_v46, %v2089_v39 }
 0xfe3   :  { %2284 = vmatpush.msra.mxu1 %v7435_v63 }
 0xfe4   :  { %6951 = vmatmul.msk.f32.vlgmr.msra.gmra.mxu1 %vm846_vm2, %v2086_v16  ;;  %v2091_v2 = vadd.f32 %v7791_v46, %v2090_v48 }
 0xfe6   :  { %v2095_v29 = vsel %vm2094_vm3, %v7791_v46, %v2091_v2 }
 0xfe7   :  { %v2100_v51 = vsel %vm2097_vm4, %v2099_v53, %v2095_v29 }
 0xfe8   :  { %v2101_v25 = vmul.f32 %v8945_v30, %v2100_v51 }
 0xfe9   :  { %6947 = vmatmul.msk.f32.gmra.mxu0 %vm846_vm2, %v2026_v60 }
 0xfec   :  { %6952 = vmatmul.msk.f32.gmra.mxu1 %vm846_vm2, %v2101_v25 }
 0xffd   :  { %v1972_v38 = vpop.xlane.xlu1 %1971 }
 0xffe   :  { %7792 = vrcp.f32 %v1972_v38  ;;  %v2113_v35 = vand.u32 2147483648, %v1972_v38  ;;  %v2111_v32 = vand.u32 2147483647, %v1972_v38  ;;  %vm2107_vm6 = vweird.f32 %v1972_v38 }
0x1000   :  { %v1957_v37 = vpop.xlane.xlu0 %1956  ;;  %v2114_v62 = vor.u32 1.1754944e-38, %v2113_v35  ;;  %vm2112_vm8 = vcmp.eq.f32.partialorder %v2111_v32, 8.507059e+37 }
0x1001   :  { %7794 = vrcp.f32 %v1957_v37  ;;  %v2038_v58 = vand.u32 2147483648, %v1957_v37  ;;  %v2036_v6 = vand.u32 2147483647, %v1957_v37  ;;  %vm2032_vm11 = vweird.f32 %v1957_v37 }
0x1003   :  { %v2039_v46 = vor.u32 1.1754944e-38, %v2038_v58  ;;  %vm2037_vm13 = vcmp.eq.f32.partialorder %v2036_v6, 8.507059e+37 }
0x1004   :  { %v7793_v24 = vpop.eup %7792 }
0x1005   :  { %v2103_v54 = vmul.f32 %v7793_v24, %v1972_v38  ;;  %v9037_v33 = vpop.xlane.xlu1 %1962  ;;  %vm2108_vm5 = vweird.f32 %v7793_v24 }
0x1006   :  { %vm2109_vm7 = vmor %vm2107_vm6, %vm2108_vm5 }
0x1007   :  { %v7795_v50 = vpop.eup %7794  ;;  %v2104_v55 = vsub.f32 1.0, %v2103_v54 }
0x1008   :  { %v2028_v47 = vmul.f32 %v7795_v50, %v1957_v37  ;;  %v1975_v21 = vpop.xlane.xlu0 %1974  ;;  %vm2033_vm9 = vweird.f32 %v7795_v50 }
0x1009   :  { %7796 = vrcp.f32 %v1975_v21  ;;  %v2105_v57 = vmul.f32 %v7793_v24, %v2104_v55  ;;  %vm2034_vm12 = vmor %vm2032_vm11, %vm2033_vm9  ;;  %v2126_v61 = vand.u32 2147483647, %v1975_v21  ;;  %v2128_v18 = vand.u32 2147483648, %v1975_v21 }
0x100a   :  { %v2029_v30 = vsub.f32 1.0, %v2028_v47  ;;  %vm2122_vm15 = vweird.f32 %v1975_v21 }
0x100b   :  { %v2106_v40 = vadd.f32 %v7793_v24, %v2105_v57  ;;  %vm2127_vm3 = vcmp.eq.f32.partialorder %v2126_v61, 8.507059e+37  ;;  %v2129_v49 = vor.u32 1.1754944e-38, %v2128_v18 }
0x100c   :  { %v2030_v56 = vmul.f32 %v7795_v50, %v2029_v30 }
0x100d   :  { %v9039_v31 = vpop.xlane.xlu1 %1980  ;;  %v2110_v45 = vsel %vm2109_vm7, %v7793_v24, %v2106_v40 }
0x100e   :  { %7798 = vrcp.f32 %v9039_v31  ;;  %v2115_v5 = vsel %vm2112_vm8, %v2114_v62, %v2110_v45  ;;  %v2031_v59 = vadd.f32 %v7795_v50, %v2030_v56  ;;  %v2158_v55 = vand.u32 2147483648, %v9039_v31 }
0x100f   :  { %v7797_v3 = vpop.eup %7796  ;;  %v2116_v10 = vmul.f32 %v8959_v34, %v2115_v5  ;;  %vm2152_vm9 = vweird.f32 %v9039_v31  ;;  %v2156_v32 = vand.u32 2147483647, %v9039_v31 }
0x1010   :  { %v2118_v15 = vmul.f32 %v7797_v3, %v1975_v21  ;;  %v1978_v14 = vpop.xlane.xlu0 %1977  ;;  %v2035_v42 = vsel %vm2034_vm12, %v7795_v50, %v2031_v59  ;;  %vm2123_vm14 = vweird.f32 %v7797_v3  ;;  %v2159_v45 = vor.u32 1.1754944e-38, %v2158_v55 }
0x1011   :  { %7800 = vrcp.f32 %v1978_v14  ;;  %6953 = vmatmul.msk.f32.gmra.mxu1 %vm846_vm2, %v2116_v10  ;;  %v2040_v28 = vsel %vm2037_vm13, %v2039_v46, %v2035_v42  ;;  %vm2124_vm1 = vmor %vm2122_vm15, %vm2123_vm14  ;;  %v2143_v53 = vand.u32 2147483648, %v1978_v14  ;;  %v2141_v51 = vand.u32 2147483647, %v1978_v14 }
0x1012   :  { %7802 = vrcp.f32 %v9037_v33  ;;  %v2119_v26 = vsub.f32 1.0, %v2118_v15  ;;  %v2041_v12 = vmul.f32 %v8962_v1, %v2040_v28  ;;  %vm2137_vm5 = vweird.f32 %v1978_v14 }
0x1013   :  { %v2144_v24 = vor.u32 1.1754944e-38, %v2143_v53  ;;  %vm2142_vm8 = vcmp.eq.f32.partialorder %v2141_v51, 8.507059e+37  ;;  %vm2157_vm15 = vcmp.eq.f32.partialorder %v2156_v32, 8.507059e+37  ;;  %v2068_v59 = vand.u32 2147483648, %v9037_v33 }
0x1014   :  { %v9046_v34 = vpop.eup %7798  ;;  %v2120_v9 = vmul.f32 %v7797_v3, %v2119_v26  ;;  %6948 = vmatmul.msk.f32.gmra.mxu0 %vm846_vm2, %v2041_v12 }
0x1015   :  { %v2148_v7 = vmul.f32 %v9046_v34, %v9039_v31  ;;  %vm2153_vm7 = vweird.f32 %v9046_v34  ;;  %v2069_v26 = vor.u32 1.1754944e-38, %v2068_v59 }
0x1016   :  { %v2121_v4 = vadd.f32 %v7797_v3, %v2120_v9  ;;  %vm9064_vm11 = vmor %vm2152_vm9, %vm2153_vm7 }
0x1017   :  { %v7801_v39 = vpop.eup %7800  ;;  %v1960_v63 = vpop.xlane.xlu2 %1959  ;;  %v2149_v1 = vsub.f32 1.0, %v2148_v7 }
0x1018   :  { %v9051_v19 = vpop.eup %7802  ;;  %v2133_v43 = vmul.f32 %v7801_v39, %v1978_v14  ;;  %7804 = vrcp.f32 %v1960_v63  ;;  %v2125_v16 = vsel %vm2124_vm1, %v7797_v3, %v2121_v4  ;;  %vm2138_vm4 = vweird.f32 %v7801_v39  ;;  %v6897_v4 = vld [vmem:[%s11076_s6 + $0xc8] sm:$0xff] }
0x1019   :  { %v2130_v48 = vsel %vm2127_vm3, %v2129_v49, %v2125_v16  ;;  %v2058_v2 = vmul.f32 %v9051_v19, %v9037_v33  ;;  %v2150_v29 = vmul.f32 %v9046_v34, %v2149_v1  ;;  %vm2139_vm6 = vmor %vm2137_vm5, %vm2138_vm4  ;;  %v2053_v57 = vand.u32 2147483648, %v1960_v63 }
0x101a   :  { %v2134_v52 = vsub.f32 1.0, %v2133_v43  ;;  %v2131_v36 = vmul.f32 %v8971_v13, %v2130_v48  ;;  %v2051_v62 = vand.u32 2147483647, %v1960_v63  ;;  %vm2047_vm13 = vweird.f32 %v1960_v63 }
0x101b   :  { %v2059_v37 = vsub.f32 1.0, %v2058_v2  ;;  %v2151_v50 = vadd.f32 %v9046_v34, %v2150_v29  ;;  %v2054_v31 = vor.u32 1.1754944e-38, %v2053_v57  ;;  %vm2063_vm1 = vweird.f32 %v9051_v19 }
0x101c   :  { %v2135_v60 = vmul.f32 %v7801_v39, %v2134_v52  ;;  %6954 = vmatmul.msk.f32.gmra.mxu1 %vm846_vm2, %v2131_v36  ;;  %vm2052_vm3 = vcmp.eq.f32.partialorder %v2051_v62, 8.507059e+37  ;;  %vm2062_vm4 = vweird.f32 %v9037_v33  ;;  %v2066_v14 = vand.u32 2147483647, %v9037_v33  ;;  %v6896_v33 = vld [vmem:[%s11076_s6 + $0xc0] sm:$0xff] }
0x101d   :  { %v2060_v56 = vmul.f32 %v9051_v19, %v2059_v37  ;;  %v2155_v58 = vsel %vm9064_vm11, %v9046_v34, %v2151_v50  ;;  %vm2064_vm5 = vmor %vm2062_vm4, %vm2063_vm1  ;;  %2383 = vmatpush.msra.mxu0 %v6896_v33  ;;  %v6893_v33 = vld [vmem:[%s11075_s5 + $0x38] sm:$0xff] }
0x101e   :  { %v7805_v25 = vpop.eup %7804  ;;  %v2136_v38 = vadd.f32 %v7801_v39, %v2135_v60  ;;  %v2160_v5 = vsel %vm2157_vm15, %v2159_v45, %v2155_v58 }
0x101f   :  { %v2043_v54 = vmul.f32 %v7805_v25, %v1960_v63  ;;  %vm2048_vm12 = vweird.f32 %v7805_v25  ;;  %v2061_v3 = vadd.f32 %v9051_v19, %v2060_v56  ;;  %v2161_v46 = vmul.f32 %v8978_v27, %v2160_v5  ;;  %v6895_v27 = vld [vmem:[%s11076_s6 + $0xb8] sm:$0xff]  ;;  %v8047_v5 = vld [vmem:[%s11070_s0 + $0x8] sm:$0xff]  ;;  %2564 = vmatpush.msrb.mxu0 %v6893_v33 }
0x1020   :  { %v2140_v13 = vsel %vm2139_vm6, %v7801_v39, %v2136_v38  ;;  %vm2049_vm14 = vmor %vm2047_vm13, %vm2048_vm12  ;;  %vm2067_vm6 = vcmp.eq.f32.partialorder %v2066_v14, 8.507059e+37  ;;  %2325 = vmatpush.msra.mxu2 %v6895_v27  ;;  %v6898_v39 = vld [vmem:[%s11076_s6 + $0xd0] sm:$0xff] }
0x1021   :  { %v2044_v47 = vsub.f32 1.0, %v2043_v54  ;;  %v2145_v21 = vsel %vm2142_vm8, %v2144_v24, %v2140_v13  ;;  %v2065_v42 = vsel %vm2064_vm5, %v9051_v19, %v2061_v3  ;;  %v9118_v54 = vld [vmem:[%s11077_s7 + $0x4] sm:$0x7] }
0x1022   :  { %v2146_v35 = vmul.f32 %v8980_v17, %v2145_v21  ;;  %v2070_v28 = vsel %vm2067_vm6, %v2069_v26, %v2065_v42  ;;  %2414 = vmatpush.msrb.mxu2 %v6897_v4  ;;  %v2486_v13 = vperm.slane %v9118_v54, 1  ;;  %v6914_v4 = vld [vmem:[%s11076_s6 + $0x150] sm:$0xff] }
0x1023   :  { %v2045_v40 = vmul.f32 %v7805_v25, %v2044_v47  ;;  %v2071_v12 = vmul.f32 %v8969_v11, %v2070_v28  ;;  %v6899_v11 = vld [vmem:[%s11076_s6 + $0xd8] sm:$0xff] }
0x1024   :  { %6955 = vmatmul.msk.f32.gmra.mxu1 %vm846_vm2, %v2146_v35 }
0x1025   :  { %v2046_v17 = vadd.f32 %v7805_v25, %v2045_v40  ;;  %2476 = vmatpush.msrb.mxu1 %v6899_v11  ;;  %v8046_v40 = vld [vmem:[%s11070_s0] sm:$0xff]  ;;  %v6892_v11 = vld [vmem:[%s11075_s5 + $0x30] sm:$0xff] }
0x1026   :  { %2565 = vmatpush.msrb.mxu0 %v6892_v11 }
0x1027   :  { %v2050_v6 = vsel %vm2049_vm14, %v7805_v25, %v2046_v17 }
0x1028   :  { %v2055_v10 = vsel %vm2052_vm3, %v2054_v31, %v2050_v6 }
0x1029   :  { %v2056_v15 = vmul.f32 %v8986_v44, %v2055_v10  ;;  %v6894_v44 = vld [vmem:[%s11076_s6 + $0xb0] sm:$0xff] }
0x102a   :  { %2354 = vmatpush.msra.mxu3 %v6894_v44 }
0x102b   :  { %6949 = vmatmul.msk.f32.gmra.mxu0 %vm846_vm2, %v2056_v15 }
0x102c   :  { %6956 = vmatmul.msk.f32.gmra.mxu1 %vm846_vm2, %v2161_v46  ;;  %2445 = vmatpush.msrb.mxu3 %v6898_v39  ;;  %v6913_v39 = vld [vmem:[%s11076_s6 + $0x148] sm:$0xff] }
0x1033   :  { %6950 = vmatmul.msk.f32.gmra.mxu0 %vm846_vm2, %v2071_v12 }
0x1056   :  { %v2215_v61 = vpop.f32.mrf.mxu0 }
0x1057   :  { %6959 = vmatmul.msk.f32.vlgmr.msra.gmra.mxu3 %vm43_vm0, %v2215_v61  ;;  %v6891_v61 = vld [vmem:[%s11075_s5 + $0x28] sm:$0xff] }
0x1058   :  { %2566 = vmatpush.msrb.mxu0 %v6891_v61 }
0x105e   :  { %v2218_v18 = vpop.f32.mrf.mxu0 }
0x105f   :  { %6957 = vmatmul.msk.f32.vlgmr.msra.gmra.mxu2 %vm43_vm0, %v2218_v18 }
0x1061   :  { %v2286_v34 = vpop.f32.mrf.mxu1 }
0x1062   :  { %6960 = vmatmul.msk.f32.gmra.mxu3 %vm43_vm0, %v2286_v34 }
0x1066   :  { %v2221_v9 = vpop.f32.mrf.mxu0 }
0x1067   :  { %6961 = vmatmul.msk.f32.vlgmr.msra.gmra.mxu0 %vm43_vm0, %v2221_v9 }
0x1069   :  { %v2289_v7 = vpop.f32.mrf.mxu1 }
0x106a   :  { %6958 = vmatmul.msk.f32.gmra.mxu2 %vm43_vm0, %v2289_v7  ;;  %v6915_v7 = vld [vmem:[%s11076_s6 + $0x158] sm:$0xff] }
0x106b   :  { %2581 = vmatpush.msra.mxu2 %v6915_v7  ;;  %v7001_v7 = vld [vmem:[%s11077_s7 + $0x8] sm:$0x7] }
0x106d   :  { %2582 = vmatpush.msra.mxu2 %v6914_v4  ;;  %v9229_v4 = vperm.slane %v7001_v7, 0 }
0x106f   :  { %2583 = vmatpush.msra.mxu2 %v6913_v39 }
0x108e   :  { %v2292_v63 = vpop.f32.mrf.mxu1 }
0x108f   :  { %6962 = vmatmul.msk.f32.gmra.mxu0 %vm43_vm0, %v2292_v63 }
0x1091   :  { %v2224_v49 = vpop.f32.mrf.mxu0 }
0x1092   :  { %6963 = vmatmul.msk.f32.vlgmr.msrb.gmra.mxu2 %vm43_vm0, %v2224_v49 }
0x1099   :  { %v2295_v19 = vpop.f32.mrf.mxu1 }
0x109a   :  { %6964 = vmatmul.msk.f32.gmra.mxu2 %vm43_vm0, %v2295_v19  ;;  %v6912_v19 = vld [vmem:[%s11076_s6 + $0x140] sm:$0xff] }
0x109b   :  { %2584 = vmatpush.msra.mxu2 %v6912_v19 }
0x10a1   :  { %v2298_v43 = vpop.f32.mrf.mxu1 }
0x10a8   :  { %v2227_v1 = vpop.f32.mrf.mxu0 }
0x10a9   :  { %6965 = vmatmul.msk.f32.vlgmr.msrb.gmra.mxu3 %vm43_vm0, %v2227_v1  ;;  %v2301_v48 = vpop.f32.mrf.mxu1 }
0x10b0   :  { %v2230_v16 = vpop.f32.mrf.mxu0 }
0x10b1   :  { %6966 = vmatmul.msk.f32.gmra.mxu3 %vm43_vm0, %v2298_v43  ;;  %6967 = vmatmul.msk.f32.vlgmr.msrb.gmra.mxu1 %vm43_vm0, %v2230_v16  ;;  %v6911_v16 = vld [vmem:[%s11076_s6 + $0x138] sm:$0xff] }
0x10b2   :  { %2585 = vmatpush.msra.mxu2 %v6911_v16 }
0x10b9   :  { %6968 = vmatmul.msk.f32.gmra.mxu1 %vm43_vm0, %v2301_v48 }
0x10da   :  { %v2356_v36 = vpop.f32.mrf.mxu3 }
0x10e2   :  { %v2327_v52 = vpop.f32.mrf.mxu2 }
0x10e3   :  { %v2357_v29 = vadd.f32 %v2356_v36, %v2327_v52  ;;  %v6910_v52 = vld [vmem:[%s11076_s6 + $0x130] sm:$0xff] }
0x10e4   :  { %v2385_v60 = vpop.f32.mrf.mxu0  ;;  %2586 = vmatpush.msra.mxu2 %v6910_v52  ;;  %v6974_v52 = vld [vmem:[%s11074_s4 + $0x58] sm:$0xff] }
0x10e5   :  { %v2359_v53 = vpop.f32.mrf.mxu3  ;;  %v2391_v25 = vadd.f32 %v2385_v60, %v2357_v29  ;;  %v6908_v29 = vld [vmem:[%s11076_s6 + $0x120] sm:$0xff]  ;;  %2722 = vmatpush.msra.mxu3 %v6974_v52 }
0x10ed   :  { %v2330_v2 = vpop.f32.mrf.mxu2 }
0x10ee   :  { %v2360_v47 = vadd.f32 %v2359_v53, %v2330_v2  ;;  %v6909_v2 = vld [vmem:[%s11076_s6 + $0x128] sm:$0xff] }
0x10ef   :  { %2587 = vmatpush.msra.mxu2 %v6909_v2  ;;  %v6972_v2 = vld [vmem:[%s11074_s4 + $0x48] sm:$0xff] }
0x10f1   :  { %2588 = vmatpush.msra.mxu2 %v6908_v29 }
0x110c   :  { %v2388_v50 = vpop.f32.mrf.mxu0 }
0x110d   :  { %v2392_v57 = vadd.f32 %v2388_v50, %v2360_v47 }
0x1115   :  { %v2416_v51 = vpop.f32.mrf.mxu2 }
0x1116   :  { %v2422_v38 = vadd.f32 %v2416_v51, %v2391_v25  ;;  %v6907_v25 = vld [vmem:[%s11076_s6 + $0x118] sm:$0xff] }
0x1117   :  { %2589 = vmatpush.msra.mxu2 %v6907_v25 }
0x111d   :  { %v2419_v35 = vpop.f32.mrf.mxu2 }
0x111e   :  { %v2423_v30 = vadd.f32 %v2419_v35, %v2392_v57 }
0x112c   :  { %v2447_v37 = vpop.f32.mrf.mxu3 }
0x112d   :  { %v2453_v24 = vadd.f32 %v2447_v37, %v2422_v38 }
0x112e   :  { %v2478_v55 = vpop.f32.mrf.mxu1 }
0x112f   :  { %v2484_v21 = vadd.f32 %v2478_v55, %v2453_v24  ;;  %v6906_v24 = vld [vmem:[%s11076_s6 + $0x110] sm:$0xff] }
0x1130   :  { %2590 = vmatpush.msra.mxu2 %v6906_v24 }
0x1131   :  { %v2487_v32 = vadd.f32 %v2486_v13, %v2484_v21  ;;  %v6905_v21 = vld [vmem:[%s11076_s6 + $0x108] sm:$0xff] }
0x1132   :  { %2591 = vmatpush.msra.mxu2 %v6905_v21 }
0x1133   :  { %v9124_v62 = vadd.f32 %v8046_v40, %v2487_v32 }
0x1134   :  { %v2450_v56 = vpop.f32.mrf.mxu3 }
0x1135   :  { %v2454_v58 = vadd.f32 %v2450_v56, %v2423_v30  ;;  %v2491_v45 = vsel %vm121_vm10, %v9124_v62, 0.0  ;;  %v6904_v30 = vld [vmem:[%s11076_s6 + $0x100] sm:$0xff] }
0x1136   :  { %v2481_v17 = vpop.f32.mrf.mxu1  ;;  %2492 = vadd.xlane.f32.xlu0 %v2491_v45  ;;  %2592 = vmatpush.msra.mxu2 %v6904_v30 }
0x1137   :  { %v2485_v31 = vadd.f32 %v2481_v17, %v2454_v58  ;;  %v6903_v58 = vld [vmem:[%s11076_s6 + $0xf8] sm:$0xff] }
0x1138   :  { %2593 = vmatpush.msra.mxu2 %v6903_v58 }
0x1139   :  { %v2488_v6 = vadd.f32 %v2486_v13, %v2485_v31 }
0x113b   :  { %v9131_v3 = vadd.f32 %v8047_v5, %v2488_v6 }
0x113d   :  { %v2494_v10 = vsel %vm121_vm10, %v9131_v3, 0.0 }
0x113e   :  { %2495 = vadd.xlane.f32.xlu1 %v2494_v10  ;;  %v6902_v10 = vld [vmem:[%s11076_s6 + $0xf0] sm:$0xff] }
0x113f   :  { %2594 = vmatpush.msra.mxu2 %v6902_v10 }
0x1157   :  { %2535 = vrot.lane.b32.xlu1 %v8755_v23, %s8110_s27 }
0x11a9   :  { %v2493_v59 = vpop.xlane.xlu0 %2492 }
0x11aa   :  { %v2497_v15 = vmul.f32 %v2493_v59, %v8266_v8  ;;  %v6901_v59 = vld [vmem:[%s11076_s6 + $0xe8] sm:$0xff] }
0x11ab   :  { %2595 = vmatpush.msra.mxu2 %v6901_v59 }
0x11ac   :  { %v2499_v14 = vsub.f32 %v9124_v62, %v2497_v15  ;;  %v6900_v15 = vld [vmem:[%s11076_s6 + $0xe0] sm:$0xff] }
0x11ad   :  { %2596 = vmatpush.msra.mxu2 %v6900_v15 }
0x11ae   :  { %v2501_v46 = vmul.f32 %v2499_v14, %v2499_v14 }
0x11b0   :  { %v2503_v42 = vsel %vm121_vm10, %v2501_v46, 0.0 }
0x11b1   :  { %2504 = vadd.xlane.f32.xlu2 %v2503_v42  ;;  %v2496_v26 = vpop.xlane.xlu1 %2495 }
0x11b2   :  { %v2498_v28 = vmul.f32 %v2496_v26, %v8266_v8 }
0x11b4   :  { %v9142_v12 = vsub.f32 %v9131_v3, %v2498_v28 }
0x11b6   :  { %v2502_v44 = vmul.f32 %v9142_v12, %v9142_v12 }
0x11b8   :  { %v2506_v27 = vsel %vm121_vm10, %v2502_v44, 0.0 }
0x11b9   :  { %2507 = vadd.xlane.f32.xlu0 %v2506_v27 }
0x11c9   :  { %2540 = vrot.lane.b32.xlu2 %v8755_v23, %s8111_s28  ;;  %v6890_v23 = vld [vmem:[%s11075_s5 + $0x20] sm:$0xff]  ;;  %v2536_v55 = vpop.permute.xlu1 %2535 }
0x11ca   :  { %2567 = vmatpush.msrb.mxu0 %v6890_v23 }
0x11cd   :  { %2578 = vrot.lane.b32.xlu0 %v2486_v13, %s8104_s26 }
0x1224   :  { %v2505_v18 = vpop.xlane.xlu2 %2504 }
0x1225   :  { %v2509_v34 = vmul.f32 %v2505_v18, %v8266_v8 }
0x1227   :  { %v2511_v9 = vadd.f32 1e-05, %v2509_v34 }
0x1229   :  { %7806 = vrsqrt.f32 %v2511_v9  ;;  %vm2519_vm8 = vweird.f32 %v2511_v9 }
0x122c   :  { %v2508_v63 = vpop.xlane.xlu0 %2507  ;;  %v2541_v57 = vpop.permute.xlu2 %2540 }
0x122d   :  { %v2510_v49 = vmul.f32 %v2508_v63, %v8266_v8 }
0x122f   :  { %v7807_v1 = vpop.eup %7806  ;;  %v2512_v43 = vadd.f32 1e-05, %v2510_v49 }
0x1230   :  { %v2514_v48 = vmul.f32 %v7807_v1, %v2511_v9  ;;  %vm2520_vm7 = vweird.f32 %v7807_v1 }
0x1231   :  { %7808 = vrsqrt.f32 %v2512_v43  ;;  %vm2521_vm9 = vmor %vm2519_vm8, %vm2520_vm7  ;;  %vm2529_vm12 = vweird.f32 %v2512_v43 }
0x1232   :  { %v2515_v36 = vmul.f32 %v7807_v1, %v2514_v48 }
0x1234   :  { %v2516_v53 = vmul.f32 0.5, %v2515_v36  ;;  %v6973_v36 = vld [vmem:[%s11074_s4 + $0x50] sm:$0xff] }
0x1235   :  { %2723 = vmatpush.msra.mxu3 %v6973_v36 }
0x1236   :  { %v2517_v60 = vsub.f32 1.5, %v2516_v53  ;;  %v6971_v53 = vld [vmem:[%s11074_s4 + $0x40] sm:$0xff] }
0x1237   :  { %v7809_v51 = vpop.eup %7808  ;;  %2724 = vmatpush.msra.mxu3 %v6972_v2 }
0x1238   :  { %v2524_v38 = vmul.f32 %v7809_v51, %v2512_v43  ;;  %v2518_v37 = vmul.f32 %v7807_v1, %v2517_v60  ;;  %vm2530_vm11 = vweird.f32 %v7809_v51 }
0x1239   :  { %vm2531_vm13 = vmor %vm2529_vm12, %vm2530_vm11  ;;  %2725 = vmatpush.msra.mxu3 %v6971_v53 }
0x123a   :  { %v2525_v13 = vmul.f32 %v7809_v51, %v2524_v38  ;;  %v2522_v50 = vsel %vm2521_vm9, %v7807_v1, %v2518_v37 }
0x123b   :  { %v2533_v47 = vmul.f32 %v2522_v50, %v2499_v14  ;;  %v2545_v14 = vperm.slane %v9118_v54, 2 }
0x123c   :  { %v2526_v35 = vmul.f32 0.5, %v2525_v13 }
0x123d   :  { %v2538_v32 = vmul.f32 %v2536_v55, %v2533_v47 }
0x123e   :  { %v2527_v40 = vsub.f32 1.5, %v2526_v35 }
0x123f   :  { %v2543_v56 = vadd.f32 %v2541_v57, %v2538_v32  ;;  %v2579_v27 = vpop.permute.xlu0 %2578 }
0x1240   :  { %v2528_v45 = vmul.f32 %v7809_v51, %v2527_v40 }
0x1241   :  { %6969 = vmatmul.msk.f32.vlgmr.msrb.gmra.mxu0 %vm121_vm10, %v2543_v56 }
0x1242   :  { %v2532_v17 = vsel %vm2531_vm13, %v7809_v51, %v2528_v45 }
0x1243   :  { %v2534_v31 = vmul.f32 %v2532_v17, %v9142_v12 }
0x1245   :  { %v2539_v6 = vmul.f32 %v2536_v55, %v2534_v31 }
0x1247   :  { %v2544_v5 = vadd.f32 %v2541_v57, %v2539_v6 }
0x1249   :  { %6970 = vmatmul.msk.f32.gmra.mxu0 %vm121_vm10, %v2544_v5 }
0x12be   :  { %v2569_v46 = vpop.f32.mrf.mxu0 }
0x12bf   :  { %v2570_v42 = vadd.f32 %v2569_v46, %v2545_v14 }
0x12c1   :  { %v2575_v26 = vmax.f32 %v2570_v42, 0.0  ;;  %v2689_v42 = vmul.f32 %v9229_v4, %v8784_v22 }
0x12c3   :  { %2597 = vmatmul.f32.vlgmr.msra.gmra.mxu2 %v2575_v26 }
0x12c6   :  { %v2572_v28 = vpop.f32.mrf.mxu0 }
0x12c7   :  { %v2573_v12 = vadd.f32 %v2572_v28, %v2545_v14  ;;  %v2688_v14 = vmul.f32 %v9229_v4, %v8779_v0 }
0x12c9   :  { %v2576_v44 = vmax.f32 %v2573_v12, 0.0 }
0x12cb   :  { %2600 = vmatmul.f32.gmra.mxu2 %v2576_v44 }
0x1346   :  { %v2598_v33 = vpop.f32.mrf.mxu2 }
0x1347   :  { %v2599_v11 = vadd.f32 %v2598_v33, %v2579_v27 }
0x1349   :  { %v9217_v61 = vadd.f32 %v2599_v11, %v9124_v62 }
0x134b   :  { %v2641_v23 = vsel %vm121_vm10, %v9217_v61, 0.0 }
0x134c   :  { %2642 = vadd.xlane.f32.xlu0 %v2641_v23 }
0x134e   :  { %v2601_v18 = vpop.f32.mrf.mxu2 }
0x134f   :  { %v2602_v54 = vadd.f32 %v2601_v18, %v2579_v27 }
0x1351   :  { %v9222_v34 = vadd.f32 %v2602_v54, %v9131_v3 }
0x1353   :  { %v2644_v9 = vsel %vm121_vm10, %v9222_v34, 0.0 }
0x1354   :  { %2645 = vadd.xlane.f32.xlu1 %v2644_v9 }
0x136d   :  { %2691 = vrot.lane.b32.xlu1 %v9229_v4, %s8104_s26 }
0x13bf   :  { %v2643_v62 = vpop.xlane.xlu0 %2642 }
0x13c0   :  { %v2647_v39 = vmul.f32 %v2643_v62, %v8266_v8 }
0x13c2   :  { %v2649_v63 = vsub.f32 %v9217_v61, %v2647_v39 }
0x13c4   :  { %v2651_v3 = vmul.f32 %v2649_v63, %v2649_v63 }
0x13c6   :  { %v2653_v49 = vsel %vm121_vm10, %v2651_v3, 0.0 }
0x13c7   :  { %v2646_v19 = vpop.xlane.xlu1 %2645  ;;  %2654 = vadd.xlane.f32.xlu2 %v2653_v49 }
0x13c8   :  { %v2648_v1 = vmul.f32 %v2646_v19, %v8266_v8 }
0x13ca   :  { %v2650_v43 = vsub.f32 %v9222_v34, %v2648_v1 }
0x13cc   :  { %v2652_v16 = vmul.f32 %v2650_v43, %v2650_v43 }
0x13ce   :  { %v2656_v48 = vsel %vm121_vm10, %v2652_v16, 0.0 }
0x13cf   :  { %2657 = vadd.xlane.f32.xlu0 %v2656_v48 }
0x13df   :  { %v2692_v45 = vpop.permute.xlu1 %2691 }
0x13e0   :  { %v2696_v46 = vadd.f32 %v2692_v45, %v2688_v14  ;;  %v2697_v26 = vadd.f32 %v2692_v45, %v2689_v42 }
0x143a   :  { %v2655_v29 = vpop.xlane.xlu2 %2654 }
0x143b   :  { %v2659_v60 = vmul.f32 %v2655_v29, %v8266_v8 }
0x143d   :  { %v2661_v51 = vadd.f32 1e-05, %v2659_v60 }
0x143f   :  { %7810 = vrsqrt.f32 %v2661_v51  ;;  %vm2669_vm15 = vweird.f32 %v2661_v51 }
0x1442   :  { %v2658_v25 = vpop.xlane.xlu0 %2657 }
0x1443   :  { %v2660_v38 = vmul.f32 %v2658_v25, %v8266_v8  ;;  %v8048_v25 = vld [vmem:[%s11072_s2] sm:$0xff] }
0x1445   :  { %v7811_v37 = vpop.eup %7810  ;;  %v2662_v24 = vadd.f32 1e-05, %v2660_v38 }
0x1446   :  { %v2664_v13 = vmul.f32 %v7811_v37, %v2661_v51  ;;  %vm2670_vm14 = vweird.f32 %v7811_v37 }
0x1447   :  { %7812 = vrsqrt.f32 %v2662_v24  ;;  %vm2671_vm1 = vmor %vm2669_vm15, %vm2670_vm14  ;;  %vm2679_vm4 = vweird.f32 %v2662_v24 }
0x1448   :  { %v2665_v50 = vmul.f32 %v7811_v37, %v2664_v13 }
0x144a   :  { %v2666_v55 = vmul.f32 0.5, %v2665_v50 }
0x144c   :  { %v2667_v47 = vsub.f32 1.5, %v2666_v55 }
0x144d   :  { %v7813_v21 = vpop.eup %7812 }
0x144e   :  { %v2668_v35 = vmul.f32 %v7811_v37, %v2667_v47  ;;  %v2674_v57 = vmul.f32 %v7813_v21, %v2662_v24  ;;  %vm2680_vm3 = vweird.f32 %v7813_v21 }
0x144f   :  { %vm2681_vm5 = vmor %vm2679_vm4, %vm2680_vm3 }
0x1450   :  { %v2672_v32 = vsel %vm2671_vm1, %v7811_v37, %v2668_v35  ;;  %v2675_v30 = vmul.f32 %v7813_v21, %v2674_v57 }
0x1451   :  { %v9253_v40 = vmul.f32 %v2672_v32, %v2649_v63  ;;  %v8049_v32 = vld [vmem:[%s11072_s2 + $0x8] sm:$0xff] }
0x1452   :  { %v2676_v56 = vmul.f32 0.5, %v2675_v30 }
0x1453   :  { %v2686_v58 = vmul.f32 %v9229_v4, %v9253_v40 }
0x1454   :  { %v2677_v17 = vsub.f32 1.5, %v2676_v56 }
0x1455   :  { %v2694_v31 = vadd.f32 %v2692_v45, %v2686_v58 }
0x1456   :  { %v2678_v6 = vmul.f32 %v7813_v21, %v2677_v17 }
0x1457   :  { %7002 = vmatmul.msk.f32.vlgmr.msra.gmra.mxu3 %vm121_vm10, %v2694_v31 }
0x1458   :  { %v2682_v5 = vsel %vm2681_vm5, %v7813_v21, %v2678_v6 }
0x1459   :  { %v9258_v10 = vmul.f32 %v2682_v5, %v2650_v43 }
0x145b   :  { %v2687_v59 = vmul.f32 %v9229_v4, %v9258_v10 }
0x145d   :  { %v2695_v15 = vadd.f32 %v2692_v45, %v2687_v59 }
0x145f   :  { %7003 = vmatmul.msk.f32.gmra.mxu3 %vm121_vm10, %v2695_v15  ;;  %v8050_v15 = vld [vmem:[%s11072_s2 + $0x10] sm:$0xff] }
0x1467   :  { %7004 = vmatmul.msk.f32.gmra.mxu3 %vm121_vm10, %v2696_v46 }
0x146f   :  { %7005 = vmatmul.msk.f32.gmra.mxu3 %vm121_vm10, %v2697_v26 }
0x14da   :  { %v9269_v28 = vpop.f32.mrf.mxu3 }
0x14e2   :  { %v9271_v12 = vpop.f32.mrf.mxu3 }
0x14e3   :  { %v7441_v0 = vpack.i.bf16 %v9271_v12, %v9269_v28 }
0x14ea   :  { %v2733_v44 = vpop.f32.mrf.mxu3 }
0x14eb   :  { %2753 = vrot.lane.b32.xlu0 %v2733_v44, %s8104_s26  ;;  %2757 = vrot.lane.b32.xlu2 %v2733_v44, %s8106_s14 }
0x14f2   :  { %v2736_v27 = vpop.f32.mrf.mxu3 }
0x14f3   :  { %2745 = vrot.lane.b32.xlu0 %v2733_v44, %s8107_s1  ;;  %2749 = vrot.lane.b32.xlu2 %v2733_v44, %s8105_s13 }
0x14f4   :  { %2759 = vrot.lane.b32.xlu1 %v2736_v27, %s8106_s14 }
0x14fb   :  { %2751 = vrot.lane.b32.xlu0 %v2736_v27, %s8105_s13  ;;  %2755 = vrot.lane.b32.xlu2 %v2736_v27, %s8104_s26 }
0x14fc   :  { %2741 = vrot.lane.b32.xlu1 %v2733_v44, %s8108_s15 }
0x1503   :  { %7442 = vrot.lane.b32.xlu0 %v7441_v0, %s8104_s26  ;;  %2747 = vrot.lane.b32.xlu2 %v2736_v27, %s8107_s1 }
0x1504   :  { %2743 = vrot.lane.b32.xlu1 %v2736_v27, %s8108_s15 }
0x150b   :  { %7452 = vrot.lane.b32.xlu0 %v7441_v0, %s8107_s1  ;;  %7447 = vrot.lane.b32.xlu2 %v7441_v0, %s8105_s13 }
0x150c   :  { %7437 = vrot.lane.b32.xlu1 %v7441_v0, %s8106_s14 }
0x1514   :  { %7457 = vrot.lane.b32.xlu1 %v7441_v0, %s8108_s15  ;;  %v8051_v0 = vld [vmem:[%s11072_s2 + $0x18] sm:$0xff] }
0x1545   :  { %v2758_v22 = vpop.permute.xlu2 %2757 }
0x1546   :  { %7006 = vmatpush.xpose.msk.msra.mxu1 %vm43_vm0, %v2758_v22 }
0x154d   :  { %v2750_v33 = vpop.permute.xlu2 %2749 }
0x1555   :  { %v2756_v54 = vpop.permute.xlu2 %2755 }
0x155d   :  { %v2754_v11 = vpop.permute.xlu0 %2753  ;;  %v2748_v62 = vpop.permute.xlu2 %2747 }
0x155e   :  { %7007 = vmatpush.xpose.msk.msra.mxu1 %vm43_vm0, %v2754_v11 }
0x1562   :  { %7008 = vmatpush.xpose.msk.msra.mxu1 %vm43_vm0, %v2750_v33 }
0x1565   :  { %v2746_v23 = vpop.permute.xlu0 %2745  ;;  %v9304_v3 = vpop.permute.xlu2 %7447 }
0x1566   :  { %v2760_v18 = vpop.permute.xlu1 %2759  ;;  %7009 = vmatpush.xpose.msk.msra.mxu1 %vm43_vm0, %v2746_v23  ;;  %v7449_v19 = vunpack.i.l.bf16 %v9304_v3 }
0x1567   :  { %7018 = vmatpush.xpose.msk.msra.mxu0 %vm43_vm0, %v2760_v18 }
0x156b   :  { %7019 = vmatpush.xpose.msk.msra.mxu0 %vm43_vm0, %v2756_v54 }
0x156d   :  { %v2752_v9 = vpop.permute.xlu0 %2751 }
0x156e   :  { %v2742_v7 = vpop.permute.xlu1 %2741 }
0x156f   :  { %7010 = vmatpush.xpose.msk.msra.mxu1 %vm43_vm0, %v2742_v7  ;;  %7020 = vmatpush.xpose.msk.msra.mxu0 %vm43_vm0, %v2752_v9 }
0x1573   :  { %7011 = vmatpush.xpose.msk.msra.mxu1 %vm43_vm0, %v2733_v44  ;;  %7021 = vmatpush.xpose.msk.msra.mxu0 %vm43_vm0, %v2748_v62 }
0x1575   :  { %v9300_v39 = vpop.permute.xlu0 %7442 }
0x1576   :  { %7012 = vmatmul.msk.f32.vlgmr.msra.gmra.mxu1 %vm43_vm0, %v2733_v44  ;;  %v2744_v63 = vpop.permute.xlu1 %2743  ;;  %v7444_v16 = vunpack.i.l.bf16 %v9300_v39 }
0x1577   :  { %7022 = vmatpush.xpose.msk.msra.mxu0 %vm43_vm0, %v2744_v63 }
0x157b   :  { %7023 = vmatpush.xpose.msk.msra.mxu0 %vm43_vm0, %v2736_v27 }
0x157d   :  { %v9307_v49 = vpop.permute.xlu0 %7452 }
0x157e   :  { %v7454_v1 = vunpack.i.l.bf16 %v9307_v49  ;;  %7013 = vmatmul.msk.f32.gmra.mxu1 %vm43_vm0, %v2742_v7  ;;  %7024 = vmatmul.msk.f32.vlgmr.msra.gmra.mxu0 %vm43_vm0, %v2736_v27  ;;  %v9313_v43 = vpop.permute.xlu1 %7437 }
0x157f   :  { %v7439_v48 = vunpack.i.l.bf16 %v9313_v43 }
0x1580   :  { %v7466_v52 = vpack.i.bf16 %v7454_v1, %v7449_v19 }
0x1581   :  { %v7461_v36 = vpack.i.bf16 %v7444_v16, %v7439_v48 }
0x1582   :  { %7467 = vrot.lane.b32.xlu1 %v7466_v52, %s8109_s16 }
0x1583   :  { %7462 = vrot.lane.b32.xlu0 %v7461_v36, %s8109_s16 }
0x1586   :  { %7014 = vmatmul.msk.f32.gmra.mxu1 %vm43_vm0, %v2746_v23  ;;  %7025 = vmatmul.msk.f32.gmra.mxu0 %vm43_vm0, %v2744_v63  ;;  %v9328_v2 = vpop.permute.xlu1 %7457  ;;  %v8052_v63 = vld [vmem:[%s11072_s2 + $0x20] sm:$0xff] }
0x158e   :  { %7015 = vmatmul.msk.f32.gmra.mxu1 %vm43_vm0, %v2750_v33  ;;  %7026 = vmatmul.msk.f32.gmra.mxu0 %vm43_vm0, %v2748_v62 }
0x1596   :  { %7016 = vmatmul.msk.f32.gmra.mxu1 %vm43_vm0, %v2754_v11  ;;  %7027 = vmatmul.msk.f32.gmra.mxu0 %vm43_vm0, %v2752_v9 }
0x159e   :  { %7017 = vmatmul.msk.f32.gmra.mxu1 %vm43_vm0, %v2758_v22  ;;  %7028 = vmatmul.msk.f32.gmra.mxu0 %vm43_vm0, %v2756_v54 }
0x15a6   :  { %7029 = vmatmul.msk.f32.gmra.mxu0 %vm43_vm0, %v2760_v18 }
0x15f3   :  { %v2812_v53 = vpop.f32.mrf.mxu1 }
0x15f4   :  { %v2877_v29 = vmul.f32 0.4472136, %v2812_v53  ;;  %v7468_v37 = vpop.permute.xlu1 %7467 }
0x15f5   :  { %v7463_v60 = vpop.permute.xlu0 %7462  ;;  %v7469_v50 = vunpack.i.l.bf16 %v7468_v37  ;;  %v7470_v21 = vunpack.i.h.bf16 %v7468_v37 }
0x15f6   :  { %v7464_v51 = vunpack.i.l.bf16 %v7463_v60  ;;  %v9333_v38 = vadd.f32 %v8048_v25, %v2877_v29  ;;  %v7465_v24 = vunpack.i.h.bf16 %v7463_v60  ;;  %v8053_v60 = vld [vmem:[%s11072_s2 + $0x28] sm:$0xff] }
0x15f8   :  { %3235 = vmatpush.msrb.mxu2 %v7464_v51  ;;  %v2901_v13 = vsel %vm846_vm2, %v9333_v38, -inf }
0x15f9   :  { %2902 = vmax.xlane.f32.xlu0 %v2901_v13 }
0x15fa   :  { %3236 = vmatpush.msrb.mxu2 %v7465_v24 }
0x15fb   :  { %v2815_v55 = vpop.f32.mrf.mxu1  ;;  %v2859_v47 = vpop.f32.mrf.mxu0 }
0x15fc   :  { %v2878_v35 = vmul.f32 0.4472136, %v2815_v55  ;;  %v2883_v57 = vmul.f32 0.4472136, %v2859_v47  ;;  %3237 = vmatpush.msrb.mxu2 %v7469_v50 }
0x15fe   :  { %3238 = vmatpush.msrb.mxu2 %v7470_v21  ;;  %v9340_v30 = vadd.f32 %v8049_v32, %v2878_v35  ;;  %v9342_v56 = vadd.f32 %v8048_v25, %v2883_v57  ;;  %v7445_v21 = vunpack.i.h.bf16 %v9300_v39 }
0x1600   :  { %v2904_v58 = vsel %vm846_vm2, %v9340_v30, -inf  ;;  %v2919_v45 = vsel %vm846_vm2, %v9342_v56, -inf  ;;  %v7476_v35 = vpack.i.bf16 %v7445_v21, %v9269_v28 }
0x1601   :  { %2905 = vmax.xlane.f32.xlu2 %v2904_v58  ;;  %2920 = vmax.xlane.f32.xlu1 %v2919_v45 }
0x1603   :  { %v2818_v17 = vpop.f32.mrf.mxu1  ;;  %v2862_v31 = vpop.f32.mrf.mxu0 }
0x1604   :  { %v2879_v6 = vmul.f32 0.4472136, %v2818_v17  ;;  %v2884_v5 = vmul.f32 0.4472136, %v2862_v31 }
0x1606   :  { %v9348_v59 = vadd.f32 %v8049_v32, %v2884_v5  ;;  %v9353_v14 = vadd.f32 %v8050_v15, %v2879_v6 }
0x1608   :  { %v2922_v46 = vsel %vm846_vm2, %v9348_v59, -inf  ;;  %v2907_v42 = vsel %vm846_vm2, %v9353_v14, -inf }
0x1609   :  { %2923 = vmax.xlane.f32.xlu2 %v2922_v46  ;;  %2908 = vmax.xlane.f32.xlu0 %v2907_v42 }
0x160b   :  { %v2821_v26 = vpop.f32.mrf.mxu1  ;;  %v2865_v44 = vpop.f32.mrf.mxu0 }
0x160c   :  { %v2880_v27 = vmul.f32 0.4472136, %v2821_v26  ;;  %v2885_v33 = vmul.f32 0.4472136, %v2865_v44 }
0x160e   :  { %v9362_v22 = vadd.f32 %v8051_v0, %v2880_v27  ;;  %v9366_v7 = vadd.f32 %v8050_v15, %v2885_v33 }
0x1610   :  { %v2910_v11 = vsel %vm846_vm2, %v9362_v22, -inf  ;;  %v2925_v1 = vsel %vm846_vm2, %v9366_v7, -inf }
0x1611   :  { %2911 = vmax.xlane.f32.xlu2 %v2910_v11  ;;  %v7459_v11 = vunpack.i.l.bf16 %v9328_v2 }
0x1613   :  { %v2824_v23 = vpop.f32.mrf.mxu1  ;;  %v2868_v18 = vpop.f32.mrf.mxu0 }
0x1614   :  { %v2881_v54 = vmul.f32 0.4472136, %v2824_v23  ;;  %v2886_v9 = vmul.f32 0.4472136, %v2868_v18  ;;  %v7440_v23 = vunpack.i.h.bf16 %v9313_v43 }
0x1616   :  { %v9368_v62 = vadd.f32 %v8051_v0, %v2886_v9  ;;  %v9373_v19 = vadd.f32 %v8052_v63, %v2881_v54  ;;  %v7471_v18 = vpack.i.bf16 %v7440_v23, %v7459_v11 }
0x1618   :  { %v2928_v16 = vsel %vm846_vm2, %v9368_v62, -inf  ;;  %v2913_v48 = vsel %vm846_vm2, %v9373_v19, -inf }
0x1619   :  { %2926 = vmax.xlane.f32.xlu2 %v2925_v1  ;;  %2929 = vmax.xlane.f32.xlu1 %v2928_v16  ;;  %v7450_v1 = vunpack.i.h.bf16 %v9304_v3 }
0x161a   :  { %2914 = vmax.xlane.f32.xlu0 %v2913_v48  ;;  %v7460_v48 = vunpack.i.h.bf16 %v9328_v2 }
0x161b   :  { %v2827_v52 = vpop.f32.mrf.mxu1  ;;  %v2871_v36 = vpop.f32.mrf.mxu0 }
0x161c   :  { %v2882_v53 = vmul.f32 0.4472136, %v2827_v52  ;;  %v2887_v29 = vmul.f32 0.4472136, %v2871_v36  ;;  %v7486_v36 = vpack.i.bf16 %v9271_v12, %v7460_v48 }
0x161e   :  { %v9384_v51 = vadd.f32 %v8053_v60, %v2882_v53  ;;  %v9386_v25 = vadd.f32 %v8052_v63, %v2887_v29  ;;  %v7455_v63 = vunpack.i.h.bf16 %v9307_v49 }
0x1620   :  { %v2916_v37 = vsel %vm846_vm2, %v9384_v51, -inf  ;;  %v2931_v24 = vsel %vm846_vm2, %v9386_v25, -inf  ;;  %v7481_v16 = vpack.i.bf16 %v7455_v63, %v7450_v1 }
0x1621   :  { %2917 = vmax.xlane.f32.xlu2 %v2916_v37 }
0x1622   :  { %2932 = vmax.xlane.f32.xlu0 %v2931_v24 }
0x1623   :  { %v2874_v13 = vpop.f32.mrf.mxu0 }
0x1624   :  { %v2888_v50 = vmul.f32 0.4472136, %v2874_v13 }
0x1626   :  { %v9392_v55 = vadd.f32 %v8053_v60, %v2888_v50 }
0x1628   :  { %v2934_v47 = vsel %vm846_vm2, %v9392_v55, -inf }
0x1629   :  { %2935 = vmax.xlane.f32.xlu1 %v2934_v47 }
0x1639   :  { %7477 = vrot.lane.b32.xlu2 %v7476_v35, %s8109_s16 }
0x166c   :  { %v2903_v57 = vpop.xlane.xlu0 %2902 }
0x166d   :  { %v2937_v32 = vsub.f32 %v9333_v38, %v2903_v57 }
0x166f   :  { %v2949_v58 = vmul.f32 1.442695, %v2937_v32 }
0x1671   :  { %7814 = vpow2.f32 %v2949_v58 }
0x1674   :  { %v2906_v45 = vpop.xlane.xlu2 %2905  ;;  %v2921_v17 = vpop.xlane.xlu1 %2920 }
0x1675   :  { %v2938_v31 = vsub.f32 %v9340_v30, %v2906_v45  ;;  %v2943_v6 = vsub.f32 %v9342_v56, %v2921_v17 }
0x1677   :  { %v9402_v5 = vpop.eup %7814  ;;  %v2951_v15 = vmul.f32 1.442695, %v2938_v31  ;;  %v2961_v46 = vmul.f32 1.442695, %v2943_v6 }
0x1678   :  { %v2973_v28 = vsel %vm846_vm2, %v9402_v5, 0.0 }
0x1679   :  { %7816 = vpow2.f32 %v2951_v15  ;;  %2974 = vadd.xlane.f32.xlu0 %v2973_v28 }
0x167a   :  { %7818 = vpow2.f32 %v2961_v46 }
0x167c   :  { %v2909_v39 = vpop.xlane.xlu0 %2908  ;;  %v2924_v38 = vpop.xlane.xlu2 %2923 }
0x167d   :  { %v2939_v42 = vsub.f32 %v9353_v14, %v2909_v39  ;;  %v2944_v56 = vsub.f32 %v9348_v59, %v2924_v38 }
0x167f   :  { %v9407_v26 = vpop.eup %7816  ;;  %v2953_v44 = vmul.f32 1.442695, %v2939_v42  ;;  %v2963_v33 = vmul.f32 1.442695, %v2944_v56 }
0x1680   :  { %v9409_v30 = vpop.eup %7818  ;;  %v2976_v27 = vsel %vm846_vm2, %v9407_v26, 0.0 }
0x1681   :  { %2977 = vadd.xlane.f32.xlu1 %v2976_v27  ;;  %v2991_v0 = vsel %vm846_vm2, %v9409_v30, 0.0  ;;  %7820 = vpow2.f32 %v2953_v44 }
0x1682   :  { %2992 = vadd.xlane.f32.xlu2 %v2991_v0  ;;  %7822 = vpow2.f32 %v2963_v33 }
0x1684   :  { %v2912_v43 = vpop.xlane.xlu2 %2911 }
0x1685   :  { %v2940_v52 = vsub.f32 %v9362_v22, %v2912_v43 }
0x1687   :  { %v9417_v14 = vpop.eup %7820  ;;  %v2955_v29 = vmul.f32 1.442695, %v2940_v52 }
0x1688   :  { %v2979_v59 = vsel %vm846_vm2, %v9417_v14, 0.0  ;;  %v9423_v54 = vpop.eup %7822 }
0x1689   :  { %v2994_v9 = vsel %vm846_vm2, %v9423_v54, 0.0  ;;  %7824 = vpow2.f32 %v2955_v29 }
0x168a   :  { %2980 = vadd.xlane.f32.xlu2 %v2979_v59 }
0x168c   :  { %v2930_v60 = vpop.xlane.xlu1 %2929  ;;  %v2927_v37 = vpop.xlane.xlu2 %2926 }
0x168d   :  { %7472 = vrot.lane.b32.xlu0 %v7471_v18, %s8109_s16  ;;  %v2915_v53 = vpop.xlane.xlu0 %2914  ;;  %v2946_v49 = vsub.f32 %v9368_v62, %v2930_v60  ;;  %v2945_v24 = vsub.f32 %v9366_v7, %v2927_v37 }
0x168e   :  { %v2941_v58 = vsub.f32 %v9373_v19, %v2915_v53 }
0x168f   :  { %v2967_v3 = vmul.f32 1.442695, %v2946_v49  ;;  %v9436_v50 = vpop.eup %7824  ;;  %v2965_v22 = vmul.f32 1.442695, %v2945_v24 }
0x1690   :  { %v2982_v12 = vsel %vm846_vm2, %v9436_v50, 0.0  ;;  %v2957_v31 = vmul.f32 1.442695, %v2941_v58 }
0x1691   :  { %7826 = vpow2.f32 %v2967_v3 }
0x1692   :  { %2995 = vadd.xlane.f32.xlu2 %v2994_v9  ;;  %7828 = vpow2.f32 %v2965_v22 }
0x1694   :  { %v2918_v47 = vpop.xlane.xlu2 %2917 }
0x1695   :  { %v2933_v13 = vpop.xlane.xlu0 %2932  ;;  %v2942_v35 = vsub.f32 %v9384_v51, %v2918_v47 }
0x1696   :  { %v2947_v2 = vsub.f32 %v9386_v25, %v2933_v13 }
0x1697   :  { %v9442_v62 = vpop.eup %7826  ;;  %v2959_v7 = vmul.f32 1.442695, %v2942_v35 }
0x1698   :  { %v2969_v21 = vmul.f32 1.442695, %v2947_v2  ;;  %v3000_v57 = vsel %vm846_vm2, %v9442_v62, 0.0  ;;  %v9446_v25 = vpop.eup %7828 }
0x1699   :  { %v2997_v51 = vsel %vm846_vm2, %v9446_v25, 0.0 }
0x169a   :  { %7482 = vrot.lane.b32.xlu1 %v7481_v16, %s8109_s16  ;;  %7830 = vpow2.f32 %v2969_v21 }
0x169b   :  { %7832 = vpow2.f32 %v2959_v7 }
0x169c   :  { %v2936_v32 = vpop.xlane.xlu1 %2935  ;;  %7834 = vpow2.f32 %v2957_v31  ;;  %v7478_v44 = vpop.permute.xlu2 %7477 }
0x169d   :  { %v2948_v45 = vsub.f32 %v9392_v55, %v2936_v32  ;;  %v7480_v24 = vunpack.i.h.bf16 %v7478_v44  ;;  %v7479_v13 = vunpack.i.l.bf16 %v7478_v44 }
0x169f   :  { %v2971_v6 = vmul.f32 1.442695, %v2948_v45 }
0x16a0   :  { %v9450_v17 = vpop.eup %7830 }
0x16a1   :  { %v3003_v15 = vsel %vm846_vm2, %v9450_v17, 0.0  ;;  %v9456_v46 = vpop.eup %7832  ;;  %7836 = vpow2.f32 %v2971_v6 }
0x16a2   :  { %v2988_v19 = vsel %vm846_vm2, %v9456_v46, 0.0  ;;  %v9460_v55 = vpop.eup %7834 }
0x16a3   :  { %v2985_v39 = vsel %vm846_vm2, %v9460_v55, 0.0 }
0x16a7   :  { %v9462_v28 = vpop.eup %7836 }
0x16a8   :  { %v3006_v38 = vsel %vm846_vm2, %v9462_v28, 0.0 }
0x16aa   :  { %7487 = vrot.lane.b32.xlu2 %v7486_v36, %s8109_s16 }
0x16b7   :  { %2983 = vadd.xlane.f32.xlu0 %v2982_v12 }
0x16bf   :  { %3001 = vadd.xlane.f32.xlu0 %v3000_v57 }
0x16c4   :  { %2998 = vadd.xlane.f32.xlu1 %v2997_v51 }
0x16c7   :  { %3004 = vadd.xlane.f32.xlu0 %v3003_v15 }
0x16cc   :  { %2989 = vadd.xlane.f32.xlu1 %v2988_v19 }
0x16d3   :  { %2986 = vadd.xlane.f32.xlu2 %v2985_v39 }
0x16d4   :  { %3007 = vadd.xlane.f32.xlu1 %v3006_v38 }
0x16ec   :  { %v2975_v42 = vpop.xlane.xlu0 %2974 }
0x16ed   :  { %7838 = vrcp.f32 %v2975_v42  ;;  %v3020_v18 = vand.u32 2147483648, %v2975_v42  ;;  %vm3014_vm7 = vweird.f32 %v2975_v42  ;;  %v3018_v63 = vand.u32 2147483647, %v2975_v42 }
0x16ef   :  { %v3021_v52 = vor.u32 1.1754944e-38, %v3020_v18  ;;  %vm3019_vm9 = vcmp.eq.f32.partialorder %v3018_v63, 8.507059e+37 }
0x16f3   :  { %v7839_v56 = vpop.eup %7838 }
0x16f4   :  { %v3010_v27 = vmul.f32 %v7839_v56, %v2975_v42  ;;  %v2978_v0 = vpop.xlane.xlu1 %2977  ;;  %vm3015_vm6 = vweird.f32 %v7839_v56 }
0x16f5   :  { %v9468_v33 = vpop.xlane.xlu2 %2992  ;;  %7840 = vrcp.f32 %v2978_v0  ;;  %vm3016_vm8 = vmor %vm3014_vm7, %vm3015_vm6  ;;  %v3035_v12 = vand.u32 2147483648, %v2978_v0  ;;  %vm3029_vm12 = vweird.f32 %v2978_v0  ;;  %v3033_v21 = vand.u32 2147483647, %v2978_v0 }
0x16f6   :  { %v3011_v11 = vsub.f32 1.0, %v3010_v27  ;;  %7842 = vrcp.f32 %v9468_v33  ;;  %vm3104_vm1 = vweird.f32 %v9468_v33  ;;  %v3110_v19 = vand.u32 2147483648, %v9468_v33 }
0x16f7   :  { %v3036_v45 = vor.u32 1.1754944e-38, %v3035_v12  ;;  %vm3034_vm14 = vcmp.eq.f32.partialorder %v3033_v21, 8.507059e+37  ;;  %v3108_v27 = vand.u32 2147483647, %v9468_v33 }
0x16f8   :  { %v3012_v23 = vmul.f32 %v7839_v56, %v3011_v11  ;;  %v3111_v63 = vor.u32 1.1754944e-38, %v3110_v19 }
0x16fa   :  { %v3013_v59 = vadd.f32 %v7839_v56, %v3012_v23 }
0x16fb   :  { %v7841_v9 = vpop.eup %7840 }
0x16fc   :  { %v9471_v1 = vpop.eup %7842  ;;  %v3025_v16 = vmul.f32 %v7841_v9, %v2978_v0  ;;  %v3017_v43 = vsel %vm3016_vm8, %v7839_v56, %v3013_v59  ;;  %vm3030_vm11 = vweird.f32 %v7841_v9  ;;  %vm3109_vm8 = vcmp.eq.f32.partialorder %v3108_v27, 8.507059e+37 }
0x16fd   :  { %v9473_v48 = vpop.xlane.xlu2 %2980  ;;  %v3100_v36 = vmul.f32 %v9471_v1, %v9468_v33  ;;  %v3022_v49 = vsel %vm3019_vm9, %v3021_v52, %v3017_v43  ;;  %vm3031_vm13 = vmor %vm3029_vm12, %vm3030_vm11  ;;  %vm3105_vm15 = vweird.f32 %v9471_v1 }
0x16fe   :  { %v3026_v53 = vsub.f32 1.0, %v3025_v16  ;;  %7844 = vrcp.f32 %v9473_v48  ;;  %v3023_v47 = vmul.f32 %v9402_v5, %v3022_v49  ;;  %v3050_v15 = vand.u32 2147483648, %v9473_v48  ;;  %vm9489_vm4 = vmor %vm3104_vm1, %vm3105_vm15 }
0x16ff   :  { %v7473_v29 = vpop.permute.xlu0 %7472  ;;  %v3101_v2 = vsub.f32 1.0, %v3100_v36  ;;  %v3048_v42 = vand.u32 2147483647, %v9473_v48  ;;  %vm3044_vm5 = vweird.f32 %v9473_v48 }
0x1700   :  { %v7475_v60 = vunpack.i.h.bf16 %v7473_v29  ;;  %v7474_v37 = vunpack.i.l.bf16 %v7473_v29  ;;  %v3027_v3 = vmul.f32 %v7841_v9, %v3026_v53  ;;  %v3051_v59 = vor.u32 1.1754944e-38, %v3050_v15 }
0x1701   :  { %v3102_v58 = vmul.f32 %v9471_v1, %v3101_v2  ;;  %vm3049_vm7 = vcmp.eq.f32.partialorder %v3048_v42, 8.507059e+37 }
0x1702   :  { %3239 = vmatpush.msrb.mxu2 %v7474_v37  ;;  %3306 = vmatpush.msrb.mxu3 %v7475_v60  ;;  %v3028_v22 = vadd.f32 %v7841_v9, %v3027_v3 }
0x1703   :  { %v3103_v6 = vadd.f32 %v9471_v1, %v3102_v58 }
0x1704   :  { %v7845_v35 = vpop.eup %7844  ;;  %3240 = vmatpush.msrb.mxu2 %v7479_v13  ;;  %3307 = vmatpush.msrb.mxu3 %v7480_v24  ;;  %v3032_v32 = vsel %vm3031_vm13, %v7841_v9, %v3028_v22 }
0x1705   :  { %v3040_v7 = vmul.f32 %v7845_v35, %v9473_v48  ;;  %v2996_v57 = vpop.xlane.xlu2 %2995  ;;  %7030 = vmatmul.msk.f32.vlgmr.msrb.gmra.mxu2 %vm846_vm2, %v3023_v47  ;;  %v3037_v31 = vsel %vm3034_vm14, %v3036_v45, %v3032_v32  ;;  %vm3045_vm3 = vweird.f32 %v7845_v35 }
0x1706   :  { %7846 = vrcp.f32 %v2996_v57  ;;  %v3038_v39 = vmul.f32 %v9407_v26, %v3037_v31  ;;  %vm3046_vm6 = vmor %vm3044_vm5, %vm3045_vm3  ;;  %v3107_v26 = vsel %vm9489_vm4, %v9471_v1, %v3103_v6  ;;  %v3125_v53 = vand.u32 2147483648, %v2996_v57 }
0x1707   :  { %v3041_v51 = vsub.f32 1.0, %v3040_v7  ;;  %v3112_v48 = vsel %vm3109_vm8, %v3111_v63, %v3107_v26  ;;  %vm3119_vm11 = vweird.f32 %v2996_v57  ;;  %v3123_v49 = vand.u32 2147483647, %v2996_v57 }
0x1708   :  { %v3113_v37 = vmul.f32 %v9409_v30, %v3112_v48  ;;  %v3126_v24 = vor.u32 1.1754944e-38, %v3125_v53 }
0x1709   :  { %v3042_v5 = vmul.f32 %v7845_v35, %v3041_v51  ;;  %vm3124_vm13 = vcmp.eq.f32.partialorder %v3123_v49, 8.507059e+37 }
0x170b   :  { %v3043_v38 = vadd.f32 %v7845_v35, %v3042_v5 }
0x170c   :  { %v7847_v44 = vpop.eup %7846  ;;  %v7483_v0 = vpop.permute.xlu1 %7482 }
0x170d   :  { %v3115_v11 = vmul.f32 %v7847_v44, %v2996_v57  ;;  %v7484_v23 = vunpack.i.l.bf16 %v7483_v0  ;;  %7031 = vmatmul.msk.f32.gmra.mxu2 %vm846_vm2, %v3038_v39  ;;  %v7488_v18 = vpop.permute.xlu2 %7487  ;;  %v3047_v9 = vsel %vm3046_vm6, %v7845_v35, %v3043_v38  ;;  %v7485_v43 = vunpack.i.h.bf16 %v7483_v0 }
0x170e   :  { %v3052_v33 = vsel %vm3049_vm7, %v3051_v59, %v3047_v9  ;;  %v7489_v36 = vunpack.i.l.bf16 %v7488_v18  ;;  %vm3120_vm9 = vweird.f32 %v7847_v44  ;;  %v7490_v29 = vunpack.i.h.bf16 %v7488_v18 }
0x170f   :  { %v3116_v16 = vsub.f32 1.0, %v3115_v11  ;;  %3308 = vmatpush.msrb.mxu3 %v7484_v23  ;;  %v3053_v1 = vmul.f32 %v9417_v14, %v3052_v33  ;;  %vm3121_vm12 = vmor %vm3119_vm11, %vm3120_vm9 }
0x1711   :  { %v3117_v52 = vmul.f32 %v7847_v44, %v3116_v16  ;;  %3309 = vmatpush.msrb.mxu3 %v7485_v43 }
0x1713   :  { %3310 = vmatpush.msrb.mxu3 %v7489_v36  ;;  %v3118_v60 = vadd.f32 %v7847_v44, %v3117_v52 }
0x1715   :  { %7032 = vmatmul.msk.f32.gmra.mxu2 %vm846_vm2, %v3053_v1  ;;  %3311 = vmatpush.msrb.mxu3 %v7490_v29  ;;  %v3122_v3 = vsel %vm3121_vm12, %v7847_v44, %v3118_v60 }
0x1716   :  { %7036 = vmatmul.msk.f32.vlgmr.msrb.gmra.mxu3 %vm846_vm2, %v3113_v37  ;;  %v3127_v13 = vsel %vm3124_vm13, %v3126_v24, %v3122_v3 }
0x1717   :  { %v3128_v2 = vmul.f32 %v9423_v54, %v3127_v13 }
0x171e   :  { %7037 = vmatmul.msk.f32.gmra.mxu3 %vm846_vm2, %v3128_v2 }
0x172a   :  { %v2984_v14 = vpop.xlane.xlu0 %2983 }
0x172b   :  { %7848 = vrcp.f32 %v2984_v14  ;;  %v3065_v21 = vand.u32 2147483648, %v2984_v14  ;;  %v3063_v7 = vand.u32 2147483647, %v2984_v14  ;;  %vm3059_vm15 = vweird.f32 %v2984_v14 }
0x172d   :  { %v3066_v54 = vor.u32 1.1754944e-38, %v3065_v21  ;;  %vm3064_vm3 = vcmp.eq.f32.partialorder %v3063_v7, 8.507059e+37 }
0x1731   :  { %v7849_v22 = vpop.eup %7848 }
0x1732   :  { %v3055_v30 = vmul.f32 %v7849_v22, %v2984_v14  ;;  %v9505_v12 = vpop.xlane.xlu0 %3001  ;;  %vm3060_vm14 = vweird.f32 %v7849_v22 }
0x1733   :  { %7850 = vrcp.f32 %v9505_v12  ;;  %vm3061_vm1 = vmor %vm3059_vm15, %vm3060_vm14  ;;  %v3155_v33 = vand.u32 2147483648, %v9505_v12  ;;  %vm3149_vm9 = vweird.f32 %v9505_v12  ;;  %v3153_v53 = vand.u32 2147483647, %v9505_v12 }
0x1734   :  { %v3056_v47 = vsub.f32 1.0, %v3055_v30 }
0x1735   :  { %v3156_v49 = vor.u32 1.1754944e-38, %v3155_v33  ;;  %vm3154_vm12 = vcmp.eq.f32.partialorder %v3153_v53, 8.507059e+37 }
0x1736   :  { %v3057_v35 = vmul.f32 %v7849_v22, %v3056_v47 }
0x1737   :  { %v2999_v57 = vpop.xlane.xlu1 %2998 }
0x1738   :  { %7852 = vrcp.f32 %v2999_v57  ;;  %v3058_v32 = vadd.f32 %v7849_v22, %v3057_v35  ;;  %v3140_v27 = vand.u32 2147483648, %v2999_v57  ;;  %v3138_v0 = vand.u32 2147483647, %v2999_v57 }
0x1739   :  { %v7851_v58 = vpop.eup %7850  ;;  %vm3134_vm5 = vweird.f32 %v2999_v57 }
0x173a   :  { %v9508_v45 = vpop.xlane.xlu0 %3004  ;;  %v3062_v51 = vsel %vm3061_vm1, %v7849_v22, %v3058_v32  ;;  %v3145_v6 = vmul.f32 %v7851_v58, %v9505_v12  ;;  %vm3150_vm6 = vweird.f32 %v7851_v58  ;;  %v3141_v9 = vor.u32 1.1754944e-38, %v3140_v27 }
0x173b   :  { %v3067_v31 = vsel %vm3064_vm3, %v3066_v54, %v3062_v51  ;;  %7854 = vrcp.f32 %v9508_v45  ;;  %vm3139_vm8 = vcmp.eq.f32.partialorder %v3138_v0, 8.507059e+37  ;;  %vm3151_vm11 = vmor %vm3149_vm9, %vm3150_vm6  ;;  %v3170_v2 = vand.u32 2147483648, %v9508_v45 }
0x173c   :  { %v3068_v5 = vmul.f32 %v9436_v50, %v3067_v31  ;;  %v3146_v38 = vsub.f32 1.0, %v3145_v6  ;;  %vm3164_vm15 = vweird.f32 %v9508_v45 }
0x173e   :  { %v7853_v15 = vpop.eup %7852  ;;  %7033 = vmatmul.msk.f32.gmra.mxu2 %vm846_vm2, %v3068_v5  ;;  %v3147_v11 = vmul.f32 %v7851_v58, %v3146_v38 }
0x173f   :  { %v3130_v19 = vmul.f32 %v7853_v15, %v2999_v57  ;;  %v9514_v39 = vpop.xlane.xlu1 %2989  ;;  %vm3135_vm4 = vweird.f32 %v7853_v15  ;;  %v3168_v57 = vand.u32 2147483647, %v9508_v45 }
0x1740   :  { %7856 = vrcp.f32 %v9514_v39  ;;  %vm3136_vm7 = vmor %vm3134_vm5, %vm3135_vm4  ;;  %v3148_v43 = vadd.f32 %v7851_v58, %v3147_v11  ;;  %v3095_v6 = vand.u32 2147483648, %v9514_v39 }
0x1741   :  { %v3131_v42 = vsub.f32 1.0, %v3130_v19  ;;  %v9517_v44 = vpop.eup %7854 }
0x1742   :  { %v3160_v50 = vmul.f32 %v9517_v44, %v9508_v45  ;;  %v3152_v60 = vsel %vm3151_vm11, %v7851_v58, %v3148_v43  ;;  %vm3165_vm13 = vweird.f32 %v9517_v44  ;;  %v3171_v58 = vor.u32 1.1754944e-38, %v3170_v2 }
0x1743   :  { %v3132_v56 = vmul.f32 %v7853_v15, %v3131_v42  ;;  %vm9542_vm1 = vmor %vm3164_vm15, %vm3165_vm13  ;;  %v3093_v42 = vand.u32 2147483647, %v9514_v39  ;;  %v3096_v0 = vor.u32 1.1754944e-38, %v3095_v6 }
0x1744   :  { %v3161_v63 = vsub.f32 1.0, %v3160_v50 }
0x1745   :  { %v3133_v23 = vadd.f32 %v7853_v15, %v3132_v56 }
0x1746   :  { %v2987_v26 = vpop.xlane.xlu2 %2986  ;;  %v9521_v59 = vpop.eup %7856  ;;  %v3162_v1 = vmul.f32 %v9517_v44, %v3161_v63 }
0x1747   :  { %7858 = vrcp.f32 %v2987_v26  ;;  %v9523_v18 = vpop.xlane.xlu1 %3007  ;;  %v3137_v16 = vsel %vm3136_vm7, %v7853_v15, %v3133_v23  ;;  %v3085_v48 = vmul.f32 %v9521_v59, %v9514_v39  ;;  %v3080_v22 = vand.u32 2147483648, %v2987_v26 }
0x1748   :  { %7860 = vrcp.f32 %v9523_v18  ;;  %v3142_v52 = vsel %vm3139_vm8, %v3141_v9, %v3137_v16  ;;  %v3163_v12 = vadd.f32 %v9517_v44, %v3162_v1  ;;  %v3078_v35 = vand.u32 2147483647, %v2987_v26  ;;  %v6983_v16 = vld [vmem:[%s11076_s6 + $0x180] sm:$0xff] }
0x1749   :  { %v3143_v36 = vmul.f32 %v9446_v25, %v3142_v52  ;;  %v3086_v3 = vsub.f32 1.0, %v3085_v48  ;;  %v3157_v25 = vsel %vm3154_vm12, %v3156_v49, %v3152_v60  ;;  %vm3074_vm3 = vweird.f32 %v2987_v26  ;;  %3472 = vmatpush.msra.mxu3 %v6983_v16 }
0x174a   :  { %v3158_v7 = vmul.f32 %v9442_v62, %v3157_v25  ;;  %v3081_v51 = vor.u32 1.1754944e-38, %v3080_v22  ;;  %v3167_v5 = vsel %vm9542_vm1, %v9517_v44, %v3163_v12  ;;  %vm3090_vm5 = vweird.f32 %v9521_v59 }
0x174b   :  { %7038 = vmatmul.msk.f32.gmra.mxu3 %vm846_vm2, %v3143_v36  ;;  %v3087_v47 = vmul.f32 %v9521_v59, %v3086_v3  ;;  %vm3079_vm6 = vcmp.eq.f32.partialorder %v3078_v35, 8.507059e+37  ;;  %vm3169_vm7 = vcmp.eq.f32.partialorder %v3168_v57, 8.507059e+37  ;;  %vm3089_vm8 = vweird.f32 %v9514_v39  ;;  %v6984_v36 = vld [vmem:[%s11076_s6 + $0x188] sm:$0xff] }
0x174c   :  { %v3172_v38 = vsel %vm3169_vm7, %v3171_v58, %v3167_v5  ;;  %vm3091_vm9 = vmor %vm3089_vm8, %vm3090_vm5  ;;  %v3185_v56 = vand.u32 2147483648, %v9523_v18  ;;  %vm3179_vm12 = vweird.f32 %v9523_v18  ;;  %v3183_v50 = vand.u32 2147483647, %v9523_v18 }
0x174d   :  { %v7859_v29 = vpop.eup %7858  ;;  %v3088_v45 = vadd.f32 %v9521_v59, %v3087_v47  ;;  %v3173_v11 = vmul.f32 %v9450_v17, %v3172_v38  ;;  %v6979_v17 = vld [vmem:[%s11076_s6 + $0x160] sm:$0xff] }
0x174e   :  { %v7861_v37 = vpop.eup %7860  ;;  %v3070_v24 = vmul.f32 %v7859_v29, %v2987_v26  ;;  %vm3075_vm14 = vweird.f32 %v7859_v29  ;;  %v3186_v23 = vor.u32 1.1754944e-38, %v3185_v56  ;;  %vm3184_vm15 = vcmp.eq.f32.partialorder %v3183_v50, 8.507059e+37  ;;  %3381 = vmatpush.msrb.mxu0 %v6979_v17  ;;  %v6978_v17 = vld [vmem:[%s11075_s5 + $0x58] sm:$0xff] }
0x174f   :  { %v3175_v13 = vmul.f32 %v7861_v37, %v9523_v18  ;;  %vm3076_vm4 = vmor %vm3074_vm3, %vm3075_vm14  ;;  %vm3180_vm11 = vweird.f32 %v7861_v37  ;;  %v3092_v27 = vsel %vm3091_vm9, %v9521_v59, %v3088_v45  ;;  %vm3094_vm14 = vcmp.eq.f32.partialorder %v3093_v42, 8.507059e+37  ;;  %v6980_v18 = vld [vmem:[%s11076_s6 + $0x168] sm:$0xff] }
0x1750   :  { %v3071_v14 = vsub.f32 1.0, %v3070_v24  ;;  %vm3181_vm13 = vmor %vm3179_vm12, %vm3180_vm11  ;;  %3352 = vmatpush.msrb.mxu1 %v6980_v18  ;;  %3503 = vmatpush.msra.mxu0 %v6984_v36  ;;  %v6977_v18 = vld [vmem:[%s11075_s5 + $0x50] sm:$0xff] }
0x1751   :  { %v3176_v30 = vsub.f32 1.0, %v3175_v13 }
0x1752   :  { %v3072_v21 = vmul.f32 %v7859_v29, %v3071_v14 }
0x1753   :  { %v3177_v31 = vmul.f32 %v7861_v37, %v3176_v30  ;;  %7039 = vmatmul.msk.f32.gmra.mxu3 %vm846_vm2, %v3158_v7  ;;  %v9600_v7 = vld [vmem:[%s11077_s7 + $0x8] sm:$0x7] }
0x1754   :  { %v3073_v54 = vadd.f32 %v7859_v29, %v3072_v21  ;;  %v3513_v57 = vperm.slane %v9600_v7, 1 }
0x1755   :  { %v3178_v44 = vadd.f32 %v7861_v37, %v3177_v31 }
0x1756   :  { %v3077_v62 = vsel %vm3076_vm4, %v7859_v29, %v3073_v54 }
0x1757   :  { %v3082_v15 = vsel %vm3079_vm6, %v3081_v51, %v3077_v62  ;;  %v3182_v39 = vsel %vm3181_vm13, %v7861_v37, %v3178_v44 }
0x1758   :  { %v3083_v19 = vmul.f32 %v9460_v55, %v3082_v15  ;;  %v3097_v55 = vsel %vm3094_vm14, %v3096_v0, %v3092_v27  ;;  %v3187_v9 = vsel %vm3184_vm15, %v3186_v23, %v3182_v39 }
0x1759   :  { %v3098_v26 = vmul.f32 %v9456_v46, %v3097_v55  ;;  %v3188_v59 = vmul.f32 %v9462_v28, %v3187_v9  ;;  %v6981_v46 = vld [vmem:[%s11076_s6 + $0x170] sm:$0xff]  ;;  %v6982_v28 = vld [vmem:[%s11076_s6 + $0x178] sm:$0xff] }
0x175a   :  { %7034 = vmatmul.msk.f32.gmra.mxu2 %vm846_vm2, %v3083_v19  ;;  %3410 = vmatpush.msra.mxu1 %v6981_v46  ;;  %v6976_v46 = vld [vmem:[%s11075_s5 + $0x48] sm:$0xff] }
0x175b   :  { %7040 = vmatmul.msk.f32.gmra.mxu3 %vm846_vm2, %v3173_v11  ;;  %3441 = vmatpush.msra.mxu2 %v6982_v28 }
0x1762   :  { %7035 = vmatmul.msk.f32.gmra.mxu2 %vm846_vm2, %v3098_v26 }
0x1763   :  { %7041 = vmatmul.msk.f32.gmra.mxu3 %vm846_vm2, %v3188_v59 }
0x1788   :  { %v3242_v63 = vpop.f32.mrf.mxu2 }
0x1789   :  { %7044 = vmatmul.msk.f32.vlgmr.msrb.gmra.mxu0 %vm43_vm0, %v3242_v63 }
0x1790   :  { %v3245_v43 = vpop.f32.mrf.mxu2 }
0x1791   :  { %7042 = vmatmul.msk.f32.vlgmr.msrb.gmra.mxu1 %vm43_vm0, %v3245_v43  ;;  %v7000_v43 = vld [vmem:[%s11076_s6 + $0x208] sm:$0xff] }
0x1792   :  { %3591 = vmatpush.msrb.mxu1 %v6978_v17  ;;  %3608 = vmatpush.msrb.mxu2 %v7000_v43  ;;  %v7086_v43 = vld [vmem:[%s11077_s7 + $0xc] sm:$0x7] }
0x1794   :  { %3592 = vmatpush.msrb.mxu1 %v6977_v18 }
0x1796   :  { %3593 = vmatpush.msrb.mxu1 %v6976_v46 }
0x1798   :  { %v3248_v52 = vpop.f32.mrf.mxu2 }
0x1799   :  { %v3313_v33 = vpop.f32.mrf.mxu3 }
0x179a   :  { %7045 = vmatmul.msk.f32.gmra.mxu0 %vm43_vm0, %v3313_v33  ;;  %v6999_v33 = vld [vmem:[%s11076_s6 + $0x200] sm:$0xff] }
0x179b   :  { %3609 = vmatpush.msrb.mxu2 %v6999_v33  ;;  %v9707_v33 = vperm.slane %v7086_v43, 0 }
0x17a1   :  { %v3316_v48 = vpop.f32.mrf.mxu3 }
0x17a2   :  { %7043 = vmatmul.msk.f32.gmra.mxu1 %vm43_vm0, %v3316_v48  ;;  %v6998_v48 = vld [vmem:[%s11076_s6 + $0x1f8] sm:$0xff] }
0x17a3   :  { %3610 = vmatpush.msrb.mxu2 %v6998_v48 }
0x17aa   :  { %7046 = vmatmul.msk.f32.vlgmr.msra.gmra.mxu1 %vm43_vm0, %v3248_v52 }
0x17c1   :  { %v3251_v53 = vpop.f32.mrf.mxu2 }
0x17c2   :  { %7048 = vmatmul.msk.f32.vlgmr.msra.gmra.mxu2 %vm43_vm0, %v3251_v53  ;;  %v6997_v53 = vld [vmem:[%s11076_s6 + $0x1f0] sm:$0xff] }
0x17c3   :  { %3611 = vmatpush.msrb.mxu2 %v6997_v53 }
0x17ce   :  { %v3319_v29 = vpop.f32.mrf.mxu3 }
0x17cf   :  { %7047 = vmatmul.msk.f32.gmra.mxu1 %vm43_vm0, %v3319_v29 }
0x17d6   :  { %v3322_v1 = vpop.f32.mrf.mxu3 }
0x17d7   :  { %7049 = vmatmul.msk.f32.gmra.mxu2 %vm43_vm0, %v3322_v1 }
0x17dd   :  { %v3254_v60 = vpop.f32.mrf.mxu2 }
0x17de   :  { %7050 = vmatmul.msk.f32.vlgmr.msra.gmra.mxu3 %vm43_vm0, %v3254_v60  ;;  %v3325_v37 = vpop.f32.mrf.mxu3  ;;  %v6996_v60 = vld [vmem:[%s11076_s6 + $0x1e8] sm:$0xff] }
0x17df   :  { %3612 = vmatpush.msrb.mxu2 %v6996_v60 }
0x17e5   :  { %v3257_v49 = vpop.f32.mrf.mxu2 }
0x17e6   :  { %7051 = vmatmul.msk.f32.gmra.mxu3 %vm43_vm0, %v3325_v37  ;;  %7052 = vmatmul.msk.f32.vlgmr.msra.gmra.mxu0 %vm43_vm0, %v3257_v49  ;;  %v3328_v3 = vpop.f32.mrf.mxu3  ;;  %v6995_v49 = vld [vmem:[%s11076_s6 + $0x1e0] sm:$0xff] }
0x17e7   :  { %3613 = vmatpush.msrb.mxu2 %v6995_v49  ;;  %v7059_v49 = vld [vmem:[%s11074_s4 + $0x78] sm:$0xff] }
0x17e8   :  { %3749 = vmatpush.msrb.mxu3 %v7059_v49 }
0x17ee   :  { %7053 = vmatmul.msk.f32.gmra.mxu0 %vm43_vm0, %v3328_v3 }
0x1806   :  { %v3383_v2 = vpop.f32.mrf.mxu0 }
0x180e   :  { %v3354_v24 = vpop.f32.mrf.mxu1 }
0x180f   :  { %v3384_v22 = vadd.f32 %v3383_v2, %v3354_v24  ;;  %v6994_v24 = vld [vmem:[%s11076_s6 + $0x1d8] sm:$0xff]  ;;  %v6993_v2 = vld [vmem:[%s11076_s6 + $0x1d0] sm:$0xff] }
0x1810   :  { %3614 = vmatpush.msrb.mxu2 %v6994_v24  ;;  %v7057_v24 = vld [vmem:[%s11074_s4 + $0x68] sm:$0xff] }
0x1812   :  { %3615 = vmatpush.msrb.mxu2 %v6993_v2 }
0x1817   :  { %v3386_v14 = vpop.f32.mrf.mxu0 }
0x181f   :  { %v3357_v13 = vpop.f32.mrf.mxu1 }
0x1820   :  { %v3387_v58 = vadd.f32 %v3386_v14, %v3357_v13 }
0x1827   :  { %v3412_v25 = vpop.f32.mrf.mxu1 }
0x1828   :  { %v3418_v12 = vadd.f32 %v3412_v25, %v3384_v22  ;;  %v6992_v22 = vld [vmem:[%s11076_s6 + $0x1c8] sm:$0xff] }
0x1829   :  { %3616 = vmatpush.msrb.mxu2 %v6992_v22 }
0x1845   :  { %v3443_v30 = vpop.f32.mrf.mxu2 }
0x1846   :  { %v3449_v47 = vadd.f32 %v3443_v30, %v3418_v12 }
0x184c   :  { %v3415_v32 = vpop.f32.mrf.mxu1 }
0x184d   :  { %v3419_v5 = vadd.f32 %v3415_v32, %v3387_v58 }
0x185a   :  { %v3446_v31 = vpop.f32.mrf.mxu2 }
0x185b   :  { %v3450_v45 = vadd.f32 %v3446_v31, %v3419_v5  ;;  %v6989_v5 = vld [vmem:[%s11076_s6 + $0x1b0] sm:$0xff] }
0x1861   :  { %v3474_v21 = vpop.f32.mrf.mxu3 }
0x1862   :  { %v3480_v35 = vadd.f32 %v3474_v21, %v3449_v47  ;;  %v6991_v47 = vld [vmem:[%s11076_s6 + $0x1c0] sm:$0xff] }
0x1863   :  { %v3505_v54 = vpop.f32.mrf.mxu0  ;;  %3617 = vmatpush.msrb.mxu2 %v6991_v47 }
0x1864   :  { %v3511_v51 = vadd.f32 %v3505_v54, %v3480_v35  ;;  %v6990_v54 = vld [vmem:[%s11076_s6 + $0x1b8] sm:$0xff] }
0x1865   :  { %3618 = vmatpush.msrb.mxu2 %v6990_v54 }
0x1866   :  { %v3514_v62 = vadd.f32 %v3513_v57, %v3511_v51 }
0x1867   :  { %3619 = vmatpush.msrb.mxu2 %v6989_v5 }
0x1868   :  { %v9604_v6 = vadd.f32 %v3514_v62, %v8743_v41 }
0x1869   :  { %v3477_v15 = vpop.f32.mrf.mxu3 }
0x186a   :  { %v3481_v19 = vadd.f32 %v3477_v15, %v3450_v45  ;;  %v3518_v38 = vsel %vm121_vm10, %v9604_v6, 0.0  ;;  %v6988_v15 = vld [vmem:[%s11076_s6 + $0x1a8] sm:$0xff] }
0x186b   :  { %v3508_v42 = vpop.f32.mrf.mxu0  ;;  %3519 = vadd.xlane.f32.xlu0 %v3518_v38  ;;  %3620 = vmatpush.msrb.mxu2 %v6988_v15 }
0x186c   :  { %v3512_v44 = vadd.f32 %v3508_v42, %v3481_v19 }
0x186e   :  { %v3515_v56 = vadd.f32 %v3513_v57, %v3512_v44 }
0x1870   :  { %v9609_v27 = vadd.f32 %v3515_v56, %v8748_v20 }
0x1872   :  { %v3521_v0 = vsel %vm121_vm10, %v9609_v27, 0.0 }
0x1873   :  { %3522 = vadd.xlane.f32.xlu1 %v3521_v0  ;;  %v6987_v0 = vld [vmem:[%s11076_s6 + $0x1a0] sm:$0xff] }
0x1874   :  { %3621 = vmatpush.msrb.mxu2 %v6987_v0 }
0x188c   :  { %3562 = vrot.lane.b32.xlu1 %v9229_v4, %s8110_s27 }
0x18de   :  { %v3520_v41 = vpop.xlane.xlu0 %3519 }
0x18df   :  { %v3524_v11 = vmul.f32 %v3520_v41, %v8266_v8  ;;  %v6986_v41 = vld [vmem:[%s11076_s6 + $0x198] sm:$0xff] }
0x18e0   :  { %3622 = vmatpush.msrb.mxu2 %v6986_v41 }
0x18e1   :  { %v3526_v50 = vsub.f32 %v9604_v6, %v3524_v11  ;;  %v6985_v11 = vld [vmem:[%s11076_s6 + $0x190] sm:$0xff] }
0x18e2   :  { %3623 = vmatpush.msrb.mxu2 %v6985_v11 }
0x18e3   :  { %v3528_v55 = vmul.f32 %v3526_v50, %v3526_v50 }
0x18e5   :  { %v3530_v39 = vsel %vm121_vm10, %v3528_v55, 0.0 }
0x18e6   :  { %3531 = vadd.xlane.f32.xlu0 %v3530_v39  ;;  %v3523_v23 = vpop.xlane.xlu1 %3522 }
0x18e7   :  { %v3525_v20 = vmul.f32 %v3523_v23, %v8266_v8 }
0x18e9   :  { %v9620_v26 = vsub.f32 %v9609_v27, %v3525_v20 }
0x18eb   :  { %v3529_v9 = vmul.f32 %v9620_v26, %v9620_v26 }
0x18ed   :  { %v3533_v59 = vsel %vm121_vm10, %v3529_v9, 0.0 }
0x18ee   :  { %3534 = vadd.xlane.f32.xlu2 %v3533_v59 }
0x18fa   :  { %3567 = vrot.lane.b32.xlu0 %v9229_v4, %s8111_s28  ;;  %v6975_v4 = vld [vmem:[%s11075_s5 + $0x40] sm:$0xff] }
0x18fb   :  { %3594 = vmatpush.msrb.mxu1 %v6975_v4 }
0x1906   :  { %3605 = vrot.lane.b32.xlu2 %v3513_v57, %s8104_s26  ;;  %v3563_v57 = vpop.permute.xlu1 %3562 }
0x1959   :  { %v3532_v63 = vpop.xlane.xlu0 %3531 }
0x195a   :  { %v3536_v28 = vmul.f32 %v3532_v63, %v8266_v8 }
0x195c   :  { %v3538_v16 = vadd.f32 1e-05, %v3536_v28 }
0x195e   :  { %7862 = vrsqrt.f32 %v3538_v16  ;;  %vm3546_vm3 = vweird.f32 %v3538_v16 }
0x1961   :  { %v3535_v52 = vpop.xlane.xlu2 %3534 }
0x1962   :  { %v3537_v36 = vmul.f32 %v3535_v52, %v8266_v8 }
0x1964   :  { %v7863_v29 = vpop.eup %7862  ;;  %v3539_v1 = vadd.f32 1e-05, %v3537_v36 }
0x1965   :  { %v3541_v37 = vmul.f32 %v7863_v29, %v3538_v16  ;;  %vm3547_vm1 = vweird.f32 %v7863_v29 }
0x1966   :  { %7864 = vrsqrt.f32 %v3539_v1  ;;  %vm3548_vm4 = vmor %vm3546_vm3, %vm3547_vm1  ;;  %vm3556_vm6 = vweird.f32 %v3539_v1 }
0x1967   :  { %v3542_v3 = vmul.f32 %v7863_v29, %v3541_v37 }
0x1969   :  { %v3543_v13 = vmul.f32 0.5, %v3542_v3  ;;  %v3606_v59 = vpop.permute.xlu2 %3605  ;;  %v7058_v3 = vld [vmem:[%s11074_s4 + $0x70] sm:$0xff] }
0x196a   :  { %3750 = vmatpush.msrb.mxu3 %v7058_v3 }
0x196b   :  { %v3544_v14 = vsub.f32 1.5, %v3543_v13  ;;  %v7056_v13 = vld [vmem:[%s11074_s4 + $0x60] sm:$0xff] }
0x196c   :  { %v7865_v25 = vpop.eup %7864  ;;  %v3568_v51 = vpop.permute.xlu0 %3567  ;;  %3751 = vmatpush.msrb.mxu3 %v7057_v24 }
0x196d   :  { %v3551_v30 = vmul.f32 %v7865_v25, %v3539_v1  ;;  %v3545_v12 = vmul.f32 %v7863_v29, %v3544_v14  ;;  %vm3557_vm5 = vweird.f32 %v7865_v25 }
0x196e   :  { %vm3558_vm7 = vmor %vm3556_vm6, %vm3557_vm5  ;;  %3752 = vmatpush.msrb.mxu3 %v7056_v13 }
0x196f   :  { %v3552_v21 = vmul.f32 %v7865_v25, %v3551_v30  ;;  %v3549_v35 = vsel %vm3548_vm4, %v7863_v29, %v3545_v12 }
0x1970   :  { %v3560_v32 = vmul.f32 %v3549_v35, %v3526_v50  ;;  %v3572_v50 = vperm.slane %v9600_v7, 2 }
0x1971   :  { %v3553_v58 = vmul.f32 0.5, %v3552_v21 }
0x1972   :  { %v3565_v31 = vmul.f32 %v3563_v57, %v3560_v32 }
0x1973   :  { %v3554_v62 = vsub.f32 1.5, %v3553_v58 }
0x1974   :  { %v3570_v45 = vadd.f32 %v3568_v51, %v3565_v31 }
0x1975   :  { %v3555_v19 = vmul.f32 %v7865_v25, %v3554_v62 }
0x1976   :  { %7054 = vmatmul.msk.f32.vlgmr.msrb.gmra.mxu1 %vm121_vm10, %v3570_v45 }
0x1977   :  { %v3559_v38 = vsel %vm3558_vm7, %v7865_v25, %v3555_v19 }
0x1978   :  { %v3561_v42 = vmul.f32 %v3559_v38, %v9620_v26 }
0x197a   :  { %v3566_v44 = vmul.f32 %v3563_v57, %v3561_v42 }
0x197c   :  { %v3571_v56 = vadd.f32 %v3568_v51, %v3566_v44 }
0x197e   :  { %7055 = vmatmul.msk.f32.gmra.mxu1 %vm121_vm10, %v3571_v56 }
0x19f3   :  { %v3596_v55 = vpop.f32.mrf.mxu1 }
0x19f4   :  { %v3597_v39 = vadd.f32 %v3596_v55, %v3572_v50 }
0x19f6   :  { %v3602_v23 = vmax.f32 %v3597_v39, 0.0  ;;  %v3716_v39 = vmul.f32 %v9707_v33, %v9258_v10 }
0x19f8   :  { %3624 = vmatmul.f32.vlgmr.msrb.gmra.mxu2 %v3602_v23 }
0x19fb   :  { %v3599_v20 = vpop.f32.mrf.mxu1 }
0x19fc   :  { %v3600_v26 = vadd.f32 %v3599_v20, %v3572_v50  ;;  %v3715_v50 = vmul.f32 %v9707_v33, %v9253_v40 }
0x19fe   :  { %v3603_v9 = vmax.f32 %v3600_v26, 0.0 }
0x1a00   :  { %3627 = vmatmul.f32.gmra.mxu2 %v3603_v9 }
0x1a7b   :  { %v3625_v17 = vpop.f32.mrf.mxu2 }
0x1a7c   :  { %v3626_v18 = vadd.f32 %v3625_v17, %v3606_v59 }
0x1a7e   :  { %v9695_v46 = vadd.f32 %v3626_v18, %v9604_v6 }
0x1a80   :  { %v3668_v4 = vsel %vm121_vm10, %v9695_v46, 0.0 }
0x1a81   :  { %3669 = vadd.xlane.f32.xlu0 %v3668_v4 }
0x1a83   :  { %v3628_v63 = vpop.f32.mrf.mxu2 }
0x1a84   :  { %v3629_v7 = vadd.f32 %v3628_v63, %v3606_v59 }
0x1a86   :  { %v9700_v28 = vadd.f32 %v3629_v7, %v9609_v27 }
0x1a88   :  { %v3671_v16 = vsel %vm121_vm10, %v9700_v28, 0.0 }
0x1a89   :  { %3672 = vadd.xlane.f32.xlu1 %v3671_v16 }
0x1aa2   :  { %3718 = vrot.lane.b32.xlu1 %v9707_v33, %s8104_s26 }
0x1af4   :  { %v3670_v6 = vpop.xlane.xlu0 %3669 }
0x1af5   :  { %v3674_v48 = vmul.f32 %v3670_v6, %v8266_v8 }
0x1af7   :  { %v3676_v52 = vsub.f32 %v9695_v46, %v3674_v48 }
0x1af9   :  { %v3678_v27 = vmul.f32 %v3676_v52, %v3676_v52 }
0x1afb   :  { %v3680_v36 = vsel %vm121_vm10, %v3678_v27, 0.0 }
0x1afc   :  { %v3673_v53 = vpop.xlane.xlu1 %3672  ;;  %3681 = vadd.xlane.f32.xlu2 %v3680_v36 }
0x1afd   :  { %v3675_v29 = vmul.f32 %v3673_v53, %v8266_v8 }
0x1aff   :  { %v3677_v1 = vsub.f32 %v9700_v28, %v3675_v29 }
0x1b01   :  { %v3679_v60 = vmul.f32 %v3677_v1, %v3677_v1 }
0x1b03   :  { %v3683_v37 = vsel %vm121_vm10, %v3679_v60, 0.0 }
0x1b04   :  { %3684 = vadd.xlane.f32.xlu0 %v3683_v37 }
0x1b14   :  { %v3719_v19 = vpop.permute.xlu1 %3718 }
0x1b15   :  { %v3723_v55 = vadd.f32 %v3719_v19, %v3715_v50  ;;  %v3724_v23 = vadd.f32 %v3719_v19, %v3716_v39  ;;  %v8057_v39 = vld [vmem:[%s11072_s2 + $0x10] sm:$0xff] }
0x1b6f   :  { %v3682_v2 = vpop.xlane.xlu2 %3681 }
0x1b70   :  { %v3686_v14 = vmul.f32 %v3682_v2, %v8266_v8 }
0x1b72   :  { %v3688_v25 = vadd.f32 1e-05, %v3686_v14 }
0x1b74   :  { %7866 = vrsqrt.f32 %v3688_v25  ;;  %vm3696_vm9 = vweird.f32 %v3688_v25 }
0x1b77   :  { %v3685_v22 = vpop.xlane.xlu0 %3684 }
0x1b78   :  { %v3687_v30 = vmul.f32 %v3685_v22, %v8266_v8 }
0x1b7a   :  { %v7867_v12 = vpop.eup %7866  ;;  %v3689_v47 = vadd.f32 1e-05, %v3687_v30 }
0x1b7b   :  { %v3691_v21 = vmul.f32 %v7867_v12, %v3688_v25  ;;  %vm3697_vm8 = vweird.f32 %v7867_v12 }
0x1b7c   :  { %7868 = vrsqrt.f32 %v3689_v47  ;;  %vm3698_vm11 = vmor %vm3696_vm9, %vm3697_vm8  ;;  %vm3706_vm13 = vweird.f32 %v3689_v47 }
0x1b7d   :  { %v3692_v35 = vmul.f32 %v7867_v12, %v3691_v21 }
0x1b7f   :  { %v3693_v57 = vmul.f32 0.5, %v3692_v35 }
0x1b81   :  { %v3694_v32 = vsub.f32 1.5, %v3693_v57  ;;  %v8055_v57 = vld [vmem:[%s11072_s2] sm:$0xff] }
0x1b82   :  { %v7869_v54 = vpop.eup %7868 }
0x1b83   :  { %v3695_v58 = vmul.f32 %v7867_v12, %v3694_v32  ;;  %v3701_v51 = vmul.f32 %v7869_v54, %v3689_v47  ;;  %vm3707_vm12 = vweird.f32 %v7869_v54 }
0x1b84   :  { %vm3708_vm14 = vmor %vm3706_vm13, %vm3707_vm12 }
0x1b85   :  { %v3699_v31 = vsel %vm3698_vm11, %v7867_v12, %v3695_v58  ;;  %v3702_v5 = vmul.f32 %v7869_v54, %v3701_v51 }
0x1b86   :  { %v9731_v62 = vmul.f32 %v3699_v31, %v3676_v52 }
0x1b87   :  { %v3703_v45 = vmul.f32 0.5, %v3702_v5 }
0x1b88   :  { %v3713_v15 = vmul.f32 %v9707_v33, %v9731_v62 }
0x1b89   :  { %v3704_v38 = vsub.f32 1.5, %v3703_v45  ;;  %v8056_v45 = vld [vmem:[%s11072_s2 + $0x8] sm:$0xff] }
0x1b8a   :  { %v3721_v42 = vadd.f32 %v3719_v19, %v3713_v15 }
0x1b8b   :  { %v3705_v44 = vmul.f32 %v7869_v54, %v3704_v38 }
0x1b8c   :  { %7087 = vmatmul.msk.f32.vlgmr.msrb.gmra.mxu3 %vm121_vm10, %v3721_v42 }
0x1b8d   :  { %v3709_v56 = vsel %vm3708_vm14, %v7869_v54, %v3705_v44 }
0x1b8e   :  { %v9736_v0 = vmul.f32 %v3709_v56, %v3677_v1 }
0x1b90   :  { %v3714_v41 = vmul.f32 %v9707_v33, %v9736_v0 }
0x1b92   :  { %v3722_v11 = vadd.f32 %v3719_v19, %v3714_v41 }
0x1b94   :  { %7088 = vmatmul.msk.f32.gmra.mxu3 %vm121_vm10, %v3722_v11 }
0x1b9c   :  { %7089 = vmatmul.msk.f32.gmra.mxu3 %vm121_vm10, %v3723_v55 }
0x1ba4   :  { %7090 = vmatmul.msk.f32.gmra.mxu3 %vm121_vm10, %v3724_v23 }
0x1c0f   :  { %v9747_v20 = vpop.f32.mrf.mxu3 }
0x1c17   :  { %v9749_v26 = vpop.f32.mrf.mxu3 }
0x1c18   :  { %v7496_v10 = vpack.i.bf16 %v9749_v26, %v9747_v20 }
0x1c1f   :  { %v3760_v9 = vpop.f32.mrf.mxu3 }
0x1c20   :  { %3772 = vrot.lane.b32.xlu1 %v3760_v9, %s8107_s1  ;;  %3780 = vrot.lane.b32.xlu0 %v3760_v9, %s8104_s26 }
0x1c21   :  { %3784 = vrot.lane.b32.xlu2 %v3760_v9, %s8106_s14 }
0x1c27   :  { %v3763_v40 = vpop.f32.mrf.mxu3 }
0x1c28   :  { %3776 = vrot.lane.b32.xlu0 %v3760_v9, %s8105_s13  ;;  %3778 = vrot.lane.b32.xlu1 %v3763_v40, %s8105_s13 }
0x1c29   :  { %3786 = vrot.lane.b32.xlu2 %v3763_v40, %s8106_s14 }
0x1c30   :  { %7497 = vrot.lane.b32.xlu1 %v7496_v10, %s8104_s26  ;;  %3782 = vrot.lane.b32.xlu0 %v3763_v40, %s8104_s26 }
0x1c31   :  { %3768 = vrot.lane.b32.xlu2 %v3760_v9, %s8108_s15 }
0x1c38   :  { %7512 = vrot.lane.b32.xlu1 %v7496_v10, %s8108_s15  ;;  %3774 = vrot.lane.b32.xlu0 %v3763_v40, %s8107_s1 }
0x1c39   :  { %3770 = vrot.lane.b32.xlu2 %v3763_v40, %s8108_s15 }
0x1c40   :  { %7492 = vrot.lane.b32.xlu0 %v7496_v10, %s8106_s14 }
0x1c41   :  { %7507 = vrot.lane.b32.xlu2 %v7496_v10, %s8107_s1 }
0x1c48   :  { %7502 = vrot.lane.b32.xlu0 %v7496_v10, %s8105_s13 }
0x1c7b   :  { %v3785_v59 = vpop.permute.xlu2 %3784 }
0x1c7c   :  { %7091 = vmatpush.xpose.msk.msrb.mxu0 %vm43_vm0, %v3785_v59 }
0x1c83   :  { %v3787_v17 = vpop.permute.xlu2 %3786 }
0x1c84   :  { %7103 = vmatpush.xpose.msk.msra.mxu1 %vm43_vm0, %v3787_v17 }
0x1c8b   :  { %v3769_v16 = vpop.permute.xlu2 %3768 }
0x1c92   :  { %v3773_v18 = vpop.permute.xlu1 %3772  ;;  %v3781_v4 = vpop.permute.xlu0 %3780 }
0x1c93   :  { %7092 = vmatpush.xpose.msk.msrb.mxu0 %vm43_vm0, %v3781_v4  ;;  %v3771_v52 = vpop.permute.xlu2 %3770 }
0x1c9a   :  { %v3777_v63 = vpop.permute.xlu0 %3776  ;;  %v3779_v7 = vpop.permute.xlu1 %3778 }
0x1c9b   :  { %7093 = vmatpush.xpose.msk.msrb.mxu0 %vm43_vm0, %v3777_v63  ;;  %v9791_v3 = vpop.permute.xlu2 %7507 }
0x1c9c   :  { %v7509_v13 = vunpack.i.l.bf16 %v9791_v3 }
0x1c9f   :  { %7094 = vmatpush.xpose.msk.msrb.mxu0 %vm43_vm0, %v3773_v18 }
0x1ca2   :  { %v3783_v43 = vpop.permute.xlu0 %3782  ;;  %v9775_v6 = vpop.permute.xlu1 %7497 }
0x1ca3   :  { %7095 = vmatpush.xpose.msk.msrb.mxu0 %vm43_vm0, %v3769_v16  ;;  %7104 = vmatpush.xpose.msk.msra.mxu1 %vm43_vm0, %v3783_v43  ;;  %v7499_v53 = vunpack.i.l.bf16 %v9775_v6 }
0x1ca7   :  { %7096 = vmatpush.xpose.msk.msrb.mxu0 %vm43_vm0, %v3760_v9  ;;  %7105 = vmatpush.xpose.msk.msra.mxu1 %vm43_vm0, %v3779_v7 }
0x1caa   :  { %v3775_v48 = vpop.permute.xlu0 %3774  ;;  %7097 = vmatmul.msk.f32.vlgmr.msrb.gmra.mxu0 %vm43_vm0, %v3760_v9  ;;  %v9782_v27 = vpop.permute.xlu1 %7512 }
0x1cab   :  { %7106 = vmatpush.xpose.msk.msra.mxu1 %vm43_vm0, %v3775_v48  ;;  %v7514_v29 = vunpack.i.l.bf16 %v9782_v27 }
0x1caf   :  { %7107 = vmatpush.xpose.msk.msra.mxu1 %vm43_vm0, %v3771_v52 }
0x1cb2   :  { %v7493_v36 = vpop.permute.xlu0 %7492  ;;  %7098 = vmatmul.msk.f32.gmra.mxu0 %vm43_vm0, %v3769_v16 }
0x1cb3   :  { %v7495_v1 = vunpack.i.h.bf16 %v7493_v36  ;;  %v7494_v60 = vunpack.i.l.bf16 %v7493_v36  ;;  %7108 = vmatpush.xpose.msk.msra.mxu1 %vm43_vm0, %v3763_v40 }
0x1cb5   :  { %v7526_v37 = vpack.i.bf16 %v7495_v1, %v7514_v29  ;;  %v7516_v49 = vpack.i.bf16 %v7499_v53, %v7494_v60  ;;  %v8059_v53 = vld [vmem:[%s11072_s2 + $0x20] sm:$0xff] }
0x1cb6   :  { %7109 = vmatmul.msk.f32.vlgmr.msra.gmra.mxu1 %vm43_vm0, %v3763_v40 }
0x1cb7   :  { %7527 = vrot.lane.b32.xlu0 %v7526_v37, %s8109_s16  ;;  %7517 = vrot.lane.b32.xlu2 %v7516_v49, %s8109_s16 }
0x1cba   :  { %v9793_v24 = vpop.permute.xlu0 %7502  ;;  %7099 = vmatmul.msk.f32.gmra.mxu0 %vm43_vm0, %v3773_v18 }
0x1cbb   :  { %v7504_v2 = vunpack.i.l.bf16 %v9793_v24 }
0x1cbd   :  { %v7521_v14 = vpack.i.bf16 %v7509_v13, %v7504_v2 }
0x1cbe   :  { %7110 = vmatmul.msk.f32.gmra.mxu1 %vm43_vm0, %v3771_v52 }
0x1cbf   :  { %7522 = vrot.lane.b32.xlu1 %v7521_v14, %s8109_s16 }
0x1cc2   :  { %7100 = vmatmul.msk.f32.gmra.mxu0 %vm43_vm0, %v3777_v63 }
0x1cc6   :  { %7111 = vmatmul.msk.f32.gmra.mxu1 %vm43_vm0, %v3775_v48 }
0x1cca   :  { %7101 = vmatmul.msk.f32.gmra.mxu0 %vm43_vm0, %v3781_v4 }
0x1cce   :  { %7112 = vmatmul.msk.f32.gmra.mxu1 %vm43_vm0, %v3779_v7  ;;  %v8058_v7 = vld [vmem:[%s11072_s2 + $0x18] sm:$0xff] }
0x1cd2   :  { %7102 = vmatmul.msk.f32.gmra.mxu0 %vm43_vm0, %v3785_v59 }
0x1cd6   :  { %7113 = vmatmul.msk.f32.gmra.mxu1 %vm43_vm0, %v3783_v43 }
0x1cde   :  { %7114 = vmatmul.msk.f32.gmra.mxu1 %vm43_vm0, %v3787_v17 }
0x1d11   :  { %v7518_v25 = vpop.permute.xlu2 %7517 }
0x1d12   :  { %v7519_v22 = vunpack.i.l.bf16 %v7518_v25  ;;  %v7520_v30 = vunpack.i.h.bf16 %v7518_v25 }
0x1d14   :  { %4262 = vmatpush.msra.mxu2 %v7519_v22 }
0x1d16   :  { %4263 = vmatpush.msra.mxu2 %v7520_v30 }
0x1d27   :  { %v3839_v12 = vpop.f32.mrf.mxu0 }
0x1d28   :  { %v3904_v47 = vmul.f32 0.4472136, %v3839_v12 }
0x1d29   :  { %v7528_v21 = vpop.permute.xlu0 %7527 }
0x1d2a   :  { %v7530_v35 = vunpack.i.h.bf16 %v7528_v21  ;;  %v9810_v32 = vadd.f32 %v8055_v57, %v3904_v47  ;;  %v7529_v56 = vunpack.i.l.bf16 %v7528_v21  ;;  %v8060_v47 = vld [vmem:[%s11072_s2 + $0x28] sm:$0xff] }
0x1d2c   :  { %4333 = vmatpush.msra.mxu3 %v7530_v35  ;;  %v3928_v54 = vsel %vm846_vm2, %v9810_v32, -inf }
0x1d2d   :  { %3929 = vmax.xlane.f32.xlu1 %v3928_v54 }
0x1d2f   :  { %v3842_v58 = vpop.f32.mrf.mxu0 }
0x1d30   :  { %v3905_v51 = vmul.f32 0.4472136, %v3842_v58 }
0x1d31   :  { %v7523_v31 = vpop.permute.xlu1 %7522 }
0x1d32   :  { %v7524_v5 = vunpack.i.l.bf16 %v7523_v31  ;;  %v9817_v15 = vadd.f32 %v8056_v45, %v3905_v51  ;;  %v7525_v38 = vunpack.i.h.bf16 %v7523_v31 }
0x1d33   :  { %v3886_v19 = vpop.f32.mrf.mxu1 }
0x1d34   :  { %v3910_v42 = vmul.f32 0.4472136, %v3886_v19  ;;  %4264 = vmatpush.msra.mxu2 %v7524_v5  ;;  %v3931_v44 = vsel %vm846_vm2, %v9817_v15, -inf }
0x1d35   :  { %3932 = vmax.xlane.f32.xlu0 %v3931_v44 }
0x1d36   :  { %4265 = vmatpush.msra.mxu2 %v7525_v38  ;;  %v9821_v41 = vadd.f32 %v8055_v57, %v3910_v42 }
0x1d37   :  { %v3845_v11 = vpop.f32.mrf.mxu0 }
0x1d38   :  { %v3906_v50 = vmul.f32 0.4472136, %v3845_v11  ;;  %4266 = vmatpush.msra.mxu2 %v7529_v56  ;;  %v3946_v55 = vsel %vm846_vm2, %v9821_v41, -inf }
0x1d39   :  { %3947 = vmax.xlane.f32.xlu2 %v3946_v55 }
0x1d3a   :  { %v9828_v23 = vadd.f32 %v8057_v39, %v3906_v50 }
0x1d3b   :  { %v3889_v9 = vpop.f32.mrf.mxu1 }
0x1d3c   :  { %v3911_v40 = vmul.f32 0.4472136, %v3889_v9  ;;  %v3934_v10 = vsel %vm846_vm2, %v9828_v23, -inf }
0x1d3d   :  { %3935 = vmax.xlane.f32.xlu1 %v3934_v10 }
0x1d3e   :  { %v9832_v59 = vadd.f32 %v8056_v45, %v3911_v40  ;;  %v7500_v45 = vunpack.i.h.bf16 %v9775_v6 }
0x1d3f   :  { %v3848_v17 = vpop.f32.mrf.mxu0 }
0x1d40   :  { %v3907_v18 = vmul.f32 0.4472136, %v3848_v17  ;;  %v3949_v4 = vsel %vm846_vm2, %v9832_v59, -inf  ;;  %v7531_v19 = vpack.i.bf16 %v7500_v45, %v9747_v20 }
0x1d41   :  { %3950 = vmax.xlane.f32.xlu2 %v3949_v4 }
0x1d42   :  { %v9839_v16 = vadd.f32 %v8058_v7, %v3907_v18 }
0x1d43   :  { %v3892_v63 = vpop.f32.mrf.mxu1 }
0x1d44   :  { %v3912_v48 = vmul.f32 0.4472136, %v3892_v63  ;;  %v3937_v36 = vsel %vm846_vm2, %v9839_v16, -inf }
0x1d46   :  { %v9850_v49 = vadd.f32 %v8057_v39, %v3912_v48 }
0x1d47   :  { %v3851_v43 = vpop.f32.mrf.mxu0 }
0x1d48   :  { %v3908_v52 = vmul.f32 0.4472136, %v3851_v43  ;;  %v3952_v25 = vsel %vm846_vm2, %v9850_v49, -inf }
0x1d49   :  { %3938 = vmax.xlane.f32.xlu2 %v3937_v36 }
0x1d4a   :  { %v9846_v29 = vadd.f32 %v8059_v53, %v3908_v52 }
0x1d4b   :  { %v3895_v1 = vpop.f32.mrf.mxu1 }
0x1d4c   :  { %v3913_v60 = vmul.f32 0.4472136, %v3895_v1  ;;  %v3940_v37 = vsel %vm846_vm2, %v9846_v29, -inf }
0x1d4d   :  { %3941 = vmax.xlane.f32.xlu0 %v3940_v37 }
0x1d4e   :  { %v9852_v13 = vadd.f32 %v8058_v7, %v3913_v60 }
0x1d4f   :  { %v3854_v2 = vpop.f32.mrf.mxu0 }
0x1d50   :  { %v3909_v14 = vmul.f32 0.4472136, %v3854_v2  ;;  %v3955_v22 = vsel %vm846_vm2, %v9852_v13, -inf }
0x1d51   :  { %3953 = vmax.xlane.f32.xlu2 %v3952_v25  ;;  %3956 = vmax.xlane.f32.xlu1 %v3955_v22  ;;  %v7505_v25 = vunpack.i.h.bf16 %v9793_v24 }
0x1d52   :  { %v9861_v21 = vadd.f32 %v8060_v47, %v3909_v14 }
0x1d53   :  { %v3898_v30 = vpop.f32.mrf.mxu1 }
0x1d54   :  { %v3914_v12 = vmul.f32 0.4472136, %v3898_v30  ;;  %v3943_v57 = vsel %vm846_vm2, %v9861_v21, -inf  ;;  %v7510_v30 = vunpack.i.h.bf16 %v9791_v3 }
0x1d56   :  { %v9863_v35 = vadd.f32 %v8059_v53, %v3914_v12  ;;  %v7536_v12 = vpack.i.bf16 %v7510_v30, %v7505_v25 }
0x1d58   :  { %v3958_v54 = vsel %vm846_vm2, %v9863_v35, -inf }
0x1d59   :  { %3944 = vmax.xlane.f32.xlu2 %v3943_v57  ;;  %3959 = vmax.xlane.f32.xlu0 %v3958_v54 }
0x1d5b   :  { %v3901_v58 = vpop.f32.mrf.mxu1 }
0x1d5c   :  { %v3915_v51 = vmul.f32 0.4472136, %v3901_v58 }
0x1d5e   :  { %v9869_v31 = vadd.f32 %v8060_v47, %v3915_v51 }
0x1d60   :  { %v3961_v5 = vsel %vm846_vm2, %v9869_v31, -inf }
0x1d61   :  { %3962 = vmax.xlane.f32.xlu1 %v3961_v5 }
0x1d71   :  { %7532 = vrot.lane.b32.xlu2 %v7531_v19, %s8109_s16  ;;  %v7515_v19 = vunpack.i.h.bf16 %v9782_v27 }
0x1da0   :  { %v3930_v38 = vpop.xlane.xlu1 %3929 }
0x1da1   :  { %v3964_v42 = vsub.f32 %v9810_v32, %v3930_v38  ;;  %v7541_v38 = vpack.i.bf16 %v9749_v26, %v7515_v19 }
0x1da3   :  { %v3976_v44 = vmul.f32 1.442695, %v3964_v42 }
0x1da5   :  { %7870 = vpow2.f32 %v3976_v44 }
0x1da8   :  { %v3933_v56 = vpop.xlane.xlu0 %3932 }
0x1da9   :  { %v3965_v11 = vsub.f32 %v9817_v15, %v3933_v56 }
0x1dab   :  { %v9878_v50 = vpop.eup %7870  ;;  %v3978_v55 = vmul.f32 1.442695, %v3965_v11 }
0x1dac   :  { %v3948_v39 = vpop.xlane.xlu2 %3947  ;;  %v4000_v9 = vsel %vm846_vm2, %v9878_v50, 0.0 }
0x1dad   :  { %7872 = vpow2.f32 %v3978_v55  ;;  %v3970_v20 = vsub.f32 %v9821_v41, %v3948_v39  ;;  %4001 = vadd.xlane.f32.xlu0 %v4000_v9 }
0x1daf   :  { %v3988_v6 = vmul.f32 1.442695, %v3970_v20 }
0x1db0   :  { %v3936_v40 = vpop.xlane.xlu1 %3935 }
0x1db1   :  { %7874 = vpow2.f32 %v3988_v6  ;;  %v3966_v32 = vsub.f32 %v9828_v23, %v3936_v40 }
0x1db3   :  { %v9884_v10 = vpop.eup %7872  ;;  %v3980_v17 = vmul.f32 1.442695, %v3966_v32 }
0x1db4   :  { %v3951_v15 = vpop.xlane.xlu2 %3950  ;;  %v4003_v18 = vsel %vm846_vm2, %v9884_v10, 0.0 }
0x1db5   :  { %4004 = vadd.xlane.f32.xlu1 %v4003_v18  ;;  %7876 = vpow2.f32 %v3980_v17  ;;  %v3971_v63 = vsub.f32 %v9832_v59, %v3951_v15 }
0x1db7   :  { %v9888_v4 = vpop.eup %7874  ;;  %v3990_v7 = vmul.f32 1.442695, %v3971_v63 }
0x1db8   :  { %v4018_v41 = vsel %vm846_vm2, %v9888_v4, 0.0 }
0x1db9   :  { %4019 = vadd.xlane.f32.xlu0 %v4018_v41  ;;  %7878 = vpow2.f32 %v3990_v7 }
0x1dbb   :  { %v9893_v23 = vpop.eup %7876 }
0x1dbc   :  { %v3939_v43 = vpop.xlane.xlu2 %3938  ;;  %v4006_v36 = vsel %vm846_vm2, %v9893_v23, 0.0 }
0x1dbd   :  { %v3967_v48 = vsub.f32 %v9839_v16, %v3939_v43 }
0x1dbf   :  { %v3982_v52 = vmul.f32 1.442695, %v3967_v48  ;;  %v9898_v60 = vpop.eup %7878 }
0x1dc0   :  { %v3942_v53 = vpop.xlane.xlu0 %3941  ;;  %v4021_v22 = vsel %vm846_vm2, %v9898_v60, 0.0 }
0x1dc1   :  { %7880 = vpow2.f32 %v3982_v52  ;;  %4007 = vadd.xlane.f32.xlu0 %v4006_v36  ;;  %v3968_v27 = vsub.f32 %v9846_v29, %v3942_v53 }
0x1dc3   :  { %v3984_v20 = vmul.f32 1.442695, %v3968_v27 }
0x1dc4   :  { %v3954_v1 = vpop.xlane.xlu2 %3953  ;;  %v3957_v59 = vpop.xlane.xlu1 %3956 }
0x1dc5   :  { %v3973_v37 = vsub.f32 %v9852_v13, %v3957_v59  ;;  %v3972_v42 = vsub.f32 %v9850_v49, %v3954_v1 }
0x1dc7   :  { %v9901_v2 = vpop.eup %7880  ;;  %v3994_v14 = vmul.f32 1.442695, %v3973_v37  ;;  %v3992_v44 = vmul.f32 1.442695, %v3972_v42 }
0x1dc8   :  { %v4009_v16 = vsel %vm846_vm2, %v9901_v2, 0.0 }
0x1dc9   :  { %4010 = vadd.xlane.f32.xlu2 %v4009_v16  ;;  %4022 = vadd.xlane.f32.xlu0 %v4021_v22  ;;  %7882 = vpow2.f32 %v3994_v14 }
0x1dcc   :  { %v3960_v47 = vpop.xlane.xlu0 %3959  ;;  %v3945_v57 = vpop.xlane.xlu2 %3944 }
0x1dcd   :  { %v3974_v13 = vsub.f32 %v9863_v35, %v3960_v47  ;;  %v3969_v56 = vsub.f32 %v9861_v21, %v3945_v57 }
0x1dce   :  { %7537 = vrot.lane.b32.xlu1 %v7536_v12, %s8109_s16 }
0x1dcf   :  { %v3996_v54 = vmul.f32 1.442695, %v3974_v13  ;;  %v9911_v24 = vpop.eup %7882  ;;  %v3986_v11 = vmul.f32 1.442695, %v3969_v56 }
0x1dd0   :  { %v4027_v58 = vsel %vm846_vm2, %v9911_v24, 0.0 }
0x1dd1   :  { %7884 = vpow2.f32 %v3996_v54  ;;  %4028 = vadd.xlane.f32.xlu2 %v4027_v58 }
0x1dd2   :  { %7886 = vpow2.f32 %v3992_v44 }
0x1dd3   :  { %7888 = vpow2.f32 %v3986_v11 }
0x1dd4   :  { %v7533_v51 = vpop.permute.xlu2 %7532  ;;  %v3963_v55 = vpop.xlane.xlu1 %3962  ;;  %7890 = vpow2.f32 %v3984_v20 }
0x1dd5   :  { %v7535_v5 = vunpack.i.h.bf16 %v7533_v51  ;;  %v7534_v45 = vunpack.i.l.bf16 %v7533_v51  ;;  %v3975_v9 = vsub.f32 %v9869_v31, %v3963_v55 }
0x1dd7   :  { %v9915_v3 = vpop.eup %7884  ;;  %4267 = vmatpush.msra.mxu2 %v7534_v45  ;;  %4334 = vmatpush.msra.mxu3 %v7535_v5  ;;  %v3998_v6 = vmul.f32 1.442695, %v3975_v9 }
0x1dd8   :  { %v4030_v35 = vsel %vm846_vm2, %v9915_v3, 0.0  ;;  %v9924_v39 = vpop.eup %7886 }
0x1dd9   :  { %4031 = vadd.xlane.f32.xlu2 %v4030_v35  ;;  %v4024_v26 = vsel %vm846_vm2, %v9924_v39, 0.0  ;;  %v9930_v49 = vpop.eup %7888  ;;  %7892 = vpow2.f32 %v3998_v6 }
0x1dda   :  { %v4015_v21 = vsel %vm846_vm2, %v9930_v49, 0.0  ;;  %v9934_v40 = vpop.eup %7890 }
0x1ddb   :  { %v4012_v31 = vsel %vm846_vm2, %v9934_v40, 0.0 }
0x1ddd   :  { %7542 = vrot.lane.b32.xlu0 %v7541_v38, %s8109_s16 }
0x1ddf   :  { %v9936_v29 = vpop.eup %7892 }
0x1de0   :  { %v4033_v32 = vsel %vm846_vm2, %v9936_v29, 0.0 }
0x1df8   :  { %4025 = vadd.xlane.f32.xlu1 %v4024_v26 }
0x1e00   :  { %4016 = vadd.xlane.f32.xlu1 %v4015_v21 }
0x1e07   :  { %4013 = vadd.xlane.f32.xlu0 %v4012_v31 }
0x1e08   :  { %4034 = vadd.xlane.f32.xlu1 %v4033_v32 }
0x1e20   :  { %v4002_v17 = vpop.xlane.xlu0 %4001 }
0x1e21   :  { %7894 = vrcp.f32 %v4002_v17  ;;  %v4047_v7 = vand.u32 2147483648, %v4002_v17  ;;  %v4045_v48 = vand.u32 2147483647, %v4002_v17  ;;  %vm4041_vm1 = vweird.f32 %v4002_v17 }
0x1e23   :  { %v4048_v1 = vor.u32 1.1754944e-38, %v4047_v7  ;;  %vm4046_vm4 = vcmp.eq.f32.partialorder %v4045_v48, 8.507059e+37 }
0x1e27   :  { %v7895_v15 = vpop.eup %7894 }
0x1e28   :  { %v4037_v18 = vmul.f32 %v7895_v15, %v4002_v17  ;;  %v4005_v63 = vpop.xlane.xlu1 %4004  ;;  %vm4042_vm15 = vweird.f32 %v7895_v15 }
0x1e29   :  { %7896 = vrcp.f32 %v4005_v63  ;;  %vm4043_vm3 = vmor %vm4041_vm1, %vm4042_vm15  ;;  %v4062_v22 = vand.u32 2147483648, %v4005_v63  ;;  %v4060_v12 = vand.u32 2147483647, %v4005_v63  ;;  %vm4056_vm6 = vweird.f32 %v4005_v63 }
0x1e2a   :  { %v4038_v41 = vsub.f32 1.0, %v4037_v18 }
0x1e2b   :  { %v4063_v13 = vor.u32 1.1754944e-38, %v4062_v22  ;;  %vm4061_vm8 = vcmp.eq.f32.partialorder %v4060_v12, 8.507059e+37 }
0x1e2c   :  { %v4039_v43 = vmul.f32 %v7895_v15, %v4038_v41  ;;  %v9942_v52 = vpop.xlane.xlu0 %4019 }
0x1e2d   :  { %7898 = vrcp.f32 %v9942_v52 }
0x1e2e   :  { %v4040_v36 = vadd.f32 %v7895_v15, %v4039_v43 }
0x1e2f   :  { %v7897_v53 = vpop.eup %7896 }
0x1e30   :  { %v4044_v59 = vsel %vm4043_vm3, %v7895_v15, %v4040_v36  ;;  %v4052_v37 = vmul.f32 %v7897_v53, %v4005_v63  ;;  %vm4057_vm5 = vweird.f32 %v7897_v53  ;;  %vm4131_vm3 = vweird.f32 %v9942_v52 }
0x1e31   :  { %v4049_v14 = vsel %vm4046_vm4, %v4048_v1, %v4044_v59  ;;  %vm4058_vm7 = vmor %vm4056_vm6, %vm4057_vm5  ;;  %v4137_v1 = vand.u32 2147483648, %v9942_v52 }
0x1e32   :  { %v4050_v25 = vmul.f32 %v9878_v50, %v4049_v14  ;;  %v4053_v16 = vsub.f32 1.0, %v4052_v37  ;;  %v4135_v37 = vand.u32 2147483647, %v9942_v52 }
0x1e33   :  { %v7899_v51 = vpop.eup %7898 }
0x1e34   :  { %v4054_v30 = vmul.f32 %v7897_v53, %v4053_v16  ;;  %v4008_v47 = vpop.xlane.xlu0 %4007  ;;  %7115 = vmatmul.msk.f32.vlgmr.msra.gmra.mxu2 %vm846_vm2, %v4050_v25  ;;  %v4127_v38 = vmul.f32 %v7899_v51, %v9942_v52  ;;  %vm4132_vm15 = vweird.f32 %v7899_v51 }
0x1e35   :  { %7900 = vrcp.f32 %v4008_v47  ;;  %v4077_v44 = vand.u32 2147483648, %v4008_v47  ;;  %v4075_v11 = vand.u32 2147483647, %v4008_v47  ;;  %vm4071_vm11 = vweird.f32 %v4008_v47  ;;  %vm4133_vm5 = vmor %vm4131_vm3, %vm4132_vm15 }
0x1e36   :  { %v4055_v57 = vadd.f32 %v7897_v53, %v4054_v30  ;;  %v4128_v27 = vsub.f32 1.0, %v4127_v38  ;;  %v4138_v30 = vor.u32 1.1754944e-38, %v4137_v1 }
0x1e37   :  { %v4078_v20 = vor.u32 1.1754944e-38, %v4077_v44  ;;  %vm4076_vm13 = vcmp.eq.f32.partialorder %v4075_v11, 8.507059e+37 }
0x1e38   :  { %v4059_v54 = vsel %vm4058_vm7, %v7897_v53, %v4055_v57  ;;  %v4129_v17 = vmul.f32 %v7899_v51, %v4128_v27  ;;  %vm4136_vm7 = vcmp.eq.f32.partialorder %v4135_v37, 8.507059e+37 }
0x1e39   :  { %v4064_v58 = vsel %vm4061_vm8, %v4063_v13, %v4059_v54 }
0x1e3a   :  { %v4065_v50 = vmul.f32 %v9884_v10, %v4064_v58  ;;  %v4130_v36 = vadd.f32 %v7899_v51, %v4129_v17 }
0x1e3b   :  { %v7901_v5 = vpop.eup %7900 }
0x1e3c   :  { %v4067_v45 = vmul.f32 %v7901_v5, %v4008_v47  ;;  %v4011_v19 = vpop.xlane.xlu2 %4010  ;;  %v9948_v35 = vpop.xlane.xlu0 %4022  ;;  %7116 = vmatmul.msk.f32.gmra.mxu2 %vm846_vm2, %v4065_v50  ;;  %vm4072_vm9 = vweird.f32 %v7901_v5  ;;  %v4134_v25 = vsel %vm4133_vm5, %v7899_v51, %v4130_v36 }
0x1e3d   :  { %7902 = vrcp.f32 %v4011_v19  ;;  %vm4073_vm12 = vmor %vm4071_vm11, %vm4072_vm9  ;;  %v4092_v41 = vand.u32 2147483648, %v4011_v19  ;;  %v4090_v48 = vand.u32 2147483647, %v4011_v19  ;;  %vm4086_vm1 = vweird.f32 %v4011_v19 }
0x1e3e   :  { %v4068_v42 = vsub.f32 1.0, %v4067_v45  ;;  %7904 = vrcp.f32 %v9948_v35  ;;  %v4139_v57 = vsel %vm4136_vm7, %v4138_v30, %v4134_v25  ;;  %v4152_v52 = vand.u32 2147483648, %v9948_v35 }
0x1e3f   :  { %v4093_v14 = vor.u32 1.1754944e-38, %v4092_v41  ;;  %vm4091_vm6 = vcmp.eq.f32.partialorder %v4090_v48, 8.507059e+37  ;;  %v4140_v50 = vmul.f32 %v9888_v4, %v4139_v57  ;;  %vm4146_vm9 = vweird.f32 %v9948_v35 }
0x1e40   :  { %v4069_v56 = vmul.f32 %v7901_v5, %v4068_v42  ;;  %v7538_v55 = vpop.permute.xlu1 %7537  ;;  %v4150_v51 = vand.u32 2147483647, %v9948_v35 }
0x1e41   :  { %v7539_v10 = vunpack.i.l.bf16 %v7538_v55  ;;  %v7540_v6 = vunpack.i.h.bf16 %v7538_v55 }
0x1e42   :  { %v4070_v9 = vadd.f32 %v7901_v5, %v4069_v56 }
0x1e43   :  { %v7903_v26 = vpop.eup %7902  ;;  %4335 = vmatpush.msra.mxu3 %v7539_v10 }
0x1e44   :  { %v7905_v21 = vpop.eup %7904  ;;  %v4082_v31 = vmul.f32 %v7903_v26, %v4011_v19  ;;  %v4074_v32 = vsel %vm4073_vm12, %v7901_v5, %v4070_v9  ;;  %vm4087_vm14 = vweird.f32 %v7903_v26  ;;  %v4153_v5 = vor.u32 1.1754944e-38, %v4152_v52  ;;  %v4029_v38 = vpop.xlane.xlu2 %4028 }
0x1e45   :  { %v4142_v15 = vmul.f32 %v7905_v21, %v9948_v35  ;;  %4336 = vmatpush.msra.mxu3 %v7540_v6  ;;  %v4079_v18 = vsel %vm4076_vm13, %v4078_v20, %v4074_v32  ;;  %vm4088_vm4 = vmor %vm4086_vm1, %vm4087_vm14  ;;  %vm4147_vm8 = vweird.f32 %v7905_v21  ;;  %vm4151_vm12 = vcmp.eq.f32.partialorder %v4150_v51, 8.507059e+37 }
0x1e46   :  { %v4083_v63 = vsub.f32 1.0, %v4082_v31  ;;  %v4080_v7 = vmul.f32 %v9893_v23, %v4079_v18  ;;  %vm4148_vm11 = vmor %vm4146_vm9, %vm4147_vm8  ;;  %7906 = vrcp.f32 %v4029_v38 }
0x1e47   :  { %v4143_v53 = vsub.f32 1.0, %v4142_v15 }
0x1e48   :  { %v4084_v43 = vmul.f32 %v7903_v26, %v4083_v63  ;;  %7117 = vmatmul.msk.f32.gmra.mxu2 %vm846_vm2, %v4080_v7 }
0x1e49   :  { %v4144_v16 = vmul.f32 %v7905_v21, %v4143_v53  ;;  %v4180_v53 = vand.u32 2147483647, %v4029_v38 }
0x1e4a   :  { %v4085_v59 = vadd.f32 %v7903_v26, %v4084_v43  ;;  %v4182_v43 = vand.u32 2147483648, %v4029_v38 }
0x1e4b   :  { %v4145_v54 = vadd.f32 %v7905_v21, %v4144_v16 }
0x1e4c   :  { %v4089_v23 = vsel %vm4088_vm4, %v7903_v26, %v4085_v59  ;;  %v7907_v4 = vpop.eup %7906  ;;  %v9968_v44 = vpop.xlane.xlu2 %4031  ;;  %vm4176_vm4 = vweird.f32 %v4029_v38  ;;  %v4183_v25 = vor.u32 1.1754944e-38, %v4182_v43 }
0x1e4d   :  { %v4094_v22 = vsel %vm4091_vm6, %v4093_v14, %v4089_v23  ;;  %v4172_v35 = vmul.f32 %v7907_v4, %v4029_v38  ;;  %vm4177_vm15 = vweird.f32 %v7907_v4  ;;  %vm4181_vm6 = vcmp.eq.f32.partialorder %v4180_v53, 8.507059e+37 }
0x1e4e   :  { %v4095_v47 = vmul.f32 %v9901_v2, %v4094_v22  ;;  %v4149_v2 = vsel %vm4148_vm11, %v7905_v21, %v4145_v54  ;;  %vm4178_vm5 = vmor %vm4176_vm4, %vm4177_vm15  ;;  %vm4191_vm9 = vweird.f32 %v9968_v44  ;;  %v4195_v51 = vand.u32 2147483647, %v9968_v44 }
0x1e4f   :  { %v7543_v12 = vpop.permute.xlu0 %7542  ;;  %v4154_v45 = vsel %vm4151_vm12, %v4153_v5, %v4149_v2  ;;  %v4173_v27 = vsub.f32 1.0, %v4172_v35 }
0x1e50   :  { %v7544_v13 = vunpack.i.l.bf16 %v7543_v12  ;;  %7118 = vmatmul.msk.f32.gmra.mxu2 %vm846_vm2, %v4095_v47  ;;  %v7545_v58 = vunpack.i.h.bf16 %v7543_v12  ;;  %v4155_v19 = vmul.f32 %v9898_v60, %v4154_v45  ;;  %v4197_v12 = vand.u32 2147483648, %v9968_v44 }
0x1e51   :  { %v4174_v26 = vmul.f32 %v7907_v4, %v4173_v27 }
0x1e52   :  { %4337 = vmatpush.msra.mxu3 %v7544_v13 }
0x1e53   :  { %v4175_v63 = vadd.f32 %v7907_v4, %v4174_v26 }
0x1e54   :  { %4338 = vmatpush.msra.mxu3 %v7545_v58 }
0x1e55   :  { %7121 = vmatmul.msk.f32.vlgmr.msra.gmra.mxu3 %vm846_vm2, %v4140_v50  ;;  %v4179_v14 = vsel %vm4178_vm5, %v7907_v4, %v4175_v63 }
0x1e56   :  { %v4184_v57 = vsel %vm4181_vm6, %v4183_v25, %v4179_v14 }
0x1e57   :  { %v4185_v2 = vmul.f32 %v9911_v24, %v4184_v57 }
0x1e5d   :  { %7122 = vmatmul.msk.f32.gmra.mxu3 %vm846_vm2, %v4155_v19  ;;  %v4198_v19 = vor.u32 1.1754944e-38, %v4197_v12 }
0x1e6b   :  { %v4026_v42 = vpop.xlane.xlu1 %4025 }
0x1e6c   :  { %7908 = vrcp.f32 %v4026_v42  ;;  %v4167_v20 = vand.u32 2147483648, %v4026_v42  ;;  %v4165_v31 = vand.u32 2147483647, %v4026_v42  ;;  %vm4161_vm14 = vweird.f32 %v4026_v42 }
0x1e6d   :  { %7910 = vrcp.f32 %v9968_v44 }
0x1e6e   :  { %v4168_v18 = vor.u32 1.1754944e-38, %v4167_v20  ;;  %vm4166_vm3 = vcmp.eq.f32.partialorder %v4165_v31, 8.507059e+37 }
0x1e72   :  { %v7909_v56 = vpop.eup %7908 }
0x1e73   :  { %v4157_v11 = vmul.f32 %v7909_v56, %v4026_v42  ;;  %v9971_v55 = vpop.xlane.xlu1 %4016  ;;  %v9974_v60 = vpop.eup %7910  ;;  %vm4162_vm13 = vweird.f32 %v7909_v56 }
0x1e74   :  { %7912 = vrcp.f32 %v9971_v55  ;;  %v4187_v6 = vmul.f32 %v9974_v60, %v9968_v44  ;;  %vm4163_vm1 = vmor %vm4161_vm14, %vm4162_vm13  ;;  %vm4192_vm7 = vweird.f32 %v9974_v60  ;;  %v4122_v35 = vand.u32 2147483648, %v9971_v55 }
0x1e75   :  { %v4158_v10 = vsub.f32 1.0, %v4157_v11  ;;  %vm9996_vm11 = vmor %vm4191_vm9, %vm4192_vm7  ;;  %v4120_v11 = vand.u32 2147483647, %v9971_v55 }
0x1e76   :  { %v4188_v41 = vsub.f32 1.0, %v4187_v6  ;;  %v4123_v20 = vor.u32 1.1754944e-38, %v4122_v35 }
0x1e77   :  { %v4159_v9 = vmul.f32 %v7909_v56, %v4158_v10  ;;  %vm4121_vm7 = vcmp.eq.f32.partialorder %v4120_v11, 8.507059e+37 }
0x1e78   :  { %v4189_v37 = vmul.f32 %v9974_v60, %v4188_v41  ;;  %v7068_v41 = vld [vmem:[%s11076_s6 + $0x230] sm:$0xff] }
0x1e79   :  { %v4160_v21 = vadd.f32 %v7909_v56, %v4159_v9  ;;  %4499 = vmatpush.msrb.mxu3 %v7068_v41 }
0x1e7a   :  { %v4014_v32 = vpop.xlane.xlu0 %4013  ;;  %v9978_v17 = vpop.eup %7912 }
0x1e7b   :  { %7914 = vrcp.f32 %v4014_v32  ;;  %v9980_v15 = vpop.xlane.xlu1 %4034  ;;  %v4164_v7 = vsel %vm4163_vm1, %v7909_v56, %v4160_v21  ;;  %v4112_v48 = vmul.f32 %v9978_v17, %v9971_v55  ;;  %v4107_v13 = vand.u32 2147483648, %v4014_v32 }
0x1e7c   :  { %7916 = vrcp.f32 %v9980_v15  ;;  %v4169_v36 = vsel %vm4166_vm3, %v4168_v18, %v4164_v7  ;;  %v4105_v50 = vand.u32 2147483647, %v4014_v32  ;;  %vm4101_vm12 = vweird.f32 %v4014_v32  ;;  %v7066_v7 = vld [vmem:[%s11076_s6 + $0x220] sm:$0xff] }
0x1e7d   :  { %v4170_v1 = vmul.f32 %v9924_v39, %v4169_v36  ;;  %v4113_v16 = vsub.f32 1.0, %v4112_v48  ;;  %v4190_v39 = vadd.f32 %v9974_v60, %v4189_v37  ;;  %v4108_v38 = vor.u32 1.1754944e-38, %v4107_v13 }
0x1e7e   :  { %vm4117_vm14 = vweird.f32 %v9978_v17  ;;  %vm4106_vm15 = vcmp.eq.f32.partialorder %v4105_v50, 8.507059e+37  ;;  %vm4196_vm1 = vcmp.eq.f32.partialorder %v4195_v51, 8.507059e+37  ;;  %vm4116_vm3 = vweird.f32 %v9971_v55  ;;  %v10054_v51 = vld [vmem:[%s11077_s7 + $0xc] sm:$0x7] }
0x1e7f   :  { %7123 = vmatmul.msk.f32.gmra.mxu3 %vm846_vm2, %v4170_v1  ;;  %v4114_v52 = vmul.f32 %v9978_v17, %v4113_v16  ;;  %v4194_v4 = vsel %vm9996_vm11, %v9974_v60, %v4190_v39  ;;  %vm4118_vm4 = vmor %vm4116_vm3, %vm4117_vm14  ;;  %v4212_v60 = vand.u32 2147483648, %v9980_v15  ;;  %vm4206_vm6 = vweird.f32 %v9980_v15  ;;  %v7069_v1 = vld [vmem:[%s11076_s6 + $0x238] sm:$0xff] }
0x1e80   :  { %v4199_v10 = vsel %vm4196_vm1, %v4198_v19, %v4194_v4  ;;  %v4210_v6 = vand.u32 2147483647, %v9980_v15 }
0x1e81   :  { %v7915_v59 = vpop.eup %7914  ;;  %v4115_v44 = vadd.f32 %v9978_v17, %v4114_v52  ;;  %v4200_v21 = vmul.f32 %v9915_v3, %v4199_v10  ;;  %v4213_v31 = vor.u32 1.1754944e-38, %v4212_v60  ;;  %v7065_v3 = vld [vmem:[%s11076_s6 + $0x218] sm:$0xff] }
0x1e82   :  { %v7917_v23 = vpop.eup %7916  ;;  %v4097_v22 = vmul.f32 %v7915_v59, %v4014_v32  ;;  %vm4102_vm8 = vweird.f32 %v7915_v59  ;;  %vm4211_vm9 = vcmp.eq.f32.partialorder %v4210_v6, 8.507059e+37  ;;  %4379 = vmatpush.msra.mxu0 %v7065_v3  ;;  %v7062_v3 = vld [vmem:[%s11075_s5 + $0x70] sm:$0xff] }
0x1e83   :  { %v4202_v30 = vmul.f32 %v7917_v23, %v9980_v15  ;;  %vm4103_vm13 = vmor %vm4101_vm12, %vm4102_vm8  ;;  %vm4207_vm5 = vweird.f32 %v7917_v23  ;;  %v4119_v26 = vsel %vm4118_vm4, %v9978_v17, %v4115_v44  ;;  %v7064_v15 = vld [vmem:[%s11076_s6 + $0x210] sm:$0xff] }
0x1e84   :  { %v4098_v47 = vsub.f32 1.0, %v4097_v22  ;;  %vm4208_vm8 = vmor %vm4206_vm6, %vm4207_vm5  ;;  %4408 = vmatpush.msrb.mxu1 %v7064_v15  ;;  %4437 = vmatpush.msrb.mxu0 %v7066_v7  ;;  %v7063_v15 = vld [vmem:[%s11075_s5 + $0x78] sm:$0xff] }
0x1e85   :  { %v4203_v54 = vsub.f32 1.0, %v4202_v30  ;;  %v7085_v7 = vld [vmem:[%s11076_s6 + $0x2b8] sm:$0xff] }
0x1e86   :  { %v4099_v58 = vmul.f32 %v7915_v59, %v4098_v47  ;;  %4530 = vmatpush.msra.mxu1 %v7069_v1  ;;  %v7082_v1 = vld [vmem:[%s11076_s6 + $0x2a0] sm:$0xff] }
0x1e87   :  { %v4204_v42 = vmul.f32 %v7917_v23, %v4203_v54  ;;  %7124 = vmatmul.msk.f32.gmra.mxu3 %vm846_vm2, %v4185_v2  ;;  %v4540_v2 = vperm.slane %v10054_v51, 1 }
0x1e88   :  { %v4100_v45 = vadd.f32 %v7915_v59, %v4099_v58 }
0x1e89   :  { %v4205_v9 = vadd.f32 %v7917_v23, %v4204_v42 }
0x1e8a   :  { %v4104_v24 = vsel %vm4103_vm13, %v7915_v59, %v4100_v45 }
0x1e8b   :  { %v4109_v56 = vsel %vm4106_vm15, %v4108_v38, %v4104_v24  ;;  %v4209_v55 = vsel %vm4208_vm8, %v7917_v23, %v4205_v9 }
0x1e8c   :  { %v4110_v27 = vmul.f32 %v9934_v40, %v4109_v56  ;;  %v4124_v40 = vsel %vm4121_vm7, %v4123_v20, %v4119_v26  ;;  %v4214_v18 = vsel %vm4211_vm9, %v4213_v31, %v4209_v55 }
0x1e8d   :  { %v4125_v32 = vmul.f32 %v9930_v49, %v4124_v40  ;;  %v4215_v17 = vmul.f32 %v9936_v29, %v4214_v18  ;;  %v7067_v49 = vld [vmem:[%s11076_s6 + $0x228] sm:$0xff] }
0x1e8e   :  { %7119 = vmatmul.msk.f32.gmra.mxu2 %vm846_vm2, %v4110_v27 }
0x1e8f   :  { %7125 = vmatmul.msk.f32.gmra.mxu3 %vm846_vm2, %v4200_v21  ;;  %4468 = vmatpush.msrb.mxu2 %v7067_v49  ;;  %v7061_v49 = vld [vmem:[%s11075_s5 + $0x68] sm:$0xff] }
0x1e91   :  { %4635 = vmatpush.msra.mxu2 %v7085_v7 }
0x1e96   :  { %7120 = vmatmul.msk.f32.gmra.mxu2 %vm846_vm2, %v4125_v32 }
0x1e97   :  { %7126 = vmatmul.msk.f32.gmra.mxu3 %vm846_vm2, %v4215_v17 }
0x1eb7   :  { %v4269_v63 = vpop.f32.mrf.mxu2 }
0x1eb8   :  { %7129 = vmatmul.msk.f32.vlgmr.msrb.gmra.mxu1 %vm43_vm0, %v4269_v63 }
0x1ebf   :  { %v4272_v29 = vpop.f32.mrf.mxu2 }
0x1ec0   :  { %7127 = vmatmul.msk.f32.vlgmr.msra.gmra.mxu0 %vm43_vm0, %v4272_v29 }
0x1ec1   :  { %4618 = vmatpush.msra.mxu0 %v7063_v15 }
0x1ec3   :  { %4619 = vmatpush.msra.mxu0 %v7062_v3 }
0x1ec5   :  { %4620 = vmatpush.msra.mxu0 %v7061_v49 }
0x1ecb   :  { %v4275_v43 = vpop.f32.mrf.mxu2 }
0x1ed3   :  { %v4278_v48 = vpop.f32.mrf.mxu2 }
0x1ed4   :  { %7133 = vmatmul.msk.f32.vlgmr.msrb.gmra.mxu2 %vm43_vm0, %v4278_v48  ;;  %v7083_v48 = vld [vmem:[%s11076_s6 + $0x2a8] sm:$0xff] }
0x1ed8   :  { %v4340_v36 = vpop.f32.mrf.mxu3 }
0x1ed9   :  { %7130 = vmatmul.msk.f32.gmra.mxu1 %vm43_vm0, %v4340_v36 }
0x1ee0   :  { %v4343_v53 = vpop.f32.mrf.mxu3 }
0x1ee1   :  { %7128 = vmatmul.msk.f32.gmra.mxu0 %vm43_vm0, %v4343_v53 }
0x1ee9   :  { %7131 = vmatmul.msk.f32.vlgmr.msrb.gmra.mxu0 %vm43_vm0, %v4275_v43  ;;  %v7084_v43 = vld [vmem:[%s11076_s6 + $0x2b0] sm:$0xff] }
0x1eea   :  { %4636 = vmatpush.msra.mxu2 %v7084_v43 }
0x1eec   :  { %4637 = vmatpush.msra.mxu2 %v7083_v48 }
0x1eee   :  { %4638 = vmatpush.msra.mxu2 %v7082_v1 }
0x1f02   :  { %v4346_v59 = vpop.f32.mrf.mxu3 }
0x1f03   :  { %7132 = vmatmul.msk.f32.gmra.mxu0 %vm43_vm0, %v4346_v59 }
0x1f0a   :  { %v4349_v37 = vpop.f32.mrf.mxu3 }
0x1f0b   :  { %7134 = vmatmul.msk.f32.gmra.mxu2 %vm43_vm0, %v4349_v37 }
0x1f11   :  { %v4281_v14 = vpop.f32.mrf.mxu2 }
0x1f12   :  { %7135 = vmatmul.msk.f32.vlgmr.msrb.gmra.mxu3 %vm43_vm0, %v4281_v14  ;;  %v4352_v23 = vpop.f32.mrf.mxu3  ;;  %v7081_v14 = vld [vmem:[%s11076_s6 + $0x298] sm:$0xff] }
0x1f13   :  { %4639 = vmatpush.msra.mxu2 %v7081_v14  ;;  %v7171_v14 = vld [vmem:[%s11077_s7 + $0x10] sm:$0x7] }
0x1f19   :  { %v4284_v25 = vpop.f32.mrf.mxu2 }
0x1f1a   :  { %7136 = vmatmul.msk.f32.gmra.mxu3 %vm43_vm0, %v4352_v23  ;;  %7137 = vmatmul.msk.f32.vlgmr.msra.gmra.mxu1 %vm43_vm0, %v4284_v25  ;;  %v4355_v16 = vpop.f32.mrf.mxu3  ;;  %v7080_v25 = vld [vmem:[%s11076_s6 + $0x290] sm:$0xff] }
0x1f1b   :  { %4640 = vmatpush.msra.mxu2 %v7080_v25  ;;  %v7144_v25 = vld [vmem:[%s11074_s4 + $0x98] sm:$0xff] }
0x1f1c   :  { %4776 = vmatpush.msra.mxu3 %v7144_v25 }
0x1f22   :  { %7138 = vmatmul.msk.f32.gmra.mxu1 %vm43_vm0, %v4355_v16 }
0x1f35   :  { %v4410_v12 = vpop.f32.mrf.mxu1 }
0x1f3d   :  { %v4381_v22 = vpop.f32.mrf.mxu0 }
0x1f3e   :  { %v4411_v57 = vadd.f32 %v4410_v12, %v4381_v22  ;;  %v7079_v22 = vld [vmem:[%s11076_s6 + $0x288] sm:$0xff]  ;;  %v7078_v12 = vld [vmem:[%s11076_s6 + $0x280] sm:$0xff] }
0x1f3f   :  { %4641 = vmatpush.msra.mxu2 %v7079_v22  ;;  %v7142_v22 = vld [vmem:[%s11074_s4 + $0x88] sm:$0xff] }
0x1f41   :  { %4642 = vmatpush.msra.mxu2 %v7078_v12 }
0x1f56   :  { %v4413_v39 = vpop.f32.mrf.mxu1 }
0x1f57   :  { %v4470_v54 = vpop.f32.mrf.mxu2 }
0x1f5e   :  { %v4384_v30 = vpop.f32.mrf.mxu0 }
0x1f5f   :  { %v4414_v19 = vadd.f32 %v4413_v39, %v4384_v30  ;;  %v7077_v39 = vld [vmem:[%s11076_s6 + $0x278] sm:$0xff] }
0x1f60   :  { %4643 = vmatpush.msra.mxu2 %v7077_v39 }
0x1f66   :  { %v4439_v47 = vpop.f32.mrf.mxu0 }
0x1f67   :  { %v4445_v13 = vadd.f32 %v4439_v47, %v4411_v57 }
0x1f69   :  { %v4476_v52 = vadd.f32 %v4470_v54, %v4445_v13 }
0x1f80   :  { %v4442_v5 = vpop.f32.mrf.mxu0 }
0x1f81   :  { %v4446_v4 = vadd.f32 %v4442_v5, %v4414_v19 }
0x1f8e   :  { %v4473_v42 = vpop.f32.mrf.mxu2 }
0x1f8f   :  { %v4477_v24 = vadd.f32 %v4473_v42, %v4446_v4  ;;  %v7074_v4 = vld [vmem:[%s11076_s6 + $0x260] sm:$0xff] }
0x1f95   :  { %v4501_v58 = vpop.f32.mrf.mxu3 }
0x1f96   :  { %v4507_v50 = vadd.f32 %v4501_v58, %v4476_v52  ;;  %v7076_v52 = vld [vmem:[%s11076_s6 + $0x270] sm:$0xff] }
0x1f97   :  { %v4532_v45 = vpop.f32.mrf.mxu1  ;;  %4644 = vmatpush.msra.mxu2 %v7076_v52 }
0x1f98   :  { %v4538_v38 = vadd.f32 %v4532_v45, %v4507_v50  ;;  %v7075_v45 = vld [vmem:[%s11076_s6 + $0x268] sm:$0xff] }
0x1f99   :  { %4645 = vmatpush.msra.mxu2 %v7075_v45 }
0x1f9a   :  { %v4541_v44 = vadd.f32 %v4540_v2, %v4538_v38 }
0x1f9b   :  { %4646 = vmatpush.msra.mxu2 %v7074_v4 }
0x1f9c   :  { %v10058_v35 = vadd.f32 %v4541_v44, %v9217_v61 }
0x1f9d   :  { %v4504_v56 = vpop.f32.mrf.mxu3 }
0x1f9e   :  { %v4508_v11 = vadd.f32 %v4504_v56, %v4477_v24  ;;  %v4545_v27 = vsel %vm121_vm10, %v10058_v35, 0.0  ;;  %v7073_v56 = vld [vmem:[%s11076_s6 + $0x258] sm:$0xff] }
0x1f9f   :  { %v4535_v10 = vpop.f32.mrf.mxu1  ;;  %4546 = vadd.xlane.f32.xlu2 %v4545_v27  ;;  %4647 = vmatpush.msra.mxu2 %v7073_v56 }
0x1fa0   :  { %v4539_v9 = vadd.f32 %v4535_v10, %v4508_v11 }
0x1fa2   :  { %v4542_v60 = vadd.f32 %v4540_v2, %v4539_v9 }
0x1fa4   :  { %v10063_v26 = vadd.f32 %v4542_v60, %v9222_v34 }
0x1fa6   :  { %v4548_v20 = vsel %vm121_vm10, %v10063_v26, 0.0 }
0x1fa7   :  { %4549 = vadd.xlane.f32.xlu0 %v4548_v20  ;;  %v7072_v20 = vld [vmem:[%s11076_s6 + $0x250] sm:$0xff] }
0x1fa8   :  { %4648 = vmatpush.msra.mxu2 %v7072_v20 }
0x1fbb   :  { %4589 = vrot.lane.b32.xlu0 %v9707_v33, %s8110_s27 }
0x2012   :  { %v4547_v61 = vpop.xlane.xlu2 %4546 }
0x2013   :  { %v4551_v6 = vmul.f32 %v4547_v61, %v8266_v8  ;;  %v7071_v61 = vld [vmem:[%s11076_s6 + $0x248] sm:$0xff] }
0x2014   :  { %4649 = vmatpush.msra.mxu2 %v7071_v61 }
0x2015   :  { %v4553_v21 = vsub.f32 %v10058_v35, %v4551_v6  ;;  %v7070_v6 = vld [vmem:[%s11076_s6 + $0x240] sm:$0xff] }
0x2016   :  { %4650 = vmatpush.msra.mxu2 %v7070_v6 }
0x2017   :  { %v4555_v40 = vmul.f32 %v4553_v21, %v4553_v21 }
0x2019   :  { %v4557_v55 = vsel %vm121_vm10, %v4555_v40, 0.0 }
0x201a   :  { %4558 = vadd.xlane.f32.xlu1 %v4557_v55  ;;  %v4550_v31 = vpop.xlane.xlu0 %4549 }
0x201b   :  { %v4552_v34 = vmul.f32 %v4550_v31, %v8266_v8 }
0x201d   :  { %v10074_v32 = vsub.f32 %v10063_v26, %v4552_v34 }
0x201f   :  { %v4556_v18 = vmul.f32 %v10074_v32, %v10074_v32 }
0x2021   :  { %v4560_v17 = vsel %vm121_vm10, %v4556_v18, 0.0 }
0x2022   :  { %4561 = vadd.xlane.f32.xlu2 %v4560_v17 }
0x2033   :  { %4594 = vrot.lane.b32.xlu1 %v9707_v33, %s8111_s28  ;;  %v7060_v33 = vld [vmem:[%s11075_s5 + $0x60] sm:$0xff] }
0x2034   :  { %4621 = vmatpush.msra.mxu0 %v7060_v33 }
0x203a   :  { %4632 = vrot.lane.b32.xlu2 %v4540_v2, %s8104_s26  ;;  %v4590_v2 = vpop.permute.xlu0 %4589 }
0x208d   :  { %v4559_v63 = vpop.xlane.xlu1 %4558 }
0x208e   :  { %v4563_v29 = vmul.f32 %v4559_v63, %v8266_v8 }
0x2090   :  { %v4565_v41 = vadd.f32 1e-05, %v4563_v29 }
0x2092   :  { %7918 = vrsqrt.f32 %v4565_v41  ;;  %vm4573_vm12 = vweird.f32 %v4565_v41 }
0x2095   :  { %v4562_v36 = vpop.xlane.xlu2 %4561 }
0x2096   :  { %v4564_v53 = vmul.f32 %v4562_v36, %v8266_v8 }
0x2098   :  { %v7919_v59 = vpop.eup %7918  ;;  %v4566_v37 = vadd.f32 1e-05, %v4564_v53 }
0x2099   :  { %v4568_v23 = vmul.f32 %v7919_v59, %v4565_v41  ;;  %vm4574_vm11 = vweird.f32 %v7919_v59 }
0x209a   :  { %7920 = vrsqrt.f32 %v4566_v37  ;;  %vm4575_vm13 = vmor %vm4573_vm12, %vm4574_vm11  ;;  %vm4583_vm15 = vweird.f32 %v4566_v37 }
0x209b   :  { %v4569_v16 = vmul.f32 %v7919_v59, %v4568_v23  ;;  %v10167_v23 = vperm.slane %v7171_v14, 0 }
0x209d   :  { %v4570_v30 = vmul.f32 0.5, %v4569_v16  ;;  %v4633_v17 = vpop.permute.xlu2 %4632  ;;  %v7143_v16 = vld [vmem:[%s11074_s4 + $0x90] sm:$0xff] }
0x209e   :  { %4777 = vmatpush.msra.mxu3 %v7143_v16 }
0x209f   :  { %v4571_v47 = vsub.f32 1.5, %v4570_v30  ;;  %v7141_v30 = vld [vmem:[%s11074_s4 + $0x80] sm:$0xff] }
0x20a0   :  { %v7921_v57 = vpop.eup %7920  ;;  %4778 = vmatpush.msra.mxu3 %v7142_v22 }
0x20a1   :  { %v4578_v13 = vmul.f32 %v7921_v57, %v4566_v37  ;;  %v4572_v54 = vmul.f32 %v7919_v59, %v4571_v47  ;;  %vm4584_vm14 = vweird.f32 %v7921_v57 }
0x20a2   :  { %vm4585_vm1 = vmor %vm4583_vm15, %vm4584_vm14  ;;  %4779 = vmatpush.msra.mxu3 %v7141_v30 }
0x20a3   :  { %v4579_v58 = vmul.f32 %v7921_v57, %v4578_v13  ;;  %v4576_v50 = vsel %vm4575_vm13, %v7919_v59, %v4572_v54 }
0x20a4   :  { %v4587_v5 = vmul.f32 %v4576_v50, %v4553_v21  ;;  %v4599_v21 = vperm.slane %v10054_v51, 2 }
0x20a5   :  { %v4580_v19 = vmul.f32 0.5, %v4579_v58  ;;  %v4595_v38 = vpop.permute.xlu1 %4594 }
0x20a6   :  { %v4592_v42 = vmul.f32 %v4590_v2, %v4587_v5 }
0x20a7   :  { %v4581_v44 = vsub.f32 1.5, %v4580_v19 }
0x20a8   :  { %v4597_v24 = vadd.f32 %v4595_v38, %v4592_v42 }
0x20a9   :  { %v4582_v11 = vmul.f32 %v7921_v57, %v4581_v44 }
0x20aa   :  { %7139 = vmatmul.msk.f32.vlgmr.msra.gmra.mxu0 %vm121_vm10, %v4597_v24 }
0x20ab   :  { %v4586_v27 = vsel %vm4585_vm1, %v7921_v57, %v4582_v11 }
0x20ac   :  { %v4588_v10 = vmul.f32 %v4586_v27, %v10074_v32 }
0x20ae   :  { %v4593_v9 = vmul.f32 %v4590_v2, %v4588_v10 }
0x20b0   :  { %v4598_v60 = vadd.f32 %v4595_v38, %v4593_v9 }
0x20b2   :  { %7140 = vmatmul.msk.f32.gmra.mxu0 %vm121_vm10, %v4598_v60 }
0x2127   :  { %v4623_v40 = vpop.f32.mrf.mxu0 }
0x2128   :  { %v4624_v55 = vadd.f32 %v4623_v40, %v4599_v21 }
0x212a   :  { %v4629_v31 = vmax.f32 %v4624_v55, 0.0  ;;  %v4743_v55 = vmul.f32 %v10167_v23, %v9736_v0 }
0x212c   :  { %4651 = vmatmul.f32.vlgmr.msra.gmra.mxu2 %v4629_v31 }
0x212f   :  { %v4626_v34 = vpop.f32.mrf.mxu0 }
0x2130   :  { %v4627_v32 = vadd.f32 %v4626_v34, %v4599_v21  ;;  %v4742_v21 = vmul.f32 %v10167_v23, %v9731_v62 }
0x2132   :  { %v4630_v18 = vmax.f32 %v4627_v32, 0.0 }
0x2134   :  { %4654 = vmatmul.f32.gmra.mxu2 %v4630_v18 }
0x21af   :  { %v4652_v15 = vpop.f32.mrf.mxu2 }
0x21b0   :  { %v4653_v3 = vadd.f32 %v4652_v15, %v4633_v17 }
0x21b2   :  { %v10149_v49 = vadd.f32 %v4653_v3, %v10058_v35 }
0x21b4   :  { %v4695_v33 = vsel %vm121_vm10, %v10149_v49, 0.0 }
0x21b5   :  { %4696 = vadd.xlane.f32.xlu0 %v4695_v33 }
0x21b7   :  { %v4655_v63 = vpop.f32.mrf.mxu2 }
0x21b8   :  { %v4656_v51 = vadd.f32 %v4655_v63, %v4633_v17 }
0x21ba   :  { %v10154_v29 = vadd.f32 %v4656_v51, %v10063_v26 }
0x21bc   :  { %v4698_v41 = vsel %vm121_vm10, %v10154_v29, 0.0 }
0x21bd   :  { %4699 = vadd.xlane.f32.xlu1 %v4698_v41 }
0x2228   :  { %v4697_v7 = vpop.xlane.xlu0 %4696 }
0x2229   :  { %v4701_v43 = vmul.f32 %v4697_v7, %v8266_v8 }
0x222b   :  { %v4703_v48 = vsub.f32 %v10149_v49, %v4701_v43 }
0x222d   :  { %v4705_v35 = vmul.f32 %v4703_v48, %v4703_v48 }
0x222f   :  { %v4707_v36 = vsel %vm121_vm10, %v4705_v35, 0.0 }
0x2230   :  { %v4700_v53 = vpop.xlane.xlu1 %4699  ;;  %4708 = vadd.xlane.f32.xlu2 %v4707_v36 }
0x2231   :  { %v4702_v1 = vmul.f32 %v4700_v53, %v8266_v8 }
0x2233   :  { %v4704_v59 = vsub.f32 %v10154_v29, %v4702_v1 }
0x2235   :  { %v4706_v26 = vmul.f32 %v4704_v59, %v4704_v59 }
0x2237   :  { %v4710_v37 = vsel %vm121_vm10, %v4706_v26, 0.0 }
0x2238   :  { %4711 = vadd.xlane.f32.xlu0 %v4710_v37 }
0x224c   :  { %4745 = vrot.lane.b32.xlu0 %v10167_v23, %s8104_s26 }
0x22a3   :  { %v4709_v12 = vpop.xlane.xlu2 %4708 }
0x22a4   :  { %v4713_v47 = vmul.f32 %v4709_v12, %v8266_v8 }
0x22a6   :  { %v4715_v57 = vadd.f32 1e-05, %v4713_v47 }
0x22a8   :  { %7922 = vrsqrt.f32 %v4715_v57  ;;  %vm4723_vm4 = vweird.f32 %v4715_v57 }
0x22ab   :  { %v4712_v39 = vpop.xlane.xlu0 %4711 }
0x22ac   :  { %v4714_v13 = vmul.f32 %v4712_v39, %v8266_v8 }
0x22ae   :  { %v7923_v54 = vpop.eup %7922  ;;  %v4716_v52 = vadd.f32 1e-05, %v4714_v13 }
0x22af   :  { %v4718_v58 = vmul.f32 %v7923_v54, %v4715_v57  ;;  %vm4724_vm3 = vweird.f32 %v7923_v54 }
0x22b0   :  { %7924 = vrsqrt.f32 %v4716_v52  ;;  %vm4725_vm5 = vmor %vm4723_vm4, %vm4724_vm3  ;;  %vm4733_vm7 = vweird.f32 %v4716_v52 }
0x22b1   :  { %v4719_v50 = vmul.f32 %v7923_v54, %v4718_v58 }
0x22b3   :  { %v4720_v2 = vmul.f32 0.5, %v4719_v50 }
0x22b5   :  { %v4721_v5 = vsub.f32 1.5, %v4720_v2 }
0x22b6   :  { %v7925_v45 = vpop.eup %7924 }
0x22b7   :  { %v4722_v19 = vmul.f32 %v7923_v54, %v4721_v5  ;;  %v4728_v38 = vmul.f32 %v7925_v45, %v4716_v52  ;;  %vm4734_vm6 = vweird.f32 %v7925_v45 }
0x22b8   :  { %vm4735_vm8 = vmor %vm4733_vm7, %vm4734_vm6 }
0x22b9   :  { %v4726_v42 = vsel %vm4725_vm5, %v7923_v54, %v4722_v19  ;;  %v4729_v4 = vmul.f32 %v7925_v45, %v4728_v38 }
0x22ba   :  { %v10185_v44 = vmul.f32 %v4726_v42, %v4703_v48 }
0x22bb   :  { %v4730_v24 = vmul.f32 0.5, %v4729_v4 }
0x22bc   :  { %v4740_v56 = vmul.f32 %v10167_v23, %v10185_v44 }
0x22bd   :  { %v4731_v11 = vsub.f32 1.5, %v4730_v24 }
0x22be   :  { %v4746_v27 = vpop.permute.xlu0 %4745 }
0x22bf   :  { %v4732_v10 = vmul.f32 %v7925_v45, %v4731_v11  ;;  %v4748_v9 = vadd.f32 %v4746_v27, %v4740_v56  ;;  %v4750_v40 = vadd.f32 %v4746_v27, %v4742_v21  ;;  %v4751_v31 = vadd.f32 %v4746_v27, %v4743_v55 }
0x22c1   :  { %v4736_v60 = vsel %vm4735_vm8, %v7925_v45, %v4732_v10  ;;  %7172 = vmatmul.msk.f32.vlgmr.msra.gmra.mxu3 %vm121_vm10, %v4748_v9  ;;  %v8062_v45 = vld [vmem:[%s11072_s2] sm:$0xff]  ;;  %v8063_v10 = vld [vmem:[%s11072_s2 + $0x8] sm:$0xff] }
0x22c2   :  { %v10190_v20 = vmul.f32 %v4736_v60, %v4704_v59 }
0x22c4   :  { %v4741_v61 = vmul.f32 %v10167_v23, %v10190_v20 }
0x22c6   :  { %v4749_v6 = vadd.f32 %v4746_v27, %v4741_v61 }
0x22c9   :  { %7173 = vmatmul.msk.f32.gmra.mxu3 %vm121_vm10, %v4749_v6 }
0x22d1   :  { %7174 = vmatmul.msk.f32.gmra.mxu3 %vm121_vm10, %v4750_v40 }
0x22d9   :  { %7175 = vmatmul.msk.f32.gmra.mxu3 %vm121_vm10, %v4751_v31 }
0x2344   :  { %v10201_v34 = vpop.f32.mrf.mxu3 }
0x234c   :  { %v10203_v32 = vpop.f32.mrf.mxu3 }
0x234d   :  { %v7556_v0 = vpack.i.bf16 %v10203_v32, %v10201_v34 }
0x2354   :  { %v4787_v18 = vpop.f32.mrf.mxu3 }
0x2355   :  { %4803 = vrot.lane.b32.xlu0 %v4787_v18, %s8105_s13  ;;  %4807 = vrot.lane.b32.xlu2 %v4787_v18, %s8104_s26 }
0x2356   :  { %4811 = vrot.lane.b32.xlu1 %v4787_v18, %s8106_s14 }
0x235c   :  { %v4790_v62 = vpop.f32.mrf.mxu3 }
0x235d   :  { %4809 = vrot.lane.b32.xlu0 %v4790_v62, %s8104_s26  ;;  %4813 = vrot.lane.b32.xlu2 %v4790_v62, %s8106_s14 }
0x235e   :  { %4799 = vrot.lane.b32.xlu1 %v4787_v18, %s8107_s1 }
0x2365   :  { %4801 = vrot.lane.b32.xlu0 %v4790_v62, %s8107_s1  ;;  %4795 = vrot.lane.b32.xlu2 %v4787_v18, %s8108_s15 }
0x2366   :  { %4805 = vrot.lane.b32.xlu1 %v4790_v62, %s8105_s13 }
0x236d   :  { %7557 = vrot.lane.b32.xlu0 %v7556_v0, %s8105_s13  ;;  %4797 = vrot.lane.b32.xlu2 %v4790_v62, %s8108_s15 }
0x236e   :  { %7552 = vrot.lane.b32.xlu1 %v7556_v0, %s8104_s26 }
0x2375   :  { %7547 = vrot.lane.b32.xlu2 %v7556_v0, %s8106_s14 }
0x2376   :  { %7567 = vrot.lane.b32.xlu1 %v7556_v0, %s8108_s15 }
0x237d   :  { %7562 = vrot.lane.b32.xlu2 %v7556_v0, %s8107_s1 }
0x23af   :  { %v4808_v17 = vpop.permute.xlu2 %4807 }
0x23b7   :  { %v4814_v15 = vpop.permute.xlu2 %4813 }
0x23b8   :  { %7188 = vmatpush.xpose.msk.msrb.mxu0 %vm43_vm0, %v4814_v15 }
0x23bf   :  { %v4796_v3 = vpop.permute.xlu2 %4795 }
0x23c7   :  { %v4804_v33 = vpop.permute.xlu0 %4803  ;;  %v4798_v51 = vpop.permute.xlu2 %4797 }
0x23c8   :  { %v4812_v63 = vpop.permute.xlu1 %4811 }
0x23c9   :  { %7176 = vmatpush.xpose.msk.msrb.mxu1 %vm43_vm0, %v4812_v63 }
0x23cd   :  { %7177 = vmatpush.xpose.msk.msrb.mxu1 %vm43_vm0, %v4808_v17 }
0x23cf   :  { %v4810_v41 = vpop.permute.xlu0 %4809  ;;  %v7548_v43 = vpop.permute.xlu2 %7547 }
0x23d0   :  { %v4800_v7 = vpop.permute.xlu1 %4799  ;;  %7189 = vmatpush.xpose.msk.msrb.mxu0 %vm43_vm0, %v4810_v41  ;;  %v7549_v37 = vunpack.i.l.bf16 %v7548_v43  ;;  %v7550_v30 = vunpack.i.h.bf16 %v7548_v43 }
0x23d1   :  { %7178 = vmatpush.xpose.msk.msrb.mxu1 %vm43_vm0, %v4804_v33 }
0x23d5   :  { %7179 = vmatpush.xpose.msk.msrb.mxu1 %vm43_vm0, %v4800_v7 }
0x23d7   :  { %v4802_v48 = vpop.permute.xlu0 %4801  ;;  %v10230_v36 = vpop.permute.xlu2 %7562 }
0x23d8   :  { %v4806_v35 = vpop.permute.xlu1 %4805  ;;  %v7564_v1 = vunpack.i.l.bf16 %v10230_v36 }
0x23d9   :  { %7180 = vmatpush.xpose.msk.msrb.mxu1 %vm43_vm0, %v4796_v3  ;;  %7190 = vmatpush.xpose.msk.msrb.mxu0 %vm43_vm0, %v4806_v35 }
0x23dd   :  { %7181 = vmatpush.xpose.msk.msrb.mxu1 %vm43_vm0, %v4787_v18  ;;  %7191 = vmatpush.xpose.msk.msrb.mxu0 %vm43_vm0, %v4802_v48 }
0x23df   :  { %v10234_v53 = vpop.permute.xlu0 %7557 }
0x23e0   :  { %v10237_v59 = vpop.permute.xlu1 %7552  ;;  %v7559_v26 = vunpack.i.l.bf16 %v10234_v53  ;;  %7182 = vmatmul.msk.f32.vlgmr.msrb.gmra.mxu1 %vm43_vm0, %v4787_v18  ;;  %v8064_v18 = vld [vmem:[%s11072_s2 + $0x10] sm:$0xff] }
0x23e1   :  { %v7554_v14 = vunpack.i.l.bf16 %v10237_v59  ;;  %7192 = vmatpush.xpose.msk.msrb.mxu0 %vm43_vm0, %v4798_v51 }
0x23e2   :  { %v7576_v25 = vpack.i.bf16 %v7564_v1, %v7559_v26 }
0x23e3   :  { %v7571_v16 = vpack.i.bf16 %v7554_v14, %v7549_v37  ;;  %v8066_v14 = vld [vmem:[%s11072_s2 + $0x20] sm:$0xff] }
0x23e4   :  { %7577 = vrot.lane.b32.xlu0 %v7576_v25, %s8109_s16 }
0x23e5   :  { %7193 = vmatpush.xpose.msk.msrb.mxu0 %vm43_vm0, %v4790_v62  ;;  %7572 = vrot.lane.b32.xlu2 %v7571_v16, %s8109_s16 }
0x23e8   :  { %v10246_v22 = vpop.permute.xlu1 %7567  ;;  %7183 = vmatmul.msk.f32.gmra.mxu1 %vm43_vm0, %v4796_v3  ;;  %7194 = vmatmul.msk.f32.vlgmr.msrb.gmra.mxu0 %vm43_vm0, %v4790_v62 }
0x23e9   :  { %v7569_v12 = vunpack.i.l.bf16 %v10246_v22 }
0x23eb   :  { %v7581_v47 = vpack.i.bf16 %v7550_v30, %v7569_v12 }
0x23ed   :  { %7582 = vrot.lane.b32.xlu1 %v7581_v47, %s8109_s16 }
0x23f0   :  { %7184 = vmatmul.msk.f32.gmra.mxu1 %vm43_vm0, %v4800_v7  ;;  %7195 = vmatmul.msk.f32.gmra.mxu0 %vm43_vm0, %v4798_v51  ;;  %v8065_v51 = vld [vmem:[%s11072_s2 + $0x18] sm:$0xff] }
0x23f8   :  { %7185 = vmatmul.msk.f32.gmra.mxu1 %vm43_vm0, %v4804_v33  ;;  %7196 = vmatmul.msk.f32.gmra.mxu0 %vm43_vm0, %v4802_v48 }
0x2400   :  { %7186 = vmatmul.msk.f32.gmra.mxu1 %vm43_vm0, %v4808_v17  ;;  %7197 = vmatmul.msk.f32.gmra.mxu0 %vm43_vm0, %v4806_v35 }
0x2408   :  { %7187 = vmatmul.msk.f32.gmra.mxu1 %vm43_vm0, %v4812_v63  ;;  %7198 = vmatmul.msk.f32.gmra.mxu0 %vm43_vm0, %v4810_v41 }
0x2410   :  { %7199 = vmatmul.msk.f32.gmra.mxu0 %vm43_vm0, %v4814_v15 }
0x243f   :  { %v7573_v57 = vpop.permute.xlu2 %7572 }
0x2440   :  { %v7574_v39 = vunpack.i.l.bf16 %v7573_v57  ;;  %v7575_v13 = vunpack.i.h.bf16 %v7573_v57 }
0x2442   :  { %5289 = vmatpush.msrb.mxu2 %v7574_v39 }
0x2444   :  { %5290 = vmatpush.msrb.mxu2 %v7575_v13 }
0x2456   :  { %v7578_v54 = vpop.permute.xlu0 %7577 }
0x2457   :  { %v7579_v52 = vunpack.i.l.bf16 %v7578_v54  ;;  %v7580_v58 = vunpack.i.h.bf16 %v7578_v54 }
0x2459   :  { %5291 = vmatpush.msrb.mxu2 %v7579_v52  ;;  %v8067_v52 = vld [vmem:[%s11072_s2 + $0x28] sm:$0xff] }
0x245b   :  { %5292 = vmatpush.msrb.mxu2 %v7580_v58 }
0x245d   :  { %v4866_v50 = vpop.f32.mrf.mxu1 }
0x245e   :  { %v4931_v2 = vmul.f32 0.4472136, %v4866_v50 }
0x245f   :  { %v7583_v5 = vpop.permute.xlu1 %7582 }
0x2460   :  { %v10264_v19 = vadd.f32 %v8062_v45, %v4931_v2  ;;  %v7585_v38 = vunpack.i.h.bf16 %v7583_v5  ;;  %v7584_v42 = vunpack.i.l.bf16 %v7583_v5 }
0x2462   :  { %5293 = vmatpush.msrb.mxu2 %v7584_v42  ;;  %5360 = vmatpush.msrb.mxu3 %v7585_v38  ;;  %v4955_v4 = vsel %vm846_vm2, %v10264_v19, -inf }
0x2463   :  { %4956 = vmax.xlane.f32.xlu1 %v4955_v4 }
0x2465   :  { %v4869_v24 = vpop.f32.mrf.mxu1  ;;  %v4913_v56 = vpop.f32.mrf.mxu0 }
0x2466   :  { %v4932_v11 = vmul.f32 0.4472136, %v4869_v24  ;;  %v4937_v27 = vmul.f32 0.4472136, %v4913_v56 }
0x2468   :  { %v10271_v9 = vadd.f32 %v8063_v10, %v4932_v11  ;;  %v10273_v60 = vadd.f32 %v8062_v45, %v4937_v27 }
0x246a   :  { %v4958_v61 = vsel %vm846_vm2, %v10271_v9, -inf  ;;  %v4973_v6 = vsel %vm846_vm2, %v10273_v60, -inf }
0x246b   :  { %4959 = vmax.xlane.f32.xlu0 %v4958_v61  ;;  %4974 = vmax.xlane.f32.xlu2 %v4973_v6 }
0x246d   :  { %v4872_v21 = vpop.f32.mrf.mxu1  ;;  %v4916_v40 = vpop.f32.mrf.mxu0 }
0x246e   :  { %v4933_v55 = vmul.f32 0.4472136, %v4872_v21  ;;  %v4938_v31 = vmul.f32 0.4472136, %v4916_v40 }
0x2470   :  { %v10282_v62 = vadd.f32 %v8064_v18, %v4933_v55  ;;  %v10284_v0 = vadd.f32 %v8063_v10, %v4938_v31 }
0x2472   :  { %v4976_v17 = vsel %vm846_vm2, %v10284_v0, -inf  ;;  %v4961_v15 = vsel %vm846_vm2, %v10282_v62, -inf }
0x2473   :  { %4977 = vmax.xlane.f32.xlu0 %v4976_v17  ;;  %4962 = vmax.xlane.f32.xlu1 %v4961_v15 }
0x2475   :  { %v4875_v3 = vpop.f32.mrf.mxu1  ;;  %v4919_v33 = vpop.f32.mrf.mxu0 }
0x2476   :  { %v4934_v63 = vmul.f32 0.4472136, %v4875_v3  ;;  %v4939_v7 = vmul.f32 0.4472136, %v4919_v33 }
0x2478   :  { %v10293_v41 = vadd.f32 %v8065_v51, %v4934_v63  ;;  %v10297_v1 = vadd.f32 %v8064_v18, %v4939_v7 }
0x247a   :  { %v4964_v43 = vsel %vm846_vm2, %v10293_v41, -inf  ;;  %v4979_v30 = vsel %vm846_vm2, %v10297_v1, -inf }
0x247b   :  { %4965 = vmax.xlane.f32.xlu0 %v4964_v43  ;;  %v7560_v43 = vunpack.i.h.bf16 %v10234_v53  ;;  %v7570_v53 = vunpack.i.h.bf16 %v10246_v22 }
0x247d   :  { %v4878_v48 = vpop.f32.mrf.mxu1  ;;  %v4922_v35 = vpop.f32.mrf.mxu0 }
0x247e   :  { %v4935_v26 = vmul.f32 0.4472136, %v4878_v48  ;;  %v4940_v37 = vmul.f32 0.4472136, %v4922_v35  ;;  %v7555_v35 = vunpack.i.h.bf16 %v10237_v59 }
0x2480   :  { %v10302_v25 = vadd.f32 %v8066_v14, %v4935_v26  ;;  %v10304_v16 = vadd.f32 %v8065_v51, %v4940_v37 }
0x2482   :  { %v4982_v12 = vsel %vm846_vm2, %v10304_v16, -inf  ;;  %v4967_v47 = vsel %vm846_vm2, %v10302_v25, -inf }
0x2483   :  { %4980 = vmax.xlane.f32.xlu0 %v4979_v30  ;;  %4983 = vmax.xlane.f32.xlu1 %v4982_v12 }
0x2484   :  { %4968 = vmax.xlane.f32.xlu2 %v4967_v47  ;;  %v7596_v47 = vpack.i.bf16 %v10203_v32, %v7570_v53 }
0x2485   :  { %v4881_v57 = vpop.f32.mrf.mxu1  ;;  %v4925_v39 = vpop.f32.mrf.mxu0 }
0x2486   :  { %v4936_v13 = vmul.f32 0.4472136, %v4881_v57  ;;  %v4941_v54 = vmul.f32 0.4472136, %v4925_v39 }
0x2488   :  { %v10315_v58 = vadd.f32 %v8067_v52, %v4936_v13  ;;  %v10317_v50 = vadd.f32 %v8066_v14, %v4941_v54  ;;  %v7586_v14 = vpack.i.bf16 %v7555_v35, %v10201_v34 }
0x248a   :  { %v4970_v2 = vsel %vm846_vm2, %v10315_v58, -inf  ;;  %v4985_v5 = vsel %vm846_vm2, %v10317_v50, -inf }
0x248b   :  { %4971 = vmax.xlane.f32.xlu0 %v4970_v2 }
0x248c   :  { %4986 = vmax.xlane.f32.xlu2 %v4985_v5 }
0x248d   :  { %v4928_v45 = vpop.f32.mrf.mxu0 }
0x248e   :  { %v4942_v38 = vmul.f32 0.4472136, %v4928_v45 }
0x2490   :  { %v10323_v42 = vadd.f32 %v8067_v52, %v4942_v38 }
0x2492   :  { %v4988_v4 = vsel %vm846_vm2, %v10323_v42, -inf }
0x2493   :  { %4989 = vmax.xlane.f32.xlu1 %v4988_v4 }
0x24d6   :  { %v4957_v24 = vpop.xlane.xlu1 %4956 }
0x24d7   :  { %v4991_v56 = vsub.f32 %v10264_v19, %v4957_v24 }
0x24d9   :  { %v5003_v11 = vmul.f32 1.442695, %v4991_v56 }
0x24db   :  { %7926 = vpow2.f32 %v5003_v11 }
0x24de   :  { %v4960_v27 = vpop.xlane.xlu0 %4959  ;;  %v4975_v10 = vpop.xlane.xlu2 %4974 }
0x24df   :  { %v4992_v61 = vsub.f32 %v10271_v9, %v4960_v27  ;;  %v4997_v6 = vsub.f32 %v10273_v60, %v4975_v10 }
0x24e1   :  { %v10330_v21 = vpop.eup %7926  ;;  %v5005_v40 = vmul.f32 1.442695, %v4992_v61  ;;  %v5015_v55 = vmul.f32 1.442695, %v4997_v6 }
0x24e2   :  { %v5027_v31 = vsel %vm846_vm2, %v10330_v21, 0.0 }
0x24e3   :  { %7928 = vpow2.f32 %v5005_v40  ;;  %5028 = vadd.xlane.f32.xlu2 %v5027_v31 }
0x24e4   :  { %7930 = vpow2.f32 %v5015_v55 }
0x24e6   :  { %v4963_v18 = vpop.xlane.xlu1 %4962  ;;  %v4978_v19 = vpop.xlane.xlu0 %4977 }
0x24e7   :  { %v4993_v17 = vsub.f32 %v10282_v62, %v4963_v18  ;;  %v4998_v60 = vsub.f32 %v10284_v0, %v4978_v19  ;;  %v7565_v0 = vunpack.i.h.bf16 %v10230_v36 }
0x24e9   :  { %v10335_v15 = vpop.eup %7928  ;;  %v5007_v3 = vmul.f32 1.442695, %v4993_v17  ;;  %v5017_v51 = vmul.f32 1.442695, %v4998_v60  ;;  %v7591_v26 = vpack.i.bf16 %v7565_v0, %v7560_v43 }
0x24ea   :  { %v10337_v9 = vpop.eup %7930  ;;  %v5030_v33 = vsel %vm846_vm2, %v10335_v15, 0.0 }
0x24eb   :  { %5031 = vadd.xlane.f32.xlu0 %v5030_v33  ;;  %v5045_v63 = vsel %vm846_vm2, %v10337_v9, 0.0  ;;  %7932 = vpow2.f32 %v5007_v3 }
0x24ec   :  { %5046 = vadd.xlane.f32.xlu1 %v5045_v63  ;;  %7934 = vpow2.f32 %v5017_v51 }
0x24ee   :  { %v4966_v30 = vpop.xlane.xlu0 %4965 }
0x24ef   :  { %v4994_v57 = vsub.f32 %v10293_v41, %v4966_v30 }
0x24f1   :  { %v10344_v7 = vpop.eup %7932  ;;  %v5009_v52 = vmul.f32 1.442695, %v4994_v57 }
0x24f2   :  { %v5033_v62 = vsel %vm846_vm2, %v10344_v7, 0.0  ;;  %v10350_v48 = vpop.eup %7934 }
0x24f3   :  { %v5048_v37 = vsel %vm846_vm2, %v10350_v48, 0.0 }
0x24f4   :  { %5034 = vadd.xlane.f32.xlu1 %v5033_v62 }
0x24f6   :  { %v4981_v12 = vpop.xlane.xlu0 %4980  ;;  %v4984_v39 = vpop.xlane.xlu1 %4983 }
0x24f7   :  { %v4999_v36 = vsub.f32 %v10297_v1, %v4981_v12  ;;  %v4969_v54 = vpop.xlane.xlu2 %4968  ;;  %v5000_v22 = vsub.f32 %v10304_v16, %v4984_v39 }
0x24f8   :  { %v4995_v10 = vsub.f32 %v10302_v25, %v4969_v54 }
0x24f9   :  { %v5019_v59 = vmul.f32 1.442695, %v4999_v36  ;;  %v5021_v45 = vmul.f32 1.442695, %v5000_v22 }
0x24fa   :  { %v5011_v6 = vmul.f32 1.442695, %v4995_v10 }
0x24fb   :  { %7592 = vrot.lane.b32.xlu2 %v7591_v26, %s8109_s16  ;;  %7936 = vpow2.f32 %v5019_v59 }
0x24fc   :  { %5049 = vadd.xlane.f32.xlu1 %v5048_v37  ;;  %7938 = vpow2.f32 %v5009_v52 }
0x24fe   :  { %v4972_v13 = vpop.xlane.xlu0 %4971 }
0x24ff   :  { %7587 = vrot.lane.b32.xlu0 %v7586_v14, %s8109_s16  ;;  %v4996_v34 = vsub.f32 %v10315_v58, %v4972_v13  ;;  %v4987_v38 = vpop.xlane.xlu2 %4986 }
0x2500   :  { %v5001_v24 = vsub.f32 %v10317_v50, %v4987_v38 }
0x2501   :  { %v5013_v2 = vmul.f32 1.442695, %v4996_v34  ;;  %v10365_v1 = vpop.eup %7936 }
0x2502   :  { %v5051_v41 = vsel %vm846_vm2, %v10365_v1, 0.0  ;;  %v10370_v4 = vpop.eup %7938 }
0x2503   :  { %7940 = vpow2.f32 %v5013_v2  ;;  %v5036_v16 = vsel %vm846_vm2, %v10370_v4, 0.0 }
0x2504   :  { %7942 = vpow2.f32 %v5021_v45 }
0x2506   :  { %v4990_v5 = vpop.xlane.xlu1 %4989 }
0x2507   :  { %v5002_v32 = vsub.f32 %v10323_v42, %v4990_v5  ;;  %v5023_v42 = vmul.f32 1.442695, %v5001_v24 }
0x2509   :  { %v5025_v58 = vmul.f32 1.442695, %v5002_v32  ;;  %v10373_v56 = vpop.eup %7940 }
0x250a   :  { %v5042_v11 = vsel %vm846_vm2, %v10373_v56, 0.0  ;;  %v10379_v27 = vpop.eup %7942 }
0x250b   :  { %7944 = vpow2.f32 %v5025_v58  ;;  %v5054_v50 = vsel %vm846_vm2, %v10379_v27, 0.0 }
0x250c   :  { %7946 = vpow2.f32 %v5023_v42 }
0x250d   :  { %7948 = vpow2.f32 %v5011_v6 }
0x2511   :  { %v10382_v61 = vpop.eup %7944 }
0x2512   :  { %v5060_v40 = vsel %vm846_vm2, %v10382_v61, 0.0  ;;  %v10388_v55 = vpop.eup %7946 }
0x2513   :  { %v5057_v31 = vsel %vm846_vm2, %v10388_v55, 0.0  ;;  %v10392_v25 = vpop.eup %7948 }
0x2514   :  { %v5039_v18 = vsel %vm846_vm2, %v10392_v25, 0.0 }
0x2515   :  { %7597 = vrot.lane.b32.xlu1 %v7596_v47, %s8109_s16 }
0x2524   :  { %5052 = vadd.xlane.f32.xlu2 %v5051_v41 }
0x2529   :  { %5037 = vadd.xlane.f32.xlu0 %v5036_v16 }
0x252c   :  { %5043 = vadd.xlane.f32.xlu2 %v5042_v11 }
0x2531   :  { %5055 = vadd.xlane.f32.xlu0 %v5054_v50 }
0x2534   :  { %5061 = vadd.xlane.f32.xlu2 %v5060_v40 }
0x2539   :  { %5058 = vadd.xlane.f32.xlu0 %v5057_v31 }
0x253f   :  { %5040 = vadd.xlane.f32.xlu1 %v5039_v18 }
0x2556   :  { %v5029_v19 = vpop.xlane.xlu2 %5028 }
0x2557   :  { %7950 = vrcp.f32 %v5029_v19  ;;  %v5074_v37 = vand.u32 2147483648, %v5029_v19  ;;  %vm5068_vm11 = vweird.f32 %v5029_v19  ;;  %v5072_v14 = vand.u32 2147483647, %v5029_v19 }
0x2559   :  { %v5075_v36 = vor.u32 1.1754944e-38, %v5074_v37  ;;  %vm5073_vm13 = vcmp.eq.f32.partialorder %v5072_v14, 8.507059e+37 }
0x255d   :  { %v7951_v17 = vpop.eup %7950 }
0x255e   :  { %v5064_v3 = vmul.f32 %v7951_v17, %v5029_v19  ;;  %v5032_v60 = vpop.xlane.xlu0 %5031  ;;  %vm5069_vm9 = vweird.f32 %v7951_v17  ;;  %v7593_v57 = vpop.permute.xlu2 %7592 }
0x255f   :  { %7952 = vrcp.f32 %v5032_v60  ;;  %v10396_v33 = vpop.xlane.xlu1 %5046  ;;  %vm5070_vm12 = vmor %vm5068_vm11, %vm5069_vm9  ;;  %v5089_v2 = vand.u32 2147483648, %v5032_v60  ;;  %vm5083_vm15 = vweird.f32 %v5032_v60  ;;  %v5087_v45 = vand.u32 2147483647, %v5032_v60 }
0x2560   :  { %v5065_v63 = vsub.f32 1.0, %v5064_v3  ;;  %v7594_v41 = vunpack.i.l.bf16 %v7593_v57  ;;  %v7595_v42 = vunpack.i.h.bf16 %v7593_v57  ;;  %vm5158_vm9 = vweird.f32 %v10396_v33 }
0x2561   :  { %v5090_v16 = vor.u32 1.1754944e-38, %v5089_v2  ;;  %vm5088_vm3 = vcmp.eq.f32.partialorder %v5087_v45, 8.507059e+37 }
0x2562   :  { %v5066_v62 = vmul.f32 %v7951_v17, %v5065_v63 }
0x2564   :  { %v5067_v35 = vadd.f32 %v7951_v17, %v5066_v62  ;;  %v5164_v62 = vand.u32 2147483648, %v10396_v33 }
0x2565   :  { %v7953_v51 = vpop.eup %7952 }
0x2566   :  { %v5079_v43 = vmul.f32 %v7953_v51, %v5032_v60  ;;  %v5071_v30 = vsel %vm5070_vm12, %v7951_v17, %v5067_v35  ;;  %vm5084_vm14 = vweird.f32 %v7953_v51 }
0x2567   :  { %v5035_v0 = vpop.xlane.xlu1 %5034  ;;  %v5076_v59 = vsel %vm5073_vm13, %v5075_v36, %v5071_v30  ;;  %vm5085_vm1 = vmor %vm5083_vm15, %vm5084_vm14 }
0x2568   :  { %7954 = vrcp.f32 %v5035_v0  ;;  %v5080_v26 = vsub.f32 1.0, %v5079_v43  ;;  %v5077_v32 = vmul.f32 %v10330_v21, %v5076_v59  ;;  %v5104_v6 = vand.u32 2147483648, %v5035_v0 }
0x2569   :  { %7956 = vrcp.f32 %v10396_v33  ;;  %vm5098_vm5 = vweird.f32 %v5035_v0  ;;  %v5102_v40 = vand.u32 2147483647, %v5035_v0  ;;  %v5162_v43 = vand.u32 2147483647, %v10396_v33 }
0x256a   :  { %v5081_v12 = vmul.f32 %v7953_v51, %v5080_v26  ;;  %v5105_v3 = vor.u32 1.1754944e-38, %v5104_v6  ;;  %v5165_v26 = vor.u32 1.1754944e-38, %v5164_v62 }
0x256b   :  { %vm5103_vm7 = vcmp.eq.f32.partialorder %v5102_v40, 8.507059e+37  ;;  %vm5163_vm12 = vcmp.eq.f32.partialorder %v5162_v43, 8.507059e+37 }
0x256c   :  { %v5082_v39 = vadd.f32 %v7953_v51, %v5081_v12 }
0x256e   :  { %v7955_v53 = vpop.eup %7954  ;;  %v5086_v24 = vsel %vm5085_vm1, %v7953_v51, %v5082_v39 }
0x256f   :  { %v5094_v47 = vmul.f32 %v7955_v53, %v5035_v0  ;;  %v10399_v54 = vpop.xlane.xlu1 %5049  ;;  %v7957_v52 = vpop.eup %7956  ;;  %v5091_v21 = vsel %vm5088_vm3, %v5090_v16, %v5086_v24  ;;  %vm5099_vm4 = vweird.f32 %v7955_v53 }
0x2570   :  { %7958 = vrcp.f32 %v10399_v54  ;;  %v5154_v38 = vmul.f32 %v7957_v52, %v10396_v33  ;;  %v5092_v31 = vmul.f32 %v10335_v15, %v5091_v21  ;;  %vm5100_vm6 = vmor %vm5098_vm5, %vm5099_vm4  ;;  %vm5159_vm8 = vweird.f32 %v7957_v52 }
0x2571   :  { %v5095_v13 = vsub.f32 1.0, %v5094_v47  ;;  %v7588_v34 = vpop.permute.xlu0 %7587  ;;  %vm5160_vm11 = vmor %vm5158_vm9, %vm5159_vm8  ;;  %vm5173_vm14 = vweird.f32 %v10399_v54 }
0x2572   :  { %v7590_v22 = vunpack.i.h.bf16 %v7588_v34  ;;  %v7589_v5 = vunpack.i.l.bf16 %v7588_v34  ;;  %v5155_v11 = vsub.f32 1.0, %v5154_v38 }
0x2573   :  { %v5096_v58 = vmul.f32 %v7955_v53, %v5095_v13 }
0x2574   :  { %5294 = vmatpush.msrb.mxu2 %v7589_v5  ;;  %5361 = vmatpush.msrb.mxu3 %v7590_v22  ;;  %v5156_v18 = vmul.f32 %v7957_v52, %v5155_v11 }
0x2575   :  { %7200 = vmatmul.msk.f32.vlgmr.msrb.gmra.mxu2 %vm846_vm2, %v5077_v32  ;;  %v5097_v10 = vadd.f32 %v7955_v53, %v5096_v58 }
0x2576   :  { %5362 = vmatpush.msrb.mxu3 %v7594_v41  ;;  %v7959_v50 = vpop.eup %7958  ;;  %v5157_v63 = vadd.f32 %v7957_v52, %v5156_v18 }
0x2577   :  { %v5169_v19 = vmul.f32 %v7959_v50, %v10399_v54  ;;  %v5101_v17 = vsel %vm5100_vm6, %v7955_v53, %v5097_v10  ;;  %vm5174_vm13 = vweird.f32 %v7959_v50  ;;  %v5179_v53 = vand.u32 2147483648, %v10399_v54 }
0x2578   :  { %5363 = vmatpush.msrb.mxu3 %v7595_v42  ;;  %v5106_v60 = vsel %vm5103_vm7, %v5105_v3, %v5101_v17  ;;  %v5161_v0 = vsel %vm5160_vm11, %v7957_v52, %v5157_v63  ;;  %vm5175_vm15 = vmor %vm5173_vm14, %vm5174_vm13 }
0x2579   :  { %v5170_v51 = vsub.f32 1.0, %v5169_v19  ;;  %v5107_v15 = vmul.f32 %v10344_v7, %v5106_v60  ;;  %v5166_v14 = vsel %vm5163_vm12, %v5165_v26, %v5161_v0  ;;  %v5177_v7 = vand.u32 2147483647, %v10399_v54 }
0x257a   :  { %v5167_v33 = vmul.f32 %v10337_v9, %v5166_v14  ;;  %v5180_v59 = vor.u32 1.1754944e-38, %v5179_v53 }
0x257b   :  { %v5171_v35 = vmul.f32 %v7959_v50, %v5170_v51  ;;  %vm5178_vm1 = vcmp.eq.f32.partialorder %v5177_v7, 8.507059e+37 }
0x257d   :  { %7201 = vmatmul.msk.f32.gmra.mxu2 %vm846_vm2, %v5092_v31  ;;  %v5172_v12 = vadd.f32 %v7959_v50, %v5171_v35 }
0x257f   :  { %v5176_v47 = vsel %vm5175_vm15, %v7959_v50, %v5172_v12 }
0x2580   :  { %v5181_v57 = vsel %vm5178_vm1, %v5180_v59, %v5176_v47 }
0x2581   :  { %v5182_v39 = vmul.f32 %v10350_v48, %v5181_v57 }
0x2585   :  { %7202 = vmatmul.msk.f32.gmra.mxu2 %vm846_vm2, %v5107_v15 }
0x2587   :  { %v7598_v37 = vpop.permute.xlu1 %7597 }
0x2588   :  { %v7599_v30 = vunpack.i.l.bf16 %v7598_v37  ;;  %v7600_v36 = vunpack.i.h.bf16 %v7598_v37 }
0x258a   :  { %5364 = vmatpush.msrb.mxu3 %v7599_v30 }
0x258c   :  { %5365 = vmatpush.msrb.mxu3 %v7600_v36 }
0x258d   :  { %7206 = vmatmul.msk.f32.vlgmr.msrb.gmra.mxu3 %vm846_vm2, %v5167_v33 }
0x2595   :  { %7207 = vmatmul.msk.f32.gmra.mxu3 %vm846_vm2, %v5182_v39 }
0x2597   :  { %v5053_v13 = vpop.xlane.xlu2 %5052 }
0x2598   :  { %7960 = vrcp.f32 %v5053_v13  ;;  %v5192_v32 = vand.u32 2147483647, %v5053_v13  ;;  %v5194_v45 = vand.u32 2147483648, %v5053_v13  ;;  %vm5188_vm4 = vweird.f32 %v5053_v13 }
0x259a   :  { %vm5193_vm6 = vcmp.eq.f32.partialorder %v5192_v32, 8.507059e+37  ;;  %v5195_v24 = vor.u32 1.1754944e-38, %v5194_v45 }
0x259c   :  { %v5038_v34 = vpop.xlane.xlu0 %5037 }
0x259d   :  { %7962 = vrcp.f32 %v5038_v34  ;;  %v5119_v11 = vand.u32 2147483648, %v5038_v34  ;;  %v5117_v10 = vand.u32 2147483647, %v5038_v34  ;;  %vm5113_vm8 = vweird.f32 %v5038_v34 }
0x259e   :  { %v7961_v9 = vpop.eup %7960 }
0x259f   :  { %v5184_v52 = vmul.f32 %v7961_v9, %v5053_v13  ;;  %v10420_v2 = vpop.xlane.xlu2 %5043  ;;  %vm5189_vm3 = vweird.f32 %v7961_v9  ;;  %v5120_v18 = vor.u32 1.1754944e-38, %v5119_v11  ;;  %vm5118_vm11 = vcmp.eq.f32.partialorder %v5117_v10, 8.507059e+37 }
0x25a0   :  { %vm5190_vm5 = vmor %vm5188_vm4, %vm5189_vm3 }
0x25a1   :  { %v5185_v54 = vsub.f32 1.0, %v5184_v52 }
0x25a3   :  { %v7963_v22 = vpop.eup %7962  ;;  %v5186_v5 = vmul.f32 %v7961_v9, %v5185_v54 }
0x25a4   :  { %v5109_v41 = vmul.f32 %v7963_v22, %v5038_v34  ;;  %v5056_v38 = vpop.xlane.xlu0 %5055  ;;  %vm5114_vm7 = vweird.f32 %v7963_v22 }
0x25a5   :  { %v5187_v58 = vadd.f32 %v7961_v9, %v5186_v5  ;;  %7964 = vrcp.f32 %v5056_v38  ;;  %vm5115_vm9 = vmor %vm5113_vm8, %vm5114_vm7  ;;  %v5209_v62 = vand.u32 2147483648, %v5056_v38  ;;  %v5207_v15 = vand.u32 2147483647, %v5056_v38 }
0x25a6   :  { %v5110_v48 = vsub.f32 1.0, %v5109_v41  ;;  %vm5203_vm13 = vweird.f32 %v5056_v38 }
0x25a7   :  { %v10422_v16 = vpop.xlane.xlu2 %5061  ;;  %v5191_v42 = vsel %vm5190_vm5, %v7961_v9, %v5187_v58  ;;  %v5210_v30 = vor.u32 1.1754944e-38, %v5209_v62  ;;  %vm5208_vm15 = vcmp.eq.f32.partialorder %v5207_v15, 8.507059e+37  ;;  %v7151_v15 = vld [vmem:[%s11076_s6 + $0x2d0] sm:$0xff] }
0x25a8   :  { %v5111_v21 = vmul.f32 %v7963_v22, %v5110_v48  ;;  %7966 = vrcp.f32 %v10422_v16  ;;  %v5196_v50 = vsel %vm5193_vm6, %v5195_v24, %v5191_v42  ;;  %vm5233_vm4 = vweird.f32 %v10422_v16 }
0x25a9   :  { %v5197_v40 = vmul.f32 %v10365_v1, %v5196_v50  ;;  %7968 = vrcp.f32 %v10420_v2 }
0x25aa   :  { %v5112_v6 = vadd.f32 %v7963_v22, %v5111_v21 }
0x25ab   :  { %v7965_v31 = vpop.eup %7964  ;;  %7208 = vmatmul.msk.f32.gmra.mxu3 %vm846_vm2, %v5197_v40 }
0x25ac   :  { %v5199_v19 = vmul.f32 %v7965_v31, %v5056_v38  ;;  %v5059_v17 = vpop.xlane.xlu0 %5058  ;;  %v5116_v3 = vsel %vm5115_vm9, %v7963_v22, %v5112_v6  ;;  %vm5204_vm12 = vweird.f32 %v7965_v31  ;;  %v5237_v22 = vand.u32 2147483647, %v10422_v16 }
0x25ad   :  { %7970 = vrcp.f32 %v5059_v17  ;;  %v5121_v51 = vsel %vm5118_vm11, %v5120_v18, %v5116_v3  ;;  %vm5205_vm14 = vmor %vm5203_vm13, %vm5204_vm12  ;;  %v5224_v59 = vand.u32 2147483648, %v5059_v17  ;;  %v5222_v13 = vand.u32 2147483647, %v5059_v17 }
0x25ae   :  { %v10428_v60 = vpop.eup %7966  ;;  %v5200_v63 = vsub.f32 1.0, %v5199_v19  ;;  %v5122_v43 = vmul.f32 %v10370_v4, %v5121_v51  ;;  %vm5218_vm3 = vweird.f32 %v5059_v17  ;;  %v5239_v38 = vand.u32 2147483648, %v10422_v16 }
0x25af   :  { %v5229_v0 = vmul.f32 %v10428_v60, %v10422_v16  ;;  %v10434_v35 = vpop.eup %7968  ;;  %vm5234_vm5 = vweird.f32 %v10428_v60  ;;  %vm5223_vm7 = vcmp.eq.f32.partialorder %v5222_v13, 8.507059e+37 }
0x25b0   :  { %v5201_v1 = vmul.f32 %v7965_v31, %v5200_v63  ;;  %7203 = vmatmul.msk.f32.gmra.mxu2 %vm846_vm2, %v5122_v43  ;;  %v5139_v36 = vmul.f32 %v10434_v35, %v10420_v2  ;;  %vm10452_vm9 = vmor %vm5233_vm4, %vm5234_vm5  ;;  %vm5144_vm12 = vweird.f32 %v10434_v35  ;;  %v5240_v6 = vor.u32 1.1754944e-38, %v5239_v38 }
0x25b1   :  { %v5230_v12 = vsub.f32 1.0, %v5229_v0 }
0x25b2   :  { %v5202_v26 = vadd.f32 %v7965_v31, %v5201_v1  ;;  %v5041_v37 = vpop.xlane.xlu1 %5040  ;;  %v5140_v9 = vsub.f32 1.0, %v5139_v36  ;;  %v7152_v1 = vld [vmem:[%s11076_s6 + $0x2d8] sm:$0xff] }
0x25b3   :  { %v7971_v14 = vpop.eup %7970  ;;  %7972 = vrcp.f32 %v5041_v37  ;;  %v5231_v57 = vmul.f32 %v10428_v60, %v5230_v12  ;;  %v5134_v58 = vand.u32 2147483648, %v5041_v37  ;;  %v5132_v42 = vand.u32 2147483647, %v5041_v37  ;;  %5495 = vmatpush.msra.mxu2 %v7152_v1 }
0x25b4   :  { %v5214_v4 = vmul.f32 %v7971_v14, %v5059_v17  ;;  %v5206_v53 = vsel %vm5205_vm14, %v7965_v31, %v5202_v26  ;;  %vm5219_vm1 = vweird.f32 %v7971_v14  ;;  %v5141_v41 = vmul.f32 %v10434_v35, %v5140_v9 }
0x25b5   :  { %v5211_v33 = vsel %vm5208_vm15, %v5210_v30, %v5206_v53  ;;  %vm5220_vm6 = vmor %vm5218_vm3, %vm5219_vm1  ;;  %v5232_v5 = vadd.f32 %v10428_v60, %v5231_v57  ;;  %vm5128_vm11 = vweird.f32 %v5041_v37  ;;  %vm5238_vm14 = vcmp.eq.f32.partialorder %v5237_v22, 8.507059e+37 }
0x25b6   :  { %v5215_v7 = vsub.f32 1.0, %v5214_v4  ;;  %v5212_v47 = vmul.f32 %v10379_v27, %v5211_v33  ;;  %v5225_v27 = vor.u32 1.1754944e-38, %v5224_v59  ;;  %v5142_v40 = vadd.f32 %v10434_v35, %v5141_v41 }
0x25b7   :  { %v5236_v50 = vsel %vm10452_vm9, %v10428_v60, %v5232_v5  ;;  %vm5133_vm15 = vcmp.eq.f32.partialorder %v5132_v42, 8.507059e+37  ;;  %v5149_v31 = vand.u32 2147483648, %v10420_v2  ;;  %vm5143_vm1 = vweird.f32 %v10420_v2  ;;  %v10505_v5 = vld [vmem:[%s11077_s7 + $0x10] sm:$0x7] }
0x25b8   :  { %v5216_v39 = vmul.f32 %v7971_v14, %v5215_v7  ;;  %7209 = vmatmul.msk.f32.gmra.mxu3 %vm846_vm2, %v5212_v47  ;;  %v5241_v19 = vsel %vm5238_vm14, %v5240_v6, %v5236_v50  ;;  %v5147_v17 = vand.u32 2147483647, %v10420_v2  ;;  %vm5145_vm3 = vmor %vm5143_vm1, %vm5144_vm12 }
0x25b9   :  { %v7973_v34 = vpop.eup %7972  ;;  %v5242_v60 = vmul.f32 %v10382_v61, %v5241_v19  ;;  %v5146_v63 = vsel %vm5145_vm3, %v10434_v35, %v5142_v40  ;;  %v5150_v51 = vor.u32 1.1754944e-38, %v5149_v31  ;;  %v7150_v61 = vld [vmem:[%s11076_s6 + $0x2c8] sm:$0xff] }
0x25ba   :  { %v5217_v52 = vadd.f32 %v7971_v14, %v5216_v39  ;;  %v5124_v54 = vmul.f32 %v7973_v34, %v5041_v37  ;;  %vm5129_vm8 = vweird.f32 %v7973_v34  ;;  %vm5148_vm4 = vcmp.eq.f32.partialorder %v5147_v17, 8.507059e+37  ;;  %5406 = vmatpush.msra.mxu1 %v7150_v61  ;;  %v7154_v37 = vld [vmem:[%s11076_s6 + $0x2e8] sm:$0xff]  ;;  %v7147_v61 = vld [vmem:[%s11075_s5 + $0x90] sm:$0xff] }
0x25bb   :  { %vm5130_vm13 = vmor %vm5128_vm11, %vm5129_vm8  ;;  %v5151_v62 = vsel %vm5148_vm4, %v5150_v51, %v5146_v63 }
0x25bc   :  { %v5125_v32 = vsub.f32 1.0, %v5124_v54  ;;  %v5221_v45 = vsel %vm5220_vm6, %v7971_v14, %v5217_v52  ;;  %v5152_v43 = vmul.f32 %v10373_v56, %v5151_v62  ;;  %v7153_v56 = vld [vmem:[%s11076_s6 + $0x2e0] sm:$0xff]  ;;  %5464 = vmatpush.msrb.mxu1 %v7151_v15 }
0x25bd   :  { %v5226_v48 = vsel %vm5223_vm7, %v5225_v27, %v5221_v45  ;;  %5526 = vmatpush.msra.mxu3 %v7153_v56 }
0x25be   :  { %v5126_v24 = vmul.f32 %v7973_v34, %v5125_v32  ;;  %v5227_v21 = vmul.f32 %v10388_v55, %v5226_v48  ;;  %v5135_v55 = vor.u32 1.1754944e-38, %v5134_v58  ;;  %v5567_v32 = vperm.slane %v10505_v5, 1 }
0x25c0   :  { %v5127_v10 = vadd.f32 %v7973_v34, %v5126_v24  ;;  %7210 = vmatmul.msk.f32.gmra.mxu3 %vm846_vm2, %v5227_v21 }
0x25c2   :  { %v5131_v16 = vsel %vm5130_vm13, %v7973_v34, %v5127_v10 }
0x25c3   :  { %v5136_v18 = vsel %vm5133_vm15, %v5135_v55, %v5131_v16 }
0x25c4   :  { %v5137_v3 = vmul.f32 %v10392_v25, %v5136_v18  ;;  %v7149_v25 = vld [vmem:[%s11076_s6 + $0x2c0] sm:$0xff] }
0x25c5   :  { %5435 = vmatpush.msra.mxu0 %v7149_v25  ;;  %v7148_v25 = vld [vmem:[%s11075_s5 + $0x98] sm:$0xff] }
0x25c6   :  { %7204 = vmatmul.msk.f32.gmra.mxu2 %vm846_vm2, %v5137_v3 }
0x25c7   :  { %5557 = vmatpush.msrb.mxu0 %v7154_v37 }
0x25c8   :  { %7211 = vmatmul.msk.f32.gmra.mxu3 %vm846_vm2, %v5242_v60 }
0x25ce   :  { %7205 = vmatmul.msk.f32.gmra.mxu2 %vm846_vm2, %v5152_v43 }
0x25f8   :  { %v5296_v2 = vpop.f32.mrf.mxu2 }
0x25f9   :  { %7214 = vmatmul.msk.f32.vlgmr.msra.gmra.mxu0 %vm43_vm0, %v5296_v2  ;;  %v7146_v2 = vld [vmem:[%s11075_s5 + $0x88] sm:$0xff] }
0x2600   :  { %v5299_v0 = vpop.f32.mrf.mxu2 }
0x2601   :  { %7212 = vmatmul.msk.f32.vlgmr.msra.gmra.mxu1 %vm43_vm0, %v5299_v0  ;;  %v7170_v0 = vld [vmem:[%s11076_s6 + $0x368] sm:$0xff] }
0x2602   :  { %5645 = vmatpush.msra.mxu1 %v7148_v25  ;;  %5662 = vmatpush.msrb.mxu2 %v7170_v0  ;;  %v7256_v0 = vld [vmem:[%s11077_s7 + $0x14] sm:$0x7] }
0x2604   :  { %5646 = vmatpush.msra.mxu1 %v7147_v61 }
0x2606   :  { %5647 = vmatpush.msra.mxu1 %v7146_v2 }
0x2608   :  { %v5302_v14 = vpop.f32.mrf.mxu2 }
0x2610   :  { %v5367_v35 = vpop.f32.mrf.mxu3 }
0x2611   :  { %7215 = vmatmul.msk.f32.gmra.mxu0 %vm43_vm0, %v5367_v35  ;;  %v7169_v35 = vld [vmem:[%s11076_s6 + $0x360] sm:$0xff] }
0x2612   :  { %5663 = vmatpush.msrb.mxu2 %v7169_v35  ;;  %v10606_v35 = vperm.slane %v7256_v0, 0 }
0x2618   :  { %v5370_v26 = vpop.f32.mrf.mxu3 }
0x2619   :  { %7213 = vmatmul.msk.f32.gmra.mxu1 %vm43_vm0, %v5370_v26  ;;  %v7168_v26 = vld [vmem:[%s11076_s6 + $0x358] sm:$0xff] }
0x261a   :  { %5664 = vmatpush.msrb.mxu2 %v7168_v26 }
0x2621   :  { %7216 = vmatmul.msk.f32.vlgmr.msrb.gmra.mxu1 %vm43_vm0, %v5302_v14 }
0x262e   :  { %v5373_v30 = vpop.f32.mrf.mxu3 }
0x262f   :  { %7217 = vmatmul.msk.f32.gmra.mxu1 %vm43_vm0, %v5373_v30  ;;  %v7167_v30 = vld [vmem:[%s11076_s6 + $0x350] sm:$0xff] }
0x2630   :  { %5665 = vmatpush.msrb.mxu2 %v7167_v30 }
0x2633   :  { %v5305_v12 = vpop.f32.mrf.mxu2 }
0x2634   :  { %7218 = vmatmul.msk.f32.vlgmr.msra.gmra.mxu2 %vm43_vm0, %v5305_v12 }
0x263b   :  { %v5376_v4 = vpop.f32.mrf.mxu3 }
0x263c   :  { %7219 = vmatmul.msk.f32.gmra.mxu2 %vm43_vm0, %v5376_v4 }
0x2643   :  { %v5379_v36 = vpop.f32.mrf.mxu3 }
0x2649   :  { %v5308_v53 = vpop.f32.mrf.mxu2 }
0x264a   :  { %7220 = vmatmul.msk.f32.vlgmr.msra.gmra.mxu3 %vm43_vm0, %v5308_v53  ;;  %v7166_v53 = vld [vmem:[%s11076_s6 + $0x348] sm:$0xff] }
0x264b   :  { %v5382_v7 = vpop.f32.mrf.mxu3  ;;  %5666 = vmatpush.msrb.mxu2 %v7166_v53 }
0x2651   :  { %v5311_v33 = vpop.f32.mrf.mxu2 }
0x2652   :  { %7221 = vmatmul.msk.f32.gmra.mxu3 %vm43_vm0, %v5379_v36  ;;  %7222 = vmatmul.msk.f32.vlgmr.msrb.gmra.mxu0 %vm43_vm0, %v5311_v33  ;;  %v7165_v33 = vld [vmem:[%s11076_s6 + $0x340] sm:$0xff] }
0x2653   :  { %5667 = vmatpush.msrb.mxu2 %v7165_v33  ;;  %v7229_v33 = vld [vmem:[%s11074_s4 + $0xb8] sm:$0xff] }
0x2654   :  { %5803 = vmatpush.msrb.mxu3 %v7229_v33 }
0x265a   :  { %7223 = vmatmul.msk.f32.gmra.mxu0 %vm43_vm0, %v5382_v7 }
0x2676   :  { %v5437_v57 = vpop.f32.mrf.mxu0 }
0x267e   :  { %v5408_v47 = vpop.f32.mrf.mxu1 }
0x267f   :  { %v5438_v9 = vadd.f32 %v5437_v57, %v5408_v47  ;;  %v7164_v47 = vld [vmem:[%s11076_s6 + $0x338] sm:$0xff]  ;;  %v7163_v57 = vld [vmem:[%s11076_s6 + $0x330] sm:$0xff] }
0x2680   :  { %5668 = vmatpush.msrb.mxu2 %v7164_v47  ;;  %v7227_v47 = vld [vmem:[%s11074_s4 + $0xa8] sm:$0xff] }
0x2682   :  { %5669 = vmatpush.msrb.mxu2 %v7163_v57 }
0x268e   :  { %v5440_v39 = vpop.f32.mrf.mxu0 }
0x2696   :  { %v5411_v59 = vpop.f32.mrf.mxu1 }
0x2697   :  { %v5441_v38 = vadd.f32 %v5440_v39, %v5411_v59 }
0x269e   :  { %v5466_v13 = vpop.f32.mrf.mxu1 }
0x269f   :  { %v5472_v52 = vadd.f32 %v5466_v13, %v5438_v9 }
0x26ac   :  { %v5469_v45 = vpop.f32.mrf.mxu1 }
0x26ad   :  { %v5473_v24 = vadd.f32 %v5469_v45, %v5441_v38 }
0x26b7   :  { %v5497_v34 = vpop.f32.mrf.mxu2 }
0x26b8   :  { %v5503_v54 = vadd.f32 %v5497_v34, %v5472_v52  ;;  %v7162_v34 = vld [vmem:[%s11076_s6 + $0x328] sm:$0xff] }
0x26b9   :  { %5670 = vmatpush.msrb.mxu2 %v7162_v34 }
0x26bf   :  { %v5500_v48 = vpop.f32.mrf.mxu2 }
0x26c0   :  { %v5504_v21 = vadd.f32 %v5500_v48, %v5473_v24  ;;  %v7159_v24 = vld [vmem:[%s11076_s6 + $0x310] sm:$0xff] }
0x26cd   :  { %v5528_v22 = vpop.f32.mrf.mxu3 }
0x26ce   :  { %v5534_v27 = vadd.f32 %v5528_v22, %v5503_v54  ;;  %v7161_v54 = vld [vmem:[%s11076_s6 + $0x320] sm:$0xff] }
0x26cf   :  { %v5559_v41 = vpop.f32.mrf.mxu0  ;;  %5671 = vmatpush.msrb.mxu2 %v7161_v54 }
0x26d0   :  { %v5565_v58 = vadd.f32 %v5559_v41, %v5534_v27  ;;  %v7160_v41 = vld [vmem:[%s11076_s6 + $0x318] sm:$0xff] }
0x26d1   :  { %5672 = vmatpush.msrb.mxu2 %v7160_v41 }
0x26d2   :  { %v5568_v42 = vadd.f32 %v5567_v32, %v5565_v58 }
0x26d3   :  { %5673 = vmatpush.msrb.mxu2 %v7159_v24 }
0x26d4   :  { %v10509_v11 = vadd.f32 %v5568_v42, %v9695_v46 }
0x26d5   :  { %v5531_v10 = vpop.f32.mrf.mxu3 }
0x26d6   :  { %v5535_v50 = vadd.f32 %v5531_v10, %v5504_v21  ;;  %v5572_v6 = vsel %vm121_vm10, %v10509_v11, 0.0  ;;  %v7158_v10 = vld [vmem:[%s11076_s6 + $0x308] sm:$0xff] }
0x26d7   :  { %v5562_v55 = vpop.f32.mrf.mxu0  ;;  %5573 = vadd.xlane.f32.xlu0 %v5572_v6  ;;  %5674 = vmatpush.msrb.mxu2 %v7158_v10 }
0x26d8   :  { %v5566_v40 = vadd.f32 %v5562_v55, %v5535_v50 }
0x26da   :  { %v5569_v16 = vadd.f32 %v5567_v32, %v5566_v40 }
0x26dc   :  { %v10514_v31 = vadd.f32 %v5569_v16, %v9700_v28 }
0x26de   :  { %v5575_v18 = vsel %vm121_vm10, %v10514_v31, 0.0 }
0x26df   :  { %5576 = vadd.xlane.f32.xlu2 %v5575_v18  ;;  %v7157_v18 = vld [vmem:[%s11076_s6 + $0x300] sm:$0xff] }
0x26e0   :  { %5675 = vmatpush.msrb.mxu2 %v7157_v18 }
0x26f7   :  { %5616 = vrot.lane.b32.xlu2 %v10167_v23, %s8110_s27 }
0x274a   :  { %v5574_v46 = vpop.xlane.xlu0 %5573 }
0x274b   :  { %v5578_v19 = vmul.f32 %v5574_v46, %v8266_v8  ;;  %v7156_v46 = vld [vmem:[%s11076_s6 + $0x2f8] sm:$0xff] }
0x274c   :  { %5676 = vmatpush.msrb.mxu2 %v7156_v46 }
0x274d   :  { %v5580_v17 = vsub.f32 %v10509_v11, %v5578_v19  ;;  %v7155_v19 = vld [vmem:[%s11076_s6 + $0x2f0] sm:$0xff] }
0x274e   :  { %5677 = vmatpush.msrb.mxu2 %v7155_v19 }
0x274f   :  { %v5582_v3 = vmul.f32 %v5580_v17, %v5580_v17 }
0x2751   :  { %v5584_v60 = vsel %vm121_vm10, %v5582_v3, 0.0 }
0x2752   :  { %5585 = vadd.xlane.f32.xlu1 %v5584_v60  ;;  %v5577_v63 = vpop.xlane.xlu2 %5576 }
0x2753   :  { %v5579_v28 = vmul.f32 %v5577_v63, %v8266_v8 }
0x2755   :  { %v10525_v51 = vsub.f32 %v10514_v31, %v5579_v28 }
0x2757   :  { %v5583_v62 = vmul.f32 %v10525_v51, %v10525_v51 }
0x2759   :  { %v5587_v43 = vsel %vm121_vm10, %v5583_v62, 0.0 }
0x275a   :  { %5588 = vadd.xlane.f32.xlu0 %v5587_v43 }
0x276b   :  { %5621 = vrot.lane.b32.xlu1 %v10167_v23, %s8111_s28  ;;  %v7145_v23 = vld [vmem:[%s11075_s5 + $0x80] sm:$0xff] }
0x276c   :  { %5648 = vmatpush.msra.mxu1 %v7145_v23 }
0x276e   :  { %5659 = vrot.lane.b32.xlu0 %v5567_v32, %s8104_s26  ;;  %v5617_v32 = vpop.permute.xlu2 %5616 }
0x27c5   :  { %v5586_v1 = vpop.xlane.xlu1 %5585 }
0x27c6   :  { %v5590_v56 = vmul.f32 %v5586_v1, %v8266_v8 }
0x27c8   :  { %v5592_v15 = vadd.f32 1e-05, %v5590_v56 }
0x27ca   :  { %7974 = vrsqrt.f32 %v5592_v15  ;;  %vm5600_vm6 = vweird.f32 %v5592_v15 }
0x27cd   :  { %v5589_v37 = vpop.xlane.xlu0 %5588 }
0x27ce   :  { %v5591_v14 = vmul.f32 %v5589_v37, %v8266_v8 }
0x27d0   :  { %v7975_v12 = vpop.eup %7974  ;;  %v5593_v4 = vadd.f32 1e-05, %v5591_v14 }
0x27d1   :  { %v5595_v36 = vmul.f32 %v7975_v12, %v5592_v15  ;;  %vm5601_vm5 = vweird.f32 %v7975_v12 }
0x27d2   :  { %7976 = vrsqrt.f32 %v5593_v4  ;;  %vm5602_vm7 = vmor %vm5600_vm6, %vm5601_vm5  ;;  %vm5610_vm9 = vweird.f32 %v5593_v4 }
0x27d3   :  { %v5596_v7 = vmul.f32 %v7975_v12, %v5595_v36 }
0x27d5   :  { %v5597_v59 = vmul.f32 0.5, %v5596_v7  ;;  %v7228_v7 = vld [vmem:[%s11074_s4 + $0xb0] sm:$0xff] }
0x27d6   :  { %5804 = vmatpush.msrb.mxu3 %v7228_v7 }
0x27d7   :  { %v5598_v39 = vsub.f32 1.5, %v5597_v59  ;;  %v7226_v59 = vld [vmem:[%s11074_s4 + $0xa0] sm:$0xff]  ;;  %s8113_s4 = smov 128  }
0x27d8   :  { %v7977_v13 = vpop.eup %7976  ;;  %5805 = vmatpush.msrb.mxu3 %v7227_v47 }
0x27d9   :  { %v5605_v9 = vmul.f32 %v7977_v13, %v5593_v4  ;;  %v5599_v52 = vmul.f32 %v7975_v12, %v5598_v39  ;;  %vm5611_vm8 = vweird.f32 %v7977_v13 }
0x27da   :  { %vm5612_vm11 = vmor %vm5610_vm9, %vm5611_vm8  ;;  %5806 = vmatpush.msrb.mxu3 %v7226_v59 }
0x27db   :  { %v5606_v22 = vmul.f32 %v7977_v13, %v5605_v9  ;;  %v5603_v27 = vsel %vm5602_vm7, %v7975_v12, %v5599_v52 }
0x27dc   :  { %v5614_v45 = vmul.f32 %v5603_v27, %v5580_v17  ;;  %v5626_v17 = vperm.slane %v10505_v5, 2 }
0x27dd   :  { %v5607_v38 = vmul.f32 0.5, %v5606_v22  ;;  %v5622_v58 = vpop.permute.xlu1 %5621 }
0x27de   :  { %v5619_v48 = vmul.f32 %v5617_v32, %v5614_v45 }
0x27df   :  { %v5608_v42 = vsub.f32 1.5, %v5607_v38 }
0x27e0   :  { %v5624_v21 = vadd.f32 %v5622_v58, %v5619_v48  ;;  %v5660_v43 = vpop.permute.xlu0 %5659 }
0x27e1   :  { %v5609_v50 = vmul.f32 %v7977_v13, %v5608_v42 }
0x27e2   :  { %7224 = vmatmul.msk.f32.vlgmr.msra.gmra.mxu1 %vm121_vm10, %v5624_v21 }
0x27e3   :  { %v5613_v6 = vsel %vm5612_vm11, %v7977_v13, %v5609_v50 }
0x27e4   :  { %v5615_v55 = vmul.f32 %v5613_v6, %v10525_v51 }
0x27e6   :  { %v5620_v40 = vmul.f32 %v5617_v32, %v5615_v55 }
0x27e8   :  { %v5625_v16 = vadd.f32 %v5622_v58, %v5620_v40 }
0x27ea   :  { %7225 = vmatmul.msk.f32.gmra.mxu1 %vm121_vm10, %v5625_v16 }
0x285f   :  { %v5650_v3 = vpop.f32.mrf.mxu1 }
0x2860   :  { %v5651_v60 = vadd.f32 %v5650_v3, %v5626_v17 }
0x2862   :  { %v5656_v63 = vmax.f32 %v5651_v60, 0.0  ;;  %v5770_v60 = vmul.f32 %v10606_v35, %v10190_v20 }
0x2864   :  { %5678 = vmatmul.f32.vlgmr.msrb.gmra.mxu2 %v5656_v63 }
0x2867   :  { %v5653_v28 = vpop.f32.mrf.mxu1 }
0x2868   :  { %v5654_v51 = vadd.f32 %v5653_v28, %v5626_v17  ;;  %v5769_v17 = vmul.f32 %v10606_v35, %v10185_v44 }
0x286a   :  { %v5657_v62 = vmax.f32 %v5654_v51, 0.0 }
0x286c   :  { %5681 = vmatmul.f32.gmra.mxu2 %v5657_v62 }
0x28e7   :  { %v5679_v25 = vpop.f32.mrf.mxu2 }
0x28e8   :  { %v5680_v61 = vadd.f32 %v5679_v25, %v5660_v43 }
0x28ea   :  { %v5685_v2 = vadd.f32 %v5680_v61, %v10509_v11 }
0x28ec   :  { %v5722_v23 = vsel %vm121_vm10, %v5685_v2, 0.0 }
0x28ed   :  { %5723 = vadd.xlane.f32.xlu2 %v5722_v23 }
0x28ef   :  { %v5682_v1 = vpop.f32.mrf.mxu2 }
0x28f0   :  { %v5683_v56 = vadd.f32 %v5682_v1, %v5660_v43 }
0x28f2   :  { %v5686_v5 = vadd.f32 %v5683_v56, %v10514_v31 }
0x28f4   :  { %v5725_v15 = vsel %vm121_vm10, %v5686_v5, 0.0 }
0x28f5   :  { %5726 = vadd.xlane.f32.xlu0 %v5725_v15 }
0x2909   :  { %5772 = vrot.lane.b32.xlu0 %v10606_v35, %s8104_s26 }
0x2960   :  { %v5724_v11 = vpop.xlane.xlu2 %5723 }
0x2961   :  { %v5728_v26 = vmul.f32 %v5724_v11, %v8266_v8 }
0x2963   :  { %v5730_v37 = vsub.f32 %v5685_v2, %v5728_v26 }
0x2965   :  { %v5732_v14 = vmul.f32 %v5730_v37, %v5730_v37 }
0x2967   :  { %v5734_v30 = vsel %vm121_vm10, %v5732_v14, 0.0 }
0x2968   :  { %v5727_v31 = vpop.xlane.xlu0 %5726  ;;  %5735 = vadd.xlane.f32.xlu1 %v5734_v30 }
0x2969   :  { %v5729_v12 = vmul.f32 %v5727_v31, %v8266_v8 }
0x296b   :  { %v5731_v4 = vsub.f32 %v5686_v5, %v5729_v12 }
0x296d   :  { %v5733_v53 = vmul.f32 %v5731_v4, %v5731_v4 }
0x296f   :  { %v5737_v36 = vsel %vm121_vm10, %v5733_v53, 0.0 }
0x2970   :  { %5738 = vadd.xlane.f32.xlu2 %v5737_v36 }
0x297b   :  { %v5773_v50 = vpop.permute.xlu0 %5772 }
0x297c   :  { %v5777_v3 = vadd.f32 %v5773_v50, %v5769_v17  ;;  %v5778_v63 = vadd.f32 %v5773_v50, %v5770_v60  ;;  %v8072_v60 = vld [vmem:[%s11072_s2 + $0x18] sm:$0xff] }
0x29db   :  { %v5736_v57 = vpop.xlane.xlu1 %5735 }
0x29dc   :  { %v5740_v39 = vmul.f32 %v5736_v57, %v8266_v8 }
0x29de   :  { %v5742_v13 = vadd.f32 1e-05, %v5740_v39 }
0x29e0   :  { %7978 = vrsqrt.f32 %v5742_v13  ;;  %vm5750_vm13 = vweird.f32 %v5742_v13 }
0x29e3   :  { %v5739_v34 = vpop.xlane.xlu2 %5738 }
0x29e4   :  { %v5741_v9 = vmul.f32 %v5739_v34, %v8266_v8 }
0x29e6   :  { %v7979_v52 = vpop.eup %7978  ;;  %v5743_v54 = vadd.f32 1e-05, %v5741_v9 }
0x29e7   :  { %v5745_v22 = vmul.f32 %v7979_v52, %v5742_v13  ;;  %vm5751_vm12 = vweird.f32 %v7979_v52  ;;  %v8069_v13 = vld [vmem:[%s11072_s2] sm:$0xff] }
0x29e8   :  { %7980 = vrsqrt.f32 %v5743_v54  ;;  %vm5752_vm14 = vmor %vm5750_vm13, %vm5751_vm12  ;;  %vm5760_vm1 = vweird.f32 %v5743_v54 }
0x29e9   :  { %v5746_v27 = vmul.f32 %v7979_v52, %v5745_v22 }
0x29eb   :  { %v5747_v32 = vmul.f32 0.5, %v5746_v27 }
0x29ed   :  { %v5748_v45 = vsub.f32 1.5, %v5747_v32 }
0x29ee   :  { %v7981_v41 = vpop.eup %7980 }
0x29ef   :  { %v5749_v38 = vmul.f32 %v7979_v52, %v5748_v45  ;;  %v5755_v58 = vmul.f32 %v7981_v41, %v5743_v54  ;;  %vm5761_vm15 = vweird.f32 %v7981_v41 }
0x29f0   :  { %vm5762_vm3 = vmor %vm5760_vm1, %vm5761_vm15 }
0x29f1   :  { %v5753_v48 = vsel %vm5752_vm14, %v7979_v52, %v5749_v38  ;;  %v5756_v24 = vmul.f32 %v7981_v41, %v5755_v58  ;;  %v8070_v58 = vld [vmem:[%s11072_s2 + $0x8] sm:$0xff] }
0x29f2   :  { %v5764_v42 = vmul.f32 %v5753_v48, %v5730_v37 }
0x29f3   :  { %v5757_v21 = vmul.f32 0.5, %v5756_v24 }
0x29f4   :  { %v5767_v10 = vmul.f32 %v10606_v35, %v5764_v42 }
0x29f5   :  { %v5758_v6 = vsub.f32 1.5, %v5757_v21 }
0x29f6   :  { %v5775_v55 = vadd.f32 %v5773_v50, %v5767_v10 }
0x29f7   :  { %v5759_v40 = vmul.f32 %v7981_v41, %v5758_v6 }
0x29f8   :  { %7257 = vmatmul.msk.f32.vlgmr.msrb.gmra.mxu3 %vm121_vm10, %v5775_v55 }
0x29f9   :  { %v5763_v16 = vsel %vm5762_vm3, %v7981_v41, %v5759_v40  ;;  %v8071_v40 = vld [vmem:[%s11072_s2 + $0x10] sm:$0xff] }
0x29fa   :  { %v5765_v18 = vmul.f32 %v5763_v16, %v5731_v4 }
0x29fc   :  { %v5768_v46 = vmul.f32 %v10606_v35, %v5765_v18 }
0x29fe   :  { %v5776_v19 = vadd.f32 %v5773_v50, %v5768_v46 }
0x2a00   :  { %7258 = vmatmul.msk.f32.gmra.mxu3 %vm121_vm10, %v5776_v19 }
0x2a08   :  { %7259 = vmatmul.msk.f32.gmra.mxu3 %vm121_vm10, %v5777_v3 }
0x2a10   :  { %7260 = vmatmul.msk.f32.gmra.mxu3 %vm121_vm10, %v5778_v63 }
0x2a7b   :  { %v10638_v28 = vpop.f32.mrf.mxu3 }
0x2a83   :  { %v10640_v51 = vpop.f32.mrf.mxu3 }
0x2a84   :  { %v7601_v20 = vpack.i.bf16 %v10640_v51, %v10638_v28 }
0x2a8b   :  { %v5814_v62 = vpop.f32.mrf.mxu3 }
0x2a8c   :  { %5830 = vrot.lane.b32.xlu0 %v5814_v62, %s8105_s13  ;;  %5834 = vrot.lane.b32.xlu2 %v5814_v62, %s8104_s26 }
0x2a8d   :  { %5838 = vrot.lane.b32.xlu1 %v5814_v62, %s8106_s14 }
0x2a93   :  { %v5817_v44 = vpop.f32.mrf.mxu3 }
0x2a94   :  { %5826 = vrot.lane.b32.xlu2 %v5814_v62, %s8107_s1  ;;  %5840 = vrot.lane.b32.xlu0 %v5817_v44, %s8106_s14 }
0x2a95   :  { %5836 = vrot.lane.b32.xlu1 %v5817_v44, %s8104_s26 }
0x2a9c   :  { %5832 = vrot.lane.b32.xlu2 %v5817_v44, %s8105_s13  ;;  %5822 = vrot.lane.b32.xlu0 %v5814_v62, %s8108_s15 }
0x2a9d   :  { %5828 = vrot.lane.b32.xlu1 %v5817_v44, %s8107_s1 }
0x2aa4   :  { %7602 = vrot.lane.b32.xlu2 %v7601_v20, %s8106_s14  ;;  %5824 = vrot.lane.b32.xlu0 %v5817_v44, %s8108_s15 }
0x2aa5   :  { %7612 = vrot.lane.b32.xlu1 %v7601_v20, %s8105_s13  ;;  %s8114_s13 = smov 8  }
0x2aac   :  { %7622 = vrot.lane.b32.xlu2 %v7601_v20, %s8108_s15  ;;  %7607 = vrot.lane.b32.xlu0 %v7601_v20, %s8104_s26 }
0x2ab4   :  { %7617 = vrot.lane.b32.xlu0 %v7601_v20, %s8107_s1 }
0x2ae6   :  { %v5835_v43 = vpop.permute.xlu2 %5834 }
0x2aee   :  { %v5827_v2 = vpop.permute.xlu2 %5826 }
0x2af6   :  { %v5833_v56 = vpop.permute.xlu2 %5832 }
0x2afe   :  { %v5831_v25 = vpop.permute.xlu0 %5830  ;;  %v10672_v11 = vpop.permute.xlu2 %7602 }
0x2aff   :  { %v5839_v61 = vpop.permute.xlu1 %5838  ;;  %v7604_v37 = vunpack.i.l.bf16 %v10672_v11 }
0x2b00   :  { %7261 = vmatpush.xpose.msk.msra.mxu0 %vm43_vm0, %v5839_v61 }
0x2b04   :  { %7262 = vmatpush.xpose.msk.msra.mxu0 %vm43_vm0, %v5835_v43 }
0x2b06   :  { %v5841_v23 = vpop.permute.xlu0 %5840  ;;  %v10697_v33 = vpop.permute.xlu2 %7622 }
0x2b07   :  { %7273 = vmatpush.xpose.msk.msrb.mxu1 %vm43_vm0, %v5841_v23  ;;  %v5837_v1 = vpop.permute.xlu1 %5836 }
0x2b08   :  { %7263 = vmatpush.xpose.msk.msra.mxu0 %vm43_vm0, %v5831_v25 }
0x2b0b   :  { %7274 = vmatpush.xpose.msk.msrb.mxu1 %vm43_vm0, %v5837_v1 }
0x2b0c   :  { %7264 = vmatpush.xpose.msk.msra.mxu0 %vm43_vm0, %v5827_v2 }
0x2b0e   :  { %v5823_v5 = vpop.permute.xlu0 %5822 }
0x2b0f   :  { %7275 = vmatpush.xpose.msk.msrb.mxu1 %vm43_vm0, %v5833_v56  ;;  %v5829_v15 = vpop.permute.xlu1 %5828 }
0x2b10   :  { %7265 = vmatpush.xpose.msk.msra.mxu0 %vm43_vm0, %v5823_v5 }
0x2b13   :  { %7276 = vmatpush.xpose.msk.msrb.mxu1 %vm43_vm0, %v5829_v15 }
0x2b14   :  { %7266 = vmatpush.xpose.msk.msra.mxu0 %vm43_vm0, %v5814_v62 }
0x2b16   :  { %v5825_v0 = vpop.permute.xlu0 %5824 }
0x2b17   :  { %7267 = vmatmul.msk.f32.vlgmr.msra.gmra.mxu0 %vm43_vm0, %v5814_v62  ;;  %7277 = vmatpush.xpose.msk.msrb.mxu1 %vm43_vm0, %v5825_v0  ;;  %v10681_v31 = vpop.permute.xlu1 %7612 }
0x2b18   :  { %v7614_v4 = vunpack.i.l.bf16 %v10681_v31 }
0x2b1b   :  { %7278 = vmatpush.xpose.msk.msrb.mxu1 %vm43_vm0, %v5817_v44 }
0x2b1e   :  { %7279 = vmatmul.msk.f32.vlgmr.msrb.gmra.mxu1 %vm43_vm0, %v5817_v44  ;;  %v10675_v26 = vpop.permute.xlu0 %7607 }
0x2b1f   :  { %7268 = vmatmul.msk.f32.gmra.mxu0 %vm43_vm0, %v5823_v5  ;;  %v7609_v14 = vunpack.i.l.bf16 %v10675_v26 }
0x2b21   :  { %v7626_v30 = vpack.i.bf16 %v7609_v14, %v7604_v37 }
0x2b23   :  { %7627 = vrot.lane.b32.xlu0 %v7626_v30, %s8109_s16 }
0x2b26   :  { %7280 = vmatmul.msk.f32.gmra.mxu1 %vm43_vm0, %v5825_v0  ;;  %v10684_v12 = vpop.permute.xlu0 %7617 }
0x2b27   :  { %7269 = vmatmul.msk.f32.gmra.mxu0 %vm43_vm0, %v5827_v2  ;;  %v7619_v53 = vunpack.i.l.bf16 %v10684_v12 }
0x2b29   :  { %v7631_v36 = vpack.i.bf16 %v7619_v53, %v7614_v4 }
0x2b2b   :  { %7632 = vrot.lane.b32.xlu2 %v7631_v36, %s8109_s16  ;;  %v8074_v36 = vld [vmem:[%s11072_s2 + $0x28] sm:$0xff] }
0x2b2e   :  { %7281 = vmatmul.msk.f32.gmra.mxu1 %vm43_vm0, %v5829_v15 }
0x2b2f   :  { %7270 = vmatmul.msk.f32.gmra.mxu0 %vm43_vm0, %v5831_v25 }
0x2b36   :  { %7282 = vmatmul.msk.f32.gmra.mxu1 %vm43_vm0, %v5833_v56 }
0x2b37   :  { %7271 = vmatmul.msk.f32.gmra.mxu0 %vm43_vm0, %v5835_v43 }
0x2b3e   :  { %7283 = vmatmul.msk.f32.gmra.mxu1 %vm43_vm0, %v5837_v1  ;;  %v8073_v1 = vld [vmem:[%s11072_s2 + $0x20] sm:$0xff] }
0x2b3f   :  { %7272 = vmatmul.msk.f32.gmra.mxu0 %vm43_vm0, %v5839_v61 }
0x2b46   :  { %7284 = vmatmul.msk.f32.gmra.mxu1 %vm43_vm0, %v5841_v23 }
0x2b85   :  { %v7633_v39 = vpop.permute.xlu2 %7632 }
0x2b86   :  { %v7634_v54 = vunpack.i.l.bf16 %v7633_v39  ;;  %v7635_v27 = vunpack.i.h.bf16 %v7633_v39 }
0x2b94   :  { %v5893_v7 = vpop.f32.mrf.mxu0 }
0x2b95   :  { %v5958_v47 = vmul.f32 0.4472136, %v5893_v7  ;;  %v7628_v59 = vpop.permute.xlu0 %7627 }
0x2b96   :  { %v7629_v57 = vunpack.i.l.bf16 %v7628_v59  ;;  %v7630_v9 = vunpack.i.h.bf16 %v7628_v59 }
0x2b97   :  { %v10702_v34 = vadd.f32 %v8069_v13, %v5958_v47 }
0x2b98   :  { %6316 = vmatpush.msra.mxu2 %v7629_v57 }
0x2b99   :  { %v5982_v52 = vsel %vm846_vm2, %v10702_v34, -inf }
0x2b9a   :  { %5983 = vmax.xlane.f32.xlu2 %v5982_v52  ;;  %6317 = vmatpush.msra.mxu2 %v7630_v9  ;;  %v7610_v52 = vunpack.i.h.bf16 %v10675_v26 }
0x2b9b   :  { %v5940_v22 = vpop.f32.mrf.mxu1 }
0x2b9c   :  { %v5896_v32 = vpop.f32.mrf.mxu0  ;;  %v5964_v45 = vmul.f32 0.4472136, %v5940_v22  ;;  %6318 = vmatpush.msra.mxu2 %v7634_v54  ;;  %v7641_v54 = vpack.i.bf16 %v7610_v52, %v10638_v28 }
0x2b9d   :  { %v5959_v41 = vmul.f32 0.4472136, %v5896_v32 }
0x2b9e   :  { %v10706_v38 = vadd.f32 %v8069_v13, %v5964_v45  ;;  %6319 = vmatpush.msra.mxu2 %v7635_v27 }
0x2b9f   :  { %v10711_v48 = vadd.f32 %v8070_v58, %v5959_v41 }
0x2ba0   :  { %v6000_v24 = vsel %vm846_vm2, %v10706_v38, -inf }
0x2ba1   :  { %v5985_v42 = vsel %vm846_vm2, %v10711_v48, -inf  ;;  %6001 = vmax.xlane.f32.xlu0 %v6000_v24 }
0x2ba2   :  { %5986 = vmax.xlane.f32.xlu1 %v5985_v42 }
0x2ba3   :  { %v5943_v21 = vpop.f32.mrf.mxu1 }
0x2ba4   :  { %v5899_v10 = vpop.f32.mrf.mxu0  ;;  %v5965_v50 = vmul.f32 0.4472136, %v5943_v21 }
0x2ba5   :  { %v5960_v6 = vmul.f32 0.4472136, %v5899_v10 }
0x2ba6   :  { %v10717_v55 = vadd.f32 %v8070_v58, %v5965_v50 }
0x2ba7   :  { %v10722_v16 = vadd.f32 %v8071_v40, %v5960_v6 }
0x2ba8   :  { %v6003_v18 = vsel %vm846_vm2, %v10717_v55, -inf }
0x2ba9   :  { %v5988_v46 = vsel %vm846_vm2, %v10722_v16, -inf }
0x2baa   :  { %6004 = vmax.xlane.f32.xlu1 %v6003_v18  ;;  %5989 = vmax.xlane.f32.xlu2 %v5988_v46 }
0x2bab   :  { %v5946_v19 = vpop.f32.mrf.mxu1 }
0x2bac   :  { %v5902_v17 = vpop.f32.mrf.mxu0  ;;  %v5966_v62 = vmul.f32 0.4472136, %v5946_v19 }
0x2bad   :  { %v5961_v3 = vmul.f32 0.4472136, %v5902_v17  ;;  %v7624_v17 = vunpack.i.l.bf16 %v10697_v33 }
0x2bae   :  { %v10735_v61 = vadd.f32 %v8071_v40, %v5966_v62 }
0x2baf   :  { %v10731_v63 = vadd.f32 %v8072_v60, %v5961_v3  ;;  %v7605_v3 = vunpack.i.h.bf16 %v10672_v11 }
0x2bb0   :  { %v6006_v15 = vsel %vm846_vm2, %v10735_v61, -inf }
0x2bb1   :  { %v5991_v44 = vsel %vm846_vm2, %v10731_v63, -inf  ;;  %v7636_v62 = vpack.i.bf16 %v7605_v3, %v7624_v17 }
0x2bb2   :  { %5992 = vmax.xlane.f32.xlu1 %v5991_v44 }
0x2bb3   :  { %v5949_v20 = vpop.f32.mrf.mxu1 }
0x2bb4   :  { %v5905_v43 = vpop.f32.mrf.mxu0  ;;  %v5967_v25 = vmul.f32 0.4472136, %v5949_v20  ;;  %v7620_v20 = vunpack.i.h.bf16 %v10684_v12 }
0x2bb5   :  { %v5962_v2 = vmul.f32 0.4472136, %v5905_v43  ;;  %v7615_v43 = vunpack.i.h.bf16 %v10681_v31 }
0x2bb6   :  { %v10737_v23 = vadd.f32 %v8072_v60, %v5967_v25 }
0x2bb7   :  { %v10742_v56 = vadd.f32 %v8073_v1, %v5962_v2  ;;  %v7646_v25 = vpack.i.bf16 %v7620_v20, %v7615_v43  ;;  %v7625_v2 = vunpack.i.h.bf16 %v10697_v33 }
0x2bb8   :  { %v6009_v5 = vsel %vm846_vm2, %v10737_v23, -inf }
0x2bb9   :  { %6010 = vmax.xlane.f32.xlu2 %v6009_v5  ;;  %v5994_v0 = vsel %vm846_vm2, %v10742_v56, -inf }
0x2bba   :  { %6007 = vmax.xlane.f32.xlu1 %v6006_v15  ;;  %5995 = vmax.xlane.f32.xlu0 %v5994_v0  ;;  %v7651_v15 = vpack.i.bf16 %v10640_v51, %v7625_v2 }
0x2bbb   :  { %v5952_v37 = vpop.f32.mrf.mxu1 }
0x2bbc   :  { %v5908_v14 = vpop.f32.mrf.mxu0  ;;  %v5968_v30 = vmul.f32 0.4472136, %v5952_v37 }
0x2bbd   :  { %v5963_v4 = vmul.f32 0.4472136, %v5908_v14 }
0x2bbe   :  { %v10750_v53 = vadd.f32 %v8073_v1, %v5968_v30 }
0x2bbf   :  { %v10755_v7 = vadd.f32 %v8074_v36, %v5963_v4 }
0x2bc0   :  { %v6012_v47 = vsel %vm846_vm2, %v10750_v53, -inf }
0x2bc1   :  { %v5997_v59 = vsel %vm846_vm2, %v10755_v7, -inf }
0x2bc2   :  { %5998 = vmax.xlane.f32.xlu1 %v5997_v59  ;;  %6013 = vmax.xlane.f32.xlu0 %v6012_v47 }
0x2bc3   :  { %v5955_v57 = vpop.f32.mrf.mxu1 }
0x2bc4   :  { %v5969_v39 = vmul.f32 0.4472136, %v5955_v57 }
0x2bc6   :  { %v10761_v13 = vadd.f32 %v8074_v36, %v5969_v39 }
0x2bc8   :  { %v6015_v9 = vsel %vm846_vm2, %v10761_v13, -inf }
0x2bc9   :  { %6016 = vmax.xlane.f32.xlu2 %v6015_v9 }
0x2bdb   :  { %7642 = vrot.lane.b32.xlu1 %v7641_v54, %s8109_s16 }
0x2c0d   :  { %v5984_v22 = vpop.xlane.xlu2 %5983 }
0x2c0e   :  { %v6018_v27 = vsub.f32 %v10702_v34, %v5984_v22 }
0x2c10   :  { %v6030_v32 = vmul.f32 1.442695, %v6018_v27 }
0x2c12   :  { %7982 = vpow2.f32 %v6030_v32 }
0x2c14   :  { %v6002_v45 = vpop.xlane.xlu0 %6001 }
0x2c15   :  { %v5987_v41 = vpop.xlane.xlu1 %5986  ;;  %v6024_v58 = vsub.f32 %v10706_v38, %v6002_v45 }
0x2c16   :  { %v6019_v24 = vsub.f32 %v10711_v48, %v5987_v41 }
0x2c17   :  { %v6042_v42 = vmul.f32 1.442695, %v6024_v58 }
0x2c18   :  { %v10771_v21 = vpop.eup %7982  ;;  %v6032_v10 = vmul.f32 1.442695, %v6019_v24 }
0x2c19   :  { %7984 = vpow2.f32 %v6042_v42  ;;  %v6054_v28 = vsel %vm846_vm2, %v10771_v21, 0.0 }
0x2c1a   :  { %7986 = vpow2.f32 %v6032_v10  ;;  %6055 = vadd.xlane.f32.xlu0 %v6054_v28 }
0x2c1d   :  { %v5990_v26 = vpop.xlane.xlu2 %5989  ;;  %v6005_v34 = vpop.xlane.xlu1 %6004 }
0x2c1e   :  { %v6020_v50 = vsub.f32 %v10722_v16, %v5990_v26  ;;  %v6025_v18 = vsub.f32 %v10717_v55, %v6005_v34 }
0x2c1f   :  { %v10776_v6 = vpop.eup %7984 }
0x2c20   :  { %v10778_v40 = vpop.eup %7986  ;;  %v6034_v38 = vmul.f32 1.442695, %v6020_v50  ;;  %v6072_v48 = vsel %vm846_vm2, %v10776_v6, 0.0  ;;  %v6044_v19 = vmul.f32 1.442695, %v6025_v18 }
0x2c21   :  { %v6057_v46 = vsel %vm846_vm2, %v10778_v40, 0.0  ;;  %6073 = vadd.xlane.f32.xlu1 %v6072_v48 }
0x2c22   :  { %6058 = vadd.xlane.f32.xlu2 %v6057_v46  ;;  %7988 = vpow2.f32 %v6034_v38 }
0x2c23   :  { %7990 = vpow2.f32 %v6044_v19 }
0x2c25   :  { %v5993_v11 = vpop.xlane.xlu1 %5992 }
0x2c26   :  { %v6021_v1 = vsub.f32 %v10731_v63, %v5993_v11 }
0x2c28   :  { %v10786_v16 = vpop.eup %7988  ;;  %v6036_v0 = vmul.f32 1.442695, %v6021_v1 }
0x2c29   :  { %v6060_v60 = vsel %vm846_vm2, %v10786_v16, 0.0  ;;  %v10792_v55 = vpop.eup %7990 }
0x2c2a   :  { %6061 = vadd.xlane.f32.xlu1 %v6060_v60  ;;  %v6075_v44 = vsel %vm846_vm2, %v10792_v55, 0.0  ;;  %7992 = vpow2.f32 %v6036_v0 }
0x2c2c   :  { %v6011_v37 = vpop.xlane.xlu2 %6010 }
0x2c2d   :  { %v5996_v5 = vpop.xlane.xlu0 %5995  ;;  %v6008_v14 = vpop.xlane.xlu1 %6007  ;;  %v6027_v12 = vsub.f32 %v10737_v23, %v6011_v37 }
0x2c2e   :  { %7637 = vrot.lane.b32.xlu0 %v7636_v62, %s8109_s16  ;;  %v6026_v31 = vsub.f32 %v10735_v61, %v6008_v14  ;;  %v6022_v22 = vsub.f32 %v10742_v56, %v5996_v5 }
0x2c2f   :  { %v6048_v30 = vmul.f32 1.442695, %v6027_v12 }
0x2c30   :  { %v10805_v36 = vpop.eup %7992  ;;  %v6046_v33 = vmul.f32 1.442695, %v6026_v31  ;;  %v6038_v41 = vmul.f32 1.442695, %v6022_v22 }
0x2c31   :  { %7994 = vpow2.f32 %v6048_v30  ;;  %v6063_v51 = vsel %vm846_vm2, %v10805_v36, 0.0 }
0x2c32   :  { %6076 = vadd.xlane.f32.xlu1 %v6075_v44  ;;  %7996 = vpow2.f32 %v6046_v33 }
0x2c35   :  { %v6014_v4 = vpop.xlane.xlu0 %6013  ;;  %v5999_v63 = vpop.xlane.xlu1 %5998 }
0x2c36   :  { %v6028_v47 = vsub.f32 %v10750_v53, %v6014_v4  ;;  %v6023_v59 = vsub.f32 %v10755_v7, %v5999_v63 }
0x2c37   :  { %v10811_v23 = vpop.eup %7994 }
0x2c38   :  { %v6050_v57 = vmul.f32 1.442695, %v6028_v47  ;;  %v6040_v61 = vmul.f32 1.442695, %v6023_v59  ;;  %v10813_v9 = vpop.eup %7996  ;;  %v6081_v52 = vsel %vm846_vm2, %v10811_v23, 0.0 }
0x2c39   :  { %v6078_v54 = vsel %vm846_vm2, %v10813_v9, 0.0 }
0x2c3a   :  { %7647 = vrot.lane.b32.xlu2 %v7646_v25, %s8109_s16  ;;  %7998 = vpow2.f32 %v6050_v57 }
0x2c3b   :  { %8000 = vpow2.f32 %v6040_v61 }
0x2c3c   :  { %v6017_v39 = vpop.xlane.xlu2 %6016 }
0x2c3d   :  { %v6029_v53 = vsub.f32 %v10761_v13, %v6017_v39 }
0x2c3f   :  { %v6052_v27 = vmul.f32 1.442695, %v6029_v53 }
0x2c40   :  { %v10820_v7 = vpop.eup %7998 }
0x2c41   :  { %v10823_v32 = vpop.eup %8000  ;;  %v6084_v45 = vsel %vm846_vm2, %v10820_v7, 0.0  ;;  %8002 = vpow2.f32 %v6052_v27 }
0x2c42   :  { %v6069_v13 = vsel %vm846_vm2, %v10823_v32, 0.0  ;;  %8004 = vpow2.f32 %v6038_v41 }
0x2c47   :  { %v10829_v58 = vpop.eup %8002 }
0x2c48   :  { %v10831_v24 = vpop.eup %8004  ;;  %v6087_v56 = vsel %vm846_vm2, %v10829_v58, 0.0 }
0x2c49   :  { %v6066_v42 = vsel %vm846_vm2, %v10831_v24, 0.0 }
0x2c4b   :  { %7652 = vrot.lane.b32.xlu1 %v7651_v15, %s8109_s16 }
0x2c4d   :  { %v7643_v10 = vpop.permute.xlu1 %7642 }
0x2c4e   :  { %v7645_v0 = vunpack.i.h.bf16 %v7643_v10  ;;  %v7644_v37 = vunpack.i.l.bf16 %v7643_v10 }
0x2c58   :  { %6064 = vadd.xlane.f32.xlu0 %v6063_v51 }
0x2c60   :  { %6082 = vadd.xlane.f32.xlu0 %v6081_v52 }
0x2c63   :  { %6079 = vadd.xlane.f32.xlu2 %v6078_v54 }
0x2c68   :  { %6085 = vadd.xlane.f32.xlu0 %v6084_v45 }
0x2c6b   :  { %6070 = vadd.xlane.f32.xlu2 %v6069_v13 }
0x2c73   :  { %6088 = vadd.xlane.f32.xlu2 %v6087_v56 }
0x2c75   :  { %6067 = vadd.xlane.f32.xlu1 %v6066_v42 }
0x2c8d   :  { %v6056_v28 = vpop.xlane.xlu0 %6055 }
0x2c8e   :  { %8006 = vrcp.f32 %v6056_v28  ;;  %v6101_v19 = vand.u32 2147483648, %v6056_v28  ;;  %vm6095_vm5 = vweird.f32 %v6056_v28  ;;  %v6099_v3 = vand.u32 2147483647, %v6056_v28 }
0x2c90   :  { %v6102_v20 = vor.u32 1.1754944e-38, %v6101_v19  ;;  %vm6100_vm7 = vcmp.eq.f32.partialorder %v6099_v3, 8.507059e+37 }
0x2c94   :  { %v8007_v26 = vpop.eup %8006  ;;  %v10837_v34 = vpop.xlane.xlu1 %6073 }
0x2c95   :  { %v6091_v50 = vmul.f32 %v8007_v26, %v6056_v28  ;;  %v6059_v38 = vpop.xlane.xlu2 %6058  ;;  %vm6096_vm4 = vweird.f32 %v8007_v26 }
0x2c96   :  { %8008 = vrcp.f32 %v6059_v38  ;;  %vm6097_vm6 = vmor %vm6095_vm5, %vm6096_vm4  ;;  %v6116_v12 = vand.u32 2147483648, %v6059_v38  ;;  %vm6110_vm9 = vweird.f32 %v6059_v38  ;;  %v6114_v30 = vand.u32 2147483647, %v6059_v38 }
0x2c97   :  { %v6092_v48 = vsub.f32 1.0, %v6091_v50  ;;  %vm6185_vm4 = vweird.f32 %v10837_v34 }
0x2c98   :  { %v6117_v59 = vor.u32 1.1754944e-38, %v6116_v12  ;;  %vm6115_vm12 = vcmp.eq.f32.partialorder %v6114_v30, 8.507059e+37 }
0x2c99   :  { %v6093_v18 = vmul.f32 %v8007_v26, %v6092_v48 }
0x2c9b   :  { %v6094_v46 = vadd.f32 %v8007_v26, %v6093_v18 }
0x2c9c   :  { %v8009_v17 = vpop.eup %8008 }
0x2c9d   :  { %v6106_v60 = vmul.f32 %v8009_v17, %v6059_v38  ;;  %v6098_v62 = vsel %vm6097_vm6, %v8007_v26, %v6094_v46  ;;  %v6062_v44 = vpop.xlane.xlu1 %6061  ;;  %vm6111_vm8 = vweird.f32 %v8009_v17  ;;  %v7648_v15 = vpop.permute.xlu2 %7647  ;;  %v6189_v46 = vand.u32 2147483647, %v10837_v34 }
0x2c9e   :  { %8010 = vrcp.f32 %v6062_v44  ;;  %v6103_v11 = vsel %vm6100_vm7, %v6102_v20, %v6098_v62  ;;  %vm10841_vm11 = vmor %vm6110_vm9, %vm6111_vm8  ;;  %v7649_v63 = vunpack.i.l.bf16 %v7648_v15  ;;  %v7650_v57 = vunpack.i.h.bf16 %v7648_v15 }
0x2c9f   :  { %v6107_v43 = vsub.f32 1.0, %v6106_v60  ;;  %8012 = vrcp.f32 %v10837_v34  ;;  %v6104_v31 = vmul.f32 %v10771_v21, %v6103_v11  ;;  %v6131_v22 = vand.u32 2147483648, %v6062_v44 }
0x2ca0   :  { %v7638_v25 = vpop.permute.xlu0 %7637  ;;  %vm6125_vm14 = vweird.f32 %v6062_v44  ;;  %v6129_v45 = vand.u32 2147483647, %v6062_v44  ;;  %vm6190_vm6 = vcmp.eq.f32.partialorder %v6189_v46, 8.507059e+37 }
0x2ca1   :  { %v6108_v2 = vmul.f32 %v8009_v17, %v6107_v43  ;;  %v7640_v1 = vunpack.i.h.bf16 %v7638_v25  ;;  %v7639_v5 = vunpack.i.l.bf16 %v7638_v25  ;;  %v6132_v56 = vor.u32 1.1754944e-38, %v6131_v22 }
0x2ca2   :  { %vm6130_vm1 = vcmp.eq.f32.partialorder %v6129_v45, 8.507059e+37 }
0x2ca3   :  { %v6109_v14 = vadd.f32 %v8009_v17, %v6108_v2  ;;  %6320 = vmatpush.msra.mxu2 %v7639_v5  ;;  %6387 = vmatpush.msra.mxu3 %v7640_v1 }
0x2ca4   :  { %v8011_v4 = vpop.eup %8010 }
0x2ca5   :  { %6321 = vmatpush.msra.mxu2 %v7644_v37  ;;  %6388 = vmatpush.msra.mxu3 %v7645_v0  ;;  %v6121_v47 = vmul.f32 %v8011_v4, %v6062_v44  ;;  %v6113_v51 = vsel %vm10841_vm11, %v8009_v17, %v6109_v14  ;;  %v8013_v21 = vpop.eup %8012  ;;  %v6077_v39 = vpop.xlane.xlu1 %6076  ;;  %vm6126_vm13 = vweird.f32 %v8011_v4 }
0x2ca6   :  { %7285 = vmatmul.msk.f32.vlgmr.msra.gmra.mxu2 %vm846_vm2, %v6104_v31  ;;  %v6118_v52 = vsel %vm6115_vm12, %v6117_v59, %v6113_v51  ;;  %v6181_v54 = vmul.f32 %v8013_v21, %v10837_v34  ;;  %8014 = vrcp.f32 %v6077_v39  ;;  %vm6127_vm15 = vmor %vm6125_vm14, %vm6126_vm13  ;;  %vm6186_vm3 = vweird.f32 %v8013_v21 }
0x2ca7   :  { %6389 = vmatpush.msra.mxu3 %v7649_v63  ;;  %v6122_v61 = vsub.f32 1.0, %v6121_v47  ;;  %v6119_v41 = vmul.f32 %v10778_v40, %v6118_v52  ;;  %v6191_v40 = vand.u32 2147483648, %v10837_v34  ;;  %vm6187_vm5 = vmor %vm6185_vm4, %vm6186_vm3  ;;  %v6206_v20 = vand.u32 2147483648, %v6077_v39 }
0x2ca8   :  { %v6182_v42 = vsub.f32 1.0, %v6181_v54  ;;  %vm6200_vm8 = vweird.f32 %v6077_v39  ;;  %v6204_v11 = vand.u32 2147483647, %v6077_v39 }
0x2ca9   :  { %6390 = vmatpush.msra.mxu3 %v7650_v57  ;;  %v6123_v53 = vmul.f32 %v8011_v4, %v6122_v61  ;;  %v6192_v3 = vor.u32 1.1754944e-38, %v6191_v40  ;;  %v6207_v2 = vor.u32 1.1754944e-38, %v6206_v20 }
0x2caa   :  { %v6183_v26 = vmul.f32 %v8013_v21, %v6182_v42  ;;  %vm6205_vm11 = vcmp.eq.f32.partialorder %v6204_v11, 8.507059e+37 }
0x2cab   :  { %v6124_v27 = vadd.f32 %v8011_v4, %v6123_v53 }
0x2cac   :  { %v8015_v10 = vpop.eup %8014  ;;  %v6184_v48 = vadd.f32 %v8013_v21, %v6183_v26 }
0x2cad   :  { %v6128_v13 = vsel %vm6127_vm15, %v8011_v4, %v6124_v27  ;;  %v6196_v50 = vmul.f32 %v8015_v10, %v6077_v39  ;;  %vm6201_vm7 = vweird.f32 %v8015_v10 }
0x2cae   :  { %7286 = vmatmul.msk.f32.gmra.mxu2 %vm846_vm2, %v6119_v41  ;;  %v6133_v28 = vsel %vm6130_vm1, %v6132_v56, %v6128_v13  ;;  %v6188_v19 = vsel %vm6187_vm5, %v8013_v21, %v6184_v48  ;;  %vm6202_vm9 = vmor %vm6200_vm8, %vm6201_vm7 }
0x2caf   :  { %v6134_v38 = vmul.f32 %v10786_v16, %v6133_v28  ;;  %v6197_v18 = vsub.f32 1.0, %v6196_v50  ;;  %v6193_v62 = vsel %vm6190_vm6, %v6192_v3, %v6188_v19 }
0x2cb0   :  { %v6194_v25 = vmul.f32 %v10776_v6, %v6193_v62 }
0x2cb1   :  { %v6198_v17 = vmul.f32 %v8015_v10, %v6197_v18 }
0x2cb3   :  { %v6199_v16 = vadd.f32 %v8015_v10, %v6198_v17 }
0x2cb5   :  { %v6203_v34 = vsel %vm6202_vm9, %v8015_v10, %v6199_v16 }
0x2cb6   :  { %7287 = vmatmul.msk.f32.gmra.mxu2 %vm846_vm2, %v6134_v38  ;;  %v6208_v1 = vsel %vm6205_vm11, %v6207_v2, %v6203_v34 }
0x2cb7   :  { %v6209_v5 = vmul.f32 %v10792_v55, %v6208_v1 }
0x2cbd   :  { %v7653_v60 = vpop.permute.xlu1 %7652 }
0x2cbe   :  { %v7654_v44 = vunpack.i.l.bf16 %v7653_v60  ;;  %v7655_v43 = vunpack.i.h.bf16 %v7653_v60 }
0x2cc0   :  { %6391 = vmatpush.msra.mxu3 %v7654_v44 }
0x2cc2   :  { %6392 = vmatpush.msra.mxu3 %v7655_v43 }
0x2cc3   :  { %7291 = vmatmul.msk.f32.vlgmr.msra.gmra.mxu3 %vm846_vm2, %v6194_v25 }
0x2ccb   :  { %v6065_v15 = vpop.xlane.xlu0 %6064  ;;  %7292 = vmatmul.msk.f32.gmra.mxu3 %vm846_vm2, %v6209_v5 }
0x2ccc   :  { %8016 = vrcp.f32 %v6065_v15  ;;  %v6146_v30 = vand.u32 2147483648, %v6065_v15  ;;  %v6144_v4 = vand.u32 2147483647, %v6065_v15  ;;  %vm6140_vm13 = vweird.f32 %v6065_v15 }
0x2cce   :  { %v6147_v55 = vor.u32 1.1754944e-38, %v6146_v30  ;;  %vm6145_vm15 = vcmp.eq.f32.partialorder %v6144_v4, 8.507059e+37 }
0x2cd2   :  { %v8017_v0 = vpop.eup %8016 }
0x2cd3   :  { %v6136_v37 = vmul.f32 %v8017_v0, %v6065_v15  ;;  %v6083_v14 = vpop.xlane.xlu0 %6082  ;;  %vm6141_vm12 = vweird.f32 %v8017_v0 }
0x2cd4   :  { %8018 = vrcp.f32 %v6083_v14  ;;  %vm6142_vm14 = vmor %vm6140_vm13, %vm6141_vm12  ;;  %v6236_v38 = vand.u32 2147483648, %v6083_v14  ;;  %vm6230_vm7 = vweird.f32 %v6083_v14  ;;  %v6234_v18 = vand.u32 2147483647, %v6083_v14 }
0x2cd5   :  { %v6137_v6 = vsub.f32 1.0, %v6136_v37 }
0x2cd6   :  { %v6080_v12 = vpop.xlane.xlu2 %6079  ;;  %v6237_v60 = vor.u32 1.1754944e-38, %v6236_v38  ;;  %vm6235_vm9 = vcmp.eq.f32.partialorder %v6234_v18, 8.507059e+37  ;;  %v7239_v38 = vld [vmem:[%s11076_s6 + $0x398] sm:$0xff] }
0x2cd7   :  { %v6138_v31 = vmul.f32 %v8017_v0, %v6137_v6  ;;  %8020 = vrcp.f32 %v6080_v12  ;;  %v6219_v45 = vand.u32 2147483647, %v6080_v12  ;;  %v6221_v41 = vand.u32 2147483648, %v6080_v12 }
0x2cd8   :  { %vm6215_vm3 = vweird.f32 %v6080_v12 }
0x2cd9   :  { %v6139_v33 = vadd.f32 %v8017_v0, %v6138_v31  ;;  %vm6220_vm5 = vcmp.eq.f32.partialorder %v6219_v45, 8.507059e+37  ;;  %v6222_v10 = vor.u32 1.1754944e-38, %v6221_v41 }
0x2cda   :  { %v8019_v63 = vpop.eup %8018 }
0x2cdb   :  { %v6226_v47 = vmul.f32 %v8019_v63, %v6083_v14  ;;  %v10860_v51 = vpop.xlane.xlu0 %6085  ;;  %v6143_v59 = vsel %vm6142_vm14, %v8017_v0, %v6139_v33  ;;  %vm6231_vm6 = vweird.f32 %v8019_v63 }
0x2cdc   :  { %8022 = vrcp.f32 %v10860_v51  ;;  %v6148_v21 = vsel %vm6145_vm15, %v6147_v55, %v6143_v59  ;;  %vm6232_vm8 = vmor %vm6230_vm7, %vm6231_vm6  ;;  %v6249_v25 = vand.u32 2147483647, %v10860_v51  ;;  %v6251_v11 = vand.u32 2147483648, %v10860_v51 }
0x2cdd   :  { %v8021_v57 = vpop.eup %8020  ;;  %v6227_v52 = vsub.f32 1.0, %v6226_v47  ;;  %v6149_v54 = vmul.f32 %v10805_v36, %v6148_v21  ;;  %vm6245_vm12 = vweird.f32 %v10860_v51 }
0x2cde   :  { %v6211_v61 = vmul.f32 %v8021_v57, %v6080_v12  ;;  %v10863_v39 = vpop.xlane.xlu2 %6070  ;;  %vm6216_vm1 = vweird.f32 %v8021_v57  ;;  %vm6250_vm14 = vcmp.eq.f32.partialorder %v6249_v25, 8.507059e+37  ;;  %v6252_v14 = vor.u32 1.1754944e-38, %v6251_v11 }
0x2cdf   :  { %7288 = vmatmul.msk.f32.gmra.mxu2 %vm846_vm2, %v6149_v54  ;;  %v6228_v13 = vmul.f32 %v8019_v63, %v6227_v52  ;;  %8024 = vrcp.f32 %v10863_v39  ;;  %vm6217_vm4 = vmor %vm6215_vm3, %vm6216_vm1  ;;  %v6176_v21 = vand.u32 2147483648, %v10863_v39  ;;  %v6174_v52 = vand.u32 2147483647, %v10863_v39 }
0x2ce0   :  { %v6212_v53 = vsub.f32 1.0, %v6211_v61 }
0x2ce1   :  { %v6229_v26 = vadd.f32 %v8019_v63, %v6228_v13  ;;  %v7234_v13 = vld [vmem:[%s11076_s6 + $0x370] sm:$0xff] }
0x2ce2   :  { %v10866_v22 = vpop.eup %8022  ;;  %v6213_v27 = vmul.f32 %v8021_v57, %v6212_v53  ;;  %6462 = vmatpush.msra.mxu1 %v7234_v13 }
0x2ce3   :  { %v6241_v56 = vmul.f32 %v10866_v22, %v10860_v51  ;;  %v6233_v3 = vsel %vm6232_vm8, %v8019_v63, %v6229_v26  ;;  %vm6246_vm11 = vweird.f32 %v10866_v22 }
0x2ce4   :  { %v6214_v42 = vadd.f32 %v8021_v57, %v6213_v27  ;;  %v6238_v20 = vsel %vm6235_vm9, %v6237_v60, %v6233_v3  ;;  %vm6247_vm13 = vmor %vm6245_vm12, %vm6246_vm11  ;;  %vm6170_vm9 = vweird.f32 %v10863_v39  ;;  %v6177_v27 = vor.u32 1.1754944e-38, %v6176_v21  ;;  %6584 = vmatpush.msrb.mxu1 %v7239_v38  ;;  %v7251_v38 = vld [vmem:[%s11076_s6 + $0x3f8] sm:$0xff] }
0x2ce5   :  { %v6242_v50 = vsub.f32 1.0, %v6241_v56  ;;  %v10876_v19 = vpop.eup %8024  ;;  %v6239_v5 = vmul.f32 %v10811_v23, %v6238_v20  ;;  %v7235_v56 = vld [vmem:[%s11076_s6 + $0x378] sm:$0xff] }
0x2ce6   :  { %v10872_v36 = vpop.xlane.xlu2 %6088  ;;  %v6218_v28 = vsel %vm6217_vm4, %v8021_v57, %v6214_v42  ;;  %v6166_v44 = vmul.f32 %v10876_v19, %v10863_v39  ;;  %vm6171_vm1 = vweird.f32 %v10876_v19  ;;  %6433 = vmatpush.msrb.mxu0 %v7235_v56 }
0x2ce7   :  { %8026 = vrcp.f32 %v10872_v36  ;;  %v6223_v48 = vsel %vm6220_vm5, %v6222_v10, %v6218_v28  ;;  %v6243_v17 = vmul.f32 %v10866_v22, %v6242_v50  ;;  %vm6260_vm5 = vweird.f32 %v10872_v36  ;;  %vm6172_vm11 = vmor %vm6170_vm9, %vm6171_vm1  ;;  %v7236_v10 = vld [vmem:[%s11076_s6 + $0x380] sm:$0xff] }
0x2ce8   :  { %v6068_v40 = vpop.xlane.xlu1 %6067  ;;  %v6224_v46 = vmul.f32 %v10813_v9, %v6223_v48  ;;  %v6167_v2 = vsub.f32 1.0, %v6166_v44  ;;  %v6264_v63 = vand.u32 2147483647, %v10872_v36  ;;  %v6266_v55 = vand.u32 2147483648, %v10872_v36  ;;  %6491 = vmatpush.msra.mxu0 %v7236_v10 }
0x2ce9   :  { %8028 = vrcp.f32 %v6068_v40  ;;  %v6244_v9 = vadd.f32 %v10866_v22, %v6243_v17  ;;  %v6161_v6 = vand.u32 2147483648, %v6068_v40  ;;  %v6159_v30 = vand.u32 2147483647, %v6068_v40 }
0x2cea   :  { %7293 = vmatmul.msk.f32.gmra.mxu3 %vm846_vm2, %v6224_v46  ;;  %v6168_v12 = vmul.f32 %v10876_v19, %v6167_v2  ;;  %vm6155_vm4 = vweird.f32 %v6068_v40  ;;  %vm6265_vm12 = vcmp.eq.f32.partialorder %v6264_v63, 8.507059e+37 }
0x2ceb   :  { %v6248_v37 = vsel %vm6247_vm13, %v10866_v22, %v6244_v9  ;;  %v6162_v47 = vor.u32 1.1754944e-38, %v6161_v6  ;;  %vm6160_vm7 = vcmp.eq.f32.partialorder %v6159_v30, 8.507059e+37  ;;  %v6267_v22 = vor.u32 1.1754944e-38, %v6266_v55 }
0x2cec   :  { %v6253_v4 = vsel %vm6250_vm14, %v6252_v14, %v6248_v37  ;;  %v6169_v51 = vadd.f32 %v10876_v19, %v6168_v12  ;;  %vm6175_vm13 = vcmp.eq.f32.partialorder %v6174_v52, 8.507059e+37 }
0x2ced   :  { %v8027_v62 = vpop.eup %8026  ;;  %v6254_v59 = vmul.f32 %v10820_v7, %v6253_v4 }
0x2cee   :  { %v6256_v16 = vmul.f32 %v8027_v62, %v10872_v36  ;;  %vm6261_vm3 = vweird.f32 %v8027_v62  ;;  %v6173_v7 = vsel %vm6172_vm11, %v10876_v19, %v6169_v51 }
0x2cef   :  { %v8029_v43 = vpop.eup %8028  ;;  %vm6262_vm8 = vmor %vm6260_vm5, %vm6261_vm3  ;;  %v6178_v41 = vsel %vm6175_vm13, %v6177_v27, %v6173_v7 }
0x2cf0   :  { %v6257_v34 = vsub.f32 1.0, %v6256_v16  ;;  %v6151_v1 = vmul.f32 %v8029_v43, %v6068_v40  ;;  %vm6156_vm15 = vweird.f32 %v8029_v43 }
0x2cf1   :  { %vm6157_vm6 = vmor %vm6155_vm4, %vm6156_vm15 }
0x2cf2   :  { %v6258_v15 = vmul.f32 %v8027_v62, %v6257_v34  ;;  %v6152_v0 = vsub.f32 1.0, %v6151_v1  ;;  %7294 = vmatmul.msk.f32.gmra.mxu3 %vm846_vm2, %v6239_v5  ;;  %v10944_v1 = vld [vmem:[%s11077_s7 + $0x14] sm:$0x7] }
0x2cf3   :  { %v6594_v5 = vperm.slane %v10944_v1, 1 }
0x2cf4   :  { %v6153_v31 = vmul.f32 %v8029_v43, %v6152_v0  ;;  %v6259_v33 = vadd.f32 %v8027_v62, %v6258_v15 }
0x2cf6   :  { %v6154_v23 = vadd.f32 %v8029_v43, %v6153_v31  ;;  %v6263_v54 = vsel %vm6262_vm8, %v8027_v62, %v6259_v33 }
0x2cf7   :  { %v6268_v45 = vsel %vm6265_vm12, %v6267_v22, %v6263_v54 }
0x2cf8   :  { %v6158_v57 = vsel %vm6157_vm6, %v8029_v43, %v6154_v23  ;;  %v6269_v39 = vmul.f32 %v10829_v58, %v6268_v45  ;;  %v7237_v58 = vld [vmem:[%s11076_s6 + $0x388] sm:$0xff]  ;;  %v7233_v45 = vld [vmem:[%s11075_s5 + $0xb8] sm:$0xff] }
0x2cf9   :  { %v6163_v61 = vsel %vm6160_vm7, %v6162_v47, %v6158_v57  ;;  %6522 = vmatpush.msrb.mxu2 %v7237_v58  ;;  %v7254_v58 = vld [vmem:[%s11076_s6 + $0x410] sm:$0xff] }
0x2cfa   :  { %7295 = vmatmul.msk.f32.gmra.mxu3 %vm846_vm2, %v6254_v59  ;;  %v6164_v53 = vmul.f32 %v10831_v24, %v6163_v61  ;;  %v6179_v24 = vmul.f32 %v10823_v32, %v6178_v41  ;;  %v7238_v32 = vld [vmem:[%s11076_s6 + $0x390] sm:$0xff] }
0x2cfb   :  { %6553 = vmatpush.msrb.mxu3 %v7238_v32  ;;  %v7232_v41 = vld [vmem:[%s11075_s5 + $0xb0] sm:$0xff]  ;;  %v7253_v32 = vld [vmem:[%s11076_s6 + $0x408] sm:$0xff] }
0x2cfc   :  { %7289 = vmatmul.msk.f32.gmra.mxu2 %vm846_vm2, %v6164_v53 }
0x2d02   :  { %7296 = vmatmul.msk.f32.gmra.mxu3 %vm846_vm2, %v6269_v39  ;;  %v7231_v39 = vld [vmem:[%s11075_s5 + $0xa8] sm:$0xff] }
0x2d04   :  { %7290 = vmatmul.msk.f32.gmra.mxu2 %vm846_vm2, %v6179_v24 }
0x2d29   :  { %v6323_v42 = vpop.f32.mrf.mxu2 }
0x2d2a   :  { %7299 = vmatmul.msk.f32.vlgmr.msra.gmra.mxu1 %vm43_vm0, %v6323_v42  ;;  %v7255_v42 = vld [vmem:[%s11076_s6 + $0x418] sm:$0xff] }
0x2d2b   :  { %6689 = vmatpush.msra.mxu2 %v7255_v42 }
0x2d2d   :  { %6690 = vmatpush.msra.mxu2 %v7254_v58 }
0x2d2f   :  { %6691 = vmatpush.msra.mxu2 %v7253_v32 }
0x2d31   :  { %v6326_v36 = vpop.f32.mrf.mxu2 }
0x2d32   :  { %7297 = vmatmul.msk.f32.vlgmr.msrb.gmra.mxu0 %vm43_vm0, %v6326_v36 }
0x2d33   :  { %6672 = vmatpush.msrb.mxu0 %v7233_v45 }
0x2d35   :  { %6673 = vmatpush.msrb.mxu0 %v7232_v41 }
0x2d37   :  { %6674 = vmatpush.msrb.mxu0 %v7231_v39 }
0x2d39   :  { %v6329_v50 = vpop.f32.mrf.mxu2 }
0x2d46   :  { %v6394_v28 = vpop.f32.mrf.mxu3 }
0x2d47   :  { %7300 = vmatmul.msk.f32.gmra.mxu1 %vm43_vm0, %v6394_v28  ;;  %v7252_v28 = vld [vmem:[%s11076_s6 + $0x400] sm:$0xff] }
0x2d48   :  { %6692 = vmatpush.msra.mxu2 %v7252_v28  ;;  %v36_v28 = vld [vmem:[%s11073_s3 + $0x30] sm:$0xff] }
0x2d4a   :  { %6693 = vmatpush.msra.mxu2 %v7251_v38 }
0x2d4e   :  { %v6397_v26 = vpop.f32.mrf.mxu3 }
0x2d4f   :  { %7298 = vmatmul.msk.f32.gmra.mxu0 %vm43_vm0, %v6397_v26 }
0x2d57   :  { %7301 = vmatmul.msk.f32.vlgmr.msra.gmra.mxu0 %vm43_vm0, %v6329_v50 }
0x2d62   :  { %v6332_v48 = vpop.f32.mrf.mxu2 }
0x2d63   :  { %7303 = vmatmul.msk.f32.vlgmr.msrb.gmra.mxu2 %vm43_vm0, %v6332_v48 }
0x2d6d   :  { %v6400_v18 = vpop.f32.mrf.mxu3 }
0x2d6e   :  { %7302 = vmatmul.msk.f32.gmra.mxu0 %vm43_vm0, %v6400_v18  ;;  %v7250_v18 = vld [vmem:[%s11076_s6 + $0x3f0] sm:$0xff] }
0x2d6f   :  { %6694 = vmatpush.msra.mxu2 %v7250_v18 }
0x2d75   :  { %v6403_v40 = vpop.f32.mrf.mxu3 }
0x2d76   :  { %7304 = vmatmul.msk.f32.gmra.mxu2 %vm43_vm0, %v6403_v40 }
0x2d7d   :  { %v6406_v19 = vpop.f32.mrf.mxu3 }
0x2d7f   :  { %v6335_v46 = vpop.f32.mrf.mxu2 }
0x2d80   :  { %7305 = vmatmul.msk.f32.vlgmr.msrb.gmra.mxu3 %vm43_vm0, %v6335_v46  ;;  %v7249_v46 = vld [vmem:[%s11076_s6 + $0x3e8] sm:$0xff] }
0x2d81   :  { %6695 = vmatpush.msra.mxu2 %v7249_v46 }
0x2d85   :  { %v6409_v3 = vpop.f32.mrf.mxu3 }
0x2d87   :  { %v6338_v17 = vpop.f32.mrf.mxu2 }
0x2d88   :  { %7306 = vmatmul.msk.f32.gmra.mxu3 %vm43_vm0, %v6406_v19  ;;  %7307 = vmatmul.msk.f32.vlgmr.msrb.gmra.mxu1 %vm43_vm0, %v6338_v17  ;;  %v7248_v17 = vld [vmem:[%s11076_s6 + $0x3e0] sm:$0xff] }
0x2d89   :  { %6696 = vmatpush.msra.mxu2 %v7248_v17 }
0x2d90   :  { %7308 = vmatmul.msk.f32.gmra.mxu1 %vm43_vm0, %v6409_v3 }
0x2da7   :  { %v6464_v44 = vpop.f32.mrf.mxu1 }
0x2daf   :  { %v6435_v60 = vpop.f32.mrf.mxu0 }
0x2db0   :  { %v6465_v9 = vadd.f32 %v6464_v44, %v6435_v60 }
0x2dc4   :  { %v6467_v16 = vpop.f32.mrf.mxu1 }
0x2dcc   :  { %v6438_v62 = vpop.f32.mrf.mxu0 }
0x2dcd   :  { %v6468_v37 = vadd.f32 %v6467_v16, %v6438_v62  ;;  %v7247_v62 = vld [vmem:[%s11076_s6 + $0x3d8] sm:$0xff] }
0x2dce   :  { %6697 = vmatpush.msra.mxu2 %v7247_v62 }
0x2dd4   :  { %v6493_v20 = vpop.f32.mrf.mxu0 }
0x2dd5   :  { %v6499_v25 = vadd.f32 %v6493_v20, %v6465_v9  ;;  %v7246_v20 = vld [vmem:[%s11076_s6 + $0x3d0] sm:$0xff] }
0x2dd6   :  { %6698 = vmatpush.msra.mxu2 %v7246_v20 }
0x2de6   :  { %v6524_v43 = vpop.f32.mrf.mxu2 }
0x2de7   :  { %v6530_v11 = vadd.f32 %v6524_v43, %v6499_v25 }
0x2deb   :  { %v6496_v15 = vpop.f32.mrf.mxu0 }
0x2dec   :  { %v6500_v12 = vadd.f32 %v6496_v15, %v6468_v37 }
0x2df9   :  { %v6527_v6 = vpop.f32.mrf.mxu2 }
0x2dfa   :  { %v6531_v30 = vadd.f32 %v6527_v6, %v6500_v12  ;;  %v7243_v6 = vld [vmem:[%s11076_s6 + $0x3b8] sm:$0xff] }
0x2e03   :  { %v6555_v34 = vpop.f32.mrf.mxu3 }
0x2e04   :  { %v6561_v2 = vadd.f32 %v6555_v34, %v6530_v11  ;;  %v7245_v34 = vld [vmem:[%s11076_s6 + $0x3c8] sm:$0xff] }
0x2e05   :  { %v6586_v0 = vpop.f32.mrf.mxu1  ;;  %6699 = vmatpush.msra.mxu2 %v7245_v34 }
0x2e06   :  { %v6592_v14 = vadd.f32 %v6586_v0, %v6561_v2  ;;  %v7244_v0 = vld [vmem:[%s11076_s6 + $0x3c0] sm:$0xff] }
0x2e07   :  { %6700 = vmatpush.msra.mxu2 %v7244_v0 }
0x2e08   :  { %v6595_v31 = vadd.f32 %v6594_v5, %v6592_v14 }
0x2e09   :  { %6701 = vmatpush.msra.mxu2 %v7243_v6 }
0x2e0a   :  { %v10948_v4 = vadd.f32 %v6595_v31, %v10149_v49 }
0x2e0b   :  { %v6558_v33 = vpop.f32.mrf.mxu3 }
0x2e0c   :  { %v6562_v23 = vadd.f32 %v6558_v33, %v6531_v30  ;;  %v6599_v63 = vsel %vm121_vm10, %v10948_v4, 0.0 }
0x2e0d   :  { %v6589_v55 = vpop.f32.mrf.mxu1  ;;  %6600 = vadd.xlane.f32.xlu0 %v6599_v63  ;;  %v7242_v63 = vld [vmem:[%s11076_s6 + $0x3b0] sm:$0xff] }
0x2e0e   :  { %v6593_v47 = vadd.f32 %v6589_v55, %v6562_v23  ;;  %6702 = vmatpush.msra.mxu2 %v7242_v63  ;;  %v7241_v55 = vld [vmem:[%s11076_s6 + $0x3a8] sm:$0xff] }
0x2e10   :  { %v6596_v51 = vadd.f32 %v6594_v5, %v6593_v47  ;;  %v7240_v47 = vld [vmem:[%s11076_s6 + $0x3a0] sm:$0xff]  ;;  %6703 = vmatpush.msra.mxu2 %v7241_v55 }
0x2e12   :  { %v10953_v59 = vadd.f32 %v6596_v51, %v10154_v29  ;;  %6704 = vmatpush.msra.mxu2 %v7240_v47  ;;  %v6653_v51 = vperm.slane %v10944_v1, 2 }
0x2e14   :  { %v6602_v57 = vsel %vm121_vm10, %v10953_v59, 0.0 }
0x2e15   :  { %6603 = vadd.xlane.f32.xlu2 %v6602_v57 }
0x2e2d   :  { %6643 = vrot.lane.b32.xlu2 %v10606_v35, %s8110_s27 }
0x2e80   :  { %v6601_v49 = vpop.xlane.xlu0 %6600 }
0x2e81   :  { %v6605_v21 = vmul.f32 %v6601_v49, %v8266_v8 }
0x2e83   :  { %v6607_v61 = vsub.f32 %v10948_v4, %v6605_v21 }
0x2e85   :  { %v6609_v52 = vmul.f32 %v6607_v61, %v6607_v61 }
0x2e87   :  { %v6611_v53 = vsel %vm121_vm10, %v6609_v52, 0.0 }
0x2e88   :  { %6612 = vadd.xlane.f32.xlu0 %v6611_v53  ;;  %v6604_v54 = vpop.xlane.xlu2 %6603 }
0x2e89   :  { %v6606_v29 = vmul.f32 %v6604_v54, %v8266_v8 }
0x2e8b   :  { %v10964_v22 = vsub.f32 %v10953_v59, %v6606_v29 }
0x2e8d   :  { %v6610_v7 = vmul.f32 %v10964_v22, %v10964_v22 }
0x2e8f   :  { %v6614_v27 = vsel %vm121_vm10, %v6610_v7, 0.0 }
0x2e90   :  { %6615 = vadd.xlane.f32.xlu1 %v6614_v27  ;;  %v6644_v25 = vpop.permute.xlu2 %6643 }
0x2e9c   :  { %6648 = vrot.lane.b32.xlu0 %v10606_v35, %s8111_s28  ;;  %v7230_v35 = vld [vmem:[%s11075_s5 + $0xa0] sm:$0xff] }
0x2e9d   :  { %6675 = vmatpush.msrb.mxu0 %v7230_v35 }
0x2ea9   :  { %6686 = vrot.lane.b32.xlu1 %v6594_v5, %s8104_s26 }
0x2efb   :  { %v6613_v24 = vpop.xlane.xlu0 %6612 }
0x2efc   :  { %v6617_v13 = vmul.f32 %v6613_v24, %v8266_v8 }
0x2efe   :  { %v6619_v56 = vadd.f32 1e-05, %v6617_v13 }
0x2f00   :  { %8030 = vrsqrt.f32 %v6619_v56  ;;  %vm6627_vm2 = vweird.f32 %v6619_v56 }
0x2f03   :  { %v6616_v10 = vpop.xlane.xlu1 %6615 }
0x2f04   :  { %v6618_v36 = vmul.f32 %v6616_v10, %v8266_v8 }
0x2f06   :  { %v8031_v26 = vpop.eup %8030  ;;  %v6620_v50 = vadd.f32 1e-05, %v6618_v36 }
0x2f07   :  { %v6622_v48 = vmul.f32 %v8031_v26, %v6619_v56  ;;  %vm6628_vm0 = vweird.f32 %v8031_v26 }
0x2f08   :  { %8032 = vrsqrt.f32 %v6620_v50  ;;  %vm6629_vm14 = vmor %vm6627_vm2, %vm6628_vm0  ;;  %vm6637_vm1 = vweird.f32 %v6620_v50 }
0x2f09   :  { %v6623_v40 = vmul.f32 %v8031_v26, %v6622_v48 }
0x2f0b   :  { %v6624_v19 = vmul.f32 0.5, %v6623_v40 }
0x2f0d   :  { %v6625_v3 = vsub.f32 1.5, %v6624_v19 }
0x2f0e   :  { %v8033_v60 = vpop.eup %8032  ;;  %v6649_v5 = vpop.permute.xlu0 %6648 }
0x2f0f   :  { %v6632_v44 = vmul.f32 %v8033_v60, %v6620_v50  ;;  %v6626_v16 = vmul.f32 %v8031_v26, %v6625_v3  ;;  %vm6638_vm15 = vweird.f32 %v8033_v60  ;;  %v34_v50 = vld [vmem:[%s11073_s3 + $0x20] sm:$0xff] }
0x2f10   :  { %vm6639_vm3 = vmor %vm6637_vm1, %vm6638_vm15 }
0x2f11   :  { %v6633_v9 = vmul.f32 %v8033_v60, %v6632_v44  ;;  %v6630_v43 = vsel %vm6629_vm14, %v8031_v26, %v6626_v16  ;;  %v35_v26 = vld [vmem:[%s11073_s3 + $0x28] sm:$0xff] }
0x2f12   :  { %v6641_v11 = vmul.f32 %v6630_v43, %v6607_v61  ;;  %v8076_v43 = vld [vmem:[%s11073_s3 + $0x48] sm:$0xff] }
0x2f13   :  { %v6634_v2 = vmul.f32 0.5, %v6633_v9  ;;  %v6761_v34 = vperm.slane %v8076_v43, 2 }
0x2f14   :  { %v6646_v15 = vmul.f32 %v6644_v25, %v6641_v11 }
0x2f15   :  { %v6635_v37 = vsub.f32 1.5, %v6634_v2 }
0x2f16   :  { %v6651_v14 = vadd.f32 %v6649_v5, %v6646_v15 }
0x2f17   :  { %v6636_v12 = vmul.f32 %v8033_v60, %v6635_v37 }
0x2f18   :  { %7309 = vmatmul.msk.f32.vlgmr.msrb.gmra.mxu0 %vm121_vm10, %v6651_v14 }
0x2f19   :  { %v6640_v31 = vsel %vm6639_vm3, %v8033_v60, %v6636_v12 }
0x2f1a   :  { %v6642_v30 = vmul.f32 %v6640_v31, %v10964_v22 }
0x2f1b   :  { %v6687_v54 = vpop.permute.xlu1 %6686 }
0x2f1c   :  { %v6647_v33 = vmul.f32 %v6644_v25, %v6642_v30  ;;  %v6758_v25 = vperm.slane %v8076_v43, 1 }
0x2f1e   :  { %v6652_v23 = vadd.f32 %v6649_v5, %v6647_v33  ;;  %v6764_v33 = vperm.slane %v8076_v43, 3 }
0x2f20   :  { %7310 = vmatmul.msk.f32.gmra.mxu0 %vm121_vm10, %v6652_v23 }
0x2f95   :  { %v6677_v57 = vpop.f32.mrf.mxu0 }
0x2f96   :  { %v6678_v49 = vadd.f32 %v6677_v57, %v6653_v51 }
0x2f98   :  { %v6683_v21 = vmax.f32 %v6678_v49, 0.0 }
0x2f9a   :  { %6705 = vmatmul.f32.vlgmr.msra.gmra.mxu2 %v6683_v21 }
0x2f9d   :  { %v6680_v61 = vpop.f32.mrf.mxu0 }
0x2f9e   :  { %v6681_v52 = vadd.f32 %v6680_v61, %v6653_v51 }
0x2fa0   :  { %v6684_v53 = vmax.f32 %v6681_v52, 0.0 }
0x2fa2   :  { %6708 = vmatmul.f32.gmra.mxu2 %v6684_v53 }
0x301d   :  { %v6706_v29 = vpop.f32.mrf.mxu2 }
0x301e   :  { %v6707_v22 = vadd.f32 %v6706_v29, %v6687_v54 }
0x3020   :  { %v6712_v7 = vadd.f32 %v6707_v22, %v10948_v4 }
0x3022   :  { %v6714_v27 = vsel %vm121_vm10, %v6712_v7, 0.0 }
0x3023   :  { %6715 = vadd.xlane.f32.xlu0 %v6714_v27 }
0x3025   :  { %v6709_v45 = vpop.f32.mrf.mxu2 }
0x3026   :  { %v6710_v41 = vadd.f32 %v6709_v45, %v6687_v54 }
0x3028   :  { %v6713_v1 = vadd.f32 %v6710_v41, %v10953_v59  ;;  %v37_v59 = vld [vmem:[%s11073_s3 + $0x38] sm:$0xff]  ;;  %s8112_s3 = smov [#allocation2]  }
0x3029   :  { %6783 = vmatpush.msra.mxu3 %v37_v59  ;;  %s6800_s17 = sshll.u32 %s8112_s3, 4  ;;  %s6801_s17 = int_to_ptr.vmem [resolvable:$true] %s6800_s17 }
0x302a   :  { %v6717_v39 = vsel %vm121_vm10, %v6713_v1, 0.0 }
0x302b   :  { %6718 = vadd.xlane.f32.xlu2 %v6717_v39  ;;  %6784 = vmatpush.msra.mxu3 %v36_v28 }
0x302d   :  { %6785 = vmatpush.msra.mxu3 %v35_v26 }
0x302f   :  { %6786 = vmatpush.msra.mxu3 %v34_v50 }
0x3096   :  { %v6716_v35 = vpop.xlane.xlu0 %6715 }
0x3097   :  { %v6720_v24 = vmul.f32 %v6716_v35, %v8266_v8 }
0x3099   :  { %v6722_v13 = vsub.f32 %v6712_v7, %v6720_v24 }
0x309b   :  { %v6724_v56 = vmul.f32 %v6722_v13, %v6722_v13 }
0x309d   :  { %v6726_v42 = vsel %vm121_vm10, %v6724_v56, 0.0 }
0x309e   :  { %v6719_v58 = vpop.xlane.xlu2 %6718  ;;  %6727 = vadd.xlane.f32.xlu1 %v6726_v42 }
0x309f   :  { %v6721_v4 = vmul.f32 %v6719_v58, %v8266_v8 }
0x30a1   :  { %v6723_v32 = vsub.f32 %v6713_v1, %v6721_v4 }
0x30a3   :  { %v6725_v10 = vmul.f32 %v6723_v32, %v6723_v32 }
0x30a5   :  { %v6729_v36 = vsel %vm121_vm10, %v6725_v10, 0.0 }
0x30a6   :  { %6730 = vadd.xlane.f32.xlu0 %v6729_v36 }
0x3111   :  { %v6728_v38 = vpop.xlane.xlu1 %6727 }
0x3112   :  { %v6732_v48 = vmul.f32 %v6728_v38, %v8266_v8 }
0x3114   :  { %v6734_v18 = vadd.f32 1e-05, %v6732_v48 }
0x3116   :  { %8034 = vrsqrt.f32 %v6734_v18  ;;  %vm6742_vm5 = vweird.f32 %v6734_v18 }
0x3119   :  { %v6731_v40 = vpop.xlane.xlu0 %6730 }
0x311a   :  { %v6733_v46 = vmul.f32 %v6731_v40, %v8266_v8 }
0x311c   :  { %v8035_v19 = vpop.eup %8034  ;;  %v6735_v17 = vadd.f32 1e-05, %v6733_v46 }
0x311d   :  { %v6737_v3 = vmul.f32 %v8035_v19, %v6734_v18  ;;  %vm6743_vm4 = vweird.f32 %v8035_v19 }
0x311e   :  { %8036 = vrsqrt.f32 %v6735_v17  ;;  %vm6744_vm6 = vmor %vm6742_vm5, %vm6743_vm4  ;;  %vm6752_vm8 = vweird.f32 %v6735_v17 }
0x311f   :  { %v6738_v60 = vmul.f32 %v8035_v19, %v6737_v3 }
0x3121   :  { %v6739_v62 = vmul.f32 0.5, %v6738_v60 }
0x3123   :  { %v6740_v44 = vsub.f32 1.5, %v6739_v62 }
0x3124   :  { %v8037_v16 = vpop.eup %8036 }
0x3125   :  { %v6741_v20 = vmul.f32 %v8035_v19, %v6740_v44  ;;  %v6747_v9 = vmul.f32 %v8037_v16, %v6735_v17  ;;  %vm6753_vm7 = vweird.f32 %v8037_v16 }
0x3126   :  { %vm6754_vm9 = vmor %vm6752_vm8, %vm6753_vm7 }
0x3127   :  { %v6745_v11 = vsel %vm6744_vm6, %v8035_v19, %v6741_v20  ;;  %v6748_v8 = vmul.f32 %v8037_v16, %v6747_v9 }
0x3128   :  { %v6756_v2 = vmul.f32 %v6745_v11, %v6722_v13 }
0x3129   :  { %v6749_v5 = vmul.f32 0.5, %v6748_v8 }
0x312a   :  { %v6759_v15 = vmul.f32 %v6758_v25, %v6756_v2 }
0x312b   :  { %v6750_v0 = vsub.f32 1.5, %v6749_v5 }
0x312c   :  { %v6762_v37 = vadd.f32 %v6761_v34, %v6759_v15 }
0x312d   :  { %v6751_v14 = vmul.f32 %v8037_v16, %v6750_v0 }
0x312e   :  { %7311 = vmatmul.msk.f32.vlgmr.msra.gmra.mxu3 %vm121_vm10, %v6762_v37 }
0x312f   :  { %v6755_v6 = vsel %vm6754_vm9, %v8037_v16, %v6751_v14 }
0x3130   :  { %v6757_v12 = vmul.f32 %v6755_v6, %v6723_v32 }
0x3132   :  { %v6760_v31 = vmul.f32 %v6758_v25, %v6757_v12 }
0x3134   :  { %v6763_v30 = vadd.f32 %v6761_v34, %v6760_v31 }
0x3136   :  { %7312 = vmatmul.msk.f32.gmra.mxu3 %vm121_vm10, %v6763_v30 }
0x31b1   :  { %v6788_v23 = vpop.f32.mrf.mxu3 }
0x31b2   :  { %v6789_v63 = vadd.f32 %v6788_v23, %v6764_v33 }
0x31b4   :  { %6794 = vst.msk [vmem:[#allocation2] sm:$0xff] %vm121_vm10, %v6789_v63 }
0x31b9   :  { %v6791_v55 = vpop.f32.mrf.mxu3 }
0x31ba   :  { %v6792_v47 = vadd.f32 %v6791_v55, %v6764_v33 }
0x31bc   :  { %6795 = vst.msk [vmem:[#allocation2 + $0x8] sm:$0xff] %vm121_vm10, %v6792_v47 }
0x31bd   :  { %6808 = dma.vmem_to_hbm [thread:$0]  %s6801_s17, 256, %s6803_s20, [#allocation3], %s8113_s4, %s8113_s4, %s8114_s13  }
0x31be   :  { %8101 = dma.done.wait [#allocation3], 256  }
0x31bf   :  { %8102 = vsyncadd [#allocation3], 4294967040 }
0x31c0   :  { %6813 = vsyncpa [#allocation3], 1 }

</bundles_post_ra>
